<compile_context>
chip_gen: v7x
topology: tpu7x:2x2x1
jax: 0.10.0
libtpu: 0.0.40
codegen_flags: <defaults>
</compile_context>

<pallas_src>
import jax
import jax.numpy as jnp
from jax.experimental import pallas as pl
from jax.experimental.pallas import tpu as pltpu


# ---------------------------------------------------------------------------
# Fused kernel: runs once (grid=(1,)), everything resident in VMEM.
# ---------------------------------------------------------------------------
def _action_net_kernel(
    # activations / per-batch adjacency
    x1_ref, x2_ref, adj1_ref, adj2_ref,
    # d-branch (ContextAttention(1024)) params
    dw1, db1, dw2, db2, dwg1, dbg1, dwg2, dbg2, dwa1e, dwa1c, dba1, dwa2, dba2,
    # s-branch (ContextAttention(2048)) params; sw1/sw2 are raw HBM refs
    sw1_hbm, sb1, sw2_hbm, sb2, swg1, sbg1, swg2, sbg2,
    swa1e, swa1c, sba1, swa2, sba2,
    # fc head params (fw1 pre-split into the 4 quarters for [d_e, d_c, s_e, s_c])
    fw1de, fw1dc, fw1se, fw1sc, fb1, fw2, fb2,
    # output
    out_ref,
    # scratch
    sw1_buf, sw2_buf, dma_sem,
):
    B = out_ref.shape[0]

    # Kick off the big s-branch weight DMAs immediately; they land while the
    # d-branch computes, hiding >60% of total weight HBM traffic.
    sw1_cp = pltpu.make_async_copy(sw1_hbm, sw1_buf, dma_sem.at[0])
    sw2_cp = pltpu.make_async_copy(sw2_hbm, sw2_buf, dma_sem.at[1])
    sw1_cp.start()
    sw2_cp.start()

    def linear(x, w_ref, b_ref):
        # bf16 x bf16 MXU matmul with f32 accumulation; bias/activation in f32.
        return jnp.dot(x.astype(jnp.bfloat16), w_ref[...],
                       preferred_element_type=jnp.float32) + b_ref[...]

    def branch(x_ref, adj_ref, w1, b1, w2, b2, wg1, bg1, wg2, bg2,
               wa1e, wa1c, ba1, wa2_row, ba2):
        x = x_ref[...]                                  # (B*N, D)  bf16
        n = x.shape[0] // B
        # per-batch adjacency, broadcast once (hoisted) for the batched einsums
        adj = jnp.broadcast_to(adj_ref[...][None, :, :], (B, n, n))   # f32

        # embedding: Linear -> ReLU -> Linear -> ReLU (batch folded into MXU rows)
        e = jnp.maximum(linear(x, w1, b1), 0.0)
        e = jnp.maximum(linear(e, w2, b2), 0.0)                       # (B*N, 256)

        # graph conv: per-batch adj @ e (kept f32), no block-diagonal kron
        cx = jnp.einsum('bnm,bmd->bnd', adj, e.reshape(B, n, 256),
                        preferred_element_type=jnp.float32).reshape(B * n, 256)
        cx = jnp.maximum(linear(cx, wg1, bg1), 0.0)
        cx = jnp.einsum('bnm,bmd->bnd', adj, cx.reshape(B, n, 256),
                        preferred_element_type=jnp.float32).reshape(B * n, 256)
        cx = jnp.maximum(linear(cx, wg2, bg2), 0.0)                   # (B*N, 256)

        # attention head on concat([e, cx]) WITHOUT materializing the concat:
        # a = relu(e @ wa1_e + cx @ wa1_c + ba1)
        a = jnp.maximum(
            linear(e, wa1e, ba1)
            + jnp.dot(cx.astype(jnp.bfloat16), wa1c[...],
                      preferred_element_type=jnp.float32),
            0.0)                                                      # (B*N, 128)
        # 128 -> 1 projection on the VPU (lane reduce), not a 1-wide MXU matmul
        logits = (jnp.sum(a * wa2_row[...], axis=-1, keepdims=True)
                  + ba2[...])                                         # (B*N, 1)

        # per-batch softmax over N (torch Softmax(dim=1)), vectorized over batch.
        # (B*N, .) -> (B, N, .) is a pure sublane-tile relabel when N % 8 == 0.
        lg = logits.reshape(B, n, 1)
        m = jnp.max(lg, axis=1, keepdims=True)
        p = jnp.exp(lg - m)
        att = p / jnp.sum(p, axis=1, keepdims=True)                   # (B, N, 1)

        # attention-weighted sum over N, carried as the two 256-wide halves of xc
        y_e = jnp.sum(e.reshape(B, n, 256) * att, axis=1)             # (B, 256)
        y_c = jnp.sum(cx.reshape(B, n, 256) * att, axis=1)            # (B, 256)
        return y_e, y_c

    # d-branch runs while sw1/sw2 stream in.
    y1e, y1c = branch(x1_ref, adj1_ref, dw1, db1, dw2, db2,
                      dwg1, dbg1, dwg2, dbg2, dwa1e, dwa1c, dba1, dwa2, dba2)

    # Block only now on the s-branch weight DMAs.
    sw1_cp.wait()
    sw2_cp.wait()
    y2e, y2c = branch(x2_ref, adj2_ref, sw1_buf, sb1, sw2_buf, sb2,
                      swg1, sbg1, swg2, sbg2, swa1e, swa1c, sba1, swa2, sba2)

    # fc head: cat([y1, y2], -1) @ fw1 decomposed over the four 256-wide halves
    # (order [d_e, d_c, s_e, s_c] matches torch's cat([x1, x2], dim=1)).
    def mm(y, w_ref):
        return jnp.dot(y.astype(jnp.bfloat16), w_ref[...],
                       preferred_element_type=jnp.float32)

    h = mm(y1e, fw1de) + mm(y1c, fw1dc) + mm(y2e, fw1se) + mm(y2c, fw1sc) + fb1[...]
    h = jnp.maximum(h, 0.0)                                           # (B, 128)
    # nn.Dropout(0.5) is the identity in eval/inference mode.
    s = jnp.sum(h * fw2[...], axis=-1, keepdims=True) + fb2[...]      # (B, 1)
    out_ref[...] = 1.0 / (1.0 + jnp.exp(-s))


# ---------------------------------------------------------------------------
# Parameter construction (deterministic, synthetic) + adjacency
# ---------------------------------------------------------------------------
def _linear_params(key, fan_in, fan_out):
    kw, kb = jax.random.split(key)
    bound = 1.0 / float(fan_in) ** 0.5
    w = jax.random.uniform(kw, (fan_in, fan_out), jnp.float32, -bound, bound)
    b = jax.random.uniform(kb, (1, fan_out), jnp.float32, -bound, bound)
    return w, b


def make_context_attention_params(key, in_size):
    ks = jax.random.split(key, 6)
    w1, b1 = _linear_params(ks[0], in_size, in_size // 2)
    w2, b2 = _linear_params(ks[1], in_size // 2, 256)
    wg1, bg1 = _linear_params(ks[2], 256, 256)
    wg2, bg2 = _linear_params(ks[3], 256, 256)
    wa1, ba1 = _linear_params(ks[4], 512, 128)
    wa2, ba2 = _linear_params(ks[5], 128, 1)
    bf = jnp.bfloat16
    # Large weights stored bf16; wa1 split into [e | cx] halves; wa2 as a
    # (1,128) row so the 128->1 projection runs on the VPU.
    return (w1.astype(bf), b1, w2.astype(bf), b2,
            wg1.astype(bf), bg1, wg2.astype(bf), bg2,
            wa1[:256].astype(bf), wa1[256:].astype(bf), ba1, wa2.T, ba2)


def make_adj(n):
    # exp(-|i-j|) followed by symmetric normalization D^-1/2 A D^-1/2
    t = jnp.arange(n, dtype=jnp.float32)
    dis = jnp.exp(-jnp.abs(t[:, None] - t[None, :]))
    d = dis.sum(axis=1)
    dmh = d ** -0.5
    return dmh[:, None] * dis * dmh[None, :]


def make_action_net_params(key, clip_num, image_num):
    k_d, k_s, k_f1, k_f2 = jax.random.split(key, 4)
    d_params = make_context_attention_params(k_d, 1024)
    s_params = make_context_attention_params(k_s, 2048)
    fw1, fb1 = _linear_params(k_f1, 1024, 128)
    fw2, fb2 = _linear_params(k_f2, 128, 1)
    bf = jnp.bfloat16
    # fw1 pre-split into the 4 quarters that multiply [d_e, d_c, s_e, s_c].
    fc_params = (fw1[0:256].astype(bf), fw1[256:512].astype(bf),
                 fw1[512:768].astype(bf), fw1[768:1024].astype(bf),
                 fb1, fw2.T, fb2)
    return dict(adj1=make_adj(clip_num), adj2=make_adj(image_num),
                d=d_params, s=s_params, fc=fc_params)


# ---------------------------------------------------------------------------
# Forward wrapper: single fused pallas_call
# ---------------------------------------------------------------------------
def action_net_forward(x1, x2, params):
    B, n1 = x1.shape[0], x1.shape[1]
    n2 = x2.shape[1]
    # N multiples of 8 keep the in-kernel (B*N,.)<->(B,N,.) reshapes as pure
    # sublane-tile relabels (other N stay correct but relayout).
    x1f = x1.reshape(B * n1, -1).astype(jnp.bfloat16)   # (B*clip_num, 1024)
    x2f = x2.reshape(B * n2, -1).astype(jnp.bfloat16)   # (B*image_num, 2048)

    inputs = (x1f, x2f, params["adj1"], params["adj2"]) \
        + tuple(params["d"]) + tuple(params["s"]) + tuple(params["fc"])

    def vmem_spec(shape):
        nd = len(shape)
        return pl.BlockSpec(shape, lambda i, _nd=nd: (0,) * _nd)

    in_specs = [vmem_spec(a.shape) for a in inputs]
    # s-branch w1 / w2 stay in HBM; the kernel overlaps their DMA with the
    # d-branch compute (manual async-copy into VMEM scratch).
    s_off = 4 + len(params["d"])
    in_specs[s_off + 0] = pl.BlockSpec(memory_space=pl.ANY)    # sw1 (2048,1024)
    in_specs[s_off + 2] = pl.BlockSpec(memory_space=pl.ANY)    # sw2 (1024,256)

    out = pl.pallas_call(
        _action_net_kernel,
        out_shape=jax.ShapeDtypeStruct((B, 1), jnp.float32),
        grid=(1,),
        in_specs=in_specs,
        out_specs=pl.BlockSpec((B, 1), lambda i: (0, 0)),
        scratch_shapes=[
            pltpu.VMEM((2048, 1024), jnp.bfloat16),   # sw1 landing buffer
            pltpu.VMEM((1024, 256), jnp.bfloat16),    # sw2 landing buffer
            pltpu.SemaphoreType.DMA((2,)),
        ],
        compiler_params=pltpu.CompilerParams(
            dimension_semantics=("arbitrary",),
            # ~5 MiB manual-DMA weight scratch + ~5 MiB pipelined inputs; well
            # inside v7x's 64 MiB physical VMEM per TensorCore.
            vmem_limit_bytes=48 * 1024 * 1024,
        ),
    )(*inputs)
    return out.reshape(B)


if __name__ == "__main__":
    B, clip_num, image_num = 2, 8, 16
    key = jax.random.PRNGKey(0)
    k_x1, k_x2, k_p = jax.random.split(key, 3)

    # x1: (B, clip_num, 32, 32)  -> view -> (B, clip_num, 1024)
    # x2: (B, image_num, 64, 32) -> view -> (B, image_num, 2048)
    x1 = jax.random.normal(k_x1, (B, clip_num, 32, 32), jnp.float32)
    x2 = jax.random.normal(k_x2, (B, image_num, 64, 32), jnp.float32)

    params = make_action_net_params(k_p, clip_num, image_num)

    score = jax.jit(action_net_forward)(x1, x2, params)
    score = jax.block_until_ready(score)
    assert score.shape == (B,)
    assert bool(jnp.all(jnp.isfinite(score)))
    assert bool(jnp.all((score >= 0.0) & (score <= 1.0)))   # sigmoid output
    print("KERNEL_OK")
</pallas_src>

<mosaic_0001>
module attributes {stable_mosaic.version = 11 : i64} {
  func.func @_action_net_kernel(%arg0: i32, %arg1: memref<16x1024xbf16, #tpu.memory_space<vmem>>, %arg2: memref<32x2048xbf16, #tpu.memory_space<vmem>>, %arg3: memref<8x8xf32, #tpu.memory_space<vmem>>, %arg4: memref<16x16xf32, #tpu.memory_space<vmem>>, %arg5: memref<1024x512xbf16, #tpu.memory_space<vmem>>, %arg6: memref<1x512xf32, #tpu.memory_space<vmem>>, %arg7: memref<512x256xbf16, #tpu.memory_space<vmem>>, %arg8: memref<1x256xf32, #tpu.memory_space<vmem>>, %arg9: memref<256x256xbf16, #tpu.memory_space<vmem>>, %arg10: memref<1x256xf32, #tpu.memory_space<vmem>>, %arg11: memref<256x256xbf16, #tpu.memory_space<vmem>>, %arg12: memref<1x256xf32, #tpu.memory_space<vmem>>, %arg13: memref<256x128xbf16, #tpu.memory_space<vmem>>, %arg14: memref<256x128xbf16, #tpu.memory_space<vmem>>, %arg15: memref<1x128xf32, #tpu.memory_space<vmem>>, %arg16: memref<1x128xf32, #tpu.memory_space<vmem>>, %arg17: memref<1x1xf32, #tpu.memory_space<vmem>>, %arg18: memref<2048x1024xbf16, #tpu.memory_space<any>>, %arg19: memref<1x1024xf32, #tpu.memory_space<vmem>>, %arg20: memref<1024x256xbf16, #tpu.memory_space<any>>, %arg21: memref<1x256xf32, #tpu.memory_space<vmem>>, %arg22: memref<256x256xbf16, #tpu.memory_space<vmem>>, %arg23: memref<1x256xf32, #tpu.memory_space<vmem>>, %arg24: memref<256x256xbf16, #tpu.memory_space<vmem>>, %arg25: memref<1x256xf32, #tpu.memory_space<vmem>>, %arg26: memref<256x128xbf16, #tpu.memory_space<vmem>>, %arg27: memref<256x128xbf16, #tpu.memory_space<vmem>>, %arg28: memref<1x128xf32, #tpu.memory_space<vmem>>, %arg29: memref<1x128xf32, #tpu.memory_space<vmem>>, %arg30: memref<1x1xf32, #tpu.memory_space<vmem>>, %arg31: memref<256x128xbf16, #tpu.memory_space<vmem>>, %arg32: memref<256x128xbf16, #tpu.memory_space<vmem>>, %arg33: memref<256x128xbf16, #tpu.memory_space<vmem>>, %arg34: memref<256x128xbf16, #tpu.memory_space<vmem>>, %arg35: memref<1x128xf32, #tpu.memory_space<vmem>>, %arg36: memref<1x128xf32, #tpu.memory_space<vmem>>, %arg37: memref<1x1xf32, #tpu.memory_space<vmem>>, %arg38: memref<2x1xf32, #tpu.memory_space<vmem>>, %arg39: memref<2048x1024xbf16, #tpu.memory_space<vmem>>, %arg40: memref<1024x256xbf16, #tpu.memory_space<vmem>>, %arg41: memref<2x!tpu.dma_semaphore, #tpu.memory_space<semaphore_mem>>) attributes {dimension_semantics = [#tpu.dimension_semantics<arbitrary>], iteration_bounds = array<i64: 1>, scalar_prefetch = 0 : i64, scratch_operands = 3 : i64, tpu.core_type = #tpu.core_type<tc>, window_params = [{pipeline_mode = #tpu.pipeline_mode<synchronous>, transform_indices = @transform_0, window_bounds = array<i64: 16, 1024>}, {pipeline_mode = #tpu.pipeline_mode<synchronous>, transform_indices = @transform_1, window_bounds = array<i64: 32, 2048>}, {pipeline_mode = #tpu.pipeline_mode<synchronous>, transform_indices = @transform_2, window_bounds = array<i64: 8, 8>}, {pipeline_mode = #tpu.pipeline_mode<synchronous>, transform_indices = @transform_3, window_bounds = array<i64: 16, 16>}, {pipeline_mode = #tpu.pipeline_mode<synchronous>, transform_indices = @transform_4, window_bounds = array<i64: 1024, 512>}, {pipeline_mode = #tpu.pipeline_mode<synchronous>, transform_indices = @transform_5, window_bounds = array<i64: 1, 512>}, {pipeline_mode = #tpu.pipeline_mode<synchronous>, transform_indices = @transform_6, window_bounds = array<i64: 512, 256>}, {pipeline_mode = #tpu.pipeline_mode<synchronous>, transform_indices = @transform_7, window_bounds = array<i64: 1, 256>}, {pipeline_mode = #tpu.pipeline_mode<synchronous>, transform_indices = @transform_8, window_bounds = array<i64: 256, 256>}, {pipeline_mode = #tpu.pipeline_mode<synchronous>, transform_indices = @transform_9, window_bounds = array<i64: 1, 256>}, {pipeline_mode = #tpu.pipeline_mode<synchronous>, transform_indices = @transform_10, window_bounds = array<i64: 256, 256>}, {pipeline_mode = #tpu.pipeline_mode<synchronous>, transform_indices = @transform_11, window_bounds = array<i64: 1, 256>}, {pipeline_mode = #tpu.pipeline_mode<synchronous>, transform_indices = @transform_12, window_bounds = array<i64: 256, 128>}, {pipeline_mode = #tpu.pipeline_mode<synchronous>, transform_indices = @transform_13, window_bounds = array<i64: 256, 128>}, {pipeline_mode = #tpu.pipeline_mode<synchronous>, transform_indices = @transform_14, window_bounds = array<i64: 1, 128>}, {pipeline_mode = #tpu.pipeline_mode<synchronous>, transform_indices = @transform_15, window_bounds = array<i64: 1, 128>}, {pipeline_mode = #tpu.pipeline_mode<synchronous>, transform_indices = @transform_16, window_bounds = array<i64: 1, 1>}, {}, {pipeline_mode = #tpu.pipeline_mode<synchronous>, transform_indices = @transform_18, window_bounds = array<i64: 1, 1024>}, {}, {pipeline_mode = #tpu.pipeline_mode<synchronous>, transform_indices = @transform_20, window_bounds = array<i64: 1, 256>}, {pipeline_mode = #tpu.pipeline_mode<synchronous>, transform_indices = @transform_21, window_bounds = array<i64: 256, 256>}, {pipeline_mode = #tpu.pipeline_mode<synchronous>, transform_indices = @transform_22, window_bounds = array<i64: 1, 256>}, {pipeline_mode = #tpu.pipeline_mode<synchronous>, transform_indices = @transform_23, window_bounds = array<i64: 256, 256>}, {pipeline_mode = #tpu.pipeline_mode<synchronous>, transform_indices = @transform_24, window_bounds = array<i64: 1, 256>}, {pipeline_mode = #tpu.pipeline_mode<synchronous>, transform_indices = @transform_25, window_bounds = array<i64: 256, 128>}, {pipeline_mode = #tpu.pipeline_mode<synchronous>, transform_indices = @transform_26, window_bounds = array<i64: 256, 128>}, {pipeline_mode = #tpu.pipeline_mode<synchronous>, transform_indices = @transform_27, window_bounds = array<i64: 1, 128>}, {pipeline_mode = #tpu.pipeline_mode<synchronous>, transform_indices = @transform_28, window_bounds = array<i64: 1, 128>}, {pipeline_mode = #tpu.pipeline_mode<synchronous>, transform_indices = @transform_29, window_bounds = array<i64: 1, 1>}, {pipeline_mode = #tpu.pipeline_mode<synchronous>, transform_indices = @transform_30, window_bounds = array<i64: 256, 128>}, {pipeline_mode = #tpu.pipeline_mode<synchronous>, transform_indices = @transform_31, window_bounds = array<i64: 256, 128>}, {pipeline_mode = #tpu.pipeline_mode<synchronous>, transform_indices = @transform_32, window_bounds = array<i64: 256, 128>}, {pipeline_mode = #tpu.pipeline_mode<synchronous>, transform_indices = @transform_33, window_bounds = array<i64: 256, 128>}, {pipeline_mode = #tpu.pipeline_mode<synchronous>, transform_indices = @transform_34, window_bounds = array<i64: 1, 128>}, {pipeline_mode = #tpu.pipeline_mode<synchronous>, transform_indices = @transform_35, window_bounds = array<i64: 1, 128>}, {pipeline_mode = #tpu.pipeline_mode<synchronous>, transform_indices = @transform_36, window_bounds = array<i64: 1, 1>}, {pipeline_mode = #tpu.pipeline_mode<synchronous>, transform_indices = @transform_37, window_bounds = array<i64: 2, 1>}]} {
    %c0_i32 = arith.constant 0 : i32
    %0 = tpu.memref_slice %arg41[%c0_i32] : memref<2x!tpu.dma_semaphore, #tpu.memory_space<semaphore_mem>> -> memref<1x!tpu.dma_semaphore, #tpu.memory_space<semaphore_mem>>
    %1 = tpu.memref_squeeze %0 : memref<1x!tpu.dma_semaphore, #tpu.memory_space<semaphore_mem>> -> memref<!tpu.dma_semaphore, #tpu.memory_space<semaphore_mem>>
    tpu.enqueue_dma source(%arg18 : memref<2048x1024xbf16, #tpu.memory_space<any>>) target(%arg39 : memref<2048x1024xbf16, #tpu.memory_space<vmem>>) target_semaphore(%1 : memref<!tpu.dma_semaphore, #tpu.memory_space<semaphore_mem>>)
    %c1_i32 = arith.constant 1 : i32
    %2 = tpu.memref_slice %arg41[%c1_i32] : memref<2x!tpu.dma_semaphore, #tpu.memory_space<semaphore_mem>> -> memref<1x!tpu.dma_semaphore, #tpu.memory_space<semaphore_mem>>
    %3 = tpu.memref_squeeze %2 : memref<1x!tpu.dma_semaphore, #tpu.memory_space<semaphore_mem>> -> memref<!tpu.dma_semaphore, #tpu.memory_space<semaphore_mem>>
    tpu.enqueue_dma source(%arg20 : memref<1024x256xbf16, #tpu.memory_space<any>>) target(%arg40 : memref<1024x256xbf16, #tpu.memory_space<vmem>>) target_semaphore(%3 : memref<!tpu.dma_semaphore, #tpu.memory_space<semaphore_mem>>)
    %c0 = arith.constant 0 : index
    %c0_0 = arith.constant 0 : index
    %4 = vector.load %arg1[%c0, %c0_0] : memref<16x1024xbf16, #tpu.memory_space<vmem>>, vector<16x1024xbf16>
    %c0_1 = arith.constant 0 : index
    %c0_2 = arith.constant 0 : index
    %5 = vector.load %arg3[%c0_1, %c0_2] : memref<8x8xf32, #tpu.memory_space<vmem>>, vector<8x8xf32>
    %6 = vector.shape_cast %5 : vector<8x8xf32> to vector<1x8x8xf32>
    %7 = vector.shape_cast %6 : vector<1x8x8xf32> to vector<1x8x8xf32>
    %8 = vector.broadcast %7 : vector<1x8x8xf32> to vector<2x8x8xf32>
    %c0_3 = arith.constant 0 : index
    %c0_4 = arith.constant 0 : index
    %9 = vector.load %arg5[%c0_3, %c0_4] : memref<1024x512xbf16, #tpu.memory_space<vmem>>, vector<1024x512xbf16>
    %cst = arith.constant dense<0.000000e+00> : vector<16x512xf32>
    %10 = tpu.matmul %4, %9, %cst {dimension_numbers = #tpu.dot_dimension_numbers<[1], [0], [0], [1], [0, 0, 1, 1], [], []>} : vector<16x1024xbf16>, vector<1024x512xbf16>, vector<16x512xf32> -> vector<16x512xf32>
    %c0_5 = arith.constant 0 : index
    %c0_6 = arith.constant 0 : index
    %11 = vector.load %arg6[%c0_5, %c0_6] : memref<1x512xf32, #tpu.memory_space<vmem>>, vector<1x512xf32>
    %12 = vector.broadcast %11 : vector<1x512xf32> to vector<16x512xf32>
    %13 = arith.addf %10, %12 : vector<16x512xf32>
    %cst_7 = arith.constant 0.000000e+00 : f32
    %14 = vector.broadcast %cst_7 : f32 to vector<16x512xf32>
    %15 = arith.maximumf %13, %14 : vector<16x512xf32>
    %16 = arith.truncf %15 : vector<16x512xf32> to vector<16x512xbf16>
    %c0_8 = arith.constant 0 : index
    %c0_9 = arith.constant 0 : index
    %17 = vector.load %arg7[%c0_8, %c0_9] : memref<512x256xbf16, #tpu.memory_space<vmem>>, vector<512x256xbf16>
    %cst_10 = arith.constant dense<0.000000e+00> : vector<16x256xf32>
    %18 = tpu.matmul %16, %17, %cst_10 {dimension_numbers = #tpu.dot_dimension_numbers<[1], [0], [0], [1], [0, 0, 1, 1], [], []>} : vector<16x512xbf16>, vector<512x256xbf16>, vector<16x256xf32> -> vector<16x256xf32>
    %c0_11 = arith.constant 0 : index
    %c0_12 = arith.constant 0 : index
    %19 = vector.load %arg8[%c0_11, %c0_12] : memref<1x256xf32, #tpu.memory_space<vmem>>, vector<1x256xf32>
    %20 = vector.broadcast %19 : vector<1x256xf32> to vector<16x256xf32>
    %21 = arith.addf %18, %20 : vector<16x256xf32>
    %cst_13 = arith.constant 0.000000e+00 : f32
    %22 = vector.broadcast %cst_13 : f32 to vector<16x256xf32>
    %23 = arith.maximumf %21, %22 : vector<16x256xf32>
    %24 = vector.shape_cast %23 : vector<16x256xf32> to vector<2x8x256xf32>
    "tpu.trace_start"() <{level = 10 : i32, message = "bnm,bmd->bnd"}> : () -> ()
    %cst_14 = arith.constant dense<0.000000e+00> : vector<2x8x256xf32>
    %25 = tpu.matmul %8, %24, %cst_14 {dimension_numbers = #tpu.dot_dimension_numbers<[2], [1], [1], [2], [0, 0, 0, 1, 1, 2], [0], [0]>} : vector<2x8x8xf32>, vector<2x8x256xf32>, vector<2x8x256xf32> -> vector<2x8x256xf32>
    "tpu.trace_stop"() : () -> ()
    %26 = vector.shape_cast %25 : vector<2x8x256xf32> to vector<16x256xf32>
    %27 = arith.truncf %26 : vector<16x256xf32> to vector<16x256xbf16>
    %c0_15 = arith.constant 0 : index
    %c0_16 = arith.constant 0 : index
    %28 = vector.load %arg9[%c0_15, %c0_16] : memref<256x256xbf16, #tpu.memory_space<vmem>>, vector<256x256xbf16>
    %cst_17 = arith.constant dense<0.000000e+00> : vector<16x256xf32>
    %29 = tpu.matmul %27, %28, %cst_17 {dimension_numbers = #tpu.dot_dimension_numbers<[1], [0], [0], [1], [0, 0, 1, 1], [], []>} : vector<16x256xbf16>, vector<256x256xbf16>, vector<16x256xf32> -> vector<16x256xf32>
    %c0_18 = arith.constant 0 : index
    %c0_19 = arith.constant 0 : index
    %30 = vector.load %arg10[%c0_18, %c0_19] : memref<1x256xf32, #tpu.memory_space<vmem>>, vector<1x256xf32>
    %31 = vector.broadcast %30 : vector<1x256xf32> to vector<16x256xf32>
    %32 = arith.addf %29, %31 : vector<16x256xf32>
    %cst_20 = arith.constant 0.000000e+00 : f32
    %33 = vector.broadcast %cst_20 : f32 to vector<16x256xf32>
    %34 = arith.maximumf %32, %33 : vector<16x256xf32>
    %35 = vector.shape_cast %34 : vector<16x256xf32> to vector<2x8x256xf32>
    "tpu.trace_start"() <{level = 10 : i32, message = "bnm,bmd->bnd"}> : () -> ()
    %cst_21 = arith.constant dense<0.000000e+00> : vector<2x8x256xf32>
    %36 = tpu.matmul %8, %35, %cst_21 {dimension_numbers = #tpu.dot_dimension_numbers<[2], [1], [1], [2], [0, 0, 0, 1, 1, 2], [0], [0]>} : vector<2x8x8xf32>, vector<2x8x256xf32>, vector<2x8x256xf32> -> vector<2x8x256xf32>
    "tpu.trace_stop"() : () -> ()
    %37 = vector.shape_cast %36 : vector<2x8x256xf32> to vector<16x256xf32>
    %38 = arith.truncf %37 : vector<16x256xf32> to vector<16x256xbf16>
    %c0_22 = arith.constant 0 : index
    %c0_23 = arith.constant 0 : index
    %39 = vector.load %arg11[%c0_22, %c0_23] : memref<256x256xbf16, #tpu.memory_space<vmem>>, vector<256x256xbf16>
    %cst_24 = arith.constant dense<0.000000e+00> : vector<16x256xf32>
    %40 = tpu.matmul %38, %39, %cst_24 {dimension_numbers = #tpu.dot_dimension_numbers<[1], [0], [0], [1], [0, 0, 1, 1], [], []>} : vector<16x256xbf16>, vector<256x256xbf16>, vector<16x256xf32> -> vector<16x256xf32>
    %c0_25 = arith.constant 0 : index
    %c0_26 = arith.constant 0 : index
    %41 = vector.load %arg12[%c0_25, %c0_26] : memref<1x256xf32, #tpu.memory_space<vmem>>, vector<1x256xf32>
    %42 = vector.broadcast %41 : vector<1x256xf32> to vector<16x256xf32>
    %43 = arith.addf %40, %42 : vector<16x256xf32>
    %cst_27 = arith.constant 0.000000e+00 : f32
    %44 = vector.broadcast %cst_27 : f32 to vector<16x256xf32>
    %45 = arith.maximumf %43, %44 : vector<16x256xf32>
    %46 = arith.truncf %23 : vector<16x256xf32> to vector<16x256xbf16>
    %c0_28 = arith.constant 0 : index
    %c0_29 = arith.constant 0 : index
    %47 = vector.load %arg13[%c0_28, %c0_29] : memref<256x128xbf16, #tpu.memory_space<vmem>>, vector<256x128xbf16>
    %cst_30 = arith.constant dense<0.000000e+00> : vector<16x128xf32>
    %48 = tpu.matmul %46, %47, %cst_30 {dimension_numbers = #tpu.dot_dimension_numbers<[1], [0], [0], [1], [0, 0, 1, 1], [], []>} : vector<16x256xbf16>, vector<256x128xbf16>, vector<16x128xf32> -> vector<16x128xf32>
    %c0_31 = arith.constant 0 : index
    %c0_32 = arith.constant 0 : index
    %49 = vector.load %arg15[%c0_31, %c0_32] : memref<1x128xf32, #tpu.memory_space<vmem>>, vector<1x128xf32>
    %50 = vector.broadcast %49 : vector<1x128xf32> to vector<16x128xf32>
    %51 = arith.addf %48, %50 : vector<16x128xf32>
    %52 = arith.truncf %45 : vector<16x256xf32> to vector<16x256xbf16>
    %c0_33 = arith.constant 0 : index
    %c0_34 = arith.constant 0 : index
    %53 = vector.load %arg14[%c0_33, %c0_34] : memref<256x128xbf16, #tpu.memory_space<vmem>>, vector<256x128xbf16>
    %cst_35 = arith.constant dense<0.000000e+00> : vector<16x128xf32>
    %54 = tpu.matmul %52, %53, %cst_35 {dimension_numbers = #tpu.dot_dimension_numbers<[1], [0], [0], [1], [0, 0, 1, 1], [], []>} : vector<16x256xbf16>, vector<256x128xbf16>, vector<16x128xf32> -> vector<16x128xf32>
    %55 = arith.addf %51, %54 : vector<16x128xf32>
    %cst_36 = arith.constant 0.000000e+00 : f32
    %56 = vector.broadcast %cst_36 : f32 to vector<16x128xf32>
    %57 = arith.maximumf %55, %56 : vector<16x128xf32>
    %c0_37 = arith.constant 0 : index
    %c0_38 = arith.constant 0 : index
    %58 = vector.load %arg16[%c0_37, %c0_38] : memref<1x128xf32, #tpu.memory_space<vmem>>, vector<1x128xf32>
    %59 = vector.broadcast %58 : vector<1x128xf32> to vector<16x128xf32>
    %60 = arith.mulf %57, %59 : vector<16x128xf32>
    %cst_39 = arith.constant dense<0.000000e+00> : vector<16xf32>
    %61 = vector.multi_reduction <add>, %60, %cst_39 [1] : vector<16x128xf32> to vector<16xf32>
    %62 = vector.shape_cast %61 : vector<16xf32> to vector<16x1xf32>
    %c0_40 = arith.constant 0 : index
    %c0_41 = arith.constant 0 : index
    %63 = vector.load %arg17[%c0_40, %c0_41] : memref<1x1xf32, #tpu.memory_space<vmem>>, vector<1x1xf32>
    %64 = vector.broadcast %63 : vector<1x1xf32> to vector<16x1xf32>
    %65 = arith.addf %62, %64 : vector<16x1xf32>
    %66 = vector.shape_cast %65 : vector<16x1xf32> to vector<2x8x1xf32>
    %cst_42 = arith.constant dense<0xFF800000> : vector<2x1xf32>
    %67 = vector.multi_reduction <maximumf>, %66, %cst_42 [1] : vector<2x8x1xf32> to vector<2x1xf32>
    %68 = vector.shape_cast %67 : vector<2x1xf32> to vector<2x1x1xf32>
    %69 = vector.broadcast %68 : vector<2x1x1xf32> to vector<2x8x1xf32>
    %70 = arith.subf %66, %69 : vector<2x8x1xf32>
    %71 = math.exp %70 : vector<2x8x1xf32>
    %cst_43 = arith.constant dense<0.000000e+00> : vector<2x1xf32>
    %72 = vector.multi_reduction <add>, %71, %cst_43 [1] : vector<2x8x1xf32> to vector<2x1xf32>
    %73 = vector.shape_cast %72 : vector<2x1xf32> to vector<2x1x1xf32>
    %74 = vector.broadcast %73 : vector<2x1x1xf32> to vector<2x8x1xf32>
    %75 = arith.divf %71, %74 : vector<2x8x1xf32>
    %76 = vector.shape_cast %23 : vector<16x256xf32> to vector<2x8x256xf32>
    %77 = vector.broadcast %75 : vector<2x8x1xf32> to vector<2x8x256xf32>
    %78 = arith.mulf %76, %77 : vector<2x8x256xf32>
    %cst_44 = arith.constant dense<0.000000e+00> : vector<2x256xf32>
    %79 = vector.multi_reduction <add>, %78, %cst_44 [1] : vector<2x8x256xf32> to vector<2x256xf32>
    %80 = vector.shape_cast %45 : vector<16x256xf32> to vector<2x8x256xf32>
    %81 = vector.broadcast %75 : vector<2x8x1xf32> to vector<2x8x256xf32>
    %82 = arith.mulf %80, %81 : vector<2x8x256xf32>
    %cst_45 = arith.constant dense<0.000000e+00> : vector<2x256xf32>
    %83 = vector.multi_reduction <add>, %82, %cst_45 [1] : vector<2x8x256xf32> to vector<2x256xf32>
    %c0_i32_46 = arith.constant 0 : i32
    %84 = tpu.memref_slice %arg41[%c0_i32_46] : memref<2x!tpu.dma_semaphore, #tpu.memory_space<semaphore_mem>> -> memref<1x!tpu.dma_semaphore, #tpu.memory_space<semaphore_mem>>
    %85 = tpu.memref_squeeze %84 : memref<1x!tpu.dma_semaphore, #tpu.memory_space<semaphore_mem>> -> memref<!tpu.dma_semaphore, #tpu.memory_space<semaphore_mem>>
    tpu.wait_dma2 semaphore(%85 : memref<!tpu.dma_semaphore, #tpu.memory_space<semaphore_mem>>) src(%arg18 : memref<2048x1024xbf16, #tpu.memory_space<any>>) dst(%arg39 : memref<2048x1024xbf16, #tpu.memory_space<vmem>>)
    %c1_i32_47 = arith.constant 1 : i32
    %86 = tpu.memref_slice %arg41[%c1_i32_47] : memref<2x!tpu.dma_semaphore, #tpu.memory_space<semaphore_mem>> -> memref<1x!tpu.dma_semaphore, #tpu.memory_space<semaphore_mem>>
    %87 = tpu.memref_squeeze %86 : memref<1x!tpu.dma_semaphore, #tpu.memory_space<semaphore_mem>> -> memref<!tpu.dma_semaphore, #tpu.memory_space<semaphore_mem>>
    tpu.wait_dma2 semaphore(%87 : memref<!tpu.dma_semaphore, #tpu.memory_space<semaphore_mem>>) src(%arg20 : memref<1024x256xbf16, #tpu.memory_space<any>>) dst(%arg40 : memref<1024x256xbf16, #tpu.memory_space<vmem>>)
    %c0_48 = arith.constant 0 : index
    %c0_49 = arith.constant 0 : index
    %88 = vector.load %arg2[%c0_48, %c0_49] : memref<32x2048xbf16, #tpu.memory_space<vmem>>, vector<32x2048xbf16>
    %c0_50 = arith.constant 0 : index
    %c0_51 = arith.constant 0 : index
    %89 = vector.load %arg4[%c0_50, %c0_51] : memref<16x16xf32, #tpu.memory_space<vmem>>, vector<16x16xf32>
    %90 = vector.shape_cast %89 : vector<16x16xf32> to vector<1x16x16xf32>
    %91 = vector.shape_cast %90 : vector<1x16x16xf32> to vector<1x16x16xf32>
    %92 = vector.broadcast %91 : vector<1x16x16xf32> to vector<2x16x16xf32>
    %c0_52 = arith.constant 0 : index
    %c0_53 = arith.constant 0 : index
    %93 = vector.load %arg39[%c0_52, %c0_53] : memref<2048x1024xbf16, #tpu.memory_space<vmem>>, vector<2048x1024xbf16>
    %cst_54 = arith.constant dense<0.000000e+00> : vector<32x1024xf32>
    %94 = tpu.matmul %88, %93, %cst_54 {dimension_numbers = #tpu.dot_dimension_numbers<[1], [0], [0], [1], [0, 0, 1, 1], [], []>} : vector<32x2048xbf16>, vector<2048x1024xbf16>, vector<32x1024xf32> -> vector<32x1024xf32>
    %c0_55 = arith.constant 0 : index
    %c0_56 = arith.constant 0 : index
    %95 = vector.load %arg19[%c0_55, %c0_56] : memref<1x1024xf32, #tpu.memory_space<vmem>>, vector<1x1024xf32>
    %96 = vector.broadcast %95 : vector<1x1024xf32> to vector<32x1024xf32>
    %97 = arith.addf %94, %96 : vector<32x1024xf32>
    %cst_57 = arith.constant 0.000000e+00 : f32
    %98 = vector.broadcast %cst_57 : f32 to vector<32x1024xf32>
    %99 = arith.maximumf %97, %98 : vector<32x1024xf32>
    %100 = arith.truncf %99 : vector<32x1024xf32> to vector<32x1024xbf16>
    %c0_58 = arith.constant 0 : index
    %c0_59 = arith.constant 0 : index
    %101 = vector.load %arg40[%c0_58, %c0_59] : memref<1024x256xbf16, #tpu.memory_space<vmem>>, vector<1024x256xbf16>
    %cst_60 = arith.constant dense<0.000000e+00> : vector<32x256xf32>
    %102 = tpu.matmul %100, %101, %cst_60 {dimension_numbers = #tpu.dot_dimension_numbers<[1], [0], [0], [1], [0, 0, 1, 1], [], []>} : vector<32x1024xbf16>, vector<1024x256xbf16>, vector<32x256xf32> -> vector<32x256xf32>
    %c0_61 = arith.constant 0 : index
    %c0_62 = arith.constant 0 : index
    %103 = vector.load %arg21[%c0_61, %c0_62] : memref<1x256xf32, #tpu.memory_space<vmem>>, vector<1x256xf32>
    %104 = vector.broadcast %103 : vector<1x256xf32> to vector<32x256xf32>
    %105 = arith.addf %102, %104 : vector<32x256xf32>
    %cst_63 = arith.constant 0.000000e+00 : f32
    %106 = vector.broadcast %cst_63 : f32 to vector<32x256xf32>
    %107 = arith.maximumf %105, %106 : vector<32x256xf32>
    %108 = vector.shape_cast %107 : vector<32x256xf32> to vector<2x16x256xf32>
    "tpu.trace_start"() <{level = 10 : i32, message = "bnm,bmd->bnd"}> : () -> ()
    %cst_64 = arith.constant dense<0.000000e+00> : vector<2x16x256xf32>
    %109 = tpu.matmul %92, %108, %cst_64 {dimension_numbers = #tpu.dot_dimension_numbers<[2], [1], [1], [2], [0, 0, 0, 1, 1, 2], [0], [0]>} : vector<2x16x16xf32>, vector<2x16x256xf32>, vector<2x16x256xf32> -> vector<2x16x256xf32>
    "tpu.trace_stop"() : () -> ()
    %110 = vector.shape_cast %109 : vector<2x16x256xf32> to vector<32x256xf32>
    %111 = arith.truncf %110 : vector<32x256xf32> to vector<32x256xbf16>
    %c0_65 = arith.constant 0 : index
    %c0_66 = arith.constant 0 : index
    %112 = vector.load %arg22[%c0_65, %c0_66] : memref<256x256xbf16, #tpu.memory_space<vmem>>, vector<256x256xbf16>
    %cst_67 = arith.constant dense<0.000000e+00> : vector<32x256xf32>
    %113 = tpu.matmul %111, %112, %cst_67 {dimension_numbers = #tpu.dot_dimension_numbers<[1], [0], [0], [1], [0, 0, 1, 1], [], []>} : vector<32x256xbf16>, vector<256x256xbf16>, vector<32x256xf32> -> vector<32x256xf32>
    %c0_68 = arith.constant 0 : index
    %c0_69 = arith.constant 0 : index
    %114 = vector.load %arg23[%c0_68, %c0_69] : memref<1x256xf32, #tpu.memory_space<vmem>>, vector<1x256xf32>
    %115 = vector.broadcast %114 : vector<1x256xf32> to vector<32x256xf32>
    %116 = arith.addf %113, %115 : vector<32x256xf32>
    %cst_70 = arith.constant 0.000000e+00 : f32
    %117 = vector.broadcast %cst_70 : f32 to vector<32x256xf32>
    %118 = arith.maximumf %116, %117 : vector<32x256xf32>
    %119 = vector.shape_cast %118 : vector<32x256xf32> to vector<2x16x256xf32>
    "tpu.trace_start"() <{level = 10 : i32, message = "bnm,bmd->bnd"}> : () -> ()
    %cst_71 = arith.constant dense<0.000000e+00> : vector<2x16x256xf32>
    %120 = tpu.matmul %92, %119, %cst_71 {dimension_numbers = #tpu.dot_dimension_numbers<[2], [1], [1], [2], [0, 0, 0, 1, 1, 2], [0], [0]>} : vector<2x16x16xf32>, vector<2x16x256xf32>, vector<2x16x256xf32> -> vector<2x16x256xf32>
    "tpu.trace_stop"() : () -> ()
    %121 = vector.shape_cast %120 : vector<2x16x256xf32> to vector<32x256xf32>
    %122 = arith.truncf %121 : vector<32x256xf32> to vector<32x256xbf16>
    %c0_72 = arith.constant 0 : index
    %c0_73 = arith.constant 0 : index
    %123 = vector.load %arg24[%c0_72, %c0_73] : memref<256x256xbf16, #tpu.memory_space<vmem>>, vector<256x256xbf16>
    %cst_74 = arith.constant dense<0.000000e+00> : vector<32x256xf32>
    %124 = tpu.matmul %122, %123, %cst_74 {dimension_numbers = #tpu.dot_dimension_numbers<[1], [0], [0], [1], [0, 0, 1, 1], [], []>} : vector<32x256xbf16>, vector<256x256xbf16>, vector<32x256xf32> -> vector<32x256xf32>
    %c0_75 = arith.constant 0 : index
    %c0_76 = arith.constant 0 : index
    %125 = vector.load %arg25[%c0_75, %c0_76] : memref<1x256xf32, #tpu.memory_space<vmem>>, vector<1x256xf32>
    %126 = vector.broadcast %125 : vector<1x256xf32> to vector<32x256xf32>
    %127 = arith.addf %124, %126 : vector<32x256xf32>
    %cst_77 = arith.constant 0.000000e+00 : f32
    %128 = vector.broadcast %cst_77 : f32 to vector<32x256xf32>
    %129 = arith.maximumf %127, %128 : vector<32x256xf32>
    %130 = arith.truncf %107 : vector<32x256xf32> to vector<32x256xbf16>
    %c0_78 = arith.constant 0 : index
    %c0_79 = arith.constant 0 : index
    %131 = vector.load %arg26[%c0_78, %c0_79] : memref<256x128xbf16, #tpu.memory_space<vmem>>, vector<256x128xbf16>
    %cst_80 = arith.constant dense<0.000000e+00> : vector<32x128xf32>
    %132 = tpu.matmul %130, %131, %cst_80 {dimension_numbers = #tpu.dot_dimension_numbers<[1], [0], [0], [1], [0, 0, 1, 1], [], []>} : vector<32x256xbf16>, vector<256x128xbf16>, vector<32x128xf32> -> vector<32x128xf32>
    %c0_81 = arith.constant 0 : index
    %c0_82 = arith.constant 0 : index
    %133 = vector.load %arg28[%c0_81, %c0_82] : memref<1x128xf32, #tpu.memory_space<vmem>>, vector<1x128xf32>
    %134 = vector.broadcast %133 : vector<1x128xf32> to vector<32x128xf32>
    %135 = arith.addf %132, %134 : vector<32x128xf32>
    %136 = arith.truncf %129 : vector<32x256xf32> to vector<32x256xbf16>
    %c0_83 = arith.constant 0 : index
    %c0_84 = arith.constant 0 : index
    %137 = vector.load %arg27[%c0_83, %c0_84] : memref<256x128xbf16, #tpu.memory_space<vmem>>, vector<256x128xbf16>
    %cst_85 = arith.constant dense<0.000000e+00> : vector<32x128xf32>
    %138 = tpu.matmul %136, %137, %cst_85 {dimension_numbers = #tpu.dot_dimension_numbers<[1], [0], [0], [1], [0, 0, 1, 1], [], []>} : vector<32x256xbf16>, vector<256x128xbf16>, vector<32x128xf32> -> vector<32x128xf32>
    %139 = arith.addf %135, %138 : vector<32x128xf32>
    %cst_86 = arith.constant 0.000000e+00 : f32
    %140 = vector.broadcast %cst_86 : f32 to vector<32x128xf32>
    %141 = arith.maximumf %139, %140 : vector<32x128xf32>
    %c0_87 = arith.constant 0 : index
    %c0_88 = arith.constant 0 : index
    %142 = vector.load %arg29[%c0_87, %c0_88] : memref<1x128xf32, #tpu.memory_space<vmem>>, vector<1x128xf32>
    %143 = vector.broadcast %142 : vector<1x128xf32> to vector<32x128xf32>
    %144 = arith.mulf %141, %143 : vector<32x128xf32>
    %cst_89 = arith.constant dense<0.000000e+00> : vector<32xf32>
    %145 = vector.multi_reduction <add>, %144, %cst_89 [1] : vector<32x128xf32> to vector<32xf32>
    %146 = vector.shape_cast %145 : vector<32xf32> to vector<32x1xf32>
    %c0_90 = arith.constant 0 : index
    %c0_91 = arith.constant 0 : index
    %147 = vector.load %arg30[%c0_90, %c0_91] : memref<1x1xf32, #tpu.memory_space<vmem>>, vector<1x1xf32>
    %148 = vector.broadcast %147 : vector<1x1xf32> to vector<32x1xf32>
    %149 = arith.addf %146, %148 : vector<32x1xf32>
    %150 = vector.shape_cast %149 : vector<32x1xf32> to vector<2x16x1xf32>
    %cst_92 = arith.constant dense<0xFF800000> : vector<2x1xf32>
    %151 = vector.multi_reduction <maximumf>, %150, %cst_92 [1] : vector<2x16x1xf32> to vector<2x1xf32>
    %152 = vector.shape_cast %151 : vector<2x1xf32> to vector<2x1x1xf32>
    %153 = vector.broadcast %152 : vector<2x1x1xf32> to vector<2x16x1xf32>
    %154 = arith.subf %150, %153 : vector<2x16x1xf32>
    %155 = math.exp %154 : vector<2x16x1xf32>
    %cst_93 = arith.constant dense<0.000000e+00> : vector<2x1xf32>
    %156 = vector.multi_reduction <add>, %155, %cst_93 [1] : vector<2x16x1xf32> to vector<2x1xf32>
    %157 = vector.shape_cast %156 : vector<2x1xf32> to vector<2x1x1xf32>
    %158 = vector.broadcast %157 : vector<2x1x1xf32> to vector<2x16x1xf32>
    %159 = arith.divf %155, %158 : vector<2x16x1xf32>
    %160 = vector.shape_cast %107 : vector<32x256xf32> to vector<2x16x256xf32>
    %161 = vector.broadcast %159 : vector<2x16x1xf32> to vector<2x16x256xf32>
    %162 = arith.mulf %160, %161 : vector<2x16x256xf32>
    %cst_94 = arith.constant dense<0.000000e+00> : vector<2x256xf32>
    %163 = vector.multi_reduction <add>, %162, %cst_94 [1] : vector<2x16x256xf32> to vector<2x256xf32>
    %164 = vector.shape_cast %129 : vector<32x256xf32> to vector<2x16x256xf32>
    %165 = vector.broadcast %159 : vector<2x16x1xf32> to vector<2x16x256xf32>
    %166 = arith.mulf %164, %165 : vector<2x16x256xf32>
    %cst_95 = arith.constant dense<0.000000e+00> : vector<2x256xf32>
    %167 = vector.multi_reduction <add>, %166, %cst_95 [1] : vector<2x16x256xf32> to vector<2x256xf32>
    %168 = arith.truncf %79 : vector<2x256xf32> to vector<2x256xbf16>
    %c0_96 = arith.constant 0 : index
    %c0_97 = arith.constant 0 : index
    %169 = vector.load %arg31[%c0_96, %c0_97] : memref<256x128xbf16, #tpu.memory_space<vmem>>, vector<256x128xbf16>
    %cst_98 = arith.constant dense<0.000000e+00> : vector<2x128xf32>
    %170 = tpu.matmul %168, %169, %cst_98 {dimension_numbers = #tpu.dot_dimension_numbers<[1], [0], [0], [1], [0, 0, 1, 1], [], []>} : vector<2x256xbf16>, vector<256x128xbf16>, vector<2x128xf32> -> vector<2x128xf32>
    %171 = arith.truncf %83 : vector<2x256xf32> to vector<2x256xbf16>
    %c0_99 = arith.constant 0 : index
    %c0_100 = arith.constant 0 : index
    %172 = vector.load %arg32[%c0_99, %c0_100] : memref<256x128xbf16, #tpu.memory_space<vmem>>, vector<256x128xbf16>
    %cst_101 = arith.constant dense<0.000000e+00> : vector<2x128xf32>
    %173 = tpu.matmul %171, %172, %cst_101 {dimension_numbers = #tpu.dot_dimension_numbers<[1], [0], [0], [1], [0, 0, 1, 1], [], []>} : vector<2x256xbf16>, vector<256x128xbf16>, vector<2x128xf32> -> vector<2x128xf32>
    %174 = arith.addf %170, %173 : vector<2x128xf32>
    %175 = arith.truncf %163 : vector<2x256xf32> to vector<2x256xbf16>
    %c0_102 = arith.constant 0 : index
    %c0_103 = arith.constant 0 : index
    %176 = vector.load %arg33[%c0_102, %c0_103] : memref<256x128xbf16, #tpu.memory_space<vmem>>, vector<256x128xbf16>
    %cst_104 = arith.constant dense<0.000000e+00> : vector<2x128xf32>
    %177 = tpu.matmul %175, %176, %cst_104 {dimension_numbers = #tpu.dot_dimension_numbers<[1], [0], [0], [1], [0, 0, 1, 1], [], []>} : vector<2x256xbf16>, vector<256x128xbf16>, vector<2x128xf32> -> vector<2x128xf32>
    %178 = arith.addf %174, %177 : vector<2x128xf32>
    %179 = arith.truncf %167 : vector<2x256xf32> to vector<2x256xbf16>
    %c0_105 = arith.constant 0 : index
    %c0_106 = arith.constant 0 : index
    %180 = vector.load %arg34[%c0_105, %c0_106] : memref<256x128xbf16, #tpu.memory_space<vmem>>, vector<256x128xbf16>
    %cst_107 = arith.constant dense<0.000000e+00> : vector<2x128xf32>
    %181 = tpu.matmul %179, %180, %cst_107 {dimension_numbers = #tpu.dot_dimension_numbers<[1], [0], [0], [1], [0, 0, 1, 1], [], []>} : vector<2x256xbf16>, vector<256x128xbf16>, vector<2x128xf32> -> vector<2x128xf32>
    %182 = arith.addf %178, %181 : vector<2x128xf32>
    %c0_108 = arith.constant 0 : index
    %c0_109 = arith.constant 0 : index
    %183 = vector.load %arg35[%c0_108, %c0_109] : memref<1x128xf32, #tpu.memory_space<vmem>>, vector<1x128xf32>
    %184 = vector.broadcast %183 : vector<1x128xf32> to vector<2x128xf32>
    %185 = arith.addf %182, %184 : vector<2x128xf32>
    %cst_110 = arith.constant 0.000000e+00 : f32
    %186 = vector.broadcast %cst_110 : f32 to vector<2x128xf32>
    %187 = arith.maximumf %185, %186 : vector<2x128xf32>
    %c0_111 = arith.constant 0 : index
    %c0_112 = arith.constant 0 : index
    %188 = vector.load %arg36[%c0_111, %c0_112] : memref<1x128xf32, #tpu.memory_space<vmem>>, vector<1x128xf32>
    %189 = vector.broadcast %188 : vector<1x128xf32> to vector<2x128xf32>
    %190 = arith.mulf %187, %189 : vector<2x128xf32>
    %cst_113 = arith.constant dense<0.000000e+00> : vector<2xf32>
    %191 = vector.multi_reduction <add>, %190, %cst_113 [1] : vector<2x128xf32> to vector<2xf32>
    %192 = vector.shape_cast %191 : vector<2xf32> to vector<2x1xf32>
    %c0_114 = arith.constant 0 : index
    %c0_115 = arith.constant 0 : index
    %193 = vector.load %arg37[%c0_114, %c0_115] : memref<1x1xf32, #tpu.memory_space<vmem>>, vector<1x1xf32>
    %194 = vector.broadcast %193 : vector<1x1xf32> to vector<2x1xf32>
    %195 = arith.addf %192, %194 : vector<2x1xf32>
    %cst_116 = arith.constant 0.000000e+00 : f32
    %196 = vector.broadcast %cst_116 : f32 to vector<2x1xf32>
    %197 = arith.subf %196, %195 : vector<2x1xf32>
    %198 = math.exp %197 : vector<2x1xf32>
    %cst_117 = arith.constant 1.000000e+00 : f32
    %199 = vector.broadcast %cst_117 : f32 to vector<2x1xf32>
    %200 = arith.addf %199, %198 : vector<2x1xf32>
    %cst_118 = arith.constant 1.000000e+00 : f32
    %201 = vector.broadcast %cst_118 : f32 to vector<2x1xf32>
    %202 = arith.divf %201, %200 : vector<2x1xf32>
    %c0_119 = arith.constant 0 : index
    %c0_120 = arith.constant 0 : index
    %203 = vector.load %arg38[%c0_119, %c0_120] : memref<2x1xf32, #tpu.memory_space<vmem>>, vector<2x1xf32>
    tpu.vector_store %arg38[%c0_119, %c0_120], %202 {strides = array<i32>} : memref<2x1xf32, #tpu.memory_space<vmem>>, vector<2x1xf32>,
    return
  }
  func.func @transform_0(%arg0: i32) -> (i32, i32) {
    %c0_i32 = arith.constant 0 : i32
    %c0_i32_0 = arith.constant 0 : i32
    %c0_i32_1 = arith.constant 0 : i32
    return %c0_i32, %c0_i32_0 : i32, i32
  }
  func.func @transform_1(%arg0: i32) -> (i32, i32) {
    %c0_i32 = arith.constant 0 : i32
    %c0_i32_0 = arith.constant 0 : i32
    %c0_i32_1 = arith.constant 0 : i32
    return %c0_i32, %c0_i32_0 : i32, i32
  }
  func.func @transform_2(%arg0: i32) -> (i32, i32) {
    %c0_i32 = arith.constant 0 : i32
    %c0_i32_0 = arith.constant 0 : i32
    %c0_i32_1 = arith.constant 0 : i32
    return %c0_i32, %c0_i32_0 : i32, i32
  }
  func.func @transform_3(%arg0: i32) -> (i32, i32) {
    %c0_i32 = arith.constant 0 : i32
    %c0_i32_0 = arith.constant 0 : i32
    %c0_i32_1 = arith.constant 0 : i32
    return %c0_i32, %c0_i32_0 : i32, i32
  }
  func.func @transform_4(%arg0: i32) -> (i32, i32) {
    %c0_i32 = arith.constant 0 : i32
    %c0_i32_0 = arith.constant 0 : i32
    %c0_i32_1 = arith.constant 0 : i32
    return %c0_i32, %c0_i32_0 : i32, i32
  }
  func.func @transform_5(%arg0: i32) -> (i32, i32) {
    %c0_i32 = arith.constant 0 : i32
    %c0_i32_0 = arith.constant 0 : i32
    %c0_i32_1 = arith.constant 0 : i32
    return %c0_i32, %c0_i32_0 : i32, i32
  }
  func.func @transform_6(%arg0: i32) -> (i32, i32) {
    %c0_i32 = arith.constant 0 : i32
    %c0_i32_0 = arith.constant 0 : i32
    %c0_i32_1 = arith.constant 0 : i32
    return %c0_i32, %c0_i32_0 : i32, i32
  }
  func.func @transform_7(%arg0: i32) -> (i32, i32) {
    %c0_i32 = arith.constant 0 : i32
    %c0_i32_0 = arith.constant 0 : i32
    %c0_i32_1 = arith.constant 0 : i32
    return %c0_i32, %c0_i32_0 : i32, i32
  }
  func.func @transform_8(%arg0: i32) -> (i32, i32) {
    %c0_i32 = arith.constant 0 : i32
    %c0_i32_0 = arith.constant 0 : i32
    %c0_i32_1 = arith.constant 0 : i32
    return %c0_i32, %c0_i32_0 : i32, i32
  }
  func.func @transform_9(%arg0: i32) -> (i32, i32) {
    %c0_i32 = arith.constant 0 : i32
    %c0_i32_0 = arith.constant 0 : i32
    %c0_i32_1 = arith.constant 0 : i32
    return %c0_i32, %c0_i32_0 : i32, i32
  }
  func.func @transform_10(%arg0: i32) -> (i32, i32) {
    %c0_i32 = arith.constant 0 : i32
    %c0_i32_0 = arith.constant 0 : i32
    %c0_i32_1 = arith.constant 0 : i32
    return %c0_i32, %c0_i32_0 : i32, i32
  }
  func.func @transform_11(%arg0: i32) -> (i32, i32) {
    %c0_i32 = arith.constant 0 : i32
    %c0_i32_0 = arith.constant 0 : i32
    %c0_i32_1 = arith.constant 0 : i32
    return %c0_i32, %c0_i32_0 : i32, i32
  }
  func.func @transform_12(%arg0: i32) -> (i32, i32) {
    %c0_i32 = arith.constant 0 : i32
    %c0_i32_0 = arith.constant 0 : i32
    %c0_i32_1 = arith.constant 0 : i32
    return %c0_i32, %c0_i32_0 : i32, i32
  }
  func.func @transform_13(%arg0: i32) -> (i32, i32) {
    %c0_i32 = arith.constant 0 : i32
    %c0_i32_0 = arith.constant 0 : i32
    %c0_i32_1 = arith.constant 0 : i32
    return %c0_i32, %c0_i32_0 : i32, i32
  }
  func.func @transform_14(%arg0: i32) -> (i32, i32) {
    %c0_i32 = arith.constant 0 : i32
    %c0_i32_0 = arith.constant 0 : i32
    %c0_i32_1 = arith.constant 0 : i32
    return %c0_i32, %c0_i32_0 : i32, i32
  }
  func.func @transform_15(%arg0: i32) -> (i32, i32) {
    %c0_i32 = arith.constant 0 : i32
    %c0_i32_0 = arith.constant 0 : i32
    %c0_i32_1 = arith.constant 0 : i32
    return %c0_i32, %c0_i32_0 : i32, i32
  }
  func.func @transform_16(%arg0: i32) -> (i32, i32) {
    %c0_i32 = arith.constant 0 : i32
    %c0_i32_0 = arith.constant 0 : i32
    %c0_i32_1 = arith.constant 0 : i32
    return %c0_i32, %c0_i32_0 : i32, i32
  }
  func.func @transform_18(%arg0: i32) -> (i32, i32) {
    %c0_i32 = arith.constant 0 : i32
    %c0_i32_0 = arith.constant 0 : i32
    %c0_i32_1 = arith.constant 0 : i32
    return %c0_i32, %c0_i32_0 : i32, i32
  }
  func.func @transform_20(%arg0: i32) -> (i32, i32) {
    %c0_i32 = arith.constant 0 : i32
    %c0_i32_0 = arith.constant 0 : i32
    %c0_i32_1 = arith.constant 0 : i32
    return %c0_i32, %c0_i32_0 : i32, i32
  }
  func.func @transform_21(%arg0: i32) -> (i32, i32) {
    %c0_i32 = arith.constant 0 : i32
    %c0_i32_0 = arith.constant 0 : i32
    %c0_i32_1 = arith.constant 0 : i32
    return %c0_i32, %c0_i32_0 : i32, i32
  }
  func.func @transform_22(%arg0: i32) -> (i32, i32) {
    %c0_i32 = arith.constant 0 : i32
    %c0_i32_0 = arith.constant 0 : i32
    %c0_i32_1 = arith.constant 0 : i32
    return %c0_i32, %c0_i32_0 : i32, i32
  }
  func.func @transform_23(%arg0: i32) -> (i32, i32) {
    %c0_i32 = arith.constant 0 : i32
    %c0_i32_0 = arith.constant 0 : i32
    %c0_i32_1 = arith.constant 0 : i32
    return %c0_i32, %c0_i32_0 : i32, i32
  }
  func.func @transform_24(%arg0: i32) -> (i32, i32) {
    %c0_i32 = arith.constant 0 : i32
    %c0_i32_0 = arith.constant 0 : i32
    %c0_i32_1 = arith.constant 0 : i32
    return %c0_i32, %c0_i32_0 : i32, i32
  }
  func.func @transform_25(%arg0: i32) -> (i32, i32) {
    %c0_i32 = arith.constant 0 : i32
    %c0_i32_0 = arith.constant 0 : i32
    %c0_i32_1 = arith.constant 0 : i32
    return %c0_i32, %c0_i32_0 : i32, i32
  }
  func.func @transform_26(%arg0: i32) -> (i32, i32) {
    %c0_i32 = arith.constant 0 : i32
    %c0_i32_0 = arith.constant 0 : i32
    %c0_i32_1 = arith.constant 0 : i32
    return %c0_i32, %c0_i32_0 : i32, i32
  }
  func.func @transform_27(%arg0: i32) -> (i32, i32) {
    %c0_i32 = arith.constant 0 : i32
    %c0_i32_0 = arith.constant 0 : i32
    %c0_i32_1 = arith.constant 0 : i32
    return %c0_i32, %c0_i32_0 : i32, i32
  }
  func.func @transform_28(%arg0: i32) -> (i32, i32) {
    %c0_i32 = arith.constant 0 : i32
    %c0_i32_0 = arith.constant 0 : i32
    %c0_i32_1 = arith.constant 0 : i32
    return %c0_i32, %c0_i32_0 : i32, i32
  }
  func.func @transform_29(%arg0: i32) -> (i32, i32) {
    %c0_i32 = arith.constant 0 : i32
    %c0_i32_0 = arith.constant 0 : i32
    %c0_i32_1 = arith.constant 0 : i32
    return %c0_i32, %c0_i32_0 : i32, i32
  }
  func.func @transform_30(%arg0: i32) -> (i32, i32) {
    %c0_i32 = arith.constant 0 : i32
    %c0_i32_0 = arith.constant 0 : i32
    %c0_i32_1 = arith.constant 0 : i32
    return %c0_i32, %c0_i32_0 : i32, i32
  }
  func.func @transform_31(%arg0: i32) -> (i32, i32) {
    %c0_i32 = arith.constant 0 : i32
    %c0_i32_0 = arith.constant 0 : i32
    %c0_i32_1 = arith.constant 0 : i32
    return %c0_i32, %c0_i32_0 : i32, i32
  }
  func.func @transform_32(%arg0: i32) -> (i32, i32) {
    %c0_i32 = arith.constant 0 : i32
    %c0_i32_0 = arith.constant 0 : i32
    %c0_i32_1 = arith.constant 0 : i32
    return %c0_i32, %c0_i32_0 : i32, i32
  }
  func.func @transform_33(%arg0: i32) -> (i32, i32) {
    %c0_i32 = arith.constant 0 : i32
    %c0_i32_0 = arith.constant 0 : i32
    %c0_i32_1 = arith.constant 0 : i32
    return %c0_i32, %c0_i32_0 : i32, i32
  }
  func.func @transform_34(%arg0: i32) -> (i32, i32) {
    %c0_i32 = arith.constant 0 : i32
    %c0_i32_0 = arith.constant 0 : i32
    %c0_i32_1 = arith.constant 0 : i32
    return %c0_i32, %c0_i32_0 : i32, i32
  }
  func.func @transform_35(%arg0: i32) -> (i32, i32) {
    %c0_i32 = arith.constant 0 : i32
    %c0_i32_0 = arith.constant 0 : i32
    %c0_i32_1 = arith.constant 0 : i32
    return %c0_i32, %c0_i32_0 : i32, i32
  }
  func.func @transform_36(%arg0: i32) -> (i32, i32) {
    %c0_i32 = arith.constant 0 : i32
    %c0_i32_0 = arith.constant 0 : i32
    %c0_i32_1 = arith.constant 0 : i32
    return %c0_i32, %c0_i32_0 : i32, i32
  }
  func.func @transform_37(%arg0: i32) -> (i32, i32) {
    %c0_i32 = arith.constant 0 : i32
    %c0_i32_0 = arith.constant 0 : i32
    %c0_i32_1 = arith.constant 0 : i32
    return %c0_i32, %c0_i32_0 : i32, i32
  }
}

</mosaic_0001>

<bundles_post_ra>
// kernel: action_net_forward.1
= control target key start
LH: loop header
LB: loop body
LE: loop exit
PB: predicated region body
PF: predicated region fallthrough
CT: control target
= control target key end

     0   :  { %s12742_s6 = smov 1   ;;  %s12743_s10 = smov 2   ;;  %s13925_s0 = inlined_call_operand.smem [shape: u32[38], index: -1, kind: input, shape index: {}] }
   0x1   :  { %s12834_s5 = sld [smem:[%s13925_s0]]   ;;  %s12744_s14 = smov 3  }
   0x2   :  { %s12839_s9 = sld [smem:[%s13925_s0 + %s12742_s6]]   ;;  %s12745_s18 = smov 4  }
   0x3   :  { %s12844_s13 = sld [smem:[%s13925_s0 + %s12743_s10]]   ;;  %s12746_s22 = smov 5  }
   0x4   :  { %s12849_s17 = sld [smem:[%s13925_s0 + %s12744_s14]]   ;;  %s12747_s26 = smov 6  }
   0x5   :  { %s12854_s21 = sld [smem:[%s13925_s0 + %s12745_s18]]   ;;  %s12748_s30 = smov 7  }
   0x6   :  { %s12859_s25 = sld [smem:[%s13925_s0 + %s12746_s22]]   ;;  %s12749_s4 = smov 8  }
   0x7   :  { %13946 = sst [smem:[#allocation76_spill]] %s12834_s5  ;;  %s12750_s10 = smov 9  }
   0x8   :  { %13947 = sst [smem:[#allocation77_spill]] %s12839_s9  ;;  %s12751_s15 = smov 10  }
   0x9   :  { %13948 = sst [smem:[#allocation78_spill]] %s12844_s13  ;;  %s12752_s20 = smov 11  }
   0xa   :  { %s12864_s29 = sld [smem:[%s13925_s0 + %s12747_s26]]   ;;  %s12753_s26 = smov 12  }
   0xb   :  { %13949 = sst [smem:[#allocation79_spill]] %s12854_s21  ;;  %s12754_s1 = smov 13  }
   0xc   :  { %s12869_s3 = sld [smem:[%s13925_s0 + %s12748_s30]]   ;;  %s12755_s7 = smov 14  }
   0xd   :  { %s12874_s8 = sld [smem:[%s13925_s0 + %s12749_s4]]   ;;  %s12757_s22 = smov 16  }
   0xe   :  { %s12879_s14 = sld [smem:[%s13925_s0 + %s12750_s10]]   ;;  %s12758_s28 = smov 17  }
   0xf   :  { %s12884_s19 = sld [smem:[%s13925_s0 + %s12751_s15]]   ;;  %s12756_s15 = smov 15  }
  0x10   :  { %13950 = sst [smem:[#allocation80_spill]] %s12864_s29  ;;  %s12759_s10 = smov 18  }
  0x11   :  { %s12889_s24 = sld [smem:[%s13925_s0 + %s12752_s20]]   ;;  %s12760_s16 = smov 19  }
  0x12   :  { %s12894_s30 = sld [smem:[%s13925_s0 + %s12753_s26]]   ;;  %s12761_s23 = smov 20  }
  0x13   :  { %13951 = sst [smem:[#allocation81_spill]] %s12874_s8 }
  0x14   :  { %s12899_s6 = sld [smem:[%s13925_s0 + %s12754_s1]]   ;;  %s12766_s1 = smov 25  }
  0x15   :  { %13952 = sst [smem:[#allocation82_spill]] %s12884_s19 }
  0x16   :  { %s12904_s12 = sld [smem:[%s13925_s0 + %s12755_s7]]  }
  0x17   :  { %s12909_s20 = sld [smem:[%s13925_s0 + %s12756_s15]]  }
  0x18   :  { %13953 = sst [smem:[#allocation83_spill]] %s12894_s30 }
  0x19   :  { %s9936_s27 = sld [smem:[%s13925_s0 + %s12757_s22]]  }
  0x1a   :  { %s12917_s4 = sld [smem:[%s13925_s0 + %s12758_s28]]   ;;  %s12762_s28 = smov 21  }
  0x1b   :  { %s12922_s9 = sld [smem:[%s13925_s0 + %s12759_s10]]   ;;  %s12763_s10 = smov 22  }
  0x1c   :  { %13954 = sst [smem:[#allocation84_spill]] %s12904_s12 }
  0x1d   :  { %s12927_s5 = sld [smem:[%s13925_s0 + %s12760_s16]]   ;;  %s12764_s16 = smov 23  }
  0x1e   :  { %s12932_s12 = sld [smem:[%s13925_s0 + %s12761_s23]]   ;;  %s12765_s23 = smov 24  }
  0x1f   :  { %v80_v0 = vstv %s9936_s27  ;;  %s12947_s22 = sld [smem:[%s13925_s0 + %s12764_s16]]   ;;  %s12767_s27 = smov 26  }
  0x20   :  { %13955 = sst [smem:[#allocation85_spill]] %s12917_s4  ;;  %81 = vst [vmem:[#allocation5] sm:$0x1] %v80_v0  ;;  %s12768_s16 = smov 27  }
  0x21   :  { %13956 = sst [smem:[#allocation86_spill]] %s12922_s9 }
  0x22   :  { %s12937_s4 = sld [smem:[%s13925_s0 + %s12762_s28]]  }
  0x23   :  { %13957 = sst [smem:[#allocation87_spill]] %s12927_s5  ;;  %s12769_s5 = smov 28  }
  0x24   :  { %s12942_s9 = sld [smem:[%s13925_s0 + %s12763_s10]]  }
  0x25   :  { %13959 = sst [smem:[#allocation89_spill]] %s12947_s22  ;;  %s12772_s22 = smov 32  }
  0x26   :  { %s12952_s28 = sld [smem:[%s13925_s0 + %s12765_s23]]  }
  0x27   :  { %s12957_s10 = sld [smem:[%s13925_s0 + %s12766_s1]]   ;;  %s12778_s1 = smov 36  }
  0x28   :  { %13958 = sst [smem:[#allocation88_spill]] %s12937_s4  ;;  %s12770_s4 = smov 30  }
  0x29   :  { %s12962_s15 = sld [smem:[%s13925_s0 + %s12767_s27]]   ;;  %s12771_s27 = smov 31  }
  0x2a   :  { %s12967_s30 = sld [smem:[%s13925_s0 + %s12768_s16]]  }
  0x2b   :  { %s12972_s19 = sld [smem:[%s13925_s0 + %s12769_s5]]   ;;  %s12773_s5 = smov 33  }
  0x2c   :  { %s12982_s8 = sld [smem:[%s13925_s0 + %s12771_s27]]   ;;  %s12775_s27 = smov 35  }
  0x2d   :  { %13960 = sst [smem:[#allocation90_spill]] %s12957_s10 }
  0x2e   :  { %s12977_s10 = sld [smem:[%s13925_s0 + %s12770_s4]]   ;;  %s12774_s4 = smov 34  }
  0x2f   :  { %s12992_s29 = sld [smem:[%s13925_s0 + %s12773_s5]]   ;;  %s12777_s5 = smov 29  }
  0x30   :  { %13961 = sst [smem:[#allocation91_spill]] %s12967_s30 }
  0x31   :  { %s12987_s30 = sld [smem:[%s13925_s0 + %s12772_s22]]   ;;  %s12776_s22 = smov 37  }
  0x32   :  { %s13002_s21 = sld [smem:[%s13925_s0 + %s12775_s27]]  }
  0x33   :  { %s9949_s13 = sld [smem:[%s13925_s0 + %s12777_s5]]  }
  0x34   :  { %13962 = sst [smem:[#allocation92_spill]] %s12977_s10 }
  0x35   :  { %s12997_s10 = sld [smem:[%s13925_s0 + %s12774_s4]]  }
  0x37   :  { %13963 = sst [smem:[#allocation93_spill]] %s12987_s30 }
  0x38   :  { %s13007_s30 = sld [smem:[%s13925_s0 + %s12776_s22]]  }
  0x39   :  { %v82_v1 = vstv %s9949_s13 }
  0x3a   :  { %83 = vst [vmem:[#allocation6] sm:$0x1] %v82_v1 }
  0x3b   :  { %13964 = sst [smem:[#allocation94_spill]] %s12997_s10 }
  0x3c   :  { %s9956_s10 = sld [smem:[%s13925_s0 + %s12778_s1]]  }
  0x42   :  { %v84_v2 = vstv %s9956_s10 }
  0x43   :  { %85 = vst [vmem:[#allocation7] sm:$0x1] %v84_v2 }
  0x44   :  { %86 = vsyncpa [#allocation9], 0 }
  0x45   :  { %87 = vsyncpa [#allocation11], 0 }
  0x46   :  { %88 = vsyncpa [#allocation14], 0 }
  0x47   :  { %89 = vsyncpa [#allocation17], 0 }
  0x48   :  { %90 = vsyncpa [#allocation20], 0 }
  0x49   :  { %91 = vsyncpa [#allocation23], 0 }
  0x4a   :  { %92 = vsyncpa [#allocation26], 0 }
  0x4b   :  { %93 = vsyncpa [#allocation29], 0 }
  0x4c   :  { %94 = vsyncpa [#allocation32], 0 }
  0x4d   :  { %95 = vsyncpa [#allocation35], 0 }
  0x4e   :  { %96 = vsyncpa [#allocation38], 0 }
  0x4f   :  { %97 = vsyncpa [#allocation41], 0 }
  0x50   :  { %98 = vsyncpa [#allocation44], 0 }
  0x51   :  { %99 = vsyncpa [#allocation47], 0 }
  0x52   :  { %100 = vsyncpa [#allocation50], 0 }
  0x53   :  { %101 = vsyncpa [#allocation53], 0  ;;  %s12779_s0 = smov [#allocation10]   ;;  %s12046_s10 = scalar_lea.hbm %s12849_s17, 256 }
  0x54   :  { %s121_s13 = sshll.u32 %s12779_s0, 4  ;;  %p12047_p0 = scmp.ne.s32.totalorder %s12849_s17, %s12046_s10  ;;  %s122_s13 = int_to_ptr.vmem [resolvable:$true] %s121_s13 }
  0x55   :  { %p12050_p1 = scmp.lt.u32.totalorder %s12046_s10, %s12849_s17 }
  0x57   :  { %p12052_p2 = pnand %p12050_p1, %p12047_p0 }
  0x59   :  { %12055 = shalt.err (!%p12052_p2)
}
  0x5a   :  { %s12056_s27 = scalar_lea.vmem %s122_s13, 256  ;;  %p12061_p4 = scmp.lt.s32.totalorder %s122_s13, %s122_s13 }
  0x5b   :  { %p12057_p3 = scmp.ne.s32.totalorder %s122_s13, %s12056_s27  ;;  %p12062_p5 = scmp.lt.s32.totalorder %s12056_s27, %s12056_s27 }
  0x5d   :  { %p12063_p6 = por %p12062_p5, %p12061_p4 }
  0x5f   :  { %p12064_p7 = pnand %p12063_p6, %p12057_p3 }
  0x61   :  { %12067 = shalt.err (!%p12064_p7)
}
  0x62   :  { %s12780_s7 = smov 128   ;;  %s12781_s11 = smov 8  }
  0x63   :  { %127 = dma.hbm_to_vmem [thread:$0]  %s12849_s17, 256, %s122_s13, [#allocation11], %s12780_s7, %s12780_s7, %s12781_s11  }
  0x64   :  { %s12782_s22 = smov [#allocation13]   ;;  %s12783_s18 = smov [#allocation16]  }
  0x65   :  { %s146_s16 = sshll.u32 %s12782_s22, 4  ;;  %s168_s5 = sshll.u32 %s12783_s18, 4  ;;  %s147_s16 = int_to_ptr.vmem [resolvable:$true] %s146_s16  ;;  %s169_s5 = int_to_ptr.vmem [resolvable:$true] %s168_s5 }
  0x66   :  { %s12068_s23 = scalar_lea.hbm %s12859_s25, 64 }
  0x67   :  { %p12069_p8 = scmp.ne.s32.totalorder %s12859_s25, %s12068_s23  ;;  %p12072_p9 = scmp.lt.u32.totalorder %s12068_s23, %s12859_s25 }
  0x69   :  { %p12074_p10 = pnand %p12072_p9, %p12069_p8 }
  0x6b   :  { %12077 = shalt.err (!%p12074_p10)
}
  0x6c   :  { %s12078_s26 = scalar_lea.vmem %s147_s16, 64  ;;  %p12083_p12 = scmp.lt.s32.totalorder %s147_s16, %s147_s16 }
  0x6d   :  { %p12079_p11 = scmp.ne.s32.totalorder %s147_s16, %s12078_s26  ;;  %p12084_p13 = scmp.lt.s32.totalorder %s12078_s26, %s12078_s26 }
  0x6f   :  { %p12085_p0 = por %p12084_p13, %p12083_p12 }
  0x71   :  { %p12086_p1 = pnand %p12085_p0, %p12079_p11 }
  0x73   :  { %12089 = shalt.err (!%p12086_p1)
}
  0x74   :  { %149 = dma.hbm_to_vmem [thread:$0]  %s12859_s25, 64, %s147_s16, [#allocation14]  }
  0x75   :  { %s12090_s17 = scalar_lea.hbm %s12869_s3, 32 }
  0x76   :  { %p12091_p2 = scmp.ne.s32.totalorder %s12869_s3, %s12090_s17  ;;  %p12094_p3 = scmp.lt.u32.totalorder %s12090_s17, %s12869_s3 }
  0x78   :  { %p12096_p4 = pnand %p12094_p3, %p12091_p2 }
  0x7a   :  { %12099 = shalt.err (!%p12096_p4)
}
  0x7b   :  { %s12100_s1 = scalar_lea.vmem %s169_s5, 32  ;;  %p12105_p6 = scmp.lt.s32.totalorder %s169_s5, %s169_s5 }
  0x7c   :  { %p12101_p5 = scmp.ne.s32.totalorder %s169_s5, %s12100_s1  ;;  %p12106_p7 = scmp.lt.s32.totalorder %s12100_s1, %s12100_s1 }
  0x7e   :  { %p12107_p8 = por %p12106_p7, %p12105_p6 }
  0x80   :  { %p12108_p9 = pnand %p12107_p8, %p12101_p5 }
  0x82   :  { %12111 = shalt.err (!%p12108_p9)
}
  0x83   :  { %171 = dma.hbm_to_vmem [thread:$0]  %s12869_s3, 32, %s169_s5, [#allocation17]  }
  0x84   :  { %s12784_s4 = smov [#allocation19]   ;;  %s12785_s2 = smov [#allocation22]  }
  0x85   :  { %s190_s25 = sshll.u32 %s12784_s4, 4  ;;  %s212_s0 = sshll.u32 %s12785_s2, 4  ;;  %s191_s25 = int_to_ptr.vmem [resolvable:$true] %s190_s25  ;;  %s213_s0 = int_to_ptr.vmem [resolvable:$true] %s212_s0 }
  0x86   :  { %s12112_s13 = scalar_lea.hbm %s12879_s14, 32 }
  0x87   :  { %p12113_p10 = scmp.ne.s32.totalorder %s12879_s14, %s12112_s13  ;;  %p12116_p11 = scmp.lt.u32.totalorder %s12112_s13, %s12879_s14 }
  0x89   :  { %p12118_p12 = pnand %p12116_p11, %p12113_p10 }
  0x8b   :  { %12121 = shalt.err (!%p12118_p12)
}
  0x8c   :  { %s12122_s10 = scalar_lea.vmem %s191_s25, 32  ;;  %p12127_p0 = scmp.lt.s32.totalorder %s191_s25, %s191_s25 }
  0x8d   :  { %p12123_p13 = scmp.ne.s32.totalorder %s191_s25, %s12122_s10  ;;  %p12128_p1 = scmp.lt.s32.totalorder %s12122_s10, %s12122_s10 }
  0x8f   :  { %p12129_p2 = por %p12128_p1, %p12127_p0 }
  0x91   :  { %p12130_p3 = pnand %p12129_p2, %p12123_p13 }
  0x93   :  { %12133 = shalt.err (!%p12130_p3)
}
  0x94   :  { %193 = dma.hbm_to_vmem [thread:$0]  %s12879_s14, 32, %s191_s25, [#allocation20]  }
  0x95   :  { %s12134_s3 = scalar_lea.hbm %s12889_s24, 32 }
  0x96   :  { %p12135_p4 = scmp.ne.s32.totalorder %s12889_s24, %s12134_s3  ;;  %p12138_p5 = scmp.lt.u32.totalorder %s12134_s3, %s12889_s24 }
  0x98   :  { %p12140_p6 = pnand %p12138_p5, %p12135_p4 }
  0x9a   :  { %12143 = shalt.err (!%p12140_p6)
}
  0x9b   :  { %s12144_s27 = scalar_lea.vmem %s213_s0, 32  ;;  %p12149_p8 = scmp.lt.s32.totalorder %s213_s0, %s213_s0 }
  0x9c   :  { %p12145_p7 = scmp.ne.s32.totalorder %s213_s0, %s12144_s27  ;;  %p12150_p9 = scmp.lt.s32.totalorder %s12144_s27, %s12144_s27 }
  0x9e   :  { %p12151_p10 = por %p12150_p9, %p12149_p8 }
  0xa0   :  { %p12152_p11 = pnand %p12151_p10, %p12145_p7 }
  0xa2   :  { %12155 = shalt.err (!%p12152_p11)
}
  0xa3   :  { %215 = dma.hbm_to_vmem [thread:$0]  %s12889_s24, 32, %s213_s0, [#allocation23]  }
  0xa4   :  { %s12786_s22 = smov [#allocation25]   ;;  %s12787_s16 = smov [#allocation28]  }
  0xa5   :  { %s233_s14 = sshll.u32 %s12786_s22, 4  ;;  %s256_s18 = sshll.u32 %s12787_s16, 4  ;;  %s234_s14 = int_to_ptr.vmem [resolvable:$true] %s233_s14  ;;  %s257_s18 = int_to_ptr.vmem [resolvable:$true] %s256_s18 }
  0xa6   :  { %s12156_s5 = scalar_lea.hbm %s12899_s6, 2048 }
  0xa7   :  { %p12157_p12 = scmp.ne.s32.totalorder %s12899_s6, %s12156_s5  ;;  %p12160_p13 = scmp.lt.u32.totalorder %s12156_s5, %s12899_s6 }
  0xa9   :  { %p12162_p0 = pnand %p12160_p13, %p12157_p12 }
  0xab   :  { %12165 = shalt.err (!%p12162_p0)
}
  0xac   :  { %s12166_s23 = scalar_lea.vmem %s234_s14, 2048  ;;  %p12171_p2 = scmp.lt.s32.totalorder %s234_s14, %s234_s14 }
  0xad   :  { %p12167_p1 = scmp.ne.s32.totalorder %s234_s14, %s12166_s23  ;;  %p12172_p3 = scmp.lt.s32.totalorder %s12166_s23, %s12166_s23 }
  0xaf   :  { %p12173_p4 = por %p12172_p3, %p12171_p2 }
  0xb1   :  { %p12174_p5 = pnand %p12173_p4, %p12167_p1 }
  0xb3   :  { %12177 = shalt.err (!%p12174_p5)
}
  0xb4   :  { %s12788_s26 = smov 64   ;;  %s12789_s24 = smov 4  }
  0xb5   :  { %239 = dma.hbm_to_vmem [thread:$0]  %s12899_s6, 2048, %s234_s14, [#allocation26], %s12788_s26, %s12788_s26, %s12789_s24  }
  0xb6   :  { %s12178_s17 = scalar_lea.hbm %s12909_s20, 16 }
  0xb7   :  { %p12179_p6 = scmp.ne.s32.totalorder %s12909_s20, %s12178_s17  ;;  %p12182_p7 = scmp.lt.u32.totalorder %s12178_s17, %s12909_s20 }
  0xb9   :  { %p12184_p8 = pnand %p12182_p7, %p12179_p6 }
  0xbb   :  { %12187 = shalt.err (!%p12184_p8)
}
  0xbc   :  { %s12188_s1 = scalar_lea.vmem %s257_s18, 16  ;;  %s12192_s4 = scalar_lea.vmem %s257_s18, 32 }
  0xbd   :  { %p12189_p9 = scmp.ne.s32.totalorder %s257_s18, %s12188_s1  ;;  %p12193_p10 = scmp.lt.s32.totalorder %s257_s18, %s257_s18 }
  0xbe   :  { %p12194_p11 = scmp.lt.s32.totalorder %s12192_s4, %s12188_s1 }
  0xc0   :  { %p12195_p12 = por %p12194_p11, %p12193_p10 }
  0xc2   :  { %p12196_p13 = pnand %p12195_p12, %p12189_p9 }
  0xc4   :  { %12199 = shalt.err (!%p12196_p13)
}
  0xc5   :  { %259 = dma.hbm_to_vmem [thread:$0]  %s12909_s20, 16, %s257_s18, [#allocation29]  }
  0xc6   :  { %s12790_s6 = smov [#allocation31]   ;;  %s12791_s2 = smov [#allocation34]  }
  0xc7   :  { %s278_s25 = sshll.u32 %s12790_s6, 4  ;;  %s300_s0 = sshll.u32 %s12791_s2, 4  ;;  %s279_s25 = int_to_ptr.vmem [resolvable:$true] %s278_s25  ;;  %s301_s0 = int_to_ptr.vmem [resolvable:$true] %s300_s0 }
  0xc8   :  { %s12200_s13 = scalar_lea.hbm %s12932_s12, 32 }
  0xc9   :  { %p12201_p0 = scmp.ne.s32.totalorder %s12932_s12, %s12200_s13  ;;  %p12204_p1 = scmp.lt.u32.totalorder %s12200_s13, %s12932_s12 }
  0xcb   :  { %p12206_p2 = pnand %p12204_p1, %p12201_p0 }
  0xcd   :  { %12209 = shalt.err (!%p12206_p2)
}
  0xce   :  { %s12210_s10 = scalar_lea.vmem %s279_s25, 32  ;;  %p12215_p4 = scmp.lt.s32.totalorder %s279_s25, %s279_s25 }
  0xcf   :  { %p12211_p3 = scmp.ne.s32.totalorder %s279_s25, %s12210_s10  ;;  %p12216_p5 = scmp.lt.s32.totalorder %s12210_s10, %s12210_s10 }
  0xd1   :  { %p12217_p6 = por %p12216_p5, %p12215_p4 }
  0xd3   :  { %p12218_p7 = pnand %p12217_p6, %p12211_p3 }
  0xd5   :  { %12221 = shalt.err (!%p12218_p7)
}
  0xd6   :  { %281 = dma.hbm_to_vmem [thread:$0]  %s12932_s12, 32, %s279_s25, [#allocation32]  }
  0xd7   :  { %s12222_s20 = scalar_lea.hbm %s12942_s9, 32 }
  0xd8   :  { %p12223_p8 = scmp.ne.s32.totalorder %s12942_s9, %s12222_s20  ;;  %p12226_p9 = scmp.lt.u32.totalorder %s12222_s20, %s12942_s9 }
  0xda   :  { %p12228_p10 = pnand %p12226_p9, %p12223_p8 }
  0xdc   :  { %12231 = shalt.err (!%p12228_p10)
}
  0xdd   :  { %s12232_s3 = scalar_lea.vmem %s301_s0, 32  ;;  %p12237_p12 = scmp.lt.s32.totalorder %s301_s0, %s301_s0 }
  0xde   :  { %p12233_p11 = scmp.ne.s32.totalorder %s301_s0, %s12232_s3  ;;  %p12238_p13 = scmp.lt.s32.totalorder %s12232_s3, %s12232_s3 }
  0xe0   :  { %p12239_p0 = por %p12238_p13, %p12237_p12 }
  0xe2   :  { %p12240_p1 = pnand %p12239_p0, %p12233_p11 }
  0xe4   :  { %12243 = shalt.err (!%p12240_p1)
}
  0xe5   :  { %303 = dma.hbm_to_vmem [thread:$0]  %s12942_s9, 32, %s301_s0, [#allocation35]  }
  0xe6   :  { %s12792_s27 = smov [#allocation37]   ;;  %s12793_s22 = smov [#allocation40]  }
  0xe7   :  { %s322_s12 = sshll.u32 %s12792_s27, 4  ;;  %s343_s14 = sshll.u32 %s12793_s22, 4  ;;  %s323_s12 = int_to_ptr.vmem [resolvable:$true] %s322_s12  ;;  %s344_s14 = int_to_ptr.vmem [resolvable:$true] %s343_s14 }
  0xe8   :  { %s12244_s16 = scalar_lea.hbm %s12952_s28, 32 }
  0xe9   :  { %p12245_p2 = scmp.ne.s32.totalorder %s12952_s28, %s12244_s16  ;;  %p12248_p3 = scmp.lt.u32.totalorder %s12244_s16, %s12952_s28 }
  0xeb   :  { %p12250_p4 = pnand %p12248_p3, %p12245_p2 }
  0xed   :  { %12253 = shalt.err (!%p12250_p4)
}
  0xee   :  { %s12254_s18 = scalar_lea.vmem %s323_s12, 32  ;;  %p12259_p6 = scmp.lt.s32.totalorder %s323_s12, %s323_s12 }
  0xef   :  { %p12255_p5 = scmp.ne.s32.totalorder %s323_s12, %s12254_s18  ;;  %p12260_p7 = scmp.lt.s32.totalorder %s12254_s18, %s12254_s18 }
  0xf1   :  { %p12261_p8 = por %p12260_p7, %p12259_p6 }
  0xf3   :  { %p12262_p9 = pnand %p12261_p8, %p12255_p5 }
  0xf5   :  { %12265 = shalt.err (!%p12262_p9)
}
  0xf6   :  { %325 = dma.hbm_to_vmem [thread:$0]  %s12952_s28, 32, %s323_s12, [#allocation38]  }
  0xf7   :  { %s12266_s9 = scalar_lea.hbm %s12962_s15, 2048 }
  0xf8   :  { %p12267_p10 = scmp.ne.s32.totalorder %s12962_s15, %s12266_s9  ;;  %p12270_p11 = scmp.lt.u32.totalorder %s12266_s9, %s12962_s15 }
  0xfa   :  { %p12272_p12 = pnand %p12270_p11, %p12267_p10 }
  0xfc   :  { %12275 = shalt.err (!%p12272_p12)
}
  0xfd   :  { %s12276_s5 = scalar_lea.vmem %s344_s14, 2048  ;;  %p12281_p0 = scmp.lt.s32.totalorder %s344_s14, %s344_s14 }
  0xfe   :  { %p12277_p13 = scmp.ne.s32.totalorder %s344_s14, %s12276_s5  ;;  %p12282_p1 = scmp.lt.s32.totalorder %s12276_s5, %s12276_s5 }
 0x100   :  { %p12283_p2 = por %p12282_p1, %p12281_p0 }
 0x102   :  { %p12284_p3 = pnand %p12283_p2, %p12277_p13 }
 0x104   :  { %12287 = shalt.err (!%p12284_p3)
}
 0x105   :  { %349 = dma.hbm_to_vmem [thread:$0]  %s12962_s15, 2048, %s344_s14, [#allocation41], %s12788_s26, %s12788_s26, %s12789_s24  }
 0x106   :  { %s12794_s28 = smov [#allocation43]   ;;  %s12795_s17 = smov [#allocation46]  }
 0x107   :  { %s366_s23 = sshll.u32 %s12794_s28, 4  ;;  %s389_s1 = sshll.u32 %s12795_s17, 4  ;;  %s367_s23 = int_to_ptr.vmem [resolvable:$true] %s366_s23  ;;  %s390_s1 = int_to_ptr.vmem [resolvable:$true] %s389_s1 }
 0x108   :  { %s12288_s4 = scalar_lea.hbm %s12972_s19, 16 }
 0x109   :  { %p12289_p4 = scmp.ne.s32.totalorder %s12972_s19, %s12288_s4  ;;  %p12292_p5 = scmp.lt.u32.totalorder %s12288_s4, %s12972_s19 }
 0x10b   :  { %p12294_p6 = pnand %p12292_p5, %p12289_p4 }
 0x10d   :  { %12297 = shalt.err (!%p12294_p6)
}
 0x10e   :  { %s12298_s6 = scalar_lea.vmem %s367_s23, 16  ;;  %s12302_s25 = scalar_lea.vmem %s367_s23, 32 }
 0x10f   :  { %p12299_p7 = scmp.ne.s32.totalorder %s367_s23, %s12298_s6  ;;  %p12303_p8 = scmp.lt.s32.totalorder %s367_s23, %s367_s23 }
 0x110   :  { %p12304_p9 = scmp.lt.s32.totalorder %s12302_s25, %s12298_s6 }
 0x112   :  { %p12305_p10 = por %p12304_p9, %p12303_p8 }
 0x114   :  { %p12306_p11 = pnand %p12305_p10, %p12299_p7 }
 0x116   :  { %12309 = shalt.err (!%p12306_p11)
}
 0x117   :  { %369 = dma.hbm_to_vmem [thread:$0]  %s12972_s19, 16, %s367_s23, [#allocation44]  }
 0x118   :  { %s12310_s15 = scalar_lea.hbm %s12982_s8, 2048 }
 0x119   :  { %p12311_p12 = scmp.ne.s32.totalorder %s12982_s8, %s12310_s15  ;;  %p12314_p13 = scmp.lt.u32.totalorder %s12310_s15, %s12982_s8 }
 0x11b   :  { %p12316_p0 = pnand %p12314_p13, %p12311_p12 }
 0x11d   :  { %12319 = shalt.err (!%p12316_p0)
}
 0x11e   :  { %s12320_s2 = scalar_lea.vmem %s390_s1, 2048  ;;  %p12325_p2 = scmp.lt.s32.totalorder %s390_s1, %s390_s1 }
 0x11f   :  { %p12321_p1 = scmp.ne.s32.totalorder %s390_s1, %s12320_s2  ;;  %p12326_p3 = scmp.lt.s32.totalorder %s12320_s2, %s12320_s2 }
 0x121   :  { %p12327_p4 = por %p12326_p3, %p12325_p2 }
 0x123   :  { %p12328_p5 = pnand %p12327_p4, %p12321_p1 }
 0x125   :  { %12331 = shalt.err (!%p12328_p5)
}
 0x126   :  { %395 = dma.hbm_to_vmem [thread:$0]  %s12982_s8, 2048, %s390_s1, [#allocation47], %s12788_s26, %s12788_s26, %s12789_s24  }
 0x127   :  { %s12796_s19 = smov [#allocation49]   ;;  %s12797_s13 = smov [#allocation8]  }
 0x128   :  { %s413_s0 = sshll.u32 %s12796_s19, 4  ;;  %s112_s10 = sshll.u32 %s12797_s13, 4  ;;  %s414_s0 = int_to_ptr.vmem [resolvable:$true] %s413_s0  ;;  %s113_s10 = int_to_ptr.vmem [resolvable:$true] %s112_s10 }
 0x129   :  { %s12332_s20 = scalar_lea.hbm %s12992_s29, 2048 }
 0x12a   :  { %p12333_p6 = scmp.ne.s32.totalorder %s12992_s29, %s12332_s20  ;;  %p12336_p7 = scmp.lt.u32.totalorder %s12332_s20, %s12992_s29 }
 0x12c   :  { %p12338_p8 = pnand %p12336_p7, %p12333_p6 }
 0x12e   :  { %12341 = shalt.err (!%p12338_p8)
}
 0x12f   :  { %s12342_s3 = scalar_lea.vmem %s414_s0, 2048  ;;  %p12347_p10 = scmp.lt.s32.totalorder %s414_s0, %s414_s0 }
 0x130   :  { %p12343_p9 = scmp.ne.s32.totalorder %s414_s0, %s12342_s3  ;;  %p12348_p11 = scmp.lt.s32.totalorder %s12342_s3, %s12342_s3 }
 0x132   :  { %p12349_p12 = por %p12348_p11, %p12347_p10 }
 0x134   :  { %p12350_p13 = pnand %p12349_p12, %p12343_p9 }
 0x136   :  { %12353 = shalt.err (!%p12350_p13)
}
 0x137   :  { %s13965_s8 = sld [smem:[#allocation78_spill]] }
 0x138   :  { %419 = dma.hbm_to_vmem [thread:$0]  %s12992_s29, 2048, %s414_s0, [#allocation50], %s12788_s26, %s12788_s26, %s12789_s24  }
 0x13d   :  { %s12354_s27 = scalar_lea.hbm %s13965_s8, 128 }
 0x13e   :  { %p12355_p0 = scmp.ne.s32.totalorder %s13965_s8, %s12354_s27  ;;  %p12358_p1 = scmp.lt.u32.totalorder %s12354_s27, %s13965_s8 }
 0x140   :  { %p12360_p2 = pnand %p12358_p1, %p12355_p0 }
 0x142   :  { %12363 = shalt.err (!%p12360_p2)
}
 0x143   :  { %s12364_s12 = scalar_lea.vmem %s113_s10, 128  ;;  %p12369_p4 = scmp.lt.s32.totalorder %s113_s10, %s113_s10 }
 0x144   :  { %p12365_p3 = scmp.ne.s32.totalorder %s113_s10, %s12364_s12  ;;  %p12370_p5 = scmp.lt.s32.totalorder %s12364_s12, %s12364_s12 }
 0x146   :  { %p12371_p6 = por %p12370_p5, %p12369_p4 }
 0x148   :  { %p12372_p7 = pnand %p12371_p6, %p12365_p3 }
 0x14a   :  { %12375 = shalt.err (!%p12372_p7)
}
 0x14b   :  { %s13966_s22 = sld [smem:[#allocation79_spill]]  ;;  %s12798_s14 = smov [#allocation12]  }
 0x14c   :  { %115 = dma.hbm_to_vmem [thread:$0]  %s13965_s8, 128, %s113_s10, [#allocation9]  }
 0x14d   :  { %s133_s29 = sshll.u32 %s12798_s14, 4  ;;  %s134_s29 = int_to_ptr.vmem [resolvable:$true] %s133_s29 }
 0x151   :  { %s12376_s16 = scalar_lea.hbm %s13966_s22, 32768 }
 0x152   :  { %p12377_p8 = scmp.ne.s32.totalorder %s13966_s22, %s12376_s16  ;;  %p12380_p9 = scmp.lt.u32.totalorder %s12376_s16, %s13966_s22 }
 0x154   :  { %p12382_p10 = pnand %p12380_p9, %p12377_p8 }
 0x156   :  { %12385 = shalt.err (!%p12382_p10)
}
 0x157   :  { %s12386_s18 = scalar_lea.vmem %s134_s29, 32768  ;;  %p12391_p12 = scmp.lt.s32.totalorder %s134_s29, %s134_s29 }
 0x158   :  { %p12387_p11 = scmp.ne.s32.totalorder %s134_s29, %s12386_s18  ;;  %p12392_p13 = scmp.lt.s32.totalorder %s12386_s18, %s12386_s18 }
 0x15a   :  { %p12393_p0 = por %p12392_p13, %p12391_p12 }
 0x15c   :  { %p12394_p1 = pnand %p12393_p0, %p12387_p11 }
 0x15e   :  { %12397 = shalt.err (!%p12394_p1)
}
 0x15f   :  { %s12799_s9 = smov 256   ;;  %s13967_s5 = sld [smem:[#allocation80_spill]] }
 0x160   :  { %s12800_s28 = smov 16   ;;  %s12801_s23 = smov [#allocation15]  }
 0x161   :  { %139 = dma.hbm_to_vmem [thread:$0]  %s13966_s22, 32768, %s134_s29, [#allocation11], %s12799_s9, %s12799_s9, %s12800_s28  }
 0x162   :  { %s155_s17 = sshll.u32 %s12801_s23, 4  ;;  %s12802_s1 = smov [#allocation18]   ;;  %s156_s17 = int_to_ptr.vmem [resolvable:$true] %s155_s17 }
 0x163   :  { %s177_s4 = sshll.u32 %s12802_s1, 4  ;;  %s13096_s4 = int_to_ptr.vmem [resolvable:$true] %s177_s4 }
 0x165   :  { %s12398_s6 = scalar_lea.hbm %s13967_s5, 8192 }
 0x166   :  { %p12399_p2 = scmp.ne.s32.totalorder %s13967_s5, %s12398_s6  ;;  %p12402_p3 = scmp.lt.u32.totalorder %s12398_s6, %s13967_s5 }
 0x168   :  { %p12404_p4 = pnand %p12402_p3, %p12399_p2 }
 0x16a   :  { %12407 = shalt.err (!%p12404_p4)
}
 0x16b   :  { %s12408_s25 = scalar_lea.vmem %s156_s17, 8192  ;;  %p12413_p6 = scmp.lt.s32.totalorder %s156_s17, %s156_s17 }
 0x16c   :  { %p12409_p5 = scmp.ne.s32.totalorder %s156_s17, %s12408_s25  ;;  %p12414_p7 = scmp.lt.s32.totalorder %s12408_s25, %s12408_s25 }
 0x16e   :  { %p12415_p8 = por %p12414_p7, %p12413_p6 }
 0x170   :  { %p12416_p9 = pnand %p12415_p8, %p12409_p5 }
 0x172   :  { %12419 = shalt.err (!%p12416_p9)
}
 0x173   :  { %s13968_s15 = sld [smem:[#allocation81_spill]] }
 0x174   :  { %161 = dma.hbm_to_vmem [thread:$0]  %s13967_s5, 8192, %s156_s17, [#allocation14], %s12780_s7, %s12780_s7, %s12781_s11  }
 0x179   :  { %s12420_s2 = scalar_lea.hbm %s13968_s15, 4096 }
 0x17a   :  { %p12421_p10 = scmp.ne.s32.totalorder %s13968_s15, %s12420_s2  ;;  %p12424_p11 = scmp.lt.u32.totalorder %s12420_s2, %s13968_s15 }
 0x17c   :  { %p12426_p12 = pnand %p12424_p11, %p12421_p10 }
 0x17e   :  { %12429 = shalt.err (!%p12426_p12)
}
 0x17f   :  { %s12430_s19 = scalar_lea.vmem %s13096_s4, 4096  ;;  %p12435_p0 = scmp.lt.s32.totalorder %s13096_s4, %s13096_s4 }
 0x180   :  { %p12431_p13 = scmp.ne.s32.totalorder %s13096_s4, %s12430_s19  ;;  %p12436_p1 = scmp.lt.s32.totalorder %s12430_s19, %s12430_s19 }
 0x182   :  { %p12437_p2 = por %p12436_p1, %p12435_p0 }
 0x184   :  { %p12438_p3 = pnand %p12437_p2, %p12431_p13 }
 0x186   :  { %12441 = shalt.err (!%p12438_p3)
}
 0x187   :  { %s13969_s0 = sld [smem:[#allocation82_spill]]  ;;  %s12803_s13 = smov [#allocation21]  }
 0x188   :  { %183 = dma.hbm_to_vmem [thread:$0]  %s13968_s15, 4096, %s13096_s4, [#allocation17], %s12780_s7, %s12780_s7, %s12781_s11  }
 0x189   :  { %s199_s10 = sshll.u32 %s12803_s13, 4  ;;  %s12804_s20 = smov [#allocation24]   ;;  %s200_s10 = int_to_ptr.vmem [resolvable:$true] %s199_s10 }
 0x18a   :  { %s221_s3 = sshll.u32 %s12804_s20, 4  ;;  %s13117_s3 = int_to_ptr.vmem [resolvable:$true] %s221_s3 }
 0x18d   :  { %s12442_s8 = scalar_lea.hbm %s13969_s0, 4096 }
 0x18e   :  { %p12443_p4 = scmp.ne.s32.totalorder %s13969_s0, %s12442_s8  ;;  %p12446_p5 = scmp.lt.u32.totalorder %s12442_s8, %s13969_s0 }
 0x190   :  { %p12448_p6 = pnand %p12446_p5, %p12443_p4 }
 0x192   :  { %12451 = shalt.err (!%p12448_p6)
}
 0x193   :  { %s12452_s27 = scalar_lea.vmem %s200_s10, 4096  ;;  %p12457_p8 = scmp.lt.s32.totalorder %s200_s10, %s200_s10 }
 0x194   :  { %p12453_p7 = scmp.ne.s32.totalorder %s200_s10, %s12452_s27  ;;  %p12458_p9 = scmp.lt.s32.totalorder %s12452_s27, %s12452_s27 }
 0x196   :  { %p12459_p10 = por %p12458_p9, %p12457_p8 }
 0x198   :  { %p12460_p11 = pnand %p12459_p10, %p12453_p7 }
 0x19a   :  { %12463 = shalt.err (!%p12460_p11)
}
 0x19b   :  { %s13970_s12 = sld [smem:[#allocation83_spill]] }
 0x19c   :  { %205 = dma.hbm_to_vmem [thread:$0]  %s13969_s0, 4096, %s200_s10, [#allocation20], %s12780_s7, %s12780_s7, %s12781_s11  }
 0x1a1   :  { %s12464_s22 = scalar_lea.hbm %s13970_s12, 2048 }
 0x1a2   :  { %p12465_p12 = scmp.ne.s32.totalorder %s13970_s12, %s12464_s22  ;;  %p12468_p13 = scmp.lt.u32.totalorder %s12464_s22, %s13970_s12 }
 0x1a4   :  { %p12470_p0 = pnand %p12468_p13, %p12465_p12 }
 0x1a6   :  { %12473 = shalt.err (!%p12470_p0)
}
 0x1a7   :  { %s12474_s14 = scalar_lea.vmem %s13117_s3, 2048  ;;  %p12479_p2 = scmp.lt.s32.totalorder %s13117_s3, %s13117_s3 }
 0x1a8   :  { %p12475_p1 = scmp.ne.s32.totalorder %s13117_s3, %s12474_s14  ;;  %p12480_p3 = scmp.lt.s32.totalorder %s12474_s14, %s12474_s14 }
 0x1aa   :  { %p12481_p4 = por %p12480_p3, %p12479_p2 }
 0x1ac   :  { %p12482_p5 = pnand %p12481_p4, %p12475_p1 }
 0x1ae   :  { %12485 = shalt.err (!%p12482_p5)
}
 0x1af   :  { %s13971_s29 = sld [smem:[#allocation84_spill]]  ;;  %s12805_s16 = smov [#allocation27]  }
 0x1b0   :  { %227 = dma.hbm_to_vmem [thread:$0]  %s13970_s12, 2048, %s13117_s3, [#allocation23], %s12788_s26, %s12788_s26, %s12789_s24  }
 0x1b1   :  { %s246_s18 = sshll.u32 %s12805_s16, 4  ;;  %s12806_s5 = smov [#allocation30]   ;;  %s247_s18 = int_to_ptr.vmem [resolvable:$true] %s246_s18 }
 0x1b2   :  { %s268_s28 = sshll.u32 %s12806_s5, 4  ;;  %s269_s28 = int_to_ptr.vmem [resolvable:$true] %s268_s28 }
 0x1b5   :  { %s12486_s23 = scalar_lea.hbm %s13971_s29, 16 }
 0x1b6   :  { %p12487_p6 = scmp.ne.s32.totalorder %s13971_s29, %s12486_s23  ;;  %p12490_p7 = scmp.lt.u32.totalorder %s12486_s23, %s13971_s29 }
 0x1b8   :  { %p12492_p8 = pnand %p12490_p7, %p12487_p6 }
 0x1ba   :  { %12495 = shalt.err (!%p12492_p8)
}
 0x1bb   :  { %s12496_s17 = scalar_lea.vmem %s247_s18, 16  ;;  %s12500_s1 = scalar_lea.vmem %s247_s18, 32 }
 0x1bc   :  { %p12497_p9 = scmp.ne.s32.totalorder %s247_s18, %s12496_s17  ;;  %p12501_p10 = scmp.lt.s32.totalorder %s247_s18, %s247_s18 }
 0x1bd   :  { %p12502_p11 = scmp.lt.s32.totalorder %s12500_s1, %s12496_s17 }
 0x1bf   :  { %p12503_p12 = por %p12502_p11, %p12501_p10 }
 0x1c1   :  { %p12504_p13 = pnand %p12503_p12, %p12497_p9 }
 0x1c3   :  { %12507 = shalt.err (!%p12504_p13)
}
 0x1c4   :  { %s13972_s4 = sld [smem:[#allocation86_spill]] }
 0x1c5   :  { %249 = dma.hbm_to_vmem [thread:$0]  %s13971_s29, 16, %s247_s18, [#allocation26]  }
 0x1ca   :  { %s12508_s6 = scalar_lea.hbm %s13972_s4, 128 }
 0x1cb   :  { %p12509_p0 = scmp.ne.s32.totalorder %s13972_s4, %s12508_s6  ;;  %p12512_p1 = scmp.lt.u32.totalorder %s12508_s6, %s13972_s4 }
 0x1cd   :  { %p12514_p2 = pnand %p12512_p1, %p12509_p0 }
 0x1cf   :  { %12517 = shalt.err (!%p12514_p2)
}
 0x1d0   :  { %s12518_s25 = scalar_lea.vmem %s269_s28, 128  ;;  %p12523_p4 = scmp.lt.s32.totalorder %s269_s28, %s269_s28 }
 0x1d1   :  { %p12519_p3 = scmp.ne.s32.totalorder %s269_s28, %s12518_s25  ;;  %p12524_p5 = scmp.lt.s32.totalorder %s12518_s25, %s12518_s25 }
 0x1d3   :  { %p12525_p6 = por %p12524_p5, %p12523_p4 }
 0x1d5   :  { %p12526_p7 = pnand %p12525_p6, %p12519_p3 }
 0x1d7   :  { %12529 = shalt.err (!%p12526_p7)
}
 0x1d8   :  { %s13973_s15 = sld [smem:[#allocation88_spill]]  ;;  %s12807_s2 = smov [#allocation33]  }
 0x1d9   :  { %271 = dma.hbm_to_vmem [thread:$0]  %s13972_s4, 128, %s269_s28, [#allocation29]  }
 0x1da   :  { %s287_s19 = sshll.u32 %s12807_s2, 4  ;;  %s12808_s0 = smov [#allocation36]   ;;  %s288_s19 = int_to_ptr.vmem [resolvable:$true] %s287_s19 }
 0x1db   :  { %s309_s13 = sshll.u32 %s12808_s0, 4  ;;  %s13146_s13 = int_to_ptr.vmem [resolvable:$true] %s309_s13 }
 0x1de   :  { %s12530_s10 = scalar_lea.hbm %s13973_s15, 4096 }
 0x1df   :  { %p12531_p8 = scmp.ne.s32.totalorder %s13973_s15, %s12530_s10  ;;  %p12534_p9 = scmp.lt.u32.totalorder %s12530_s10, %s13973_s15 }
 0x1e1   :  { %p12536_p10 = pnand %p12534_p9, %p12531_p8 }
 0x1e3   :  { %12539 = shalt.err (!%p12536_p10)
}
 0x1e4   :  { %s12540_s20 = scalar_lea.vmem %s288_s19, 4096  ;;  %p12545_p12 = scmp.lt.s32.totalorder %s288_s19, %s288_s19 }
 0x1e5   :  { %p12541_p11 = scmp.ne.s32.totalorder %s288_s19, %s12540_s20  ;;  %p12546_p13 = scmp.lt.s32.totalorder %s12540_s20, %s12540_s20 }
 0x1e7   :  { %p12547_p0 = por %p12546_p13, %p12545_p12 }
 0x1e9   :  { %p12548_p1 = pnand %p12547_p0, %p12541_p11 }
 0x1eb   :  { %12551 = shalt.err (!%p12548_p1)
}
 0x1ec   :  { %s13974_s3 = sld [smem:[#allocation89_spill]] }
 0x1ed   :  { %293 = dma.hbm_to_vmem [thread:$0]  %s13973_s15, 4096, %s288_s19, [#allocation32], %s12780_s7, %s12780_s7, %s12781_s11  }
 0x1f2   :  { %s12552_s8 = scalar_lea.hbm %s13974_s3, 4096 }
 0x1f3   :  { %p12553_p2 = scmp.ne.s32.totalorder %s13974_s3, %s12552_s8  ;;  %p12556_p3 = scmp.lt.u32.totalorder %s12552_s8, %s13974_s3 }
 0x1f5   :  { %p12558_p4 = pnand %p12556_p3, %p12553_p2 }
 0x1f7   :  { %12561 = shalt.err (!%p12558_p4)
}
 0x1f8   :  { %s12562_s27 = scalar_lea.vmem %s13146_s13, 4096  ;;  %p12567_p6 = scmp.lt.s32.totalorder %s13146_s13, %s13146_s13 }
 0x1f9   :  { %p12563_p5 = scmp.ne.s32.totalorder %s13146_s13, %s12562_s27  ;;  %p12568_p7 = scmp.lt.s32.totalorder %s12562_s27, %s12562_s27 }
 0x1fb   :  { %p12569_p8 = por %p12568_p7, %p12567_p6 }
 0x1fd   :  { %p12570_p9 = pnand %p12569_p8, %p12563_p5 }
 0x1ff   :  { %12573 = shalt.err (!%p12570_p9)
}
 0x200   :  { %s13975_s12 = sld [smem:[#allocation90_spill]]  ;;  %s12809_s22 = smov [#allocation39]  }
 0x201   :  { %315 = dma.hbm_to_vmem [thread:$0]  %s13974_s3, 4096, %s13146_s13, [#allocation35], %s12780_s7, %s12780_s7, %s12781_s11  }
 0x202   :  { %s331_s14 = sshll.u32 %s12809_s22, 4  ;;  %s12810_s29 = smov [#allocation42]   ;;  %s332_s14 = int_to_ptr.vmem [resolvable:$true] %s331_s14 }
 0x203   :  { %s356_s16 = sshll.u32 %s12810_s29, 4  ;;  %s357_s16 = int_to_ptr.vmem [resolvable:$true] %s356_s16 }
 0x206   :  { %s12574_s18 = scalar_lea.hbm %s13975_s12, 2048 }
 0x207   :  { %p12575_p10 = scmp.ne.s32.totalorder %s13975_s12, %s12574_s18  ;;  %p12578_p11 = scmp.lt.u32.totalorder %s12574_s18, %s13975_s12 }
 0x209   :  { %p12580_p12 = pnand %p12578_p11, %p12575_p10 }
 0x20b   :  { %12583 = shalt.err (!%p12580_p12)
}
 0x20c   :  { %s12584_s5 = scalar_lea.vmem %s332_s14, 2048  ;;  %p12589_p0 = scmp.lt.s32.totalorder %s332_s14, %s332_s14 }
 0x20d   :  { %p12585_p13 = scmp.ne.s32.totalorder %s332_s14, %s12584_s5  ;;  %p12590_p1 = scmp.lt.s32.totalorder %s12584_s5, %s12584_s5 }
 0x20f   :  { %p12591_p2 = por %p12590_p1, %p12589_p0 }
 0x211   :  { %p12592_p3 = pnand %p12591_p2, %p12585_p13 }
 0x213   :  { %12595 = shalt.err (!%p12592_p3)
}
 0x214   :  { %s13976_s28 = sld [smem:[#allocation91_spill]] }
 0x215   :  { %337 = dma.hbm_to_vmem [thread:$0]  %s13975_s12, 2048, %s332_s14, [#allocation38], %s12788_s26, %s12788_s26, %s12789_s24  }
 0x21a   :  { %s12596_s23 = scalar_lea.hbm %s13976_s28, 16 }
 0x21b   :  { %p12597_p4 = scmp.ne.s32.totalorder %s13976_s28, %s12596_s23  ;;  %p12600_p5 = scmp.lt.u32.totalorder %s12596_s23, %s13976_s28 }
 0x21d   :  { %p12602_p6 = pnand %p12600_p5, %p12597_p4 }
 0x21f   :  { %12605 = shalt.err (!%p12602_p6)
}
 0x220   :  { %s12606_s17 = scalar_lea.vmem %s357_s16, 16  ;;  %s12610_s1 = scalar_lea.vmem %s357_s16, 32 }
 0x221   :  { %p12607_p7 = scmp.ne.s32.totalorder %s357_s16, %s12606_s17  ;;  %p12611_p8 = scmp.lt.s32.totalorder %s357_s16, %s357_s16 }
 0x222   :  { %p12612_p9 = scmp.lt.s32.totalorder %s12610_s1, %s12606_s17 }
 0x224   :  { %p12613_p10 = por %p12612_p9, %p12611_p8 }
 0x226   :  { %p12614_p11 = pnand %p12613_p10, %p12607_p7 }
 0x228   :  { %12617 = shalt.err (!%p12614_p11)
}
 0x229   :  { %s13977_s4 = sld [smem:[#allocation92_spill]]  ;;  %s12811_s6 = smov [#allocation45]  }
 0x22a   :  { %359 = dma.hbm_to_vmem [thread:$0]  %s13976_s28, 16, %s357_s16, [#allocation41]  }
 0x22b   :  { %s377_s25 = sshll.u32 %s12811_s6, 4  ;;  %s12812_s15 = smov [#allocation48]   ;;  %s378_s25 = int_to_ptr.vmem [resolvable:$true] %s377_s25 }
 0x22c   :  { %s401_s2 = sshll.u32 %s12812_s15, 4  ;;  %s13178_s2 = int_to_ptr.vmem [resolvable:$true] %s401_s2 }
 0x22f   :  { %s12618_s19 = scalar_lea.hbm %s13977_s4, 2048 }
 0x230   :  { %p12619_p12 = scmp.ne.s32.totalorder %s13977_s4, %s12618_s19  ;;  %p12622_p13 = scmp.lt.u32.totalorder %s12618_s19, %s13977_s4 }
 0x232   :  { %p12624_p0 = pnand %p12622_p13, %p12619_p12 }
 0x234   :  { %12627 = shalt.err (!%p12624_p0)
}
 0x235   :  { %s12628_s0 = scalar_lea.vmem %s378_s25, 2048  ;;  %p12633_p2 = scmp.lt.s32.totalorder %s378_s25, %s378_s25 }
 0x236   :  { %p12629_p1 = scmp.ne.s32.totalorder %s378_s25, %s12628_s0  ;;  %p12634_p3 = scmp.lt.s32.totalorder %s12628_s0, %s12628_s0 }
 0x238   :  { %p12635_p4 = por %p12634_p3, %p12633_p2 }
 0x23a   :  { %p12636_p5 = pnand %p12635_p4, %p12629_p1 }
 0x23c   :  { %12639 = shalt.err (!%p12636_p5)
}
 0x23d   :  { %s13978_s13 = sld [smem:[#allocation93_spill]] }
 0x23e   :  { %383 = dma.hbm_to_vmem [thread:$0]  %s13977_s4, 2048, %s378_s25, [#allocation44], %s12788_s26, %s12788_s26, %s12789_s24  }
 0x243   :  { %s12640_s10 = scalar_lea.hbm %s13978_s13, 2048 }
 0x244   :  { %p12641_p6 = scmp.ne.s32.totalorder %s13978_s13, %s12640_s10  ;;  %p12644_p7 = scmp.lt.u32.totalorder %s12640_s10, %s13978_s13 }
 0x246   :  { %p12646_p8 = pnand %p12644_p7, %p12641_p6 }
 0x248   :  { %12649 = shalt.err (!%p12646_p8)
}
 0x249   :  { %s12650_s20 = scalar_lea.vmem %s13178_s2, 2048  ;;  %p12655_p10 = scmp.lt.s32.totalorder %s13178_s2, %s13178_s2 }
 0x24a   :  { %p12651_p9 = scmp.ne.s32.totalorder %s13178_s2, %s12650_s20  ;;  %p12656_p11 = scmp.lt.s32.totalorder %s12650_s20, %s12650_s20 }
 0x24c   :  { %p12657_p12 = por %p12656_p11, %p12655_p10 }
 0x24e   :  { %p12658_p13 = pnand %p12657_p12, %p12651_p9 }
 0x250   :  { %12661 = shalt.err (!%p12658_p13)
}
 0x251   :  { %s13979_s3 = sld [smem:[#allocation94_spill]]  ;;  %s12813_s8 = smov [#allocation51]  }
 0x252   :  { %407 = dma.hbm_to_vmem [thread:$0]  %s13978_s13, 2048, %s13178_s2, [#allocation47], %s12788_s26, %s12788_s26, %s12789_s24  }
 0x253   :  { %s426_s27 = sshll.u32 %s12813_s8, 4  ;;  %s12814_s12 = smov [#allocation52]   ;;  %s427_s27 = int_to_ptr.vmem [resolvable:$true] %s426_s27 }
 0x254   :  { %s436_s22 = sshll.u32 %s12814_s12, 4  ;;  %s437_s22 = int_to_ptr.vmem [resolvable:$true] %s436_s22 }
 0x257   :  { %s12662_s14 = scalar_lea.hbm %s13979_s3, 16 }
 0x258   :  { %p12663_p0 = scmp.ne.s32.totalorder %s13979_s3, %s12662_s14  ;;  %p12666_p1 = scmp.lt.u32.totalorder %s12662_s14, %s13979_s3 }
 0x25a   :  { %p12668_p2 = pnand %p12666_p1, %p12663_p0 }
 0x25c   :  { %12671 = shalt.err (!%p12668_p2)
}
 0x25d   :  { %s12672_s29 = scalar_lea.vmem %s427_s27, 16  ;;  %s12676_s16 = scalar_lea.vmem %s427_s27, 32 }
 0x25e   :  { %p12673_p3 = scmp.ne.s32.totalorder %s427_s27, %s12672_s29  ;;  %p12677_p4 = scmp.lt.s32.totalorder %s427_s27, %s427_s27 }
 0x25f   :  { %p12678_p5 = scmp.lt.s32.totalorder %s12676_s16, %s12672_s29 }
 0x261   :  { %p12679_p6 = por %p12678_p5, %p12677_p4 }
 0x263   :  { %p12680_p7 = pnand %p12679_p6, %p12673_p3 }
 0x265   :  { %12683 = shalt.err (!%p12680_p7)
}
 0x266   :  { %429 = dma.hbm_to_vmem [thread:$0]  %s13979_s3, 16, %s427_s27, [#allocation50]  }
 0x267   :  { %s12684_s18 = scalar_lea.hbm %s13002_s21, 16 }
 0x268   :  { %p12685_p8 = scmp.ne.s32.totalorder %s13002_s21, %s12684_s18  ;;  %p12688_p9 = scmp.lt.u32.totalorder %s12684_s18, %s13002_s21 }
 0x26a   :  { %p12690_p10 = pnand %p12688_p9, %p12685_p8 }
 0x26c   :  { %12693 = shalt.err (!%p12690_p10)
}
 0x26d   :  { %s12694_s5 = scalar_lea.vmem %s437_s22, 16  ;;  %s12698_s28 = scalar_lea.vmem %s437_s22, 32 }
 0x26e   :  { %p12695_p11 = scmp.ne.s32.totalorder %s437_s22, %s12694_s5  ;;  %p12699_p12 = scmp.lt.s32.totalorder %s437_s22, %s437_s22 }
 0x26f   :  { %p12700_p13 = scmp.lt.s32.totalorder %s12698_s28, %s12694_s5 }
 0x271   :  { %p12701_p0 = por %p12700_p13, %p12699_p12 }
 0x273   :  { %p12702_p1 = pnand %p12701_p0, %p12695_p11 }
 0x275   :  { %12705 = shalt.err (!%p12702_p1)
}
 0x276   :  { %439 = dma.hbm_to_vmem [thread:$0]  %s13002_s21, 16, %s437_s22, [#allocation53]  }
 0x277   :  { %12706 = dma.done.wait [#allocation9], 128  }
 0x278   :  { %12707 = vsyncadd [#allocation9], 4294967168 }
 0x279   :  { %12708 = dma.done.wait [#allocation11], 33024  }
 0x27a   :  { %12709 = vsyncadd [#allocation11], 4294934272 }
 0x27b   :  { %12710 = dma.done.wait [#allocation14], 8256  }
 0x27c   :  { %12711 = vsyncadd [#allocation14], 4294959040 }
 0x27d   :  { %12712 = dma.done.wait [#allocation17], 4128  }
 0x27e   :  { %12713 = vsyncadd [#allocation17], 4294963168 }
 0x27f   :  { %12714 = dma.done.wait [#allocation20], 4128  }
 0x280   :  { %12715 = vsyncadd [#allocation20], 4294963168 }
 0x281   :  { %12716 = dma.done.wait [#allocation23], 2080  }
 0x282   :  { %12717 = vsyncadd [#allocation23], 4294965216 }
 0x283   :  { %12718 = dma.done.wait [#allocation26], 2064  }
 0x284   :  { %12719 = vsyncadd [#allocation26], 4294965232 }
 0x285   :  { %12720 = dma.done.wait [#allocation29], 144  }
 0x286   :  { %12721 = vsyncadd [#allocation29], 4294967152 }
 0x287   :  { %12722 = dma.done.wait [#allocation32], 4128  }
 0x288   :  { %12723 = vsyncadd [#allocation32], 4294963168 }
 0x289   :  { %12724 = dma.done.wait [#allocation35], 4128  }
 0x28a   :  { %12725 = vsyncadd [#allocation35], 4294963168 }
 0x28b   :  { %12726 = dma.done.wait [#allocation38], 2080  }
 0x28c   :  { %12727 = vsyncadd [#allocation38], 4294965216 }
 0x28d   :  { %12728 = dma.done.wait [#allocation41], 2064  }
 0x28e   :  { %12729 = vsyncadd [#allocation41], 4294965232 }
 0x28f   :  { %12730 = dma.done.wait [#allocation44], 2064  }
 0x290   :  { %12731 = vsyncadd [#allocation44], 4294965232 }
 0x291   :  { %12732 = dma.done.wait [#allocation47], 4096  }
 0x292   :  { %12733 = vsyncadd [#allocation47], 4294963200 }
 0x293   :  { %12734 = dma.done.wait [#allocation50], 2064  }
 0x294   :  { %12735 = vsyncadd [#allocation50], 4294965232 }
 0x295   :  { %12736 = dma.done.wait [#allocation53], 16  }
 0x296   :  { %12737 = vsyncadd [#allocation53], 4294967280  ;;  %s537_s21 = sld [smem:[#allocation0]]   ;;  %s12815_s23 = smov 1024   ;;  %vm3052_vm0 = vcmask 64512   ;;  %vm4221_vm1 = vcmask 7168  }
 0x297   :  { %549 = sst [smem:[#allocation55]] %s12815_s23  ;;  %s13980_s17 = sld [smem:[#allocation85_spill]] }
 0x298   :  { %551 = sst [smem:[#allocation55 + $0x1]] %s12815_s23  ;;  %s12816_s1 = smov [#allocation2]  }
 0x299   :  { %553 = sst [smem:[#allocation55 + $0x2]] %s12781_s11  ;;  %s545_s4 = sshll.u32 %s12816_s1, 4  ;;  %s546_s4 = int_to_ptr.vmem [resolvable:$true] %s545_s4 }
 0x29a   :  { %555 = sst [smem:[#allocation55 + $0x3]] %s12788_s26  ;;  %s12817_s6 = smov 512  }
 0x29b   :  { %557 = sst [smem:[#allocation55 + $0x4]] %s12780_s7  ;;  %s12818_s2 = smov 2  }
 0x29c   :  { %561 = sst [smem:[#allocation55 + $0x6]] %s12817_s6  ;;  %s9958_s25 = sshll.u32 %s537_s21, 26 }
 0x29d   :  { %563 = sst [smem:[#allocation55 + $0x7]] %s12788_s26  ;;  %s9959_s15 = sadd.s32 134217728, %s9958_s25 }
 0x29e   :  { %565 = sst [smem:[#allocation55 + $0x8]] %s12789_s24  ;;  %s12819_s19 = smov [#allocation4]  }
 0x29f   :  { %559 = sst [smem:[#allocation55 + $0x5]] %s12818_s2  ;;  %s12820_s11 = smov [#allocation54]  }
 0x2a0   :  { %s13981_s0 = sld [smem:[#allocation87_spill]]  ;;  %s12821_s13 = smov [#allocation3]  }
 0x2a1   :  { %567 = dma.general %s13980_s17, 131072, %s546_s4, %s12819_s19, %s12820_s11, [#allocation55], %s9959_s15, 0  }
 0x2a2   :  { %584 = sst [smem:[#allocation57]] %s12799_s9  ;;  %s580_s10 = sshll.u32 %s12821_s13, 4  ;;  %s581_s10 = int_to_ptr.vmem [resolvable:$true] %s580_s10 }
 0x2a3   :  { %586 = sst [smem:[#allocation57 + $0x1]] %s12799_s9  ;;  %s12822_s20 = smov [#allocation4 + $0x1]  }
 0x2a4   :  { %588 = sst [smem:[#allocation57 + $0x2]] %s12818_s2  ;;  %s12823_s3 = smov [#allocation56]  }
 0x2a5   :  { %590 = sst [smem:[#allocation57 + $0x3]] %s12788_s26 }
 0x2a6   :  { %592 = sst [smem:[#allocation57 + $0x4]] %s12780_s7 }
 0x2a7   :  { %594 = sst [smem:[#allocation57 + $0x5]] %s12818_s2 }
 0x2a8   :  { %596 = sst [smem:[#allocation57 + $0x6]] %s12780_s7 }
 0x2a9   :  { %598 = sst [smem:[#allocation57 + $0x7]] %s12788_s26 }
 0x2aa   :  { %600 = sst [smem:[#allocation57 + $0x8]] %s12789_s24 }
 0x2ab   :  { %602 = dma.general %s13981_s0, 16384, %s581_s10, %s12822_s20, %s12823_s3, [#allocation57], %s9959_s15, 0  }
 0x2ac   :  { %v11219_v3 = vld [vmem:[#allocation12 + $0x4] ss:$16 sps:$4 sm:$0xff]   ;;  %v11221_v4 = vld [vmem:[#allocation12 + $0xc] ss:$16 sps:$4 sm:$0xff]   ;;  %v11223_v5 = vld [vmem:[#allocation12] ss:$16 sps:$4 sm:$0xff]  }
 0x2ad   :  { %2210 = vmatprep.subr.bf16.mxu0 %v11219_v3  ;;  %v11224_v6 = vld [vmem:[#allocation12 + $0x8] ss:$16 sps:$4 sm:$0xff]   ;;  %2382 = vmatprep.subr.bf16.mxu1 %v11221_v4  ;;  %v11225_v7 = vld [vmem:[#allocation12 + $0x24] ss:$16 sps:$4 sm:$0xff]   ;;  %v11227_v8 = vld [vmem:[#allocation12 + $0x2c] ss:$16 sps:$4 sm:$0xff]  }
 0x2ae   :  { %2211 = vmatpush1.bf16.msra.mxu0 %v11223_v5  ;;  %2383 = vmatpush1.bf16.msra.mxu1 %v11224_v6  ;;  %v11229_v9 = vld [vmem:[#allocation12 + $0x20] ss:$16 sps:$4 sm:$0xff]   ;;  %v11230_v10 = vld [vmem:[#allocation12 + $0x28] ss:$16 sps:$4 sm:$0xff]   ;;  %v11231_v11 = vld [vmem:[#allocation12 + $0x44] ss:$16 sps:$4 sm:$0xff]  }
 0x2af   :  { %2212 = vmatprep.subr.bf16.mxu0 %v11225_v7  ;;  %2384 = vmatprep.subr.bf16.mxu1 %v11227_v8  ;;  %v11233_v12 = vld [vmem:[#allocation12 + $0x4c] ss:$16 sps:$4 sm:$0xff]   ;;  %v11235_v13 = vld [vmem:[#allocation12 + $0x40] ss:$16 sps:$4 sm:$0xff]   ;;  %v11236_v14 = vld [vmem:[#allocation12 + $0x48] ss:$16 sps:$4 sm:$0xff]  }
 0x2b0   :  { %v11237_v15 = vld [vmem:[#allocation12 + $0x64] ss:$16 sps:$4 sm:$0xff]   ;;  %v11239_v16 = vld [vmem:[#allocation12 + $0x6c] ss:$16 sps:$4 sm:$0xff]   ;;  %v11241_v17 = vld [vmem:[#allocation12 + $0x60] ss:$16 sps:$4 sm:$0xff]  }
 0x2b1   :  { %v11242_v18 = vld [vmem:[#allocation12 + $0x68] ss:$16 sps:$4 sm:$0xff]   ;;  %v11243_v19 = vld [vmem:[#allocation12 + $0x84] ss:$16 sps:$4 sm:$0xff]   ;;  %v11245_v20 = vld [vmem:[#allocation12 + $0x8c] ss:$16 sps:$4 sm:$0xff]  }
 0x2b2   :  { %2213 = vmatpush1.bf16.msra.mxu0 %v11229_v9  ;;  %2385 = vmatpush1.bf16.msra.mxu1 %v11230_v10  ;;  %v11247_v21 = vld [vmem:[#allocation12 + $0x80] ss:$16 sps:$4 sm:$0xff]   ;;  %v11248_v22 = vld [vmem:[#allocation12 + $0x88] ss:$16 sps:$4 sm:$0xff]   ;;  %v11249_v23 = vld [vmem:[#allocation12 + $0xa4] ss:$16 sps:$4 sm:$0xff]  }
 0x2b3   :  { %2214 = vmatprep.subr.bf16.mxu0 %v11231_v11  ;;  %2386 = vmatprep.subr.bf16.mxu1 %v11233_v12  ;;  %v11251_v24 = vld [vmem:[#allocation12 + $0xac] ss:$16 sps:$4 sm:$0xff]   ;;  %v11253_v25 = vld [vmem:[#allocation12 + $0xa0] ss:$16 sps:$4 sm:$0xff]   ;;  %v11254_v26 = vld [vmem:[#allocation12 + $0xa8] ss:$16 sps:$4 sm:$0xff]  }
 0x2b4   :  { %v11255_v27 = vld [vmem:[#allocation12 + $0xc4] ss:$16 sps:$4 sm:$0xff]   ;;  %v11257_v28 = vld [vmem:[#allocation12 + $0xcc] ss:$16 sps:$4 sm:$0xff]   ;;  %v11259_v29 = vld [vmem:[#allocation12 + $0xc0] ss:$16 sps:$4 sm:$0xff]  }
 0x2b5   :  { %v11260_v30 = vld [vmem:[#allocation12 + $0xc8] ss:$16 sps:$4 sm:$0xff]   ;;  %v11261_v31 = vld [vmem:[#allocation12 + $0xe4] ss:$16 sps:$4 sm:$0xff]   ;;  %v11263_v32 = vld [vmem:[#allocation12 + $0xec] ss:$16 sps:$4 sm:$0xff]  }
 0x2b6   :  { %2215 = vmatpush1.bf16.msra.mxu0 %v11235_v13  ;;  %2387 = vmatpush1.bf16.msra.mxu1 %v11236_v14  ;;  %v11265_v33 = vld [vmem:[#allocation12 + $0xe0] ss:$16 sps:$4 sm:$0xff]   ;;  %v11266_v34 = vld [vmem:[#allocation12 + $0xe8] ss:$16 sps:$4 sm:$0xff]   ;;  %v11267_v35 = vld [vmem:[#allocation12 + $0x104] ss:$16 sps:$4 sm:$0xff]  }
 0x2b7   :  { %2216 = vmatprep.subr.bf16.mxu0 %v11237_v15  ;;  %2388 = vmatprep.subr.bf16.mxu1 %v11239_v16  ;;  %v11269_v36 = vld [vmem:[#allocation12 + $0x10c] ss:$16 sps:$4 sm:$0xff]   ;;  %v11271_v37 = vld [vmem:[#allocation12 + $0x100] ss:$16 sps:$4 sm:$0xff]   ;;  %v11272_v38 = vld [vmem:[#allocation12 + $0x108] ss:$16 sps:$4 sm:$0xff]  }
 0x2b8   :  { %v11273_v39 = vld [vmem:[#allocation12 + $0x124] ss:$16 sps:$4 sm:$0xff]   ;;  %v11275_v40 = vld [vmem:[#allocation12 + $0x12c] ss:$16 sps:$4 sm:$0xff]   ;;  %v11277_v41 = vld [vmem:[#allocation12 + $0x120] ss:$16 sps:$4 sm:$0xff]  }
 0x2b9   :  { %s13982_s7 = sld [smem:[#allocation76_spill]]  ;;  %v11278_v42 = vld [vmem:[#allocation12 + $0x128] ss:$16 sps:$4 sm:$0xff]   ;;  %v11279_v43 = vld [vmem:[#allocation12 + $0x144] ss:$16 sps:$4 sm:$0xff]  }
 0x2ba   :  { %2217 = vmatpush1.bf16.msra.mxu0 %v11241_v17  ;;  %2389 = vmatpush1.bf16.msra.mxu1 %v11242_v18  ;;  %v11281_v44 = vld [vmem:[#allocation12 + $0x14c] ss:$16 sps:$4 sm:$0xff]   ;;  %v11283_v45 = vld [vmem:[#allocation12 + $0x140] ss:$16 sps:$4 sm:$0xff]   ;;  %v11284_v46 = vld [vmem:[#allocation12 + $0x148] ss:$16 sps:$4 sm:$0xff]  }
 0x2bb   :  { %2218 = vmatprep.subr.bf16.mxu0 %v11243_v19  ;;  %2390 = vmatprep.subr.bf16.mxu1 %v11245_v20  ;;  %v11285_v47 = vld [vmem:[#allocation12 + $0x164] ss:$16 sps:$4 sm:$0xff]   ;;  %v11287_v48 = vld [vmem:[#allocation12 + $0x16c] ss:$16 sps:$4 sm:$0xff]   ;;  %v11289_v51 = vld [vmem:[#allocation12 + $0x160] ss:$16 sps:$4 sm:$0xff]  }
 0x2bc   :  { %v11290_v52 = vld [vmem:[#allocation12 + $0x168] ss:$16 sps:$4 sm:$0xff]   ;;  %v11291_v54 = vld [vmem:[#allocation12 + $0x184] ss:$16 sps:$4 sm:$0xff]   ;;  %v11293_v55 = vld [vmem:[#allocation12 + $0x18c] ss:$16 sps:$4 sm:$0xff]  }
 0x2bd   :  { %v11295_v56 = vld [vmem:[#allocation12 + $0x180] ss:$16 sps:$4 sm:$0xff]   ;;  %v11296_v57 = vld [vmem:[#allocation12 + $0x188] ss:$16 sps:$4 sm:$0xff]   ;;  %v11297_v58 = vld [vmem:[#allocation12 + $0x1a4] ss:$16 sps:$4 sm:$0xff]  }
 0x2be   :  { %2219 = vmatpush1.bf16.msra.mxu0 %v11247_v21  ;;  %2391 = vmatpush1.bf16.msra.mxu1 %v11248_v22  ;;  %v11299_v59 = vld [vmem:[#allocation12 + $0x1ac] ss:$16 sps:$4 sm:$0xff]   ;;  %v11301_v60 = vld [vmem:[#allocation12 + $0x1a0] ss:$16 sps:$4 sm:$0xff]   ;;  %v11302_v61 = vld [vmem:[#allocation12 + $0x1a8] ss:$16 sps:$4 sm:$0xff]  }
 0x2bf   :  { %2220 = vmatprep.subr.bf16.mxu0 %v11249_v23  ;;  %2392 = vmatprep.subr.bf16.mxu1 %v11251_v24  ;;  %v603_v49 = vld [vmem:[%s13982_s7] sm:$0xff]  ;;  %v11307_v0 = vld [vmem:[#allocation12 + $0x1c0] ss:$16 sps:$4 sm:$0xff]  }
 0x2c0   :  { %v607_v50 = vld [vmem:[%s13982_s7 + $0x20] sm:$0xff]  ;;  %v11313_v4 = vld [vmem:[#allocation12 + $0x1e0] ss:$16 sps:$4 sm:$0xff]  }
 0x2c1   :  { %v9963_v53 = vcombine.high %v603_v49, %v607_v50  ;;  %v11303_v62 = vld [vmem:[#allocation12 + $0x1c4] ss:$16 sps:$4 sm:$0xff]   ;;  %v11305_v63 = vld [vmem:[#allocation12 + $0x1cc] ss:$16 sps:$4 sm:$0xff]   ;;  %v11308_v1 = vld [vmem:[#allocation12 + $0x1c8] ss:$16 sps:$4 sm:$0xff]   ;;  %v9962_v8 = vcombine.low %v603_v49, %v607_v50 }
 0x2c2   :  { %2221 = vmatpush1.bf16.msra.mxu0 %v11253_v25  ;;  %2393 = vmatpush1.bf16.msra.mxu1 %v11254_v26  ;;  %v11309_v2 = vld [vmem:[#allocation12 + $0x1e4] ss:$16 sps:$4 sm:$0xff]   ;;  %v11311_v3 = vld [vmem:[#allocation12 + $0x1ec] ss:$16 sps:$4 sm:$0xff]   ;;  %v11314_v5 = vld [vmem:[#allocation12 + $0x1e8] ss:$16 sps:$4 sm:$0xff]  }
 0x2c3   :  { %2222 = vmatprep.subr.bf16.mxu0 %v11255_v27  ;;  %2394 = vmatprep.subr.bf16.mxu1 %v11257_v28  ;;  %v11317_v6 = vld [vmem:[#allocation12 + $0x204] ss:$16 sps:$4 sm:$0xff]   ;;  %v11320_v7 = vld [vmem:[#allocation12 + $0x20c] ss:$16 sps:$4 sm:$0xff]   ;;  %v11315_v9 = vld [vmem:[#allocation12 + $0x200] ss:$16 sps:$4 sm:$0xff]  }
 0x2c4   :  { %2242 = vmatprep.mubr.bf16.mxu0 %v9963_v53  ;;  %2414 = vmatprep.mubr.bf16.mxu1 %v9963_v53  ;;  %v11318_v10 = vld [vmem:[#allocation12 + $0x208] ss:$16 sps:$4 sm:$0xff]   ;;  %v11323_v11 = vld [vmem:[#allocation12 + $0x224] ss:$16 sps:$4 sm:$0xff]   ;;  %v11326_v12 = vld [vmem:[#allocation12 + $0x22c] ss:$16 sps:$4 sm:$0xff]  }
 0x2c5   :  { %v11321_v13 = vld [vmem:[#allocation12 + $0x220] ss:$16 sps:$4 sm:$0xff]   ;;  %v11324_v14 = vld [vmem:[#allocation12 + $0x228] ss:$16 sps:$4 sm:$0xff]   ;;  %v11329_v15 = vld [vmem:[#allocation12 + $0x244] ss:$16 sps:$4 sm:$0xff]  }
 0x2c6   :  { %2223 = vmatpush1.bf16.msra.mxu0 %v11259_v29  ;;  %2395 = vmatpush1.bf16.msra.mxu1 %v11260_v30  ;;  %v11332_v16 = vld [vmem:[#allocation12 + $0x24c] ss:$16 sps:$4 sm:$0xff]   ;;  %v11327_v17 = vld [vmem:[#allocation12 + $0x240] ss:$16 sps:$4 sm:$0xff]   ;;  %v11330_v18 = vld [vmem:[#allocation12 + $0x248] ss:$16 sps:$4 sm:$0xff]  }
 0x2c7   :  { %2224 = vmatprep.subr.bf16.mxu0 %v11261_v31  ;;  %2396 = vmatprep.subr.bf16.mxu1 %v11263_v32  ;;  %v11335_v19 = vld [vmem:[#allocation12 + $0x264] ss:$16 sps:$4 sm:$0xff]   ;;  %v11338_v20 = vld [vmem:[#allocation12 + $0x26c] ss:$16 sps:$4 sm:$0xff]   ;;  %v11333_v21 = vld [vmem:[#allocation12 + $0x260] ss:$16 sps:$4 sm:$0xff]  }
 0x2c8   :  { %v11336_v22 = vld [vmem:[#allocation12 + $0x268] ss:$16 sps:$4 sm:$0xff]   ;;  %v11341_v23 = vld [vmem:[#allocation12 + $0x284] ss:$16 sps:$4 sm:$0xff]   ;;  %v11344_v24 = vld [vmem:[#allocation12 + $0x28c] ss:$16 sps:$4 sm:$0xff]  }
 0x2c9   :  { %v11339_v25 = vld [vmem:[#allocation12 + $0x280] ss:$16 sps:$4 sm:$0xff]   ;;  %v11342_v26 = vld [vmem:[#allocation12 + $0x288] ss:$16 sps:$4 sm:$0xff]   ;;  %v11347_v27 = vld [vmem:[#allocation12 + $0x2a4] ss:$16 sps:$4 sm:$0xff]  }
 0x2ca   :  { %2225 = vmatpush1.bf16.msra.mxu0 %v11265_v33  ;;  %2397 = vmatpush1.bf16.msra.mxu1 %v11266_v34  ;;  %v11350_v28 = vld [vmem:[#allocation12 + $0x2ac] ss:$16 sps:$4 sm:$0xff]   ;;  %v11345_v29 = vld [vmem:[#allocation12 + $0x2a0] ss:$16 sps:$4 sm:$0xff]   ;;  %v11348_v30 = vld [vmem:[#allocation12 + $0x2a8] ss:$16 sps:$4 sm:$0xff]  }
 0x2cb   :  { %2226 = vmatprep.subr.bf16.mxu0 %v11267_v35  ;;  %2398 = vmatprep.subr.bf16.mxu1 %v11269_v36  ;;  %v11353_v31 = vld [vmem:[#allocation12 + $0x2c4] ss:$16 sps:$4 sm:$0xff]   ;;  %v11356_v32 = vld [vmem:[#allocation12 + $0x2cc] ss:$16 sps:$4 sm:$0xff]   ;;  %v11351_v35 = vld [vmem:[#allocation12 + $0x2c0] ss:$16 sps:$4 sm:$0xff]  }
 0x2cc   :  { %v13224_v33 = vld [vmem:[%s13982_s7 + $0x8] sm:$0xff]  ;;  %v11354_v36 = vld [vmem:[#allocation12 + $0x2c8] ss:$16 sps:$4 sm:$0xff]  }
 0x2cd   :  { %v13227_v34 = vld [vmem:[%s13982_s7 + $0x28] sm:$0xff]  ;;  %v11372_v49 = vld [vmem:[#allocation12 + $0x328] ss:$16 sps:$4 sm:$0xff]  }
 0x2ce   :  { %2227 = vmatpush1.bf16.msra.mxu0 %v11271_v37  ;;  %2399 = vmatpush1.bf16.msra.mxu1 %v11272_v38  ;;  %v9965_v37 = vcombine.high %v13224_v33, %v13227_v34  ;;  %v11359_v38 = vld [vmem:[#allocation12 + $0x2e4] ss:$16 sps:$4 sm:$0xff]   ;;  %v11378_v53 = vld [vmem:[#allocation12 + $0x348] ss:$16 sps:$4 sm:$0xff]  }
 0x2cf   :  { %2228 = vmatprep.subr.bf16.mxu0 %v11273_v39  ;;  %2400 = vmatprep.subr.bf16.mxu1 %v11275_v40  ;;  %v11362_v39 = vld [vmem:[#allocation12 + $0x2ec] ss:$16 sps:$4 sm:$0xff]   ;;  %v11357_v40 = vld [vmem:[#allocation12 + $0x2e0] ss:$16 sps:$4 sm:$0xff]   ;;  %v11377_v50 = vld [vmem:[#allocation12 + $0x344] ss:$16 sps:$4 sm:$0xff]  }
 0x2d2   :  { %2229 = vmatpush1.bf16.msra.mxu0 %v11277_v41  ;;  %2401 = vmatpush1.bf16.msra.mxu1 %v11278_v42  ;;  %v11360_v41 = vld [vmem:[#allocation12 + $0x2e8] ss:$16 sps:$4 sm:$0xff]   ;;  %v11365_v42 = vld [vmem:[#allocation12 + $0x304] ss:$16 sps:$4 sm:$0xff]  }
 0x2d3   :  { %2230 = vmatprep.subr.bf16.mxu0 %v11279_v43  ;;  %2402 = vmatprep.subr.bf16.mxu1 %v11281_v44  ;;  %v11368_v43 = vld [vmem:[#allocation12 + $0x30c] ss:$16 sps:$4 sm:$0xff]   ;;  %v11363_v44 = vld [vmem:[#allocation12 + $0x300] ss:$16 sps:$4 sm:$0xff]  }
 0x2d6   :  { %2231 = vmatpush1.bf16.msra.mxu0 %v11283_v45  ;;  %2403 = vmatpush1.bf16.msra.mxu1 %v11284_v46  ;;  %v11366_v45 = vld [vmem:[#allocation12 + $0x308] ss:$16 sps:$4 sm:$0xff]   ;;  %v11371_v46 = vld [vmem:[#allocation12 + $0x324] ss:$16 sps:$4 sm:$0xff]  }
 0x2d7   :  { %2232 = vmatprep.subr.bf16.mxu0 %v11285_v47  ;;  %2404 = vmatprep.subr.bf16.mxu1 %v11287_v48  ;;  %v11374_v47 = vld [vmem:[#allocation12 + $0x32c] ss:$16 sps:$4 sm:$0xff]   ;;  %v11369_v48 = vld [vmem:[#allocation12 + $0x320] ss:$16 sps:$4 sm:$0xff]  }
 0x2da   :  { %2233 = vmatpush1.bf16.msra.mxu0 %v11289_v51  ;;  %2405 = vmatpush1.bf16.msra.mxu1 %v11290_v52  ;;  %v11380_v51 = vld [vmem:[#allocation12 + $0x34c] ss:$16 sps:$4 sm:$0xff]   ;;  %v11375_v52 = vld [vmem:[#allocation12 + $0x340] ss:$16 sps:$4 sm:$0xff]  }
 0x2db   :  { %2234 = vmatprep.subr.bf16.mxu0 %v11291_v54  ;;  %2406 = vmatprep.subr.bf16.mxu1 %v11293_v55  ;;  %v11383_v54 = vld [vmem:[#allocation12 + $0x364] ss:$16 sps:$4 sm:$0xff]   ;;  %v11386_v55 = vld [vmem:[#allocation12 + $0x36c] ss:$16 sps:$4 sm:$0xff]  }
 0x2de   :  { %2235 = vmatpush1.bf16.msra.mxu0 %v11295_v56  ;;  %2407 = vmatpush1.bf16.msra.mxu1 %v11296_v57  ;;  %v11381_v56 = vld [vmem:[#allocation12 + $0x360] ss:$16 sps:$4 sm:$0xff]   ;;  %v11384_v57 = vld [vmem:[#allocation12 + $0x368] ss:$16 sps:$4 sm:$0xff]  }
 0x2df   :  { %2236 = vmatprep.subr.bf16.mxu0 %v11297_v58  ;;  %2408 = vmatprep.subr.bf16.mxu1 %v11299_v59  ;;  %v11389_v58 = vld [vmem:[#allocation12 + $0x384] ss:$16 sps:$4 sm:$0xff]   ;;  %v11392_v59 = vld [vmem:[#allocation12 + $0x38c] ss:$16 sps:$4 sm:$0xff]  }
 0x2e2   :  { %2237 = vmatpush1.bf16.msra.mxu0 %v11301_v60  ;;  %2409 = vmatpush1.bf16.msra.mxu1 %v11302_v61  ;;  %v11387_v60 = vld [vmem:[#allocation12 + $0x380] ss:$16 sps:$4 sm:$0xff]   ;;  %v11390_v61 = vld [vmem:[#allocation12 + $0x388] ss:$16 sps:$4 sm:$0xff]  }
 0x2e3   :  { %2238 = vmatprep.subr.bf16.mxu0 %v11303_v62  ;;  %2410 = vmatprep.subr.bf16.mxu1 %v11305_v63  ;;  %v11395_v62 = vld [vmem:[#allocation12 + $0x3a4] ss:$16 sps:$4 sm:$0xff]   ;;  %v11398_v63 = vld [vmem:[#allocation12 + $0x3ac] ss:$16 sps:$4 sm:$0xff]  }
 0x2e6   :  { %2239 = vmatpush1.bf16.msra.mxu0 %v11307_v0  ;;  %2411 = vmatpush1.bf16.msra.mxu1 %v11308_v1  ;;  %v11393_v0 = vld [vmem:[#allocation12 + $0x3a0] ss:$16 sps:$4 sm:$0xff]   ;;  %v11396_v1 = vld [vmem:[#allocation12 + $0x3a8] ss:$16 sps:$4 sm:$0xff]  }
 0x2e7   :  { %2240 = vmatprep.subr.bf16.mxu0 %v11309_v2  ;;  %2412 = vmatprep.subr.bf16.mxu1 %v11311_v3  ;;  %v11401_v2 = vld [vmem:[#allocation12 + $0x3c4] ss:$16 sps:$4 sm:$0xff]   ;;  %v11404_v3 = vld [vmem:[#allocation12 + $0x3cc] ss:$16 sps:$4 sm:$0xff]  }
 0x2ea   :  { %2241 = vmatpush1.bf16.msra.mxu0 %v11313_v4  ;;  %2413 = vmatpush1.bf16.msra.mxu1 %v11314_v5  ;;  %v11399_v4 = vld [vmem:[#allocation12 + $0x3c0] ss:$16 sps:$4 sm:$0xff]   ;;  %v11402_v5 = vld [vmem:[#allocation12 + $0x3c8] ss:$16 sps:$4 sm:$0xff]  }
 0x2eb   :  { %2253 = vmatprep.subr.bf16.mxu0 %v11317_v6  ;;  %2425 = vmatprep.subr.bf16.mxu1 %v11320_v7  ;;  %v11407_v6 = vld [vmem:[#allocation12 + $0x3e4] ss:$16 sps:$4 sm:$0xff]   ;;  %v11410_v7 = vld [vmem:[#allocation12 + $0x3ec] ss:$16 sps:$4 sm:$0xff]  }
 0x2ed   :  { %2243 = vmatmul.mubr.bf16.vlgmr.msra.gmra.mrb[0].mxu0 %v9962_v8  ;;  %2415 = vmatmul.mubr.bf16.vlgmr.msra.gmra.mrb[0].mxu1 %v9962_v8  ;;  %v11405_v8 = vld [vmem:[#allocation12 + $0x3e0] ss:$16 sps:$4 sm:$0xff]  }
 0x2ee   :  { %2254 = vmatpush1.bf16.msra.mxu0 %v11315_v9  ;;  %2426 = vmatpush1.bf16.msra.mxu1 %v11318_v10  ;;  %v11408_v9 = vld [vmem:[#allocation12 + $0x3e8] ss:$16 sps:$4 sm:$0xff]   ;;  %v11413_v10 = vld [vmem:[#allocation12 + $0x404] ss:$16 sps:$4 sm:$0xff]  }
 0x2ef   :  { %2255 = vmatprep.subr.bf16.mxu0 %v11323_v11  ;;  %2427 = vmatprep.subr.bf16.mxu1 %v11326_v12  ;;  %v11416_v11 = vld [vmem:[#allocation12 + $0x40c] ss:$16 sps:$4 sm:$0xff]   ;;  %v9964_v12 = vcombine.low %v13224_v33, %v13227_v34  ;;  %v11438_v33 = vld [vmem:[#allocation12 + $0x488] ss:$16 sps:$4 sm:$0xff]   ;;  %v11443_v34 = vld [vmem:[#allocation12 + $0x4a4] ss:$16 sps:$4 sm:$0xff]  }
 0x2f0   :  { %2285 = vmatprep.mubr.bf16.mxu0 %v9965_v37  ;;  %2457 = vmatprep.mubr.bf16.mxu1 %v9965_v37  ;;  %v11444_v37 = vld [vmem:[#allocation12 + $0x4a8] ss:$16 sps:$4 sm:$0xff]  }
 0x2f2   :  { %2256 = vmatpush1.bf16.msra.mxu0 %v11321_v13  ;;  %2428 = vmatpush1.bf16.msra.mxu1 %v11324_v14  ;;  %v11411_v13 = vld [vmem:[#allocation12 + $0x400] ss:$16 sps:$4 sm:$0xff]   ;;  %v11414_v14 = vld [vmem:[#allocation12 + $0x408] ss:$16 sps:$4 sm:$0xff]  }
 0x2f3   :  { %2257 = vmatprep.subr.bf16.mxu0 %v11329_v15  ;;  %2429 = vmatprep.subr.bf16.mxu1 %v11332_v16  ;;  %v11419_v15 = vld [vmem:[#allocation12 + $0x424] ss:$16 sps:$4 sm:$0xff]   ;;  %v11422_v16 = vld [vmem:[#allocation12 + $0x42c] ss:$16 sps:$4 sm:$0xff]  }
 0x2f6   :  { %2258 = vmatpush1.bf16.msra.mxu0 %v11327_v17  ;;  %2430 = vmatpush1.bf16.msra.mxu1 %v11330_v18  ;;  %v13234_v17 = vld [vmem:[%s13982_s7 + $0x10] sm:$0xff] }
 0x2f7   :  { %2259 = vmatprep.subr.bf16.mxu0 %v11335_v19  ;;  %2431 = vmatprep.subr.bf16.mxu1 %v11338_v20  ;;  %v13237_v18 = vld [vmem:[%s13982_s7 + $0x30] sm:$0xff]  ;;  %v11417_v20 = vld [vmem:[#allocation12 + $0x420] ss:$16 sps:$4 sm:$0xff]  }
 0x2f8   :  { %v9967_v19 = vcombine.high %v13234_v17, %v13237_v18 }
 0x2fa   :  { %2260 = vmatpush1.bf16.msra.mxu0 %v11333_v21  ;;  %2432 = vmatpush1.bf16.msra.mxu1 %v11336_v22  ;;  %v11420_v21 = vld [vmem:[#allocation12 + $0x428] ss:$16 sps:$4 sm:$0xff]   ;;  %v11425_v22 = vld [vmem:[#allocation12 + $0x444] ss:$16 sps:$4 sm:$0xff]  }
 0x2fb   :  { %2261 = vmatprep.subr.bf16.mxu0 %v11341_v23  ;;  %2433 = vmatprep.subr.bf16.mxu1 %v11344_v24  ;;  %v11428_v23 = vld [vmem:[#allocation12 + $0x44c] ss:$16 sps:$4 sm:$0xff]   ;;  %v11423_v24 = vld [vmem:[#allocation12 + $0x440] ss:$16 sps:$4 sm:$0xff]  }
 0x2fe   :  { %2262 = vmatpush1.bf16.msra.mxu0 %v11339_v25  ;;  %2434 = vmatpush1.bf16.msra.mxu1 %v11342_v26  ;;  %v11426_v25 = vld [vmem:[#allocation12 + $0x448] ss:$16 sps:$4 sm:$0xff]   ;;  %v11431_v26 = vld [vmem:[#allocation12 + $0x464] ss:$16 sps:$4 sm:$0xff]  }
 0x2ff   :  { %2263 = vmatprep.subr.bf16.mxu0 %v11347_v27  ;;  %2435 = vmatprep.subr.bf16.mxu1 %v11350_v28  ;;  %v11434_v27 = vld [vmem:[#allocation12 + $0x46c] ss:$16 sps:$4 sm:$0xff]   ;;  %v11429_v28 = vld [vmem:[#allocation12 + $0x460] ss:$16 sps:$4 sm:$0xff]  }
 0x302   :  { %2264 = vmatpush1.bf16.msra.mxu0 %v11345_v29  ;;  %2436 = vmatpush1.bf16.msra.mxu1 %v11348_v30  ;;  %v11432_v29 = vld [vmem:[#allocation12 + $0x468] ss:$16 sps:$4 sm:$0xff]   ;;  %v11437_v30 = vld [vmem:[#allocation12 + $0x484] ss:$16 sps:$4 sm:$0xff]  }
 0x303   :  { %2265 = vmatprep.subr.bf16.mxu0 %v11353_v31  ;;  %2437 = vmatprep.subr.bf16.mxu1 %v11356_v32  ;;  %v11440_v31 = vld [vmem:[#allocation12 + $0x48c] ss:$16 sps:$4 sm:$0xff]   ;;  %v11435_v32 = vld [vmem:[#allocation12 + $0x480] ss:$16 sps:$4 sm:$0xff]  }
 0x306   :  { %2266 = vmatpush1.bf16.msra.mxu0 %v11351_v35  ;;  %2438 = vmatpush1.bf16.msra.mxu1 %v11354_v36  ;;  %v11446_v35 = vld [vmem:[#allocation12 + $0x4ac] ss:$16 sps:$4 sm:$0xff]   ;;  %v11441_v36 = vld [vmem:[#allocation12 + $0x4a0] ss:$16 sps:$4 sm:$0xff]  }
 0x307   :  { %2267 = vmatprep.subr.bf16.mxu0 %v11359_v38  ;;  %2439 = vmatprep.subr.bf16.mxu1 %v11362_v39  ;;  %v11449_v38 = vld [vmem:[#allocation12 + $0x4c4] ss:$16 sps:$4 sm:$0xff]   ;;  %v11452_v39 = vld [vmem:[#allocation12 + $0x4cc] ss:$16 sps:$4 sm:$0xff]  }
 0x30a   :  { %2268 = vmatpush1.bf16.msra.mxu0 %v11357_v40  ;;  %2440 = vmatpush1.bf16.msra.mxu1 %v11360_v41  ;;  %v11447_v40 = vld [vmem:[#allocation12 + $0x4c0] ss:$16 sps:$4 sm:$0xff]   ;;  %v11450_v41 = vld [vmem:[#allocation12 + $0x4c8] ss:$16 sps:$4 sm:$0xff]  }
 0x30b   :  { %2269 = vmatprep.subr.bf16.mxu0 %v11365_v42  ;;  %2441 = vmatprep.subr.bf16.mxu1 %v11368_v43  ;;  %v11455_v42 = vld [vmem:[#allocation12 + $0x4e4] ss:$16 sps:$4 sm:$0xff]   ;;  %v11458_v43 = vld [vmem:[#allocation12 + $0x4ec] ss:$16 sps:$4 sm:$0xff]  }
 0x30e   :  { %2270 = vmatpush1.bf16.msra.mxu0 %v11363_v44  ;;  %2442 = vmatpush1.bf16.msra.mxu1 %v11366_v45  ;;  %v11453_v44 = vld [vmem:[#allocation12 + $0x4e0] ss:$16 sps:$4 sm:$0xff]   ;;  %v11456_v45 = vld [vmem:[#allocation12 + $0x4e8] ss:$16 sps:$4 sm:$0xff]  }
 0x30f   :  { %2271 = vmatprep.subr.bf16.mxu0 %v11371_v46  ;;  %2443 = vmatprep.subr.bf16.mxu1 %v11374_v47  ;;  %v11461_v46 = vld [vmem:[#allocation12 + $0x504] ss:$16 sps:$4 sm:$0xff]   ;;  %v11464_v47 = vld [vmem:[#allocation12 + $0x50c] ss:$16 sps:$4 sm:$0xff]  }
 0x312   :  { %2272 = vmatpush1.bf16.msra.mxu0 %v11369_v48  ;;  %2444 = vmatpush1.bf16.msra.mxu1 %v11372_v49  ;;  %v11459_v48 = vld [vmem:[#allocation12 + $0x500] ss:$16 sps:$4 sm:$0xff]   ;;  %v11462_v49 = vld [vmem:[#allocation12 + $0x508] ss:$16 sps:$4 sm:$0xff]  }
 0x313   :  { %2273 = vmatprep.subr.bf16.mxu0 %v11377_v50  ;;  %2445 = vmatprep.subr.bf16.mxu1 %v11380_v51  ;;  %v11467_v50 = vld [vmem:[#allocation12 + $0x524] ss:$16 sps:$4 sm:$0xff]   ;;  %v11470_v51 = vld [vmem:[#allocation12 + $0x52c] ss:$16 sps:$4 sm:$0xff]  }
 0x316   :  { %2274 = vmatpush1.bf16.msra.mxu0 %v11375_v52  ;;  %2446 = vmatpush1.bf16.msra.mxu1 %v11378_v53  ;;  %v11465_v52 = vld [vmem:[#allocation12 + $0x520] ss:$16 sps:$4 sm:$0xff]   ;;  %v11468_v53 = vld [vmem:[#allocation12 + $0x528] ss:$16 sps:$4 sm:$0xff]  }
 0x317   :  { %2275 = vmatprep.subr.bf16.mxu0 %v11383_v54  ;;  %2447 = vmatprep.subr.bf16.mxu1 %v11386_v55  ;;  %v11473_v54 = vld [vmem:[#allocation12 + $0x544] ss:$16 sps:$4 sm:$0xff]   ;;  %v11476_v55 = vld [vmem:[#allocation12 + $0x54c] ss:$16 sps:$4 sm:$0xff]  }
 0x31a   :  { %2276 = vmatpush1.bf16.msra.mxu0 %v11381_v56  ;;  %2448 = vmatpush1.bf16.msra.mxu1 %v11384_v57  ;;  %v11471_v56 = vld [vmem:[#allocation12 + $0x540] ss:$16 sps:$4 sm:$0xff]   ;;  %v11474_v57 = vld [vmem:[#allocation12 + $0x548] ss:$16 sps:$4 sm:$0xff]  }
 0x31b   :  { %2277 = vmatprep.subr.bf16.mxu0 %v11389_v58  ;;  %2449 = vmatprep.subr.bf16.mxu1 %v11392_v59  ;;  %v11479_v58 = vld [vmem:[#allocation12 + $0x564] ss:$16 sps:$4 sm:$0xff]   ;;  %v11482_v59 = vld [vmem:[#allocation12 + $0x56c] ss:$16 sps:$4 sm:$0xff]  }
 0x31e   :  { %2278 = vmatpush1.bf16.msra.mxu0 %v11387_v60  ;;  %2450 = vmatpush1.bf16.msra.mxu1 %v11390_v61  ;;  %v11477_v60 = vld [vmem:[#allocation12 + $0x560] ss:$16 sps:$4 sm:$0xff]   ;;  %v11480_v61 = vld [vmem:[#allocation12 + $0x568] ss:$16 sps:$4 sm:$0xff]  }
 0x31f   :  { %2279 = vmatprep.subr.bf16.mxu0 %v11395_v62  ;;  %2451 = vmatprep.subr.bf16.mxu1 %v11398_v63  ;;  %v11485_v62 = vld [vmem:[#allocation12 + $0x584] ss:$16 sps:$4 sm:$0xff]   ;;  %v11488_v63 = vld [vmem:[#allocation12 + $0x58c] ss:$16 sps:$4 sm:$0xff]  }
 0x322   :  { %2280 = vmatpush1.bf16.msra.mxu0 %v11393_v0  ;;  %2452 = vmatpush1.bf16.msra.mxu1 %v11396_v1  ;;  %v11483_v0 = vld [vmem:[#allocation12 + $0x580] ss:$16 sps:$4 sm:$0xff]   ;;  %v11486_v1 = vld [vmem:[#allocation12 + $0x588] ss:$16 sps:$4 sm:$0xff]  }
 0x323   :  { %2281 = vmatprep.subr.bf16.mxu0 %v11401_v2  ;;  %2453 = vmatprep.subr.bf16.mxu1 %v11404_v3  ;;  %v11491_v2 = vld [vmem:[#allocation12 + $0x5a4] ss:$16 sps:$4 sm:$0xff]   ;;  %v11494_v3 = vld [vmem:[#allocation12 + $0x5ac] ss:$16 sps:$4 sm:$0xff]  }
 0x326   :  { %2282 = vmatpush1.bf16.msra.mxu0 %v11399_v4  ;;  %2454 = vmatpush1.bf16.msra.mxu1 %v11402_v5  ;;  %v11489_v4 = vld [vmem:[#allocation12 + $0x5a0] ss:$16 sps:$4 sm:$0xff]   ;;  %v11492_v5 = vld [vmem:[#allocation12 + $0x5a8] ss:$16 sps:$4 sm:$0xff]  }
 0x327   :  { %2283 = vmatprep.subr.bf16.mxu0 %v11407_v6  ;;  %2455 = vmatprep.subr.bf16.mxu1 %v11410_v7  ;;  %v11497_v6 = vld [vmem:[#allocation12 + $0x5c4] ss:$16 sps:$4 sm:$0xff]   ;;  %v11500_v7 = vld [vmem:[#allocation12 + $0x5cc] ss:$16 sps:$4 sm:$0xff]  }
 0x32a   :  { %2284 = vmatpush1.bf16.msra.mxu0 %v11405_v8  ;;  %2456 = vmatpush1.bf16.msra.mxu1 %v11408_v9  ;;  %v11495_v8 = vld [vmem:[#allocation12 + $0x5c0] ss:$16 sps:$4 sm:$0xff]   ;;  %v11498_v9 = vld [vmem:[#allocation12 + $0x5c8] ss:$16 sps:$4 sm:$0xff]  }
 0x32b   :  { %2296 = vmatprep.subr.bf16.mxu0 %v11413_v10  ;;  %2468 = vmatprep.subr.bf16.mxu1 %v11416_v11  ;;  %v11503_v10 = vld [vmem:[#allocation12 + $0x5e4] ss:$16 sps:$4 sm:$0xff]   ;;  %v11506_v11 = vld [vmem:[#allocation12 + $0x5ec] ss:$16 sps:$4 sm:$0xff]  }
 0x32d   :  { %2286 = vmatmul.mubr.bf16.vlgmr.msra.gmra.mrb[0].mxu0 %v9964_v12  ;;  %2458 = vmatmul.mubr.bf16.vlgmr.msra.gmra.mrb[0].mxu1 %v9964_v12  ;;  %v11501_v12 = vld [vmem:[#allocation12 + $0x5e0] ss:$16 sps:$4 sm:$0xff]  }
 0x32e   :  { %2297 = vmatpush1.bf16.msra.mxu0 %v11411_v13  ;;  %2469 = vmatpush1.bf16.msra.mxu1 %v11414_v14  ;;  %v11504_v13 = vld [vmem:[#allocation12 + $0x5e8] ss:$16 sps:$4 sm:$0xff]   ;;  %v11509_v14 = vld [vmem:[#allocation12 + $0x604] ss:$16 sps:$4 sm:$0xff]  }
 0x32f   :  { %2298 = vmatprep.subr.bf16.mxu0 %v11419_v15  ;;  %2470 = vmatprep.subr.bf16.mxu1 %v11422_v16  ;;  %v11512_v15 = vld [vmem:[#allocation12 + $0x60c] ss:$16 sps:$4 sm:$0xff]   ;;  %v11507_v16 = vld [vmem:[#allocation12 + $0x600] ss:$16 sps:$4 sm:$0xff]  }
 0x330   :  { %2328 = vmatprep.mubr.bf16.mxu0 %v9967_v19  ;;  %2500 = vmatprep.mubr.bf16.mxu1 %v9967_v19  ;;  %v11510_v19 = vld [vmem:[#allocation12 + $0x608] ss:$16 sps:$4 sm:$0xff]  }
 0x332   :  { %2299 = vmatpush1.bf16.msra.mxu0 %v11417_v20  ;;  %2471 = vmatpush1.bf16.msra.mxu1 %v11420_v21  ;;  %v9966_v20 = vcombine.low %v13234_v17, %v13237_v18  ;;  %v11515_v21 = vld [vmem:[#allocation12 + $0x624] ss:$16 sps:$4 sm:$0xff]   ;;  %v11519_v17 = vld [vmem:[#allocation12 + $0x640] ss:$16 sps:$4 sm:$0xff]   ;;  %v11522_v18 = vld [vmem:[#allocation12 + $0x648] ss:$16 sps:$4 sm:$0xff]  }
 0x333   :  { %2300 = vmatprep.subr.bf16.mxu0 %v11425_v22  ;;  %2472 = vmatprep.subr.bf16.mxu1 %v11428_v23  ;;  %v13244_v22 = vld [vmem:[%s13982_s7 + $0x18] sm:$0xff] }
 0x334   :  { %v13247_v23 = vld [vmem:[%s13982_s7 + $0x38] sm:$0xff] }
 0x336   :  { %2301 = vmatpush1.bf16.msra.mxu0 %v11423_v24  ;;  %2473 = vmatpush1.bf16.msra.mxu1 %v11426_v25  ;;  %v11518_v24 = vld [vmem:[#allocation12 + $0x62c] ss:$16 sps:$4 sm:$0xff]   ;;  %v11513_v25 = vld [vmem:[#allocation12 + $0x620] ss:$16 sps:$4 sm:$0xff]  }
 0x337   :  { %2302 = vmatprep.subr.bf16.mxu0 %v11431_v26  ;;  %2474 = vmatprep.subr.bf16.mxu1 %v11434_v27  ;;  %v11516_v26 = vld [vmem:[#allocation12 + $0x628] ss:$16 sps:$4 sm:$0xff]   ;;  %v9969_v27 = vcombine.high %v13244_v22, %v13247_v23 }
 0x33a   :  { %2303 = vmatpush1.bf16.msra.mxu0 %v11429_v28  ;;  %2475 = vmatpush1.bf16.msra.mxu1 %v11432_v29  ;;  %v11521_v28 = vld [vmem:[#allocation12 + $0x644] ss:$16 sps:$4 sm:$0xff]   ;;  %v11524_v29 = vld [vmem:[#allocation12 + $0x64c] ss:$16 sps:$4 sm:$0xff]  }
 0x33b   :  { %2304 = vmatprep.subr.bf16.mxu0 %v11437_v30  ;;  %2476 = vmatprep.subr.bf16.mxu1 %v11440_v31  ;;  %v11527_v30 = vld [vmem:[#allocation12 + $0x664] ss:$16 sps:$4 sm:$0xff]   ;;  %v11530_v31 = vld [vmem:[#allocation12 + $0x66c] ss:$16 sps:$4 sm:$0xff]  }
 0x33e   :  { %2305 = vmatpush1.bf16.msra.mxu0 %v11435_v32  ;;  %2477 = vmatpush1.bf16.msra.mxu1 %v11438_v33  ;;  %v11525_v32 = vld [vmem:[#allocation12 + $0x660] ss:$16 sps:$4 sm:$0xff]   ;;  %v11528_v33 = vld [vmem:[#allocation12 + $0x668] ss:$16 sps:$4 sm:$0xff]  }
 0x33f   :  { %2306 = vmatprep.subr.bf16.mxu0 %v11443_v34  ;;  %2478 = vmatprep.subr.bf16.mxu1 %v11446_v35  ;;  %v11533_v34 = vld [vmem:[#allocation12 + $0x684] ss:$16 sps:$4 sm:$0xff]   ;;  %v11536_v35 = vld [vmem:[#allocation12 + $0x68c] ss:$16 sps:$4 sm:$0xff]  }
 0x342   :  { %2307 = vmatpush1.bf16.msra.mxu0 %v11441_v36  ;;  %2479 = vmatpush1.bf16.msra.mxu1 %v11444_v37  ;;  %v11531_v36 = vld [vmem:[#allocation12 + $0x680] ss:$16 sps:$4 sm:$0xff]   ;;  %v11534_v37 = vld [vmem:[#allocation12 + $0x688] ss:$16 sps:$4 sm:$0xff]  }
 0x343   :  { %2308 = vmatprep.subr.bf16.mxu0 %v11449_v38  ;;  %2480 = vmatprep.subr.bf16.mxu1 %v11452_v39  ;;  %v11539_v38 = vld [vmem:[#allocation12 + $0x6a4] ss:$16 sps:$4 sm:$0xff]   ;;  %v11542_v39 = vld [vmem:[#allocation12 + $0x6ac] ss:$16 sps:$4 sm:$0xff]  }
 0x346   :  { %2309 = vmatpush1.bf16.msra.mxu0 %v11447_v40  ;;  %2481 = vmatpush1.bf16.msra.mxu1 %v11450_v41  ;;  %v11537_v40 = vld [vmem:[#allocation12 + $0x6a0] ss:$16 sps:$4 sm:$0xff]   ;;  %v11540_v41 = vld [vmem:[#allocation12 + $0x6a8] ss:$16 sps:$4 sm:$0xff]  }
 0x347   :  { %2310 = vmatprep.subr.bf16.mxu0 %v11455_v42  ;;  %2482 = vmatprep.subr.bf16.mxu1 %v11458_v43  ;;  %v11545_v42 = vld [vmem:[#allocation12 + $0x6c4] ss:$16 sps:$4 sm:$0xff]   ;;  %v11548_v43 = vld [vmem:[#allocation12 + $0x6cc] ss:$16 sps:$4 sm:$0xff]  }
 0x34a   :  { %2311 = vmatpush1.bf16.msra.mxu0 %v11453_v44  ;;  %2483 = vmatpush1.bf16.msra.mxu1 %v11456_v45  ;;  %v11543_v44 = vld [vmem:[#allocation12 + $0x6c0] ss:$16 sps:$4 sm:$0xff]   ;;  %v11546_v45 = vld [vmem:[#allocation12 + $0x6c8] ss:$16 sps:$4 sm:$0xff]  }
 0x34b   :  { %2312 = vmatprep.subr.bf16.mxu0 %v11461_v46  ;;  %2484 = vmatprep.subr.bf16.mxu1 %v11464_v47  ;;  %v11551_v46 = vld [vmem:[#allocation12 + $0x6e4] ss:$16 sps:$4 sm:$0xff]   ;;  %v11554_v47 = vld [vmem:[#allocation12 + $0x6ec] ss:$16 sps:$4 sm:$0xff]  }
 0x34e   :  { %2313 = vmatpush1.bf16.msra.mxu0 %v11459_v48  ;;  %2485 = vmatpush1.bf16.msra.mxu1 %v11462_v49  ;;  %v11549_v48 = vld [vmem:[#allocation12 + $0x6e0] ss:$16 sps:$4 sm:$0xff]   ;;  %v11552_v49 = vld [vmem:[#allocation12 + $0x6e8] ss:$16 sps:$4 sm:$0xff]  }
 0x34f   :  { %2314 = vmatprep.subr.bf16.mxu0 %v11467_v50  ;;  %2486 = vmatprep.subr.bf16.mxu1 %v11470_v51  ;;  %v11557_v50 = vld [vmem:[#allocation12 + $0x704] ss:$16 sps:$4 sm:$0xff]   ;;  %v11560_v51 = vld [vmem:[#allocation12 + $0x70c] ss:$16 sps:$4 sm:$0xff]  }
 0x352   :  { %2315 = vmatpush1.bf16.msra.mxu0 %v11465_v52  ;;  %2487 = vmatpush1.bf16.msra.mxu1 %v11468_v53  ;;  %v11555_v52 = vld [vmem:[#allocation12 + $0x700] ss:$16 sps:$4 sm:$0xff]   ;;  %v11558_v53 = vld [vmem:[#allocation12 + $0x708] ss:$16 sps:$4 sm:$0xff]  }
 0x353   :  { %2316 = vmatprep.subr.bf16.mxu0 %v11473_v54  ;;  %2488 = vmatprep.subr.bf16.mxu1 %v11476_v55  ;;  %v11563_v54 = vld [vmem:[#allocation12 + $0x724] ss:$16 sps:$4 sm:$0xff]   ;;  %v11566_v55 = vld [vmem:[#allocation12 + $0x72c] ss:$16 sps:$4 sm:$0xff]  }
 0x356   :  { %2317 = vmatpush1.bf16.msra.mxu0 %v11471_v56  ;;  %2489 = vmatpush1.bf16.msra.mxu1 %v11474_v57  ;;  %v11561_v56 = vld [vmem:[#allocation12 + $0x720] ss:$16 sps:$4 sm:$0xff]   ;;  %v11564_v57 = vld [vmem:[#allocation12 + $0x728] ss:$16 sps:$4 sm:$0xff]  }
 0x357   :  { %2318 = vmatprep.subr.bf16.mxu0 %v11479_v58  ;;  %2490 = vmatprep.subr.bf16.mxu1 %v11482_v59  ;;  %v11569_v58 = vld [vmem:[#allocation12 + $0x744] ss:$16 sps:$4 sm:$0xff]   ;;  %v11572_v59 = vld [vmem:[#allocation12 + $0x74c] ss:$16 sps:$4 sm:$0xff]  }
 0x35a   :  { %2319 = vmatpush1.bf16.msra.mxu0 %v11477_v60  ;;  %2491 = vmatpush1.bf16.msra.mxu1 %v11480_v61  ;;  %v11567_v60 = vld [vmem:[#allocation12 + $0x740] ss:$16 sps:$4 sm:$0xff]   ;;  %v11570_v61 = vld [vmem:[#allocation12 + $0x748] ss:$16 sps:$4 sm:$0xff]  }
 0x35b   :  { %2320 = vmatprep.subr.bf16.mxu0 %v11485_v62  ;;  %2492 = vmatprep.subr.bf16.mxu1 %v11488_v63  ;;  %v11575_v62 = vld [vmem:[#allocation12 + $0x764] ss:$16 sps:$4 sm:$0xff]   ;;  %v11578_v63 = vld [vmem:[#allocation12 + $0x76c] ss:$16 sps:$4 sm:$0xff]  }
 0x35e   :  { %2321 = vmatpush1.bf16.msra.mxu0 %v11483_v0  ;;  %2493 = vmatpush1.bf16.msra.mxu1 %v11486_v1  ;;  %v11573_v0 = vld [vmem:[#allocation12 + $0x760] ss:$16 sps:$4 sm:$0xff]   ;;  %v11576_v1 = vld [vmem:[#allocation12 + $0x768] ss:$16 sps:$4 sm:$0xff]  }
 0x35f   :  { %2322 = vmatprep.subr.bf16.mxu0 %v11491_v2  ;;  %2494 = vmatprep.subr.bf16.mxu1 %v11494_v3  ;;  %v11581_v2 = vld [vmem:[#allocation12 + $0x784] ss:$16 sps:$4 sm:$0xff]   ;;  %v11584_v3 = vld [vmem:[#allocation12 + $0x78c] ss:$16 sps:$4 sm:$0xff]  }
 0x362   :  { %2323 = vmatpush1.bf16.msra.mxu0 %v11489_v4  ;;  %2495 = vmatpush1.bf16.msra.mxu1 %v11492_v5  ;;  %v11579_v4 = vld [vmem:[#allocation12 + $0x780] ss:$16 sps:$4 sm:$0xff]   ;;  %v11582_v5 = vld [vmem:[#allocation12 + $0x788] ss:$16 sps:$4 sm:$0xff]  }
 0x363   :  { %2324 = vmatprep.subr.bf16.mxu0 %v11497_v6  ;;  %2496 = vmatprep.subr.bf16.mxu1 %v11500_v7  ;;  %v11587_v6 = vld [vmem:[#allocation12 + $0x7a4] ss:$16 sps:$4 sm:$0xff]   ;;  %v11590_v7 = vld [vmem:[#allocation12 + $0x7ac] ss:$16 sps:$4 sm:$0xff]  }
 0x366   :  { %2325 = vmatpush1.bf16.msra.mxu0 %v11495_v8  ;;  %2497 = vmatpush1.bf16.msra.mxu1 %v11498_v9  ;;  %v11585_v8 = vld [vmem:[#allocation12 + $0x7a0] ss:$16 sps:$4 sm:$0xff]   ;;  %v11588_v9 = vld [vmem:[#allocation12 + $0x7a8] ss:$16 sps:$4 sm:$0xff]  }
 0x367   :  { %2326 = vmatprep.subr.bf16.mxu0 %v11503_v10  ;;  %2498 = vmatprep.subr.bf16.mxu1 %v11506_v11  ;;  %v11593_v10 = vld [vmem:[#allocation12 + $0x7c4] ss:$16 sps:$4 sm:$0xff]   ;;  %v11596_v11 = vld [vmem:[#allocation12 + $0x7cc] ss:$16 sps:$4 sm:$0xff]  }
 0x36a   :  { %2327 = vmatpush1.bf16.msra.mxu0 %v11501_v12  ;;  %2499 = vmatpush1.bf16.msra.mxu1 %v11504_v13  ;;  %v11591_v12 = vld [vmem:[#allocation12 + $0x7c0] ss:$16 sps:$4 sm:$0xff]   ;;  %v11594_v13 = vld [vmem:[#allocation12 + $0x7c8] ss:$16 sps:$4 sm:$0xff]  }
 0x36b   :  { %2339 = vmatprep.subr.bf16.mxu0 %v11509_v14  ;;  %2511 = vmatprep.subr.bf16.mxu1 %v11512_v15  ;;  %v11599_v14 = vld [vmem:[#allocation12 + $0x7e4] ss:$16 sps:$4 sm:$0xff]   ;;  %v11602_v15 = vld [vmem:[#allocation12 + $0x7ec] ss:$16 sps:$4 sm:$0xff]  }
 0x36d   :  { %2329 = vmatmul.mubr.bf16.vlgmr.msra.gmra.mrb[0].mxu0 %v9966_v20  ;;  %2501 = vmatmul.mubr.bf16.vlgmr.msra.gmra.mrb[0].mxu1 %v9966_v20  ;;  %v11605_v20 = vld [vmem:[#allocation15 + $0x4] ss:$8 sps:$4 sm:$0xff]  }
 0x36e   :  { %2340 = vmatpush1.bf16.msra.mxu0 %v11507_v16  ;;  %2512 = vmatpush1.bf16.msra.mxu1 %v11510_v19  ;;  %v11597_v16 = vld [vmem:[#allocation12 + $0x7e0] ss:$16 sps:$4 sm:$0xff]   ;;  %v11600_v19 = vld [vmem:[#allocation12 + $0x7e8] ss:$16 sps:$4 sm:$0xff]  }
 0x36f   :  { %2341 = vmatprep.subr.bf16.mxu0 %v11515_v21  ;;  %2513 = vmatprep.subr.bf16.mxu1 %v11518_v24  ;;  %v9968_v21 = vcombine.low %v13244_v22, %v13247_v23  ;;  %v11603_v24 = vld [vmem:[#allocation15] ss:$8 sps:$4 sm:$0xff]   ;;  %v11620_v23 = vld [vmem:[#allocation15 + $0x54] ss:$8 sps:$4 sm:$0xff]  }
 0x370   :  { %2371 = vmatprep.mubr.bf16.mxu0 %v9969_v27  ;;  %2543 = vmatprep.mubr.bf16.mxu1 %v9969_v27  ;;  %v11611_v27 = vld [vmem:[#allocation15 + $0x24] ss:$8 sps:$4 sm:$0xff]   ;;  %v11615_v22 = vld [vmem:[#allocation15 + $0x40] ss:$8 sps:$4 sm:$0xff]  }
 0x372   :  { %2342 = vmatpush1.bf16.msra.mxu0 %v11513_v25  ;;  %2514 = vmatpush1.bf16.msra.mxu1 %v11516_v26  ;;  %v11608_v25 = vld [vmem:[#allocation15 + $0x14] ss:$8 sps:$4 sm:$0xff]   ;;  %v11606_v26 = vld [vmem:[#allocation15 + $0x10] ss:$8 sps:$4 sm:$0xff]  }
 0x373   :  { %2343 = vmatprep.subr.bf16.mxu0 %v11521_v28  ;;  %2515 = vmatprep.subr.bf16.mxu1 %v11524_v29  ;;  %v11609_v28 = vld [vmem:[#allocation15 + $0x20] ss:$8 sps:$4 sm:$0xff]   ;;  %v11614_v29 = vld [vmem:[#allocation15 + $0x34] ss:$8 sps:$4 sm:$0xff]  }
 0x376   :  { %2344 = vmatpush1.bf16.msra.mxu0 %v11519_v17  ;;  %2516 = vmatpush1.bf16.msra.mxu1 %v11522_v18  ;;  %v11612_v17 = vld [vmem:[#allocation15 + $0x30] ss:$8 sps:$4 sm:$0xff]   ;;  %v11617_v18 = vld [vmem:[#allocation15 + $0x44] ss:$8 sps:$4 sm:$0xff]  }
 0x377   :  { %2345 = vmatprep.subr.bf16.mxu0 %v11527_v30  ;;  %2517 = vmatprep.subr.bf16.mxu1 %v11530_v31  ;;  %v11618_v30 = vld [vmem:[#allocation15 + $0x50] ss:$8 sps:$4 sm:$0xff]   ;;  %v11623_v31 = vld [vmem:[#allocation15 + $0x64] ss:$8 sps:$4 sm:$0xff]  }
 0x37a   :  { %2346 = vmatpush1.bf16.msra.mxu0 %v11525_v32  ;;  %2518 = vmatpush1.bf16.msra.mxu1 %v11528_v33  ;;  %v11621_v32 = vld [vmem:[#allocation15 + $0x60] ss:$8 sps:$4 sm:$0xff]   ;;  %v11626_v33 = vld [vmem:[#allocation15 + $0x74] ss:$8 sps:$4 sm:$0xff]  }
 0x37b   :  { %2347 = vmatprep.subr.bf16.mxu0 %v11533_v34  ;;  %2519 = vmatprep.subr.bf16.mxu1 %v11536_v35  ;;  %v11624_v34 = vld [vmem:[#allocation15 + $0x70] ss:$8 sps:$4 sm:$0xff]   ;;  %v11629_v35 = vld [vmem:[#allocation15 + $0x84] ss:$8 sps:$4 sm:$0xff]  }
 0x37e   :  { %2348 = vmatpush1.bf16.msra.mxu0 %v11531_v36  ;;  %2520 = vmatpush1.bf16.msra.mxu1 %v11534_v37  ;;  %v11627_v36 = vld [vmem:[#allocation15 + $0x80] ss:$8 sps:$4 sm:$0xff]   ;;  %v11632_v37 = vld [vmem:[#allocation15 + $0x94] ss:$8 sps:$4 sm:$0xff]  }
 0x37f   :  { %2349 = vmatprep.subr.bf16.mxu0 %v11539_v38  ;;  %2521 = vmatprep.subr.bf16.mxu1 %v11542_v39  ;;  %v11630_v38 = vld [vmem:[#allocation15 + $0x90] ss:$8 sps:$4 sm:$0xff]   ;;  %v11635_v39 = vld [vmem:[#allocation15 + $0xa4] ss:$8 sps:$4 sm:$0xff]  }
 0x382   :  { %2350 = vmatpush1.bf16.msra.mxu0 %v11537_v40  ;;  %2522 = vmatpush1.bf16.msra.mxu1 %v11540_v41  ;;  %v11633_v40 = vld [vmem:[#allocation15 + $0xa0] ss:$8 sps:$4 sm:$0xff]   ;;  %v11638_v41 = vld [vmem:[#allocation15 + $0xb4] ss:$8 sps:$4 sm:$0xff]  }
 0x383   :  { %2351 = vmatprep.subr.bf16.mxu0 %v11545_v42  ;;  %2523 = vmatprep.subr.bf16.mxu1 %v11548_v43  ;;  %v11636_v42 = vld [vmem:[#allocation15 + $0xb0] ss:$8 sps:$4 sm:$0xff]   ;;  %v11641_v43 = vld [vmem:[#allocation15 + $0xc4] ss:$8 sps:$4 sm:$0xff]  }
 0x386   :  { %2352 = vmatpush1.bf16.msra.mxu0 %v11543_v44  ;;  %2524 = vmatpush1.bf16.msra.mxu1 %v11546_v45  ;;  %v11639_v44 = vld [vmem:[#allocation15 + $0xc0] ss:$8 sps:$4 sm:$0xff]   ;;  %v11644_v45 = vld [vmem:[#allocation15 + $0xd4] ss:$8 sps:$4 sm:$0xff]  }
 0x387   :  { %2353 = vmatprep.subr.bf16.mxu0 %v11551_v46  ;;  %2525 = vmatprep.subr.bf16.mxu1 %v11554_v47  ;;  %v11642_v46 = vld [vmem:[#allocation15 + $0xd0] ss:$8 sps:$4 sm:$0xff]   ;;  %v11647_v47 = vld [vmem:[#allocation15 + $0xe4] ss:$8 sps:$4 sm:$0xff]  }
 0x38a   :  { %2354 = vmatpush1.bf16.msra.mxu0 %v11549_v48  ;;  %2526 = vmatpush1.bf16.msra.mxu1 %v11552_v49  ;;  %v11645_v48 = vld [vmem:[#allocation15 + $0xe0] ss:$8 sps:$4 sm:$0xff]   ;;  %v11650_v49 = vld [vmem:[#allocation15 + $0xf4] ss:$8 sps:$4 sm:$0xff]  }
 0x38b   :  { %2355 = vmatprep.subr.bf16.mxu0 %v11557_v50  ;;  %2527 = vmatprep.subr.bf16.mxu1 %v11560_v51  ;;  %v11648_v50 = vld [vmem:[#allocation15 + $0xf0] ss:$8 sps:$4 sm:$0xff]   ;;  %v11653_v51 = vld [vmem:[#allocation15 + $0x104] ss:$8 sps:$4 sm:$0xff]  }
 0x38e   :  { %2356 = vmatpush1.bf16.msra.mxu0 %v11555_v52  ;;  %2528 = vmatpush1.bf16.msra.mxu1 %v11558_v53  ;;  %v870_v52 = vlaneseq }
 0x38f   :  { %2357 = vmatprep.subr.bf16.mxu0 %v11563_v54  ;;  %2529 = vmatprep.subr.bf16.mxu1 %v11566_v55 }
 0x390   :  { %v13253_v53 = vshrl.u32 %v870_v52, 7  ;;  %v11692_v52 = vld [vmem:[#allocation15 + $0x1d4] ss:$8 sps:$4 sm:$0xff]  }
 0x392   :  { %2358 = vmatpush1.bf16.msra.mxu0 %v11561_v56  ;;  %2530 = vmatpush1.bf16.msra.mxu1 %v11564_v57  ;;  %v13256_v54 = vsub.s32 0, %v13253_v53  ;;  %v880_v55 = vsub.s32 2, %v13253_v53  ;;  %v868_v56 = vld [vmem:[#allocation13] sm:$0xf]  ;;  %v13260_v57 = vsub.s32 1, %v13253_v53 }
 0x393   :  { %2359 = vmatprep.subr.bf16.mxu0 %v11569_v58  ;;  %2531 = vmatprep.subr.bf16.mxu1 %v11572_v59  ;;  %v884_v58 = vsub.s32 3, %v13253_v53 }
 0x394   :  { %v873_v59 = vrot.slane %v868_v56, %v13256_v54 }
 0x396   :  { %2360 = vmatpush1.bf16.msra.mxu0 %v11567_v60  ;;  %2532 = vmatpush1.bf16.msra.mxu1 %v11570_v61  ;;  %v881_v60 = vrot.slane %v868_v56, %v880_v55  ;;  %v877_v61 = vrot.slane %v868_v56, %v13260_v57 }
 0x397   :  { %2361 = vmatprep.subr.bf16.mxu0 %v11575_v62  ;;  %2533 = vmatprep.subr.bf16.mxu1 %v11578_v63  ;;  %v885_v62 = vrot.slane %v868_v56, %v884_v58  ;;  %v11690_v56 = vld [vmem:[#allocation15 + $0x1d0] ss:$8 sps:$4 sm:$0xff]  }
 0x39a   :  { %2362 = vmatpush1.bf16.msra.mxu0 %v11573_v0  ;;  %2534 = vmatpush1.bf16.msra.mxu1 %v11576_v1 }
 0x39b   :  { %2363 = vmatprep.subr.bf16.mxu0 %v11581_v2  ;;  %2535 = vmatprep.subr.bf16.mxu1 %v11584_v3 }
 0x39e   :  { %2364 = vmatpush1.bf16.msra.mxu0 %v11579_v4  ;;  %2536 = vmatpush1.bf16.msra.mxu1 %v11582_v5 }
 0x39f   :  { %2365 = vmatprep.subr.bf16.mxu0 %v11587_v6  ;;  %2537 = vmatprep.subr.bf16.mxu1 %v11590_v7 }
 0x3a2   :  { %2366 = vmatpush1.bf16.msra.mxu0 %v11585_v8  ;;  %2538 = vmatpush1.bf16.msra.mxu1 %v11588_v9 }
 0x3a3   :  { %2367 = vmatprep.subr.bf16.mxu0 %v11593_v10  ;;  %2539 = vmatprep.subr.bf16.mxu1 %v11596_v11 }
 0x3a6   :  { %2368 = vmatpush1.bf16.msra.mxu0 %v11591_v12  ;;  %2540 = vmatpush1.bf16.msra.mxu1 %v11594_v13 }
 0x3a7   :  { %2369 = vmatprep.subr.bf16.mxu0 %v11599_v14  ;;  %2541 = vmatprep.subr.bf16.mxu1 %v11602_v15 }
 0x3aa   :  { %2370 = vmatpush1.bf16.msra.mxu0 %v11597_v16  ;;  %2542 = vmatpush1.bf16.msra.mxu1 %v11600_v19 }
 0x3ab   :  { %2962 = vmatprep.subr.bf16.mxu0 %v11605_v20 }
 0x3ad   :  { %2372 = vmatmul.mubr.bf16.vlgmr.msra.gmra.mrb[0].mxu0 %v9968_v21  ;;  %2544 = vmatmul.mubr.bf16.vlgmr.msra.gmra.mrb[0].mxu1 %v9968_v21 }
 0x3ae   :  { %2963 = vmatpush1.bf16.msra.mxu0 %v11603_v24 }
 0x3af   :  { %2964 = vmatprep.subr.bf16.mxu0 %v11608_v25 }
 0x3b2   :  { %2965 = vmatpush1.bf16.msra.mxu0 %v11606_v26 }
 0x3b3   :  { %2966 = vmatprep.subr.bf16.mxu0 %v11611_v27 }
 0x3b6   :  { %2967 = vmatpush1.bf16.msra.mxu0 %v11609_v28 }
 0x3b7   :  { %2968 = vmatprep.subr.bf16.mxu0 %v11614_v29 }
 0x3ba   :  { %2969 = vmatpush1.bf16.msra.mxu0 %v11612_v17 }
 0x3bb   :  { %2970 = vmatprep.subr.bf16.mxu0 %v11617_v18  ;;  %v11651_v18 = vld [vmem:[#allocation15 + $0x100] ss:$8 sps:$4 sm:$0xff]  }
 0x3be   :  { %2971 = vmatpush1.bf16.msra.mxu0 %v11615_v22  ;;  %v11656_v22 = vld [vmem:[#allocation15 + $0x114] ss:$8 sps:$4 sm:$0xff]  }
 0x3bf   :  { %2972 = vmatprep.subr.bf16.mxu0 %v11620_v23  ;;  %v11654_v23 = vld [vmem:[#allocation15 + $0x110] ss:$8 sps:$4 sm:$0xff]  }
 0x3c2   :  { %2973 = vmatpush1.bf16.msra.mxu0 %v11618_v30  ;;  %v11659_v30 = vld [vmem:[#allocation15 + $0x124] ss:$8 sps:$4 sm:$0xff]  }
 0x3c3   :  { %2974 = vmatprep.subr.bf16.mxu0 %v11623_v31  ;;  %v11657_v31 = vld [vmem:[#allocation15 + $0x120] ss:$8 sps:$4 sm:$0xff]  }
 0x3c6   :  { %2975 = vmatpush1.bf16.msra.mxu0 %v11621_v32  ;;  %v11662_v32 = vld [vmem:[#allocation15 + $0x134] ss:$8 sps:$4 sm:$0xff]  }
 0x3c7   :  { %2976 = vmatprep.subr.bf16.mxu0 %v11626_v33  ;;  %v11660_v33 = vld [vmem:[#allocation15 + $0x130] ss:$8 sps:$4 sm:$0xff]  }
 0x3ca   :  { %2977 = vmatpush1.bf16.msra.mxu0 %v11624_v34  ;;  %v11665_v34 = vld [vmem:[#allocation15 + $0x144] ss:$8 sps:$4 sm:$0xff]  }
 0x3cb   :  { %2978 = vmatprep.subr.bf16.mxu0 %v11629_v35  ;;  %v11663_v35 = vld [vmem:[#allocation15 + $0x140] ss:$8 sps:$4 sm:$0xff]  }
 0x3ce   :  { %2979 = vmatpush1.bf16.msra.mxu0 %v11627_v36  ;;  %v11668_v36 = vld [vmem:[#allocation15 + $0x154] ss:$8 sps:$4 sm:$0xff]  }
 0x3cf   :  { %2980 = vmatprep.subr.bf16.mxu0 %v11632_v37  ;;  %v11666_v37 = vld [vmem:[#allocation15 + $0x150] ss:$8 sps:$4 sm:$0xff]  }
 0x3d2   :  { %2981 = vmatpush1.bf16.msra.mxu0 %v11630_v38  ;;  %v11671_v38 = vld [vmem:[#allocation15 + $0x164] ss:$8 sps:$4 sm:$0xff]  }
 0x3d3   :  { %2982 = vmatprep.subr.bf16.mxu0 %v11635_v39  ;;  %v11669_v39 = vld [vmem:[#allocation15 + $0x160] ss:$8 sps:$4 sm:$0xff]  }
 0x3d6   :  { %2983 = vmatpush1.bf16.msra.mxu0 %v11633_v40  ;;  %v11674_v40 = vld [vmem:[#allocation15 + $0x174] ss:$8 sps:$4 sm:$0xff]  }
 0x3d7   :  { %2984 = vmatprep.subr.bf16.mxu0 %v11638_v41  ;;  %v11672_v41 = vld [vmem:[#allocation15 + $0x170] ss:$8 sps:$4 sm:$0xff]  }
 0x3da   :  { %2985 = vmatpush1.bf16.msra.mxu0 %v11636_v42  ;;  %v11677_v42 = vld [vmem:[#allocation15 + $0x184] ss:$8 sps:$4 sm:$0xff]  }
 0x3db   :  { %2986 = vmatprep.subr.bf16.mxu0 %v11641_v43  ;;  %v11675_v43 = vld [vmem:[#allocation15 + $0x180] ss:$8 sps:$4 sm:$0xff]  }
 0x3de   :  { %2987 = vmatpush1.bf16.msra.mxu0 %v11639_v44  ;;  %v11680_v44 = vld [vmem:[#allocation15 + $0x194] ss:$8 sps:$4 sm:$0xff]  }
 0x3df   :  { %2988 = vmatprep.subr.bf16.mxu0 %v11644_v45  ;;  %v11678_v45 = vld [vmem:[#allocation15 + $0x190] ss:$8 sps:$4 sm:$0xff]  }
 0x3e2   :  { %2989 = vmatpush1.bf16.msra.mxu0 %v11642_v46  ;;  %v11683_v46 = vld [vmem:[#allocation15 + $0x1a4] ss:$8 sps:$4 sm:$0xff]  }
 0x3e3   :  { %2990 = vmatprep.subr.bf16.mxu0 %v11647_v47  ;;  %v11681_v47 = vld [vmem:[#allocation15 + $0x1a0] ss:$8 sps:$4 sm:$0xff]  }
 0x3e6   :  { %2991 = vmatpush1.bf16.msra.mxu0 %v11645_v48  ;;  %v11686_v48 = vld [vmem:[#allocation15 + $0x1b4] ss:$8 sps:$4 sm:$0xff]  }
 0x3e7   :  { %2992 = vmatprep.subr.bf16.mxu0 %v11650_v49  ;;  %v11684_v49 = vld [vmem:[#allocation15 + $0x1b0] ss:$8 sps:$4 sm:$0xff]  }
 0x3ea   :  { %2993 = vmatpush1.bf16.msra.mxu0 %v11648_v50  ;;  %v11689_v50 = vld [vmem:[#allocation15 + $0x1c4] ss:$8 sps:$4 sm:$0xff]  }
 0x3eb   :  { %3005 = vmatprep.subr.bf16.mxu0 %v11653_v51  ;;  %v11687_v51 = vld [vmem:[#allocation15 + $0x1c0] ss:$8 sps:$4 sm:$0xff]  }
 0x480   :  { %v2373_v63 = vpop.f32.mrb[0].mxu0  ;;  %v2545_v0 = vpop.f32.mrb[0].mxu1 }
 0x481   :  { %v10805_v1 = vadd.f32 %v2373_v63, %v873_v59  ;;  %v10809_v2 = vadd.f32 %v2545_v0, %v881_v60  ;;  %v2375_v3 = vpop.f32.mrb[1].mxu0  ;;  %v2547_v4 = vpop.f32.mrb[1].mxu1  ;;  %v11699_v63 = vld [vmem:[#allocation24 + $0x40] sm:$0xff]  }
 0x482   :  { %v10806_v5 = vadd.f32 %v2375_v3, %v877_v61  ;;  %v10810_v6 = vadd.f32 %v2547_v4, %v885_v62  ;;  %v2377_v7 = vpop.f32.mrb[2].mxu0  ;;  %v2549_v8 = vpop.f32.mrb[2].mxu1  ;;  %v11700_v0 = vld [vmem:[#allocation24] sm:$0xff]   ;;  %v11703_v3 = vld [vmem:[#allocation24 + $0x50] sm:$0xff]  }
 0x483   :  { %v10807_v9 = vadd.f32 %v2377_v7, %v873_v59  ;;  %v10811_v10 = vadd.f32 %v2549_v8, %v881_v60  ;;  %v2379_v11 = vpop.f32.mrb[3].mxu0  ;;  %v2551_v12 = vpop.f32.mrb[3].mxu1  ;;  %v2554_v15 = vmax.f32 %v10805_v1, 0.0  ;;  %v2556_v16 = vmax.f32 %v10809_v2, 0.0  ;;  %v11695_v59 = vld [vmem:[#allocation15 + $0x1e4] ss:$8 sps:$4 sm:$0xff]  }
 0x484   :  { %v10808_v13 = vadd.f32 %v2379_v11, %v877_v61  ;;  %v10812_v14 = vadd.f32 %v2551_v12, %v885_v62  ;;  %v2555_v21 = vmax.f32 %v10806_v5, 0.0  ;;  %v2557_v24 = vmax.f32 %v10810_v6, 0.0  ;;  %v11693_v60 = vld [vmem:[#allocation15 + $0x1e0] ss:$8 sps:$4 sm:$0xff]   ;;  %v11698_v61 = vld [vmem:[#allocation15 + $0x1f4] ss:$8 sps:$4 sm:$0xff]  }
 0x485   :  { %v2558_v19 = vmax.f32 %v10807_v9, 0.0  ;;  %v2560_v20 = vmax.f32 %v10811_v10, 0.0  ;;  %v11696_v62 = vld [vmem:[#allocation15 + $0x1f0] ss:$8 sps:$4 sm:$0xff]   ;;  %v11705_v5 = vld [vmem:[#allocation24 + $0x58] sm:$0xff]   ;;  %v11707_v7 = vld [vmem:[#allocation24 + $0x60] sm:$0xff]  }
 0x486   :  { %v2559_v25 = vmax.f32 %v10808_v13, 0.0  ;;  %v2561_v26 = vmax.f32 %v10812_v14, 0.0  ;;  %v11701_v1 = vld [vmem:[#allocation24 + $0x48] sm:$0xff]   ;;  %v11704_v4 = vld [vmem:[#allocation24 + $0x10] sm:$0xff]   ;;  %v11706_v6 = vld [vmem:[#allocation24 + $0x18] sm:$0xff]  }
 0x487   :  { %v2562_v27 = vpack.c.bf16 %v2558_v19, %v2554_v15  ;;  %v13269_v28 = vpack.c.bf16 %v2560_v20, %v2556_v16  ;;  %v11702_v2 = vld [vmem:[#allocation24 + $0x8] sm:$0xff]   ;;  %v11708_v8 = vld [vmem:[#allocation24 + $0x20] sm:$0xff]   ;;  %v11711_v11 = vld [vmem:[#allocation24 + $0x70] sm:$0xff]   ;;  %v12824_v15 = vmov 0.0  }
 0x488   :  { %v2563_v29 = vpack.c.bf16 %v2559_v25, %v2555_v21  ;;  %v2565_v17 = vpack.c.bf16 %v2561_v26, %v2557_v24  ;;  %v11709_v9 = vld [vmem:[#allocation24 + $0x68] sm:$0xff]   ;;  %v11712_v12 = vld [vmem:[#allocation24 + $0x30] sm:$0xff]   ;;  %v11713_v13 = vld [vmem:[#allocation24 + $0x78] sm:$0xff]   ;;  %3120 = vmatprep.mubr.f32.mxu1 %v12824_v15 }
 0x489   :  { %v11710_v10 = vld [vmem:[#allocation24 + $0x28] sm:$0xff]   ;;  %v11714_v14 = vld [vmem:[#allocation24 + $0x38] sm:$0xff]  }
 0x48a   :  { %2994 = vmatprep.mubr.bf16.mxu0 %v2563_v29  ;;  %v2630_v16 = vld [vmem:[#allocation16] sm:$0x3] }
 0x48b   :  { %2995 = vmatmul.mubr.bf16.vlgmr.msra.gmra.mrb[4].mxu0 %v2562_v27  ;;  %v2635_v19 = vrot.slane %v2630_v16, %v13256_v54  ;;  %v2639_v20 = vrot.slane %v2630_v16, %v13260_v57 }
 0x48c   :  { %3006 = vmatpush1.bf16.msra.mxu0 %v11651_v18  ;;  %3037 = vmatprep.mubr.bf16.mxu0 %v2565_v17 }
 0x48d   :  { %3007 = vmatprep.subr.bf16.mxu0 %v11656_v22 }
 0x490   :  { %3008 = vmatpush1.bf16.msra.mxu0 %v11654_v23 }
 0x491   :  { %3009 = vmatprep.subr.bf16.mxu0 %v11659_v30  ;;  %v13281_v30 = vld [vmem:[#allocation8] sm:$0xff] }
 0x494   :  { %3010 = vmatpush1.bf16.msra.mxu0 %v11657_v31 }
 0x495   :  { %3011 = vmatprep.subr.bf16.mxu0 %v11662_v32  ;;  %v11717_v32 = vld [vmem:[#allocation18 + $0x4] ss:$8 sps:$4 sm:$0xff]  }
 0x498   :  { %3012 = vmatpush1.bf16.msra.mxu0 %v11660_v33 }
 0x499   :  { %3013 = vmatprep.subr.bf16.mxu0 %v11665_v34 }
 0x49c   :  { %3014 = vmatpush1.bf16.msra.mxu0 %v11663_v35  ;;  %v11715_v35 = vld [vmem:[#allocation18] ss:$8 sps:$4 sm:$0xff]  }
 0x49d   :  { %3015 = vmatprep.subr.bf16.mxu0 %v11668_v36  ;;  %v11720_v36 = vld [vmem:[#allocation18 + $0x14] ss:$8 sps:$4 sm:$0xff]  }
 0x4a0   :  { %3016 = vmatpush1.bf16.msra.mxu0 %v11666_v37  ;;  %v11718_v37 = vld [vmem:[#allocation18 + $0x10] ss:$8 sps:$4 sm:$0xff]  }
 0x4a1   :  { %3017 = vmatprep.subr.bf16.mxu0 %v11671_v38  ;;  %v11723_v38 = vld [vmem:[#allocation18 + $0x24] ss:$8 sps:$4 sm:$0xff]  }
 0x4a4   :  { %3018 = vmatpush1.bf16.msra.mxu0 %v11669_v39  ;;  %v11721_v39 = vld [vmem:[#allocation18 + $0x20] ss:$8 sps:$4 sm:$0xff]  }
 0x4a5   :  { %3019 = vmatprep.subr.bf16.mxu0 %v11674_v40  ;;  %v11726_v40 = vld [vmem:[#allocation18 + $0x34] ss:$8 sps:$4 sm:$0xff]  }
 0x4a8   :  { %3020 = vmatpush1.bf16.msra.mxu0 %v11672_v41  ;;  %v11724_v41 = vld [vmem:[#allocation18 + $0x30] ss:$8 sps:$4 sm:$0xff]  }
 0x4a9   :  { %3021 = vmatprep.subr.bf16.mxu0 %v11677_v42  ;;  %v11729_v42 = vld [vmem:[#allocation18 + $0x44] ss:$8 sps:$4 sm:$0xff]  }
 0x4ac   :  { %3022 = vmatpush1.bf16.msra.mxu0 %v11675_v43  ;;  %v11727_v43 = vld [vmem:[#allocation18 + $0x40] ss:$8 sps:$4 sm:$0xff]  }
 0x4ad   :  { %3023 = vmatprep.subr.bf16.mxu0 %v11680_v44  ;;  %v11732_v44 = vld [vmem:[#allocation18 + $0x54] ss:$8 sps:$4 sm:$0xff]  }
 0x4b0   :  { %3024 = vmatpush1.bf16.msra.mxu0 %v11678_v45  ;;  %v11730_v45 = vld [vmem:[#allocation18 + $0x50] ss:$8 sps:$4 sm:$0xff]  }
 0x4b1   :  { %3025 = vmatprep.subr.bf16.mxu0 %v11683_v46  ;;  %v11735_v46 = vld [vmem:[#allocation18 + $0x64] ss:$8 sps:$4 sm:$0xff]  }
 0x4b4   :  { %3026 = vmatpush1.bf16.msra.mxu0 %v11681_v47  ;;  %v11733_v47 = vld [vmem:[#allocation18 + $0x60] ss:$8 sps:$4 sm:$0xff]  }
 0x4b5   :  { %3027 = vmatprep.subr.bf16.mxu0 %v11686_v48  ;;  %v11738_v48 = vld [vmem:[#allocation18 + $0x74] ss:$8 sps:$4 sm:$0xff]  }
 0x4b8   :  { %3028 = vmatpush1.bf16.msra.mxu0 %v11684_v49  ;;  %v11736_v49 = vld [vmem:[#allocation18 + $0x70] ss:$8 sps:$4 sm:$0xff]  }
 0x4b9   :  { %3029 = vmatprep.subr.bf16.mxu0 %v11689_v50  ;;  %v11741_v50 = vld [vmem:[#allocation18 + $0x84] ss:$8 sps:$4 sm:$0xff]  }
 0x4bc   :  { %3030 = vmatpush1.bf16.msra.mxu0 %v11687_v51  ;;  %v11739_v51 = vld [vmem:[#allocation18 + $0x80] ss:$8 sps:$4 sm:$0xff]  }
 0x4bd   :  { %3031 = vmatprep.subr.bf16.mxu0 %v11692_v52  ;;  %v11744_v52 = vld [vmem:[#allocation18 + $0x94] ss:$8 sps:$4 sm:$0xff]  }
 0x4c0   :  { %3032 = vmatpush1.bf16.msra.mxu0 %v11690_v56  ;;  %v11742_v56 = vld [vmem:[#allocation18 + $0x90] ss:$8 sps:$4 sm:$0xff]  }
 0x4c1   :  { %3033 = vmatprep.subr.bf16.mxu0 %v11695_v59  ;;  %v11747_v59 = vld [vmem:[#allocation18 + $0xa4] ss:$8 sps:$4 sm:$0xff]  }
 0x4c4   :  { %3034 = vmatpush1.bf16.msra.mxu0 %v11693_v60  ;;  %v11745_v60 = vld [vmem:[#allocation18 + $0xa0] ss:$8 sps:$4 sm:$0xff]  }
 0x4c5   :  { %3035 = vmatprep.subr.bf16.mxu0 %v11698_v61  ;;  %v11750_v61 = vld [vmem:[#allocation18 + $0xb4] ss:$8 sps:$4 sm:$0xff]  }
 0x4c8   :  { %3036 = vmatpush1.bf16.msra.mxu0 %v11696_v62  ;;  %v11748_v62 = vld [vmem:[#allocation18 + $0xb0] ss:$8 sps:$4 sm:$0xff]  }
 0x4c9   :  { %10601 = vmatprep.subr.bf16.mxu0 %v11699_v63  ;;  %v11753_v63 = vld [vmem:[#allocation18 + $0xc4] ss:$8 sps:$4 sm:$0xff]  }
 0x4cb   :  { %3038 = vmatmul.mubr.bf16.vlgmr.msra.gmra.mrb[4].mxu0 %v13269_v28 }
 0x4cc   :  { %10602 = vmatpush3.bf16.msra.mxu0 %v11700_v0  ;;  %v11751_v0 = vld [vmem:[#allocation18 + $0xc0] ss:$8 sps:$4 sm:$0xff]  }
 0x4cd   :  { %10603 = vmatprep.subr.bf16.mxu0 %v11701_v1  ;;  %v11756_v1 = vld [vmem:[#allocation18 + $0xd4] ss:$8 sps:$4 sm:$0xff]  }
 0x4d0   :  { %10604 = vmatpush3.bf16.msra.mxu0 %v11702_v2  ;;  %v11754_v2 = vld [vmem:[#allocation18 + $0xd0] ss:$8 sps:$4 sm:$0xff]  }
 0x4d1   :  { %10605 = vmatprep.subr.bf16.mxu0 %v11703_v3  ;;  %v11759_v3 = vld [vmem:[#allocation18 + $0xe4] ss:$8 sps:$4 sm:$0xff]  }
 0x4d4   :  { %10606 = vmatpush3.bf16.msra.mxu0 %v11704_v4  ;;  %v11757_v4 = vld [vmem:[#allocation18 + $0xe0] ss:$8 sps:$4 sm:$0xff]  }
 0x4d5   :  { %10607 = vmatprep.subr.bf16.mxu0 %v11705_v5  ;;  %v11762_v5 = vld [vmem:[#allocation18 + $0xf4] ss:$8 sps:$4 sm:$0xff]  }
 0x4d8   :  { %10608 = vmatpush3.bf16.msra.mxu0 %v11706_v6  ;;  %v11760_v6 = vld [vmem:[#allocation18 + $0xf0] ss:$8 sps:$4 sm:$0xff]  }
 0x4d9   :  { %10609 = vmatprep.subr.bf16.mxu0 %v11707_v7 }
 0x4dc   :  { %10610 = vmatpush3.bf16.msra.mxu0 %v11708_v8 }
 0x4dd   :  { %10611 = vmatprep.subr.bf16.mxu0 %v11709_v9 }
 0x4e0   :  { %10612 = vmatpush3.bf16.msra.mxu0 %v11710_v10 }
 0x4e1   :  { %10613 = vmatprep.subr.bf16.mxu0 %v11711_v11 }
 0x4e4   :  { %10614 = vmatpush3.bf16.msra.mxu0 %v11712_v12 }
 0x4e5   :  { %10615 = vmatprep.subr.bf16.mxu0 %v11713_v13 }
 0x4e8   :  { %10616 = vmatpush3.bf16.msra.mxu0 %v11714_v14 }
 0x59e   :  { %v3039_v21 = vpop.f32.mrb[4].mxu0 }
 0x59f   :  { %v10813_v24 = vadd.f32 %v3039_v21, %v2635_v19  ;;  %v3041_v25 = vpop.f32.mrb[5].mxu0 }
 0x5a0   :  { %v10814_v26 = vadd.f32 %v3041_v25, %v2639_v20  ;;  %v3043_v27 = vpop.f32.mrb[6].mxu0 }
 0x5a1   :  { %v10815_v28 = vadd.f32 %v3043_v27, %v2635_v19  ;;  %v3045_v29 = vpop.f32.mrb[7].mxu0  ;;  %v13277_v22 = vmax.f32 %v10813_v24, 0.0  ;;  %v3232_v24 = vld [vmem:[#allocation19] sm:$0x3] }
 0x5a2   :  { %v13275_v17 = vmax.f32 %v10814_v26, 0.0  ;;  %v10816_v18 = vadd.f32 %v3045_v29, %v2639_v20  ;;  %v3237_v25 = vrot.slane %v3232_v24, %v13256_v54  ;;  %v3241_v26 = vrot.slane %v3232_v24, %v13260_v57 }
 0x5a3   :  { %v13279_v23 = vmax.f32 %v10815_v28, 0.0 }
 0x5a4   :  { %v13283_v31 = vmax.f32 %v10816_v18, 0.0  ;;  %3056 = vmatprep.subr.mxu1 %v13275_v17 }
 0x5a5   :  { %3057 = vmatpush1.msra.mxu1 %v13277_v22  ;;  %v3846_v34 = vpack.c.bf16 %v13279_v23, %v13277_v22 }
 0x5a6   :  { %10290 = vmatmul.mubr.msk.f32.vlgmr.msra.gmra.mrb[4].mxu1 %vm3052_vm0, %v13281_v30  ;;  %3127 = vmatprep.subr.mxu1 %v13283_v31  ;;  %v3847_v33 = vpack.c.bf16 %v13283_v31, %v13275_v17 }
 0x5a7   :  { %3128 = vmatpush1.msra.mxu1 %v13279_v23  ;;  %3191 = vmatprep.mubr.f32.mxu1 %v12824_v15 }
 0x5a8   :  { %4015 = vmatprep.mubr.bf16.mxu0 %v3847_v33  ;;  %3404 = vmatprep.subr.bf16.mxu1 %v11717_v32 }
 0x5a9   :  { %4016 = vmatmul.mubr.bf16.vlgmr.msra.gmra.mrb[8].mxu0 %v3846_v34 }
 0x5aa   :  { %10291 = vmatmul.mubr.msk.f32.vlgmr.msra.gmra.mrb[6].mxu1 %vm3052_vm0, %v13281_v30 }
 0x5ab   :  { %3405 = vmatpush1.bf16.msra.mxu1 %v11715_v35 }
 0x5ac   :  { %3406 = vmatprep.subr.bf16.mxu1 %v11720_v36 }
 0x5af   :  { %3407 = vmatpush1.bf16.msra.mxu1 %v11718_v37 }
 0x5b0   :  { %3408 = vmatprep.subr.bf16.mxu1 %v11723_v38 }
 0x5b3   :  { %3409 = vmatpush1.bf16.msra.mxu1 %v11721_v39  ;;  %v11765_v39 = vld [vmem:[#allocation21 + $0x4] ss:$8 sps:$4 sm:$0xff]  }
 0x5b4   :  { %3410 = vmatprep.subr.bf16.mxu1 %v11726_v40 }
 0x5b7   :  { %3411 = vmatpush1.bf16.msra.mxu1 %v11724_v41  ;;  %v11763_v41 = vld [vmem:[#allocation21] ss:$8 sps:$4 sm:$0xff]  }
 0x5b8   :  { %3412 = vmatprep.subr.bf16.mxu1 %v11729_v42  ;;  %v11768_v42 = vld [vmem:[#allocation21 + $0x14] ss:$8 sps:$4 sm:$0xff]  }
 0x5bb   :  { %3413 = vmatpush1.bf16.msra.mxu1 %v11727_v43  ;;  %v11766_v43 = vld [vmem:[#allocation21 + $0x10] ss:$8 sps:$4 sm:$0xff]  }
 0x5bc   :  { %3414 = vmatprep.subr.bf16.mxu1 %v11732_v44  ;;  %v11771_v44 = vld [vmem:[#allocation21 + $0x24] ss:$8 sps:$4 sm:$0xff]  }
 0x5bf   :  { %3415 = vmatpush1.bf16.msra.mxu1 %v11730_v45  ;;  %v11769_v45 = vld [vmem:[#allocation21 + $0x20] ss:$8 sps:$4 sm:$0xff]  }
 0x5c0   :  { %3416 = vmatprep.subr.bf16.mxu1 %v11735_v46  ;;  %v11774_v46 = vld [vmem:[#allocation21 + $0x34] ss:$8 sps:$4 sm:$0xff]  }
 0x5c3   :  { %3417 = vmatpush1.bf16.msra.mxu1 %v11733_v47  ;;  %v11772_v47 = vld [vmem:[#allocation21 + $0x30] ss:$8 sps:$4 sm:$0xff]  }
 0x5c4   :  { %3418 = vmatprep.subr.bf16.mxu1 %v11738_v48  ;;  %v11777_v48 = vld [vmem:[#allocation21 + $0x44] ss:$8 sps:$4 sm:$0xff]  }
 0x5c7   :  { %3419 = vmatpush1.bf16.msra.mxu1 %v11736_v49  ;;  %v11775_v49 = vld [vmem:[#allocation21 + $0x40] ss:$8 sps:$4 sm:$0xff]  }
 0x5c8   :  { %3420 = vmatprep.subr.bf16.mxu1 %v11741_v50  ;;  %v11780_v50 = vld [vmem:[#allocation21 + $0x54] ss:$8 sps:$4 sm:$0xff]  }
 0x5cb   :  { %3421 = vmatpush1.bf16.msra.mxu1 %v11739_v51  ;;  %v11778_v51 = vld [vmem:[#allocation21 + $0x50] ss:$8 sps:$4 sm:$0xff]  }
 0x5cc   :  { %3422 = vmatprep.subr.bf16.mxu1 %v11744_v52  ;;  %v11781_v52 = vld [vmem:[#allocation21 + $0x60] ss:$8 sps:$4 sm:$0xff]  }
 0x5cf   :  { %3423 = vmatpush1.bf16.msra.mxu1 %v11742_v56  ;;  %v11786_v56 = vld [vmem:[#allocation21 + $0x74] ss:$8 sps:$4 sm:$0xff]  }
 0x5d0   :  { %3424 = vmatprep.subr.bf16.mxu1 %v11747_v59  ;;  %v11784_v59 = vld [vmem:[#allocation21 + $0x70] ss:$8 sps:$4 sm:$0xff]  }
 0x5d3   :  { %3425 = vmatpush1.bf16.msra.mxu1 %v11745_v60  ;;  %v11789_v60 = vld [vmem:[#allocation21 + $0x84] ss:$8 sps:$4 sm:$0xff]  }
 0x5d4   :  { %3426 = vmatprep.subr.bf16.mxu1 %v11750_v61  ;;  %v11787_v61 = vld [vmem:[#allocation21 + $0x80] ss:$8 sps:$4 sm:$0xff]  }
 0x5d7   :  { %3427 = vmatpush1.bf16.msra.mxu1 %v11748_v62  ;;  %v11792_v62 = vld [vmem:[#allocation21 + $0x94] ss:$8 sps:$4 sm:$0xff]  }
 0x5d8   :  { %3428 = vmatprep.subr.bf16.mxu1 %v11753_v63  ;;  %v11790_v63 = vld [vmem:[#allocation21 + $0x90] ss:$8 sps:$4 sm:$0xff]  }
 0x5db   :  { %3429 = vmatpush1.bf16.msra.mxu1 %v11751_v0  ;;  %v11795_v0 = vld [vmem:[#allocation21 + $0xa4] ss:$8 sps:$4 sm:$0xff]  }
 0x5dc   :  { %3430 = vmatprep.subr.bf16.mxu1 %v11756_v1  ;;  %v11793_v1 = vld [vmem:[#allocation21 + $0xa0] ss:$8 sps:$4 sm:$0xff]  }
 0x5df   :  { %3431 = vmatpush1.bf16.msra.mxu1 %v11754_v2  ;;  %v11798_v2 = vld [vmem:[#allocation21 + $0xb4] ss:$8 sps:$4 sm:$0xff]  }
 0x5e0   :  { %3432 = vmatprep.subr.bf16.mxu1 %v11759_v3  ;;  %v11796_v3 = vld [vmem:[#allocation21 + $0xb0] ss:$8 sps:$4 sm:$0xff]  }
 0x5e3   :  { %3433 = vmatpush1.bf16.msra.mxu1 %v11757_v4  ;;  %v11801_v4 = vld [vmem:[#allocation21 + $0xc4] ss:$8 sps:$4 sm:$0xff]  }
 0x5e4   :  { %3434 = vmatprep.subr.bf16.mxu1 %v11762_v5  ;;  %v11799_v5 = vld [vmem:[#allocation21 + $0xc0] ss:$8 sps:$4 sm:$0xff]  }
 0x5e7   :  { %3435 = vmatpush1.bf16.msra.mxu1 %v11760_v6  ;;  %v11804_v6 = vld [vmem:[#allocation21 + $0xd4] ss:$8 sps:$4 sm:$0xff]  }
 0x679   :  { %v3122_v7 = vpop.f32.mrb[4].mxu1 }
 0x67a   :  { %v3124_v8 = vpop.f32.mrb[5].mxu1 }
 0x67c   :  { %v10617_v9 = vpop.f32.mrb[8].mxu0 }
 0x67d   :  { %v3193_v10 = vpop.f32.mrb[6].mxu1  ;;  %v10618_v11 = vpop.f32.mrb[9].mxu0 }
 0x67e   :  { %v3198_v12 = vpack.c.bf16 %v3193_v10, %v3122_v7  ;;  %v13298_v13 = vadd.f32 %v10618_v11, %v10617_v9  ;;  %v3195_v14 = vpop.f32.mrb[7].mxu1  ;;  %v10620_v16 = vpop.f32.mrb[10].mxu0  ;;  %v11802_v7 = vld [vmem:[#allocation21 + $0xd0] ss:$8 sps:$4 sm:$0xff]   ;;  %v11805_v9 = vld [vmem:[#allocation21 + $0xe0] ss:$8 sps:$4 sm:$0xff]  }
 0x67f   :  { %v3199_v19 = vpack.c.bf16 %v3195_v14, %v3124_v8  ;;  %v10621_v20 = vpop.f32.mrb[11].mxu0  ;;  %v11807_v8 = vld [vmem:[#allocation21 + $0xe4] ss:$8 sps:$4 sm:$0xff]   ;;  %v11810_v10 = vld [vmem:[#allocation21 + $0xf4] ss:$8 sps:$4 sm:$0xff]  }
 0x680   :  { %v13300_v21 = vadd.f32 %v10621_v20, %v10620_v16  ;;  %v11808_v11 = vld [vmem:[#allocation21 + $0xf0] ss:$8 sps:$4 sm:$0xff]  }
 0x681   :  { %3436 = vmatprep.mubr.bf16.mxu1 %v3199_v19 }
 0x682   :  { %3437 = vmatmul.mubr.bf16.vlgmr.msra.gmra.mrb[8].mxu1 %v3198_v12  ;;  %v11811_v12 = vld [vmem:[#allocation25 + $0x40] sm:$0xff]  }
 0x683   :  { %3515 = vmatprep.mubr.f32.mxu1 %v12824_v15 }
 0x755   :  { %v3438_v27 = vpop.f32.mrb[8].mxu1 }
 0x756   :  { %v3439_v28 = vadd.f32 %v3438_v27, %v3237_v25  ;;  %v3440_v29 = vpop.f32.mrb[9].mxu1  ;;  %v11813_v27 = vld [vmem:[#allocation25 + $0x48] sm:$0xff]  }
 0x757   :  { %v3441_v18 = vadd.f32 %v3440_v29, %v3241_v26  ;;  %v3442_v32 = vpop.f32.mrb[10].mxu1  ;;  %v11815_v29 = vld [vmem:[#allocation25 + $0x50] sm:$0xff]  }
 0x758   :  { %v3443_v33 = vadd.f32 %v3442_v32, %v3237_v25  ;;  %v3444_v34 = vpop.f32.mrb[11].mxu1  ;;  %v3447_v37 = vmax.f32 %v3439_v28, 0.0  ;;  %v11814_v28 = vld [vmem:[#allocation25 + $0x8] sm:$0xff]   ;;  %v11817_v32 = vld [vmem:[#allocation25 + $0x58] sm:$0xff]  }
 0x759   :  { %v3448_v35 = vmax.f32 %v3441_v18, 0.0  ;;  %v3445_v36 = vadd.f32 %v3444_v34, %v3241_v26  ;;  %v11812_v26 = vld [vmem:[#allocation25] sm:$0xff]   ;;  %v11816_v18 = vld [vmem:[#allocation25 + $0x10] sm:$0xff]  }
 0x75a   :  { %v3449_v40 = vmax.f32 %v3443_v33, 0.0  ;;  %v11818_v33 = vld [vmem:[#allocation25 + $0x18] sm:$0xff]   ;;  %v11819_v34 = vld [vmem:[#allocation25 + $0x60] sm:$0xff]  }
 0x75b   :  { %v3450_v38 = vmax.f32 %v3445_v36, 0.0  ;;  %3451 = vmatprep.subr.mxu1 %v3448_v35  ;;  %v11820_v35 = vld [vmem:[#allocation25 + $0x20] sm:$0xff]   ;;  %v11821_v36 = vld [vmem:[#allocation25 + $0x68] sm:$0xff]  }
 0x75c   :  { %3452 = vmatpush1.msra.mxu1 %v3447_v37  ;;  %v11822_v37 = vld [vmem:[#allocation25 + $0x28] sm:$0xff]  }
 0x75d   :  { %10324 = vmatmul.mubr.msk.f32.vlgmr.msra.gmra.mrb[12].mxu1 %vm3052_vm0, %v13281_v30  ;;  %3522 = vmatprep.subr.mxu1 %v3450_v38  ;;  %v11823_v38 = vld [vmem:[#allocation25 + $0x70] sm:$0xff]  }
 0x75e   :  { %3523 = vmatpush1.msra.mxu1 %v3449_v40  ;;  %3586 = vmatprep.mubr.f32.mxu1 %v12824_v15  ;;  %v11825_v40 = vld [vmem:[#allocation25 + $0x78] sm:$0xff]  }
 0x75f   :  { %3799 = vmatprep.subr.bf16.mxu1 %v11765_v39  ;;  %v11824_v39 = vld [vmem:[#allocation25 + $0x30] sm:$0xff]  }
 0x761   :  { %10325 = vmatmul.mubr.msk.f32.vlgmr.msra.gmra.mrb[14].mxu1 %vm3052_vm0, %v13281_v30  ;;  %v11783_v30 = vld [vmem:[#allocation21 + $0x64] ss:$8 sps:$4 sm:$0xff]  }
 0x762   :  { %3800 = vmatpush1.bf16.msra.mxu1 %v11763_v41  ;;  %v11826_v41 = vld [vmem:[#allocation25 + $0x38] sm:$0xff]  }
 0x763   :  { %3801 = vmatprep.subr.bf16.mxu1 %v11768_v42  ;;  %v3627_v42 = vld [vmem:[#allocation22] sm:$0x3] }
 0x766   :  { %3802 = vmatpush1.bf16.msra.mxu1 %v11766_v43  ;;  %v3636_v43 = vrot.slane %v3627_v42, %v13260_v57 }
 0x767   :  { %3803 = vmatprep.subr.bf16.mxu1 %v11771_v44  ;;  %v3632_v44 = vrot.slane %v3627_v42, %v13256_v54 }
 0x76a   :  { %3804 = vmatpush1.bf16.msra.mxu1 %v11769_v45 }
 0x76b   :  { %3805 = vmatprep.subr.bf16.mxu1 %v11774_v46 }
 0x76e   :  { %3806 = vmatpush1.bf16.msra.mxu1 %v11772_v47 }
 0x76f   :  { %3807 = vmatprep.subr.bf16.mxu1 %v11777_v48 }
 0x772   :  { %3808 = vmatpush1.bf16.msra.mxu1 %v11775_v49 }
 0x773   :  { %3809 = vmatprep.subr.bf16.mxu1 %v11780_v50 }
 0x776   :  { %3810 = vmatpush1.bf16.msra.mxu1 %v11778_v51 }
 0x777   :  { %3811 = vmatprep.subr.bf16.mxu1 %v11783_v30 }
 0x77a   :  { %3812 = vmatpush1.bf16.msra.mxu1 %v11781_v52 }
 0x77b   :  { %3813 = vmatprep.subr.bf16.mxu1 %v11786_v56 }
 0x77e   :  { %3814 = vmatpush1.bf16.msra.mxu1 %v11784_v59 }
 0x77f   :  { %3815 = vmatprep.subr.bf16.mxu1 %v11789_v60 }
 0x782   :  { %3816 = vmatpush1.bf16.msra.mxu1 %v11787_v61 }
 0x783   :  { %3817 = vmatprep.subr.bf16.mxu1 %v11792_v62 }
 0x786   :  { %3818 = vmatpush1.bf16.msra.mxu1 %v11790_v63  ;;  %v10358_v63 = vld [vmem:[#allocation27] ss:$0 sm:$0xff] }
 0x787   :  { %3819 = vmatprep.subr.bf16.mxu1 %v11795_v0 }
 0x78a   :  { %3820 = vmatpush1.bf16.msra.mxu1 %v11793_v1 }
 0x78b   :  { %3821 = vmatprep.subr.bf16.mxu1 %v11798_v2  ;;  %v4018_v2 = vadd.f32 %v13298_v13, %v10358_v63  ;;  %v10392_v13 = vld [vmem:[#allocation5] ss:$0 sm:$0xff] }
 0x78e   :  { %3822 = vmatpush1.bf16.msra.mxu1 %v11796_v3 }
 0x78f   :  { %3823 = vmatprep.subr.bf16.mxu1 %v11801_v4 }
 0x792   :  { %3824 = vmatpush1.bf16.msra.mxu1 %v11799_v5 }
 0x793   :  { %3825 = vmatprep.subr.bf16.mxu1 %v11804_v6  ;;  %v4021_v6 = vadd.f32 %v13300_v21, %v10358_v63 }
 0x796   :  { %3826 = vmatpush1.bf16.msra.mxu1 %v11802_v7 }
 0x797   :  { %3827 = vmatprep.subr.bf16.mxu1 %v11807_v8 }
 0x79a   :  { %3828 = vmatpush1.bf16.msra.mxu1 %v11805_v9  ;;  %v10391_v9 = vld [vmem:[#allocation28] ss:$0 sm:$0xff] }
 0x79b   :  { %3829 = vmatprep.subr.bf16.mxu1 %v11810_v10 }
 0x79e   :  { %3830 = vmatpush1.bf16.msra.mxu1 %v11808_v11 }
 0x79f   :  { %10623 = vmatprep.subr.bf16.mxu1 %v11811_v12 }
 0x830   :  { %v3517_v14 = vpop.f32.mrb[12].mxu1 }
 0x831   :  { %v3519_v16 = vpop.f32.mrb[13].mxu1 }
 0x834   :  { %v3588_v19 = vpop.f32.mrb[14].mxu1 }
 0x835   :  { %v3593_v20 = vpack.c.bf16 %v3588_v19, %v3517_v14  ;;  %v3590_v24 = vpop.f32.mrb[15].mxu1  ;;  %v12825_v19 = vmov 0  }
 0x836   :  { %v3594_v25 = vpack.c.bf16 %v3590_v24, %v3519_v16  ;;  %11217 = vset.pattern.permute.xlu1 %v12825_v19  ;;  %11218 = vset.pattern.permute.xlu0 %v12825_v19 }
 0x838   :  { %3831 = vmatprep.mubr.bf16.mxu1 %v3594_v25 }
 0x839   :  { %3832 = vmatmul.mubr.bf16.vlgmr.msra.gmra.mrb[16].mxu1 %v3593_v20 }
 0x83a   :  { %10624 = vmatpush3.bf16.msra.mxu1 %v11812_v26 }
 0x83b   :  { %10625 = vmatprep.subr.bf16.mxu1 %v11813_v27 }
 0x83e   :  { %10626 = vmatpush3.bf16.msra.mxu1 %v11814_v28 }
 0x83f   :  { %10627 = vmatprep.subr.bf16.mxu1 %v11815_v29 }
 0x842   :  { %10628 = vmatpush3.bf16.msra.mxu1 %v11816_v18 }
 0x843   :  { %10629 = vmatprep.subr.bf16.mxu1 %v11817_v32 }
 0x846   :  { %10630 = vmatpush3.bf16.msra.mxu1 %v11818_v33 }
 0x847   :  { %10631 = vmatprep.subr.bf16.mxu1 %v11819_v34 }
 0x84a   :  { %10632 = vmatpush3.bf16.msra.mxu1 %v11820_v35 }
 0x84b   :  { %10633 = vmatprep.subr.bf16.mxu1 %v11821_v36 }
 0x84e   :  { %10634 = vmatpush3.bf16.msra.mxu1 %v11822_v37 }
 0x84f   :  { %10635 = vmatprep.subr.bf16.mxu1 %v11823_v38 }
 0x852   :  { %10636 = vmatpush3.bf16.msra.mxu1 %v11824_v39 }
 0x853   :  { %10637 = vmatprep.subr.bf16.mxu1 %v11825_v40 }
 0x856   :  { %10638 = vmatpush3.bf16.msra.mxu1 %v11826_v41 }
 0x90c   :  { %v3833_v45 = vpop.f32.mrb[16].mxu1 }
 0x90d   :  { %v3835_v46 = vpop.f32.mrb[17].mxu1  ;;  %v13314_v49 = vadd.f32 %v3833_v45, %v3632_v44 }
 0x90e   :  { %v13312_v47 = vadd.f32 %v3835_v46, %v3636_v43  ;;  %v3837_v48 = vpop.f32.mrb[18].mxu1 }
 0x90f   :  { %v13316_v50 = vadd.f32 %v3837_v48, %v3632_v44  ;;  %v3839_v51 = vpop.f32.mrb[19].mxu1  ;;  %v3842_v60 = vmax.f32 %v13314_v49, 0.0 }
 0x910   :  { %v13318_v30 = vadd.f32 %v3839_v51, %v3636_v43  ;;  %v3843_v56 = vmax.f32 %v13312_v47, 0.0 }
 0x911   :  { %v3844_v52 = vmax.f32 %v13316_v50, 0.0 }
 0x912   :  { %v3845_v59 = vmax.f32 %v13318_v30, 0.0 }
 0x913   :  { %v4024_v62 = vpack.c.bf16 %v3844_v52, %v3842_v60 }
 0x914   :  { %v4025_v61 = vpack.c.bf16 %v3845_v59, %v3843_v56 }
 0x916   :  { %4186 = vmatprep.mubr.bf16.mxu1 %v4025_v61 }
 0x917   :  { %4187 = vmatmul.mubr.bf16.vlgmr.msra.gmra.mrb[20].mxu1 %v4024_v62 }
 0x9ea   :  { %v10639_v0 = vpop.f32.mrb[20].mxu1 }
 0x9eb   :  { %v10640_v1 = vpop.f32.mrb[21].mxu1 }
 0x9ec   :  { %v10641_v3 = vadd.f32 %v10640_v1, %v10639_v0  ;;  %v10642_v4 = vpop.f32.mrb[22].mxu1 }
 0x9ed   :  { %v10643_v5 = vpop.f32.mrb[23].mxu1 }
 0x9ee   :  { %v10644_v7 = vadd.f32 %v10643_v5, %v10642_v4  ;;  %v4195_v8 = vadd.f32 %v10641_v3, %v4018_v2 }
 0x9f0   :  { %v4196_v10 = vadd.f32 %v10644_v7, %v4021_v6  ;;  %v4197_v11 = vmax.f32 %v4195_v8, 0.0 }
 0x9f2   :  { %v4198_v12 = vmax.f32 %v4196_v10, 0.0  ;;  %v4206_v14 = vmul.f32 %v10391_v9, %v4197_v11 }
 0x9f4   :  { %4208 = vadd.xlane.f32.xlu0 %v4206_v14  ;;  %v4207_v16 = vmul.f32 %v10391_v9, %v4198_v12 }
 0x9f8   :  { %4210 = vadd.xlane.f32.xlu0 %v4207_v16 }
 0xa81   :  { %v4209_v20 = vpop.xlane.xlu0 %4208 }
 0xa82   :  { %v4219_v24 = vadd.f32 %v10392_v13, %v4209_v20 }
 0xa84   :  { %v4222_v21 = vsel %vm4221_vm1, %v4219_v24, -inf }
 0xa85   :  { %v4223_v25 = vrot.slane %v4222_v21, 4  ;;  %v4211_v26 = vpop.xlane.xlu0 %4210 }
 0xa86   :  { %v4220_v27 = vadd.f32 %v10392_v13, %v4211_v26 }
 0xa87   :  { %v4224_v28 = vmax.f32 %v4222_v21, %v4223_v25 }
 0xa88   :  { %v4229_v29 = vsel %vm4221_vm1, %v4220_v27, -inf }
 0xa89   :  { %v4225_v18 = vrot.slane %v4224_v28, 2  ;;  %v4230_v32 = vrot.slane %v4229_v29, 4 }
 0xa8b   :  { %v4226_v33 = vmax.f32 %v4224_v28, %v4225_v18  ;;  %v4231_v34 = vmax.f32 %v4229_v29, %v4230_v32 }
 0xa8d   :  { %v4227_v35 = vrot.slane %v4226_v33, 1  ;;  %v4232_v36 = vrot.slane %v4231_v34, 2 }
 0xa8f   :  { %v4228_v37 = vmax.f32 %v4226_v33, %v4227_v35  ;;  %v4233_v38 = vmax.f32 %v4231_v34, %v4232_v36 }
 0xa91   :  { %v4236_v39 = vsub.f32 %v4219_v24, %v4228_v37  ;;  %v4234_v40 = vrot.slane %v4233_v38, 1 }
 0xa93   :  { %v4238_v41 = vmul.f32 1.442695, %v4236_v39  ;;  %v4235_v42 = vmax.f32 %v4233_v38, %v4234_v40 }
 0xa95   :  { %11827 = vpow2.f32 %v4238_v41  ;;  %v4237_v43 = vsub.f32 %v4220_v27, %v4235_v42 }
 0xa97   :  { %v4240_v44 = vmul.f32 1.442695, %v4237_v43 }
 0xa99   :  { %11829 = vpow2.f32 %v4240_v44 }
 0xa9f   :  { %v11828_v45 = vpop.eup %11827 }
 0xaa0   :  { %v4242_v46 = vsel %vm4221_vm1, %v11828_v45, 0.0 }
 0xaa1   :  { %v4243_v48 = vrot.slane %v4242_v46, 4 }
 0xaa3   :  { %v11830_v51 = vpop.eup %11829  ;;  %v4244_v61 = vadd.f32 %v4243_v48, %v4242_v46 }
 0xaa4   :  { %v4249_v62 = vsel %vm4221_vm1, %v11830_v51, 0.0 }
 0xaa5   :  { %v4245_v63 = vrot.slane %v4244_v61, 2  ;;  %v4250_v0 = vrot.slane %v4249_v62, 4 }
 0xaa7   :  { %v4246_v1 = vadd.f32 %v4245_v63, %v4244_v61  ;;  %v4251_v2 = vadd.f32 %v4250_v0, %v4249_v62 }
 0xaa9   :  { %v4252_v3 = vrot.slane %v4251_v2, 2  ;;  %v4247_v4 = vrot.slane %v4246_v1, 1 }
 0xaab   :  { %v4248_v5 = vadd.f32 %v4247_v4, %v4246_v1  ;;  %v4253_v6 = vadd.f32 %v4252_v3, %v4251_v2 }
 0xaad   :  { %11831 = vrcp.f32 %v4248_v5  ;;  %v4254_v7 = vrot.slane %v4253_v6, 1 }
 0xaaf   :  { %v4255_v8 = vadd.f32 %v4254_v7, %v4253_v6 }
 0xab1   :  { %11833 = vrcp.f32 %v4255_v8 }
 0xab7   :  { %v11832_v9 = vpop.eup %11831 }
 0xab8   :  { %v4257_v10 = vmul.f32 %v11832_v9, %v11828_v45 }
 0xaba   :  { %4262 = vperm.xlu1 %11217, %v4257_v10  }
 0xabb   :  { %v11834_v11 = vpop.eup %11833 }
 0xabc   :  { %v4259_v12 = vmul.f32 %v11834_v11, %v11830_v51 }
 0xabe   :  { %4267 = vperm.xlu1 %11217, %v4259_v12  }
 0xb39   :  { %v4263_v14 = vpop.permute.xlu1 %4262 }
 0xb3a   :  { %v4270_v16 = vmul.f32 %v4263_v14, %v13277_v22  ;;  %v4271_v13 = vmul.f32 %v4263_v14, %v13275_v17  ;;  %v4298_v20 = vmul.f32 %v4263_v14, %v3842_v60  ;;  %v4299_v24 = vmul.f32 %v4263_v14, %v3843_v56 }
 0xb3c   :  { %v4274_v21 = vrot.slane %v4270_v16, 4  ;;  %v4280_v25 = vrot.slane %v4271_v13, 4  ;;  %v4302_v26 = vrot.slane %v4298_v20, 4  ;;  %v4308_v27 = vrot.slane %v4299_v24, 4 }
 0xb3d   :  { %v4268_v28 = vpop.permute.xlu1 %4267 }
 0xb3e   :  { %v4275_v29 = vadd.f32 %v4274_v21, %v4270_v16  ;;  %v4281_v18 = vadd.f32 %v4280_v25, %v4271_v13  ;;  %v4303_v32 = vadd.f32 %v4302_v26, %v4298_v20  ;;  %v4309_v33 = vadd.f32 %v4308_v27, %v4299_v24 }
 0xb3f   :  { %v4272_v34 = vmul.f32 %v4268_v28, %v13279_v23  ;;  %v4273_v22 = vmul.f32 %v4268_v28, %v13283_v31  ;;  %v4300_v17 = vmul.f32 %v4268_v28, %v3844_v52  ;;  %v4301_v47 = vmul.f32 %v4268_v28, %v3845_v59 }
 0xb40   :  { %v4276_v49 = vrot.slane %v4275_v29, 2  ;;  %v4282_v56 = vrot.slane %v4281_v18, 2  ;;  %v4304_v60 = vrot.slane %v4303_v32, 2  ;;  %v4310_v35 = vrot.slane %v4309_v33, 2 }
 0xb41   :  { %v4286_v36 = vrot.slane %v4272_v34, 4  ;;  %v4292_v37 = vrot.slane %v4273_v22, 4  ;;  %v4314_v38 = vrot.slane %v4300_v17, 4  ;;  %v4320_v39 = vrot.slane %v4301_v47, 4 }
 0xb42   :  { %v4277_v40 = vadd.f32 %v4276_v49, %v4275_v29  ;;  %v4283_v41 = vadd.f32 %v4282_v56, %v4281_v18  ;;  %v4305_v42 = vadd.f32 %v4304_v60, %v4303_v32  ;;  %v4311_v23 = vadd.f32 %v4310_v35, %v4309_v33 }
 0xb43   :  { %v4287_v43 = vadd.f32 %v4286_v36, %v4272_v34  ;;  %v4293_v31 = vadd.f32 %v4292_v37, %v4273_v22  ;;  %v4315_v44 = vadd.f32 %v4314_v38, %v4300_v17  ;;  %v4321_v50 = vadd.f32 %v4320_v39, %v4301_v47 }
 0xb44   :  { %v4278_v52 = vrot.slane %v4277_v40, 1  ;;  %v4284_v45 = vrot.slane %v4283_v41, 1  ;;  %v4306_v30 = vrot.slane %v4305_v42, 1  ;;  %v4312_v59 = vrot.slane %v4311_v23, 1 }
 0xb45   :  { %v4288_v46 = vrot.slane %v4287_v43, 2  ;;  %v4294_v48 = vrot.slane %v4293_v31, 2  ;;  %v4316_v51 = vrot.slane %v4315_v44, 2  ;;  %v4322_v61 = vrot.slane %v4321_v50, 2 }
 0xb46   :  { %v13352_v62 = vadd.f32 %v4278_v52, %v4277_v40  ;;  %v13354_v63 = vadd.f32 %v4284_v45, %v4283_v41  ;;  %v13356_v0 = vadd.f32 %v4306_v30, %v4305_v42  ;;  %v13358_v1 = vadd.f32 %v4312_v59, %v4311_v23 }
 0xb47   :  { %v4289_v2 = vadd.f32 %v4288_v46, %v4287_v43  ;;  %v4295_v3 = vadd.f32 %v4294_v48, %v4293_v31  ;;  %v4317_v4 = vadd.f32 %v4316_v51, %v4315_v44  ;;  %v4323_v5 = vadd.f32 %v4322_v61, %v4321_v50 }
 0xb49   :  { %v4290_v6 = vrot.slane %v4289_v2, 1  ;;  %v4296_v7 = vrot.slane %v4295_v3, 1  ;;  %v4318_v8 = vrot.slane %v4317_v4, 1  ;;  %v4324_v9 = vrot.slane %v4323_v5, 1 }
 0xb4b   :  { %v13360_v10 = vadd.f32 %v4290_v6, %v4289_v2  ;;  %v13362_v11 = vadd.f32 %v4296_v7, %v4295_v3  ;;  %v13364_v12 = vadd.f32 %v4318_v8, %v4317_v4  ;;  %v13366_v14 = vadd.f32 %v4324_v9, %v4323_v5 }
 0xb4c   :  { %12738 = dma.done.wait [#allocation4], 131072 }
 0xb4d   :  { %12739 = vsyncadd [#allocation4], 4294836224 }
 0xb4e   :  { %12740 = dma.done.wait [#allocation4 + $0x1], 16384 }
 0xb4f   :  { %12741 = vsyncadd [#allocation4 + $0x1], 4294950912  ;;  %11836 = vset.pattern.permute.xlu1 %v12825_v19  ;;  %11835 = vset.pattern.permute.xlu0 %v12825_v19  ;;  %v4369_v16 = vld [vmem:[#allocation2 + $0x8] sm:$0xff]  ;;  %v4371_v13 = vld [vmem:[#allocation2 + $0x18] sm:$0xff]  ;;  %s13983_s26 = sld [smem:[#allocation77_spill]]  ;;  %vm7698_vm2 = vcmask 130048  }
 0xb50   :  { %v4368_v20 = vld [vmem:[#allocation2] sm:$0xff]  ;;  %5594 = vmatprep.subr.bf16.mxu0 %v4369_v16  ;;  %6018 = vmatprep.subr.bf16.mxu1 %v4371_v13  ;;  %v4370_v24 = vld [vmem:[#allocation2 + $0x10] sm:$0xff]  ;;  %v4377_v21 = vld [vmem:[#allocation2 + $0x48] sm:$0xff]  ;;  %vm9184_vm3 = vcmask 1041409   ;;  %vm9868_vm4 = vcmask 1041408   ;;  %vm9886_vm5 = vcmask 1024  }
 0xb51   :  { %v4379_v25 = vld [vmem:[#allocation2 + $0x58] sm:$0xff]  ;;  %5595 = vmatpush1.bf16.msra.mxu0 %v4368_v20  ;;  %6019 = vmatpush1.bf16.msra.mxu1 %v4370_v24  ;;  %v4376_v26 = vld [vmem:[#allocation2 + $0x40] sm:$0xff]  ;;  %v4378_v27 = vld [vmem:[#allocation2 + $0x50] sm:$0xff] }
 0xb52   :  { %5596 = vmatprep.subr.bf16.mxu0 %v4377_v21  ;;  %6020 = vmatprep.subr.bf16.mxu1 %v4379_v25  ;;  %v4385_v28 = vld [vmem:[#allocation2 + $0x88] sm:$0xff]  ;;  %v4387_v29 = vld [vmem:[#allocation2 + $0x98] sm:$0xff]  ;;  %v4384_v19 = vld [vmem:[#allocation2 + $0x80] sm:$0xff] }
 0xb53   :  { %v4386_v18 = vld [vmem:[#allocation2 + $0x90] sm:$0xff]  ;;  %v4393_v32 = vld [vmem:[#allocation2 + $0xc8] sm:$0xff]  ;;  %v4395_v33 = vld [vmem:[#allocation2 + $0xd8] sm:$0xff] }
 0xb54   :  { %v4392_v34 = vld [vmem:[#allocation2 + $0xc0] sm:$0xff]  ;;  %v4394_v22 = vld [vmem:[#allocation2 + $0xd0] sm:$0xff]  ;;  %v4401_v17 = vld [vmem:[#allocation2 + $0x108] sm:$0xff] }
 0xb55   :  { %5597 = vmatpush1.bf16.msra.mxu0 %v4376_v26  ;;  %6021 = vmatpush1.bf16.msra.mxu1 %v4378_v27  ;;  %v4403_v47 = vld [vmem:[#allocation2 + $0x118] sm:$0xff]  ;;  %v4400_v49 = vld [vmem:[#allocation2 + $0x100] sm:$0xff]  ;;  %v4402_v56 = vld [vmem:[#allocation2 + $0x110] sm:$0xff] }
 0xb56   :  { %5598 = vmatprep.subr.bf16.mxu0 %v4385_v28  ;;  %6022 = vmatprep.subr.bf16.mxu1 %v4387_v29  ;;  %v4409_v60 = vld [vmem:[#allocation2 + $0x148] sm:$0xff]  ;;  %v4411_v35 = vld [vmem:[#allocation2 + $0x158] sm:$0xff]  ;;  %v4408_v36 = vld [vmem:[#allocation2 + $0x140] sm:$0xff] }
 0xb57   :  { %v4410_v37 = vld [vmem:[#allocation2 + $0x150] sm:$0xff]  ;;  %v4417_v38 = vld [vmem:[#allocation2 + $0x188] sm:$0xff]  ;;  %v4419_v39 = vld [vmem:[#allocation2 + $0x198] sm:$0xff] }
 0xb58   :  { %v13371_v40 = vld [vmem:[%s13983_s26] sm:$0xff]  ;;  %v4418_v43 = vld [vmem:[#allocation2 + $0x190] sm:$0xff]  ;;  %v4425_v31 = vld [vmem:[#allocation2 + $0x1c8] sm:$0xff] }
 0xb59   :  { %5599 = vmatpush1.bf16.msra.mxu0 %v4384_v19  ;;  %6023 = vmatpush1.bf16.msra.mxu1 %v4386_v18  ;;  %v13374_v41 = vld [vmem:[%s13983_s26 + $0x40] sm:$0xff]  ;;  %v4427_v44 = vld [vmem:[#allocation2 + $0x1d8] sm:$0xff]  ;;  %v4426_v52 = vld [vmem:[#allocation2 + $0x1d0] sm:$0xff] }
 0xb5a   :  { %5600 = vmatprep.subr.bf16.mxu0 %v4393_v32  ;;  %6024 = vmatprep.subr.bf16.mxu1 %v4395_v33  ;;  %v13378_v42 = vcombine.high %v13371_v40, %v13374_v41  ;;  %v4416_v23 = vld [vmem:[#allocation2 + $0x180] sm:$0xff]  ;;  %v4433_v45 = vld [vmem:[#allocation2 + $0x208] sm:$0xff]  ;;  %v4435_v30 = vld [vmem:[#allocation2 + $0x218] sm:$0xff] }
 0xb5b   :  { %v4424_v50 = vld [vmem:[#allocation2 + $0x1c0] sm:$0xff]  ;;  %v4434_v46 = vld [vmem:[#allocation2 + $0x210] sm:$0xff]  ;;  %v4441_v48 = vld [vmem:[#allocation2 + $0x248] sm:$0xff] }
 0xb5c   :  { %5626 = vmatprep.mubr.bf16.mxu0 %v13378_v42  ;;  %6050 = vmatprep.mubr.bf16.mxu1 %v13378_v42  ;;  %v4432_v59 = vld [vmem:[#allocation2 + $0x200] sm:$0xff]  ;;  %v4443_v51 = vld [vmem:[#allocation2 + $0x258] sm:$0xff]  ;;  %v4442_v2 = vld [vmem:[#allocation2 + $0x250] sm:$0xff] }
 0xb5d   :  { %5601 = vmatpush1.bf16.msra.mxu0 %v4392_v34  ;;  %6025 = vmatpush1.bf16.msra.mxu1 %v4394_v22  ;;  %v4440_v61 = vld [vmem:[#allocation2 + $0x240] sm:$0xff]  ;;  %v4449_v3 = vld [vmem:[#allocation2 + $0x288] sm:$0xff]  ;;  %v4451_v4 = vld [vmem:[#allocation2 + $0x298] sm:$0xff] }
 0xb5e   :  { %5602 = vmatprep.subr.bf16.mxu0 %v4401_v17  ;;  %6026 = vmatprep.subr.bf16.mxu1 %v4403_v47  ;;  %v4448_v5 = vld [vmem:[#allocation2 + $0x280] sm:$0xff]  ;;  %v4450_v6 = vld [vmem:[#allocation2 + $0x290] sm:$0xff]  ;;  %v4457_v7 = vld [vmem:[#allocation2 + $0x2c8] sm:$0xff] }
 0xb5f   :  { %v4459_v8 = vld [vmem:[#allocation2 + $0x2d8] sm:$0xff]  ;;  %v4456_v9 = vld [vmem:[#allocation2 + $0x2c0] sm:$0xff]  ;;  %v4458_v16 = vld [vmem:[#allocation2 + $0x2d0] sm:$0xff] }
 0xb60   :  { %v4465_v13 = vld [vmem:[#allocation2 + $0x308] sm:$0xff]  ;;  %v4467_v20 = vld [vmem:[#allocation2 + $0x318] sm:$0xff]  ;;  %v4464_v24 = vld [vmem:[#allocation2 + $0x300] sm:$0xff] }
 0xb61   :  { %5603 = vmatpush1.bf16.msra.mxu0 %v4400_v49  ;;  %6027 = vmatpush1.bf16.msra.mxu1 %v4402_v56  ;;  %v4466_v21 = vld [vmem:[#allocation2 + $0x310] sm:$0xff]  ;;  %v4473_v25 = vld [vmem:[#allocation2 + $0x348] sm:$0xff]  ;;  %v4475_v26 = vld [vmem:[#allocation2 + $0x358] sm:$0xff]  ;;  %v13384_v56 = vcombine.low %v13371_v40, %v13374_v41 }
 0xb62   :  { %5604 = vmatprep.subr.bf16.mxu0 %v4409_v60  ;;  %6028 = vmatprep.subr.bf16.mxu1 %v4411_v35  ;;  %v4472_v27 = vld [vmem:[#allocation2 + $0x340] sm:$0xff]  ;;  %v4474_v28 = vld [vmem:[#allocation2 + $0x350] sm:$0xff]  ;;  %v4481_v29 = vld [vmem:[#allocation2 + $0x388] sm:$0xff] }
 0xb63   :  { %v4483_v19 = vld [vmem:[#allocation2 + $0x398] sm:$0xff]  ;;  %v4480_v18 = vld [vmem:[#allocation2 + $0x380] sm:$0xff]  ;;  %v4482_v32 = vld [vmem:[#allocation2 + $0x390] sm:$0xff] }
 0xb64   :  { %v4489_v33 = vld [vmem:[#allocation2 + $0x3c8] sm:$0xff]  ;;  %v4491_v34 = vld [vmem:[#allocation2 + $0x3d8] sm:$0xff]  ;;  %v4488_v22 = vld [vmem:[#allocation2 + $0x3c0] sm:$0xff] }
 0xb65   :  { %5605 = vmatpush1.bf16.msra.mxu0 %v4408_v36  ;;  %6029 = vmatpush1.bf16.msra.mxu1 %v4410_v37  ;;  %v4490_v17 = vld [vmem:[#allocation2 + $0x3d0] sm:$0xff]  ;;  %v4497_v47 = vld [vmem:[#allocation2 + $0x408] sm:$0xff]  ;;  %v4499_v49 = vld [vmem:[#allocation2 + $0x418] sm:$0xff] }
 0xb66   :  { %5606 = vmatprep.subr.bf16.mxu0 %v4417_v38  ;;  %6030 = vmatprep.subr.bf16.mxu1 %v4419_v39  ;;  %v4350_v60 = vld [vmem:[%s13983_s26 + $0x80] sm:$0xff]  ;;  %v4498_v37 = vld [vmem:[#allocation2 + $0x410] sm:$0xff]  ;;  %v4505_v38 = vld [vmem:[#allocation2 + $0x448] sm:$0xff] }
 0xb67   :  { %v4358_v35 = vld [vmem:[%s13983_s26 + $0xc0] sm:$0xff]  ;;  %v4507_v39 = vld [vmem:[#allocation2 + $0x458] sm:$0xff]  ;;  %v4506_v41 = vld [vmem:[#allocation2 + $0x450] sm:$0xff] }
 0xb68   :  { %v4496_v36 = vld [vmem:[#allocation2 + $0x400] sm:$0xff] }
 0xb69   :  { %5607 = vmatpush1.bf16.msra.mxu0 %v4416_v23  ;;  %6031 = vmatpush1.bf16.msra.mxu1 %v4418_v43  ;;  %v13388_v23 = vcombine.high %v4350_v60, %v4358_v35  ;;  %v4504_v40 = vld [vmem:[#allocation2 + $0x440] sm:$0xff]  ;;  %v4513_v43 = vld [vmem:[#allocation2 + $0x488] sm:$0xff] }
 0xb6a   :  { %5608 = vmatprep.subr.bf16.mxu0 %v4425_v31  ;;  %6032 = vmatprep.subr.bf16.mxu1 %v4427_v44  ;;  %v4515_v31 = vld [vmem:[#allocation2 + $0x498] sm:$0xff]  ;;  %v4512_v44 = vld [vmem:[#allocation2 + $0x480] sm:$0xff] }
 0xb6d   :  { %5609 = vmatpush1.bf16.msra.mxu0 %v4424_v50  ;;  %6033 = vmatpush1.bf16.msra.mxu1 %v4426_v52  ;;  %v13394_v50 = vcombine.low %v4350_v60, %v4358_v35  ;;  %v13397_v52 = vld [vmem:[%s13983_s26 + $0x8] sm:$0xff]  ;;  %v4578_v60 = vld [vmem:[#allocation2 + $0x690] sm:$0xff] }
 0xb6e   :  { %5610 = vmatprep.subr.bf16.mxu0 %v4433_v45  ;;  %6034 = vmatprep.subr.bf16.mxu1 %v4435_v30  ;;  %v13400_v45 = vld [vmem:[%s13983_s26 + $0x48] sm:$0xff]  ;;  %v4514_v30 = vld [vmem:[#allocation2 + $0x490] sm:$0xff] }
 0xb6f   :  { %v4585_v35 = vld [vmem:[#allocation2 + $0x6c8] sm:$0xff] }
 0xb71   :  { %5611 = vmatpush1.bf16.msra.mxu0 %v4432_v59  ;;  %6035 = vmatpush1.bf16.msra.mxu1 %v4434_v46  ;;  %v4521_v59 = vld [vmem:[#allocation2 + $0x4c8] sm:$0xff]  ;;  %v4523_v46 = vld [vmem:[#allocation2 + $0x4d8] sm:$0xff] }
 0xb72   :  { %5612 = vmatprep.subr.bf16.mxu0 %v4441_v48  ;;  %6036 = vmatprep.subr.bf16.mxu1 %v4443_v51  ;;  %v13404_v48 = vcombine.high %v13397_v52, %v13400_v45  ;;  %v4520_v51 = vld [vmem:[#allocation2 + $0x4c0] sm:$0xff] }
 0xb75   :  { %5613 = vmatpush1.bf16.msra.mxu0 %v4440_v61  ;;  %6037 = vmatpush1.bf16.msra.mxu1 %v4442_v2  ;;  %v4522_v61 = vld [vmem:[#allocation2 + $0x4d0] sm:$0xff]  ;;  %v4529_v2 = vld [vmem:[#allocation2 + $0x508] sm:$0xff] }
 0xb76   :  { %5614 = vmatprep.subr.bf16.mxu0 %v4449_v3  ;;  %6038 = vmatprep.subr.bf16.mxu1 %v4451_v4  ;;  %v4531_v3 = vld [vmem:[#allocation2 + $0x518] sm:$0xff]  ;;  %v4528_v4 = vld [vmem:[#allocation2 + $0x500] sm:$0xff] }
 0xb79   :  { %5615 = vmatpush1.bf16.msra.mxu0 %v4448_v5  ;;  %6039 = vmatpush1.bf16.msra.mxu1 %v4450_v6  ;;  %v4530_v5 = vld [vmem:[#allocation2 + $0x510] sm:$0xff]  ;;  %v4537_v6 = vld [vmem:[#allocation2 + $0x548] sm:$0xff] }
 0xb7a   :  { %5616 = vmatprep.subr.bf16.mxu0 %v4457_v7  ;;  %6040 = vmatprep.subr.bf16.mxu1 %v4459_v8  ;;  %v4539_v7 = vld [vmem:[#allocation2 + $0x558] sm:$0xff]  ;;  %v4536_v8 = vld [vmem:[#allocation2 + $0x540] sm:$0xff] }
 0xb7d   :  { %5617 = vmatpush1.bf16.msra.mxu0 %v4456_v9  ;;  %6041 = vmatpush1.bf16.msra.mxu1 %v4458_v16  ;;  %v4538_v9 = vld [vmem:[#allocation2 + $0x550] sm:$0xff]  ;;  %v4545_v16 = vld [vmem:[#allocation2 + $0x588] sm:$0xff] }
 0xb7e   :  { %5618 = vmatprep.subr.bf16.mxu0 %v4465_v13  ;;  %6042 = vmatprep.subr.bf16.mxu1 %v4467_v20  ;;  %v4547_v13 = vld [vmem:[#allocation2 + $0x598] sm:$0xff]  ;;  %v4544_v20 = vld [vmem:[#allocation2 + $0x580] sm:$0xff] }
 0xb81   :  { %5619 = vmatpush1.bf16.msra.mxu0 %v4464_v24  ;;  %6043 = vmatpush1.bf16.msra.mxu1 %v4466_v21  ;;  %v4546_v24 = vld [vmem:[#allocation2 + $0x590] sm:$0xff]  ;;  %v4553_v21 = vld [vmem:[#allocation2 + $0x5c8] sm:$0xff] }
 0xb82   :  { %5620 = vmatprep.subr.bf16.mxu0 %v4473_v25  ;;  %6044 = vmatprep.subr.bf16.mxu1 %v4475_v26  ;;  %v4555_v25 = vld [vmem:[#allocation2 + $0x5d8] sm:$0xff]  ;;  %v4552_v26 = vld [vmem:[#allocation2 + $0x5c0] sm:$0xff] }
 0xb85   :  { %5621 = vmatpush1.bf16.msra.mxu0 %v4472_v27  ;;  %6045 = vmatpush1.bf16.msra.mxu1 %v4474_v28  ;;  %v4554_v27 = vld [vmem:[#allocation2 + $0x5d0] sm:$0xff]  ;;  %v4561_v28 = vld [vmem:[#allocation2 + $0x608] sm:$0xff] }
 0xb86   :  { %5622 = vmatprep.subr.bf16.mxu0 %v4481_v29  ;;  %6046 = vmatprep.subr.bf16.mxu1 %v4483_v19  ;;  %v4563_v29 = vld [vmem:[#allocation2 + $0x618] sm:$0xff]  ;;  %v4560_v19 = vld [vmem:[#allocation2 + $0x600] sm:$0xff] }
 0xb89   :  { %5623 = vmatpush1.bf16.msra.mxu0 %v4480_v18  ;;  %6047 = vmatpush1.bf16.msra.mxu1 %v4482_v32  ;;  %v4562_v18 = vld [vmem:[#allocation2 + $0x610] sm:$0xff]  ;;  %v4569_v32 = vld [vmem:[#allocation2 + $0x648] sm:$0xff] }
 0xb8a   :  { %5624 = vmatprep.subr.bf16.mxu0 %v4489_v33  ;;  %6048 = vmatprep.subr.bf16.mxu1 %v4491_v34  ;;  %v4571_v33 = vld [vmem:[#allocation2 + $0x658] sm:$0xff]  ;;  %v4568_v34 = vld [vmem:[#allocation2 + $0x640] sm:$0xff] }
 0xb8d   :  { %5625 = vmatpush1.bf16.msra.mxu0 %v4488_v22  ;;  %6049 = vmatpush1.bf16.msra.mxu1 %v4490_v17  ;;  %v4570_v22 = vld [vmem:[#allocation2 + $0x650] sm:$0xff]  ;;  %v4577_v17 = vld [vmem:[#allocation2 + $0x688] sm:$0xff] }
 0xb8e   :  { %5647 = vmatprep.subr.bf16.mxu0 %v4497_v47  ;;  %6071 = vmatprep.subr.bf16.mxu1 %v4499_v49  ;;  %v4579_v47 = vld [vmem:[#allocation2 + $0x698] sm:$0xff]  ;;  %v4576_v49 = vld [vmem:[#allocation2 + $0x680] sm:$0xff] }
 0xb90   :  { %5627 = vmatmul.mubr.bf16.vlgmr.msra.gmra.mrb[12].mxu0 %v13384_v56  ;;  %6051 = vmatmul.mubr.bf16.vlgmr.msra.gmra.mrb[24].mxu1 %v13384_v56 }
 0xb91   :  { %5648 = vmatpush1.bf16.msra.mxu0 %v4496_v36  ;;  %6072 = vmatpush1.bf16.msra.mxu1 %v4498_v37  ;;  %v4587_v36 = vld [vmem:[#allocation2 + $0x6d8] sm:$0xff]  ;;  %v4584_v37 = vld [vmem:[#allocation2 + $0x6c0] sm:$0xff] }
 0xb92   :  { %5649 = vmatprep.subr.bf16.mxu0 %v4505_v38  ;;  %6073 = vmatprep.subr.bf16.mxu1 %v4507_v39  ;;  %v4586_v38 = vld [vmem:[#allocation2 + $0x6d0] sm:$0xff]  ;;  %v4593_v39 = vld [vmem:[#allocation2 + $0x708] sm:$0xff] }
 0xb93   :  { %5636 = vmatprep.mubr.bf16.mxu0 %v13388_v23  ;;  %6060 = vmatprep.mubr.bf16.mxu1 %v13388_v23 }
 0xb95   :  { %5650 = vmatpush1.bf16.msra.mxu0 %v4504_v40  ;;  %6074 = vmatpush1.bf16.msra.mxu1 %v4506_v41  ;;  %v4595_v40 = vld [vmem:[#allocation2 + $0x718] sm:$0xff]  ;;  %v4592_v41 = vld [vmem:[#allocation2 + $0x700] sm:$0xff] }
 0xb96   :  { %5651 = vmatprep.subr.bf16.mxu0 %v4513_v43  ;;  %6075 = vmatprep.subr.bf16.mxu1 %v4515_v31  ;;  %v4594_v43 = vld [vmem:[#allocation2 + $0x710] sm:$0xff]  ;;  %v4601_v31 = vld [vmem:[#allocation2 + $0x748] sm:$0xff] }
 0xb98   :  { %5637 = vmatmul.mubr.bf16.gmra.mrb[16].mxu0 %v13394_v50  ;;  %6061 = vmatmul.mubr.bf16.gmra.mrb[28].mxu1 %v13394_v50 }
 0xb99   :  { %5652 = vmatpush1.bf16.msra.mxu0 %v4512_v44  ;;  %6076 = vmatpush1.bf16.msra.mxu1 %v4514_v30  ;;  %v4603_v44 = vld [vmem:[#allocation2 + $0x758] sm:$0xff]  ;;  %v4600_v30 = vld [vmem:[#allocation2 + $0x740] sm:$0xff] }
 0xb9a   :  { %5653 = vmatprep.subr.bf16.mxu0 %v4521_v59  ;;  %6077 = vmatprep.subr.bf16.mxu1 %v4523_v46  ;;  %v4602_v59 = vld [vmem:[#allocation2 + $0x750] sm:$0xff]  ;;  %v4609_v46 = vld [vmem:[#allocation2 + $0x788] sm:$0xff] }
 0xb9b   :  { %5679 = vmatprep.mubr.bf16.mxu0 %v13404_v48  ;;  %6103 = vmatprep.mubr.bf16.mxu1 %v13404_v48 }
 0xb9d   :  { %5654 = vmatpush1.bf16.msra.mxu0 %v4520_v51  ;;  %6078 = vmatpush1.bf16.msra.mxu1 %v4522_v61  ;;  %v4611_v51 = vld [vmem:[#allocation2 + $0x798] sm:$0xff]  ;;  %v4608_v61 = vld [vmem:[#allocation2 + $0x780] sm:$0xff] }
 0xb9e   :  { %5655 = vmatprep.subr.bf16.mxu0 %v4529_v2  ;;  %6079 = vmatprep.subr.bf16.mxu1 %v4531_v3  ;;  %v4610_v2 = vld [vmem:[#allocation2 + $0x790] sm:$0xff]  ;;  %v4617_v3 = vld [vmem:[#allocation2 + $0x7c8] sm:$0xff] }
 0xba1   :  { %5656 = vmatpush1.bf16.msra.mxu0 %v4528_v4  ;;  %6080 = vmatpush1.bf16.msra.mxu1 %v4530_v5  ;;  %v4619_v4 = vld [vmem:[#allocation2 + $0x7d8] sm:$0xff]  ;;  %v4616_v5 = vld [vmem:[#allocation2 + $0x7c0] sm:$0xff] }
 0xba2   :  { %5657 = vmatprep.subr.bf16.mxu0 %v4537_v6  ;;  %6081 = vmatprep.subr.bf16.mxu1 %v4539_v7  ;;  %v4618_v6 = vld [vmem:[#allocation2 + $0x7d0] sm:$0xff]  ;;  %v4625_v7 = vld [vmem:[#allocation2 + $0x808] sm:$0xff] }
 0xba5   :  { %5658 = vmatpush1.bf16.msra.mxu0 %v4536_v8  ;;  %6082 = vmatpush1.bf16.msra.mxu1 %v4538_v9  ;;  %v4627_v8 = vld [vmem:[#allocation2 + $0x818] sm:$0xff]  ;;  %v4351_v9 = vld [vmem:[%s13983_s26 + $0x88] sm:$0xff] }
 0xba6   :  { %5659 = vmatprep.subr.bf16.mxu0 %v4545_v16  ;;  %6083 = vmatprep.subr.bf16.mxu1 %v4547_v13  ;;  %v13413_v16 = vcombine.low %v13397_v52, %v13400_v45  ;;  %v4359_v13 = vld [vmem:[%s13983_s26 + $0xc8] sm:$0xff]  ;;  %v4634_v52 = vld [vmem:[#allocation2 + $0x850] sm:$0xff] }
 0xba7   :  { %v4641_v45 = vld [vmem:[#allocation2 + $0x888] sm:$0xff] }
 0xba9   :  { %5660 = vmatpush1.bf16.msra.mxu0 %v4544_v20  ;;  %6084 = vmatpush1.bf16.msra.mxu1 %v4546_v24  ;;  %v4624_v20 = vld [vmem:[#allocation2 + $0x800] sm:$0xff]  ;;  %v4626_v24 = vld [vmem:[#allocation2 + $0x810] sm:$0xff] }
 0xbaa   :  { %5661 = vmatprep.subr.bf16.mxu0 %v4553_v21  ;;  %6085 = vmatprep.subr.bf16.mxu1 %v4555_v25  ;;  %v4633_v21 = vld [vmem:[#allocation2 + $0x848] sm:$0xff]  ;;  %v4635_v25 = vld [vmem:[#allocation2 + $0x858] sm:$0xff] }
 0xbad   :  { %5662 = vmatpush1.bf16.msra.mxu0 %v4552_v26  ;;  %6086 = vmatpush1.bf16.msra.mxu1 %v4554_v27  ;;  %v13416_v26 = vcombine.high %v4351_v9, %v4359_v13  ;;  %v4632_v27 = vld [vmem:[#allocation2 + $0x840] sm:$0xff] }
 0xbae   :  { %5663 = vmatprep.subr.bf16.mxu0 %v4561_v28  ;;  %6087 = vmatprep.subr.bf16.mxu1 %v4563_v29  ;;  %v4643_v28 = vld [vmem:[#allocation2 + $0x898] sm:$0xff]  ;;  %v13421_v29 = vld [vmem:[%s13983_s26 + $0x10] sm:$0xff] }
 0xbb1   :  { %5664 = vmatpush1.bf16.msra.mxu0 %v4560_v19  ;;  %6088 = vmatpush1.bf16.msra.mxu1 %v4562_v18  ;;  %v4640_v19 = vld [vmem:[#allocation2 + $0x880] sm:$0xff]  ;;  %v13425_v18 = vcombine.low %v4351_v9, %v4359_v13  ;;  %v4698_v9 = vld [vmem:[#allocation2 + $0xa50] sm:$0xff]  ;;  %v4705_v13 = vld [vmem:[#allocation2 + $0xa88] sm:$0xff] }
 0xbb2   :  { %5665 = vmatprep.subr.bf16.mxu0 %v4569_v32  ;;  %6089 = vmatprep.subr.bf16.mxu1 %v4571_v33  ;;  %v13428_v32 = vld [vmem:[%s13983_s26 + $0x50] sm:$0xff] }
 0xbb3   :  { %v4642_v33 = vld [vmem:[#allocation2 + $0x890] sm:$0xff] }
 0xbb5   :  { %5666 = vmatpush1.bf16.msra.mxu0 %v4568_v34  ;;  %6090 = vmatpush1.bf16.msra.mxu1 %v4570_v22  ;;  %v4649_v34 = vld [vmem:[#allocation2 + $0x8c8] sm:$0xff]  ;;  %v4651_v22 = vld [vmem:[#allocation2 + $0x8d8] sm:$0xff] }
 0xbb6   :  { %5667 = vmatprep.subr.bf16.mxu0 %v4577_v17  ;;  %6091 = vmatprep.subr.bf16.mxu1 %v4579_v47  ;;  %v13432_v17 = vcombine.high %v13421_v29, %v13428_v32  ;;  %v4648_v47 = vld [vmem:[#allocation2 + $0x8c0] sm:$0xff] }
 0xbb9   :  { %5668 = vmatpush1.bf16.msra.mxu0 %v4576_v49  ;;  %6092 = vmatpush1.bf16.msra.mxu1 %v4578_v60  ;;  %v4650_v49 = vld [vmem:[#allocation2 + $0x8d0] sm:$0xff]  ;;  %v4657_v60 = vld [vmem:[#allocation2 + $0x908] sm:$0xff] }
 0xbba   :  { %5669 = vmatprep.subr.bf16.mxu0 %v4585_v35  ;;  %6093 = vmatprep.subr.bf16.mxu1 %v4587_v36  ;;  %v4659_v35 = vld [vmem:[#allocation2 + $0x918] sm:$0xff]  ;;  %v4656_v36 = vld [vmem:[#allocation2 + $0x900] sm:$0xff] }
 0xbbd   :  { %5670 = vmatpush1.bf16.msra.mxu0 %v4584_v37  ;;  %6094 = vmatpush1.bf16.msra.mxu1 %v4586_v38  ;;  %v4658_v37 = vld [vmem:[#allocation2 + $0x910] sm:$0xff]  ;;  %v4665_v38 = vld [vmem:[#allocation2 + $0x948] sm:$0xff] }
 0xbbe   :  { %5671 = vmatprep.subr.bf16.mxu0 %v4593_v39  ;;  %6095 = vmatprep.subr.bf16.mxu1 %v4595_v40  ;;  %v4667_v39 = vld [vmem:[#allocation2 + $0x958] sm:$0xff]  ;;  %v4664_v40 = vld [vmem:[#allocation2 + $0x940] sm:$0xff] }
 0xbc1   :  { %5672 = vmatpush1.bf16.msra.mxu0 %v4592_v41  ;;  %6096 = vmatpush1.bf16.msra.mxu1 %v4594_v43  ;;  %v4666_v41 = vld [vmem:[#allocation2 + $0x950] sm:$0xff]  ;;  %v4673_v43 = vld [vmem:[#allocation2 + $0x988] sm:$0xff] }
 0xbc2   :  { %5673 = vmatprep.subr.bf16.mxu0 %v4601_v31  ;;  %6097 = vmatprep.subr.bf16.mxu1 %v4603_v44  ;;  %v4675_v31 = vld [vmem:[#allocation2 + $0x998] sm:$0xff]  ;;  %v4672_v44 = vld [vmem:[#allocation2 + $0x980] sm:$0xff] }
 0xbc5   :  { %5674 = vmatpush1.bf16.msra.mxu0 %v4600_v30  ;;  %6098 = vmatpush1.bf16.msra.mxu1 %v4602_v59  ;;  %v4674_v30 = vld [vmem:[#allocation2 + $0x990] sm:$0xff]  ;;  %v4681_v59 = vld [vmem:[#allocation2 + $0x9c8] sm:$0xff] }
 0xbc6   :  { %5675 = vmatprep.subr.bf16.mxu0 %v4609_v46  ;;  %6099 = vmatprep.subr.bf16.mxu1 %v4611_v51  ;;  %v4683_v46 = vld [vmem:[#allocation2 + $0x9d8] sm:$0xff]  ;;  %v4680_v51 = vld [vmem:[#allocation2 + $0x9c0] sm:$0xff] }
 0xbc9   :  { %5676 = vmatpush1.bf16.msra.mxu0 %v4608_v61  ;;  %6100 = vmatpush1.bf16.msra.mxu1 %v4610_v2  ;;  %v4682_v61 = vld [vmem:[#allocation2 + $0x9d0] sm:$0xff]  ;;  %v4689_v2 = vld [vmem:[#allocation2 + $0xa08] sm:$0xff] }
 0xbca   :  { %5677 = vmatprep.subr.bf16.mxu0 %v4617_v3  ;;  %6101 = vmatprep.subr.bf16.mxu1 %v4619_v4  ;;  %v4691_v3 = vld [vmem:[#allocation2 + $0xa18] sm:$0xff]  ;;  %v4688_v4 = vld [vmem:[#allocation2 + $0xa00] sm:$0xff] }
 0xbcd   :  { %5678 = vmatpush1.bf16.msra.mxu0 %v4616_v5  ;;  %6102 = vmatpush1.bf16.msra.mxu1 %v4618_v6  ;;  %v4690_v5 = vld [vmem:[#allocation2 + $0xa10] sm:$0xff]  ;;  %v4697_v6 = vld [vmem:[#allocation2 + $0xa48] sm:$0xff] }
 0xbce   :  { %5700 = vmatprep.subr.bf16.mxu0 %v4625_v7  ;;  %6124 = vmatprep.subr.bf16.mxu1 %v4627_v8  ;;  %v4699_v7 = vld [vmem:[#allocation2 + $0xa58] sm:$0xff]  ;;  %v4696_v8 = vld [vmem:[#allocation2 + $0xa40] sm:$0xff] }
 0xbd0   :  { %5680 = vmatmul.mubr.bf16.vlgmr.msra.gmra.mrb[12].mxu0 %v13413_v16  ;;  %6104 = vmatmul.mubr.bf16.vlgmr.msra.gmra.mrb[24].mxu1 %v13413_v16 }
 0xbd1   :  { %5701 = vmatpush1.bf16.msra.mxu0 %v4624_v20  ;;  %6125 = vmatpush1.bf16.msra.mxu1 %v4626_v24  ;;  %v4707_v20 = vld [vmem:[#allocation2 + $0xa98] sm:$0xff]  ;;  %v4704_v24 = vld [vmem:[#allocation2 + $0xa80] sm:$0xff] }
 0xbd2   :  { %5702 = vmatprep.subr.bf16.mxu0 %v4633_v21  ;;  %6126 = vmatprep.subr.bf16.mxu1 %v4635_v25  ;;  %v4706_v21 = vld [vmem:[#allocation2 + $0xa90] sm:$0xff]  ;;  %v4713_v25 = vld [vmem:[#allocation2 + $0xac8] sm:$0xff] }
 0xbd3   :  { %5689 = vmatprep.mubr.bf16.mxu0 %v13416_v26  ;;  %6113 = vmatprep.mubr.bf16.mxu1 %v13416_v26 }
 0xbd5   :  { %5703 = vmatpush1.bf16.msra.mxu0 %v4632_v27  ;;  %6127 = vmatpush1.bf16.msra.mxu1 %v4634_v52  ;;  %v4715_v27 = vld [vmem:[#allocation2 + $0xad8] sm:$0xff]  ;;  %v4712_v52 = vld [vmem:[#allocation2 + $0xac0] sm:$0xff] }
 0xbd6   :  { %5704 = vmatprep.subr.bf16.mxu0 %v4641_v45  ;;  %6128 = vmatprep.subr.bf16.mxu1 %v4643_v28  ;;  %v4714_v45 = vld [vmem:[#allocation2 + $0xad0] sm:$0xff]  ;;  %v4721_v28 = vld [vmem:[#allocation2 + $0xb08] sm:$0xff] }
 0xbd8   :  { %5690 = vmatmul.mubr.bf16.gmra.mrb[16].mxu0 %v13425_v18  ;;  %6114 = vmatmul.mubr.bf16.gmra.mrb[28].mxu1 %v13425_v18 }
 0xbd9   :  { %5705 = vmatpush1.bf16.msra.mxu0 %v4640_v19  ;;  %6129 = vmatpush1.bf16.msra.mxu1 %v4642_v33  ;;  %v4723_v19 = vld [vmem:[#allocation2 + $0xb18] sm:$0xff]  ;;  %v4720_v33 = vld [vmem:[#allocation2 + $0xb00] sm:$0xff] }
 0xbda   :  { %5706 = vmatprep.subr.bf16.mxu0 %v4649_v34  ;;  %6130 = vmatprep.subr.bf16.mxu1 %v4651_v22  ;;  %v4722_v34 = vld [vmem:[#allocation2 + $0xb10] sm:$0xff]  ;;  %v4729_v22 = vld [vmem:[#allocation2 + $0xb48] sm:$0xff] }
 0xbdb   :  { %5732 = vmatprep.mubr.bf16.mxu0 %v13432_v17  ;;  %6156 = vmatprep.mubr.bf16.mxu1 %v13432_v17 }
 0xbdd   :  { %5707 = vmatpush1.bf16.msra.mxu0 %v4648_v47  ;;  %6131 = vmatpush1.bf16.msra.mxu1 %v4650_v49  ;;  %v4731_v47 = vld [vmem:[#allocation2 + $0xb58] sm:$0xff]  ;;  %v4728_v49 = vld [vmem:[#allocation2 + $0xb40] sm:$0xff] }
 0xbde   :  { %5708 = vmatprep.subr.bf16.mxu0 %v4657_v60  ;;  %6132 = vmatprep.subr.bf16.mxu1 %v4659_v35  ;;  %v4730_v60 = vld [vmem:[#allocation2 + $0xb50] sm:$0xff]  ;;  %v4737_v35 = vld [vmem:[#allocation2 + $0xb88] sm:$0xff] }
 0xbe1   :  { %5709 = vmatpush1.bf16.msra.mxu0 %v4656_v36  ;;  %6133 = vmatpush1.bf16.msra.mxu1 %v4658_v37  ;;  %v4739_v36 = vld [vmem:[#allocation2 + $0xb98] sm:$0xff]  ;;  %v4736_v37 = vld [vmem:[#allocation2 + $0xb80] sm:$0xff] }
 0xbe2   :  { %5710 = vmatprep.subr.bf16.mxu0 %v4665_v38  ;;  %6134 = vmatprep.subr.bf16.mxu1 %v4667_v39  ;;  %v4738_v38 = vld [vmem:[#allocation2 + $0xb90] sm:$0xff]  ;;  %v4745_v39 = vld [vmem:[#allocation2 + $0xbc8] sm:$0xff] }
 0xbe5   :  { %5711 = vmatpush1.bf16.msra.mxu0 %v4664_v40  ;;  %6135 = vmatpush1.bf16.msra.mxu1 %v4666_v41  ;;  %v4747_v40 = vld [vmem:[#allocation2 + $0xbd8] sm:$0xff]  ;;  %v4744_v41 = vld [vmem:[#allocation2 + $0xbc0] sm:$0xff] }
 0xbe6   :  { %5712 = vmatprep.subr.bf16.mxu0 %v4673_v43  ;;  %6136 = vmatprep.subr.bf16.mxu1 %v4675_v31  ;;  %v4746_v43 = vld [vmem:[#allocation2 + $0xbd0] sm:$0xff]  ;;  %v4753_v31 = vld [vmem:[#allocation2 + $0xc08] sm:$0xff] }
 0xbe9   :  { %5713 = vmatpush1.bf16.msra.mxu0 %v4672_v44  ;;  %6137 = vmatpush1.bf16.msra.mxu1 %v4674_v30  ;;  %v4755_v44 = vld [vmem:[#allocation2 + $0xc18] sm:$0xff]  ;;  %v4352_v30 = vld [vmem:[%s13983_s26 + $0x90] sm:$0xff] }
 0xbea   :  { %5714 = vmatprep.subr.bf16.mxu0 %v4681_v59  ;;  %6138 = vmatprep.subr.bf16.mxu1 %v4683_v46  ;;  %v13441_v59 = vcombine.low %v13421_v29, %v13428_v32  ;;  %v4360_v46 = vld [vmem:[%s13983_s26 + $0xd0] sm:$0xff]  ;;  %v4769_v32 = vld [vmem:[#allocation2 + $0xc88] sm:$0xff] }
 0xbeb   :  { %v4762_v29 = vld [vmem:[#allocation2 + $0xc50] sm:$0xff] }
 0xbed   :  { %5715 = vmatpush1.bf16.msra.mxu0 %v4680_v51  ;;  %6139 = vmatpush1.bf16.msra.mxu1 %v4682_v61  ;;  %v4752_v51 = vld [vmem:[#allocation2 + $0xc00] sm:$0xff]  ;;  %v4754_v61 = vld [vmem:[#allocation2 + $0xc10] sm:$0xff] }
 0xbee   :  { %5716 = vmatprep.subr.bf16.mxu0 %v4689_v2  ;;  %6140 = vmatprep.subr.bf16.mxu1 %v4691_v3  ;;  %v4761_v2 = vld [vmem:[#allocation2 + $0xc48] sm:$0xff]  ;;  %v4763_v3 = vld [vmem:[#allocation2 + $0xc58] sm:$0xff] }
 0xbf1   :  { %5717 = vmatpush1.bf16.msra.mxu0 %v4688_v4  ;;  %6141 = vmatpush1.bf16.msra.mxu1 %v4690_v5  ;;  %v13444_v4 = vcombine.high %v4352_v30, %v4360_v46  ;;  %v4760_v5 = vld [vmem:[#allocation2 + $0xc40] sm:$0xff] }
 0xbf2   :  { %5718 = vmatprep.subr.bf16.mxu0 %v4697_v6  ;;  %6142 = vmatprep.subr.bf16.mxu1 %v4699_v7  ;;  %v4771_v6 = vld [vmem:[#allocation2 + $0xc98] sm:$0xff] }
 0xbf3   :  { %v13449_v7 = vld [vmem:[%s13983_s26 + $0x18] sm:$0xff] }
 0xbf5   :  { %5719 = vmatpush1.bf16.msra.mxu0 %v4696_v8  ;;  %6143 = vmatpush1.bf16.msra.mxu1 %v4698_v9  ;;  %v4768_v8 = vld [vmem:[#allocation2 + $0xc80] sm:$0xff]  ;;  %v13453_v9 = vcombine.low %v4352_v30, %v4360_v46  ;;  %v4818_v30 = vld [vmem:[#allocation2 + $0xe10] sm:$0xff]  ;;  %v4825_v46 = vld [vmem:[#allocation2 + $0xe48] sm:$0xff] }
 0xbf6   :  { %5720 = vmatprep.subr.bf16.mxu0 %v4705_v13  ;;  %6144 = vmatprep.subr.bf16.mxu1 %v4707_v20  ;;  %v13456_v13 = vld [vmem:[%s13983_s26 + $0x58] sm:$0xff]  ;;  %v4770_v20 = vld [vmem:[#allocation2 + $0xc90] sm:$0xff] }
 0xbf9   :  { %5721 = vmatpush1.bf16.msra.mxu0 %v4704_v24  ;;  %6145 = vmatpush1.bf16.msra.mxu1 %v4706_v21  ;;  %v4777_v24 = vld [vmem:[#allocation2 + $0xcc8] sm:$0xff]  ;;  %v4779_v21 = vld [vmem:[#allocation2 + $0xcd8] sm:$0xff] }
 0xbfa   :  { %5722 = vmatprep.subr.bf16.mxu0 %v4713_v25  ;;  %6146 = vmatprep.subr.bf16.mxu1 %v4715_v27  ;;  %v13460_v25 = vcombine.high %v13449_v7, %v13456_v13  ;;  %v4776_v27 = vld [vmem:[#allocation2 + $0xcc0] sm:$0xff] }
 0xbfd   :  { %5723 = vmatpush1.bf16.msra.mxu0 %v4712_v52  ;;  %6147 = vmatpush1.bf16.msra.mxu1 %v4714_v45  ;;  %v4778_v52 = vld [vmem:[#allocation2 + $0xcd0] sm:$0xff]  ;;  %v4785_v45 = vld [vmem:[#allocation2 + $0xd08] sm:$0xff] }
 0xbfe   :  { %5724 = vmatprep.subr.bf16.mxu0 %v4721_v28  ;;  %6148 = vmatprep.subr.bf16.mxu1 %v4723_v19  ;;  %v4787_v28 = vld [vmem:[#allocation2 + $0xd18] sm:$0xff]  ;;  %v4784_v19 = vld [vmem:[#allocation2 + $0xd00] sm:$0xff] }
 0xc01   :  { %5725 = vmatpush1.bf16.msra.mxu0 %v4720_v33  ;;  %6149 = vmatpush1.bf16.msra.mxu1 %v4722_v34  ;;  %v4786_v33 = vld [vmem:[#allocation2 + $0xd10] sm:$0xff]  ;;  %v4793_v34 = vld [vmem:[#allocation2 + $0xd48] sm:$0xff] }
 0xc02   :  { %5726 = vmatprep.subr.bf16.mxu0 %v4729_v22  ;;  %6150 = vmatprep.subr.bf16.mxu1 %v4731_v47  ;;  %v4795_v22 = vld [vmem:[#allocation2 + $0xd58] sm:$0xff]  ;;  %v4792_v47 = vld [vmem:[#allocation2 + $0xd40] sm:$0xff] }
 0xc05   :  { %5727 = vmatpush1.bf16.msra.mxu0 %v4728_v49  ;;  %6151 = vmatpush1.bf16.msra.mxu1 %v4730_v60  ;;  %v4794_v49 = vld [vmem:[#allocation2 + $0xd50] sm:$0xff]  ;;  %v4801_v60 = vld [vmem:[#allocation2 + $0xd88] sm:$0xff] }
 0xc06   :  { %5728 = vmatprep.subr.bf16.mxu0 %v4737_v35  ;;  %6152 = vmatprep.subr.bf16.mxu1 %v4739_v36  ;;  %v4803_v35 = vld [vmem:[#allocation2 + $0xd98] sm:$0xff]  ;;  %v4800_v36 = vld [vmem:[#allocation2 + $0xd80] sm:$0xff] }
 0xc09   :  { %5729 = vmatpush1.bf16.msra.mxu0 %v4736_v37  ;;  %6153 = vmatpush1.bf16.msra.mxu1 %v4738_v38  ;;  %v4802_v37 = vld [vmem:[#allocation2 + $0xd90] sm:$0xff]  ;;  %v4809_v38 = vld [vmem:[#allocation2 + $0xdc8] sm:$0xff] }
 0xc0a   :  { %5730 = vmatprep.subr.bf16.mxu0 %v4745_v39  ;;  %6154 = vmatprep.subr.bf16.mxu1 %v4747_v40  ;;  %v4811_v39 = vld [vmem:[#allocation2 + $0xdd8] sm:$0xff]  ;;  %v4808_v40 = vld [vmem:[#allocation2 + $0xdc0] sm:$0xff] }
 0xc0d   :  { %5731 = vmatpush1.bf16.msra.mxu0 %v4744_v41  ;;  %6155 = vmatpush1.bf16.msra.mxu1 %v4746_v43  ;;  %v4810_v41 = vld [vmem:[#allocation2 + $0xdd0] sm:$0xff]  ;;  %v4817_v43 = vld [vmem:[#allocation2 + $0xe08] sm:$0xff] }
 0xc0e   :  { %5753 = vmatprep.subr.bf16.mxu0 %v4753_v31  ;;  %6177 = vmatprep.subr.bf16.mxu1 %v4755_v44  ;;  %v4819_v31 = vld [vmem:[#allocation2 + $0xe18] sm:$0xff]  ;;  %v4816_v44 = vld [vmem:[#allocation2 + $0xe00] sm:$0xff] }
 0xc10   :  { %5733 = vmatmul.mubr.bf16.vlgmr.msra.gmra.mrb[12].mxu0 %v13441_v59  ;;  %6157 = vmatmul.mubr.bf16.vlgmr.msra.gmra.mrb[24].mxu1 %v13441_v59 }
 0xc11   :  { %5754 = vmatpush1.bf16.msra.mxu0 %v4752_v51  ;;  %6178 = vmatpush1.bf16.msra.mxu1 %v4754_v61  ;;  %v4827_v51 = vld [vmem:[#allocation2 + $0xe58] sm:$0xff]  ;;  %v4824_v61 = vld [vmem:[#allocation2 + $0xe40] sm:$0xff] }
 0xc12   :  { %5755 = vmatprep.subr.bf16.mxu0 %v4761_v2  ;;  %6179 = vmatprep.subr.bf16.mxu1 %v4763_v3  ;;  %v4826_v2 = vld [vmem:[#allocation2 + $0xe50] sm:$0xff]  ;;  %v4833_v3 = vld [vmem:[#allocation2 + $0xe88] sm:$0xff] }
 0xc13   :  { %5742 = vmatprep.mubr.bf16.mxu0 %v13444_v4  ;;  %6166 = vmatprep.mubr.bf16.mxu1 %v13444_v4 }
 0xc15   :  { %5756 = vmatpush1.bf16.msra.mxu0 %v4760_v5  ;;  %6180 = vmatpush1.bf16.msra.mxu1 %v4762_v29  ;;  %v4835_v5 = vld [vmem:[#allocation2 + $0xe98] sm:$0xff]  ;;  %v4832_v29 = vld [vmem:[#allocation2 + $0xe80] sm:$0xff] }
 0xc16   :  { %5757 = vmatprep.subr.bf16.mxu0 %v4769_v32  ;;  %6181 = vmatprep.subr.bf16.mxu1 %v4771_v6  ;;  %v4834_v32 = vld [vmem:[#allocation2 + $0xe90] sm:$0xff]  ;;  %v4841_v6 = vld [vmem:[#allocation2 + $0xec8] sm:$0xff] }
 0xc18   :  { %5743 = vmatmul.mubr.bf16.gmra.mrb[16].mxu0 %v13453_v9  ;;  %6167 = vmatmul.mubr.bf16.gmra.mrb[28].mxu1 %v13453_v9 }
 0xc19   :  { %5758 = vmatpush1.bf16.msra.mxu0 %v4768_v8  ;;  %6182 = vmatpush1.bf16.msra.mxu1 %v4770_v20  ;;  %v4843_v8 = vld [vmem:[#allocation2 + $0xed8] sm:$0xff]  ;;  %v4840_v20 = vld [vmem:[#allocation2 + $0xec0] sm:$0xff] }
 0xc1a   :  { %5759 = vmatprep.subr.bf16.mxu0 %v4777_v24  ;;  %6183 = vmatprep.subr.bf16.mxu1 %v4779_v21  ;;  %v4842_v24 = vld [vmem:[#allocation2 + $0xed0] sm:$0xff]  ;;  %v4849_v21 = vld [vmem:[#allocation2 + $0xf08] sm:$0xff] }
 0xc1b   :  { %5785 = vmatprep.mubr.bf16.mxu0 %v13460_v25  ;;  %6209 = vmatprep.mubr.bf16.mxu1 %v13460_v25 }
 0xc1d   :  { %5760 = vmatpush1.bf16.msra.mxu0 %v4776_v27  ;;  %6184 = vmatpush1.bf16.msra.mxu1 %v4778_v52  ;;  %v4851_v27 = vld [vmem:[#allocation2 + $0xf18] sm:$0xff]  ;;  %v4848_v52 = vld [vmem:[#allocation2 + $0xf00] sm:$0xff] }
 0xc1e   :  { %5761 = vmatprep.subr.bf16.mxu0 %v4785_v45  ;;  %6185 = vmatprep.subr.bf16.mxu1 %v4787_v28  ;;  %v4850_v45 = vld [vmem:[#allocation2 + $0xf10] sm:$0xff]  ;;  %v4857_v28 = vld [vmem:[#allocation2 + $0xf48] sm:$0xff] }
 0xc21   :  { %5762 = vmatpush1.bf16.msra.mxu0 %v4784_v19  ;;  %6186 = vmatpush1.bf16.msra.mxu1 %v4786_v33  ;;  %v4859_v19 = vld [vmem:[#allocation2 + $0xf58] sm:$0xff]  ;;  %v4856_v33 = vld [vmem:[#allocation2 + $0xf40] sm:$0xff] }
 0xc22   :  { %5763 = vmatprep.subr.bf16.mxu0 %v4793_v34  ;;  %6187 = vmatprep.subr.bf16.mxu1 %v4795_v22  ;;  %v4858_v34 = vld [vmem:[#allocation2 + $0xf50] sm:$0xff]  ;;  %v4865_v22 = vld [vmem:[#allocation2 + $0xf88] sm:$0xff] }
 0xc25   :  { %5764 = vmatpush1.bf16.msra.mxu0 %v4792_v47  ;;  %6188 = vmatpush1.bf16.msra.mxu1 %v4794_v49  ;;  %v4867_v47 = vld [vmem:[#allocation2 + $0xf98] sm:$0xff]  ;;  %v4864_v49 = vld [vmem:[#allocation2 + $0xf80] sm:$0xff] }
 0xc26   :  { %5765 = vmatprep.subr.bf16.mxu0 %v4801_v60  ;;  %6189 = vmatprep.subr.bf16.mxu1 %v4803_v35  ;;  %v4866_v60 = vld [vmem:[#allocation2 + $0xf90] sm:$0xff]  ;;  %v4873_v35 = vld [vmem:[#allocation2 + $0xfc8] sm:$0xff] }
 0xc29   :  { %5766 = vmatpush1.bf16.msra.mxu0 %v4800_v36  ;;  %6190 = vmatpush1.bf16.msra.mxu1 %v4802_v37  ;;  %v4875_v36 = vld [vmem:[#allocation2 + $0xfd8] sm:$0xff]  ;;  %v4872_v37 = vld [vmem:[#allocation2 + $0xfc0] sm:$0xff] }
 0xc2a   :  { %5767 = vmatprep.subr.bf16.mxu0 %v4809_v38  ;;  %6191 = vmatprep.subr.bf16.mxu1 %v4811_v39  ;;  %v4874_v38 = vld [vmem:[#allocation2 + $0xfd0] sm:$0xff]  ;;  %v4881_v39 = vld [vmem:[#allocation2 + $0x1008] sm:$0xff] }
 0xc2d   :  { %5768 = vmatpush1.bf16.msra.mxu0 %v4808_v40  ;;  %6192 = vmatpush1.bf16.msra.mxu1 %v4810_v41  ;;  %v4883_v40 = vld [vmem:[#allocation2 + $0x1018] sm:$0xff]  ;;  %v13468_v41 = vcombine.low %v13449_v7, %v13456_v13  ;;  %v4888_v7 = vld [vmem:[#allocation2 + $0x1040] sm:$0xff]  ;;  %v4890_v13 = vld [vmem:[#allocation2 + $0x1050] sm:$0xff] }
 0xc2e   :  { %5769 = vmatprep.subr.bf16.mxu0 %v4817_v43  ;;  %6193 = vmatprep.subr.bf16.mxu1 %v4819_v31  ;;  %v4353_v43 = vld [vmem:[%s13983_s26 + $0x98] sm:$0xff] }
 0xc2f   :  { %v4361_v31 = vld [vmem:[%s13983_s26 + $0xd8] sm:$0xff] }
 0xc31   :  { %5770 = vmatpush1.bf16.msra.mxu0 %v4816_v44  ;;  %6194 = vmatpush1.bf16.msra.mxu1 %v4818_v30  ;;  %v4880_v44 = vld [vmem:[#allocation2 + $0x1000] sm:$0xff]  ;;  %v4882_v30 = vld [vmem:[#allocation2 + $0x1010] sm:$0xff] }
 0xc32   :  { %5771 = vmatprep.subr.bf16.mxu0 %v4825_v46  ;;  %6195 = vmatprep.subr.bf16.mxu1 %v4827_v51  ;;  %v4889_v46 = vld [vmem:[#allocation2 + $0x1048] sm:$0xff]  ;;  %v4891_v51 = vld [vmem:[#allocation2 + $0x1058] sm:$0xff] }
 0xc35   :  { %5772 = vmatpush1.bf16.msra.mxu0 %v4824_v61  ;;  %6196 = vmatpush1.bf16.msra.mxu1 %v4826_v2  ;;  %v13472_v61 = vcombine.high %v4353_v43, %v4361_v31  ;;  %v4897_v2 = vld [vmem:[#allocation2 + $0x1088] sm:$0xff] }
 0xc36   :  { %5773 = vmatprep.subr.bf16.mxu0 %v4833_v3  ;;  %6197 = vmatprep.subr.bf16.mxu1 %v4835_v5  ;;  %v4899_v3 = vld [vmem:[#allocation2 + $0x1098] sm:$0xff]  ;;  %v13478_v5 = vcombine.low %v4353_v43, %v4361_v31  ;;  %v4938_v43 = vld [vmem:[#allocation2 + $0x11d0] sm:$0xff]  ;;  %v4945_v31 = vld [vmem:[#allocation2 + $0x1208] sm:$0xff] }
 0xc39   :  { %5774 = vmatpush1.bf16.msra.mxu0 %v4832_v29  ;;  %6198 = vmatpush1.bf16.msra.mxu1 %v4834_v32  ;;  %v13481_v29 = vld [vmem:[%s13983_s26 + $0x20] sm:$0xff] }
 0xc3a   :  { %5775 = vmatprep.subr.bf16.mxu0 %v4841_v6  ;;  %6199 = vmatprep.subr.bf16.mxu1 %v4843_v8  ;;  %v13484_v32 = vld [vmem:[%s13983_s26 + $0x60] sm:$0xff]  ;;  %v4898_v8 = vld [vmem:[#allocation2 + $0x1090] sm:$0xff] }
 0xc3b   :  { %v4896_v6 = vld [vmem:[#allocation2 + $0x1080] sm:$0xff] }
 0xc3d   :  { %5776 = vmatpush1.bf16.msra.mxu0 %v4840_v20  ;;  %6200 = vmatpush1.bf16.msra.mxu1 %v4842_v24  ;;  %v4905_v20 = vld [vmem:[#allocation2 + $0x10c8] sm:$0xff]  ;;  %v4907_v24 = vld [vmem:[#allocation2 + $0x10d8] sm:$0xff] }
 0xc3e   :  { %5777 = vmatprep.subr.bf16.mxu0 %v4849_v21  ;;  %6201 = vmatprep.subr.bf16.mxu1 %v4851_v27  ;;  %v13488_v21 = vcombine.high %v13481_v29, %v13484_v32  ;;  %v4904_v27 = vld [vmem:[#allocation2 + $0x10c0] sm:$0xff] }
 0xc41   :  { %5778 = vmatpush1.bf16.msra.mxu0 %v4848_v52  ;;  %6202 = vmatpush1.bf16.msra.mxu1 %v4850_v45  ;;  %v4906_v52 = vld [vmem:[#allocation2 + $0x10d0] sm:$0xff]  ;;  %v4913_v45 = vld [vmem:[#allocation2 + $0x1108] sm:$0xff] }
 0xc42   :  { %5779 = vmatprep.subr.bf16.mxu0 %v4857_v28  ;;  %6203 = vmatprep.subr.bf16.mxu1 %v4859_v19  ;;  %v4915_v28 = vld [vmem:[#allocation2 + $0x1118] sm:$0xff]  ;;  %v4912_v19 = vld [vmem:[#allocation2 + $0x1100] sm:$0xff] }
 0xc45   :  { %5780 = vmatpush1.bf16.msra.mxu0 %v4856_v33  ;;  %6204 = vmatpush1.bf16.msra.mxu1 %v4858_v34  ;;  %v4914_v33 = vld [vmem:[#allocation2 + $0x1110] sm:$0xff]  ;;  %v4921_v34 = vld [vmem:[#allocation2 + $0x1148] sm:$0xff] }
 0xc46   :  { %5781 = vmatprep.subr.bf16.mxu0 %v4865_v22  ;;  %6205 = vmatprep.subr.bf16.mxu1 %v4867_v47  ;;  %v4923_v22 = vld [vmem:[#allocation2 + $0x1158] sm:$0xff]  ;;  %v4920_v47 = vld [vmem:[#allocation2 + $0x1140] sm:$0xff] }
 0xc49   :  { %5782 = vmatpush1.bf16.msra.mxu0 %v4864_v49  ;;  %6206 = vmatpush1.bf16.msra.mxu1 %v4866_v60  ;;  %v4922_v49 = vld [vmem:[#allocation2 + $0x1150] sm:$0xff]  ;;  %v4929_v60 = vld [vmem:[#allocation2 + $0x1188] sm:$0xff] }
 0xc4a   :  { %5783 = vmatprep.subr.bf16.mxu0 %v4873_v35  ;;  %6207 = vmatprep.subr.bf16.mxu1 %v4875_v36  ;;  %v4931_v35 = vld [vmem:[#allocation2 + $0x1198] sm:$0xff]  ;;  %v4928_v36 = vld [vmem:[#allocation2 + $0x1180] sm:$0xff] }
 0xc4d   :  { %5784 = vmatpush1.bf16.msra.mxu0 %v4872_v37  ;;  %6208 = vmatpush1.bf16.msra.mxu1 %v4874_v38  ;;  %v4930_v37 = vld [vmem:[#allocation2 + $0x1190] sm:$0xff]  ;;  %v4937_v38 = vld [vmem:[#allocation2 + $0x11c8] sm:$0xff] }
 0xc4e   :  { %5806 = vmatprep.subr.bf16.mxu0 %v4881_v39  ;;  %6230 = vmatprep.subr.bf16.mxu1 %v4883_v40  ;;  %v4939_v39 = vld [vmem:[#allocation2 + $0x11d8] sm:$0xff]  ;;  %v4936_v40 = vld [vmem:[#allocation2 + $0x11c0] sm:$0xff] }
 0xc50   :  { %5786 = vmatmul.mubr.bf16.vlgmr.msra.gmra.mrb[12].mxu0 %v13468_v41  ;;  %6210 = vmatmul.mubr.bf16.vlgmr.msra.gmra.mrb[24].mxu1 %v13468_v41 }
 0xc51   :  { %5807 = vmatpush1.bf16.msra.mxu0 %v4880_v44  ;;  %6231 = vmatpush1.bf16.msra.mxu1 %v4882_v30  ;;  %v4947_v44 = vld [vmem:[#allocation2 + $0x1218] sm:$0xff]  ;;  %v4944_v30 = vld [vmem:[#allocation2 + $0x1200] sm:$0xff] }
 0xc52   :  { %5808 = vmatprep.subr.bf16.mxu0 %v4889_v46  ;;  %6232 = vmatprep.subr.bf16.mxu1 %v4891_v51  ;;  %v4946_v46 = vld [vmem:[#allocation2 + $0x1210] sm:$0xff]  ;;  %v4953_v51 = vld [vmem:[#allocation2 + $0x1248] sm:$0xff] }
 0xc53   :  { %5795 = vmatprep.mubr.bf16.mxu0 %v13472_v61  ;;  %6219 = vmatprep.mubr.bf16.mxu1 %v13472_v61 }
 0xc55   :  { %5809 = vmatpush1.bf16.msra.mxu0 %v4888_v7  ;;  %6233 = vmatpush1.bf16.msra.mxu1 %v4890_v13  ;;  %v4955_v7 = vld [vmem:[#allocation2 + $0x1258] sm:$0xff]  ;;  %v4952_v13 = vld [vmem:[#allocation2 + $0x1240] sm:$0xff] }
 0xc56   :  { %5810 = vmatprep.subr.bf16.mxu0 %v4897_v2  ;;  %6234 = vmatprep.subr.bf16.mxu1 %v4899_v3  ;;  %v4954_v2 = vld [vmem:[#allocation2 + $0x1250] sm:$0xff]  ;;  %v4961_v3 = vld [vmem:[#allocation2 + $0x1288] sm:$0xff] }
 0xc58   :  { %5796 = vmatmul.mubr.bf16.gmra.mrb[16].mxu0 %v13478_v5  ;;  %6220 = vmatmul.mubr.bf16.gmra.mrb[28].mxu1 %v13478_v5 }
 0xc59   :  { %5811 = vmatpush1.bf16.msra.mxu0 %v4896_v6  ;;  %6235 = vmatpush1.bf16.msra.mxu1 %v4898_v8  ;;  %v4963_v6 = vld [vmem:[#allocation2 + $0x1298] sm:$0xff]  ;;  %v4960_v8 = vld [vmem:[#allocation2 + $0x1280] sm:$0xff] }
 0xc5a   :  { %5812 = vmatprep.subr.bf16.mxu0 %v4905_v20  ;;  %6236 = vmatprep.subr.bf16.mxu1 %v4907_v24  ;;  %v4962_v20 = vld [vmem:[#allocation2 + $0x1290] sm:$0xff]  ;;  %v4969_v24 = vld [vmem:[#allocation2 + $0x12c8] sm:$0xff] }
 0xc5b   :  { %5838 = vmatprep.mubr.bf16.mxu0 %v13488_v21  ;;  %6262 = vmatprep.mubr.bf16.mxu1 %v13488_v21 }
 0xc5d   :  { %5813 = vmatpush1.bf16.msra.mxu0 %v4904_v27  ;;  %6237 = vmatpush1.bf16.msra.mxu1 %v4906_v52  ;;  %v4971_v27 = vld [vmem:[#allocation2 + $0x12d8] sm:$0xff]  ;;  %v4968_v52 = vld [vmem:[#allocation2 + $0x12c0] sm:$0xff] }
 0xc5e   :  { %5814 = vmatprep.subr.bf16.mxu0 %v4913_v45  ;;  %6238 = vmatprep.subr.bf16.mxu1 %v4915_v28  ;;  %v4970_v45 = vld [vmem:[#allocation2 + $0x12d0] sm:$0xff]  ;;  %v4977_v28 = vld [vmem:[#allocation2 + $0x1308] sm:$0xff] }
 0xc61   :  { %5815 = vmatpush1.bf16.msra.mxu0 %v4912_v19  ;;  %6239 = vmatpush1.bf16.msra.mxu1 %v4914_v33  ;;  %v4979_v19 = vld [vmem:[#allocation2 + $0x1318] sm:$0xff]  ;;  %v4976_v33 = vld [vmem:[#allocation2 + $0x1300] sm:$0xff] }
 0xc62   :  { %5816 = vmatprep.subr.bf16.mxu0 %v4921_v34  ;;  %6240 = vmatprep.subr.bf16.mxu1 %v4923_v22  ;;  %v4978_v34 = vld [vmem:[#allocation2 + $0x1310] sm:$0xff]  ;;  %v4985_v22 = vld [vmem:[#allocation2 + $0x1348] sm:$0xff] }
 0xc65   :  { %5817 = vmatpush1.bf16.msra.mxu0 %v4920_v47  ;;  %6241 = vmatpush1.bf16.msra.mxu1 %v4922_v49  ;;  %v4987_v47 = vld [vmem:[#allocation2 + $0x1358] sm:$0xff]  ;;  %v4984_v49 = vld [vmem:[#allocation2 + $0x1340] sm:$0xff] }
 0xc66   :  { %5818 = vmatprep.subr.bf16.mxu0 %v4929_v60  ;;  %6242 = vmatprep.subr.bf16.mxu1 %v4931_v35  ;;  %v4986_v60 = vld [vmem:[#allocation2 + $0x1350] sm:$0xff]  ;;  %v4993_v35 = vld [vmem:[#allocation2 + $0x1388] sm:$0xff] }
 0xc69   :  { %5819 = vmatpush1.bf16.msra.mxu0 %v4928_v36  ;;  %6243 = vmatpush1.bf16.msra.mxu1 %v4930_v37  ;;  %v4995_v36 = vld [vmem:[#allocation2 + $0x1398] sm:$0xff]  ;;  %v4992_v37 = vld [vmem:[#allocation2 + $0x1380] sm:$0xff] }
 0xc6a   :  { %5820 = vmatprep.subr.bf16.mxu0 %v4937_v38  ;;  %6244 = vmatprep.subr.bf16.mxu1 %v4939_v39  ;;  %v4994_v38 = vld [vmem:[#allocation2 + $0x1390] sm:$0xff]  ;;  %v5001_v39 = vld [vmem:[#allocation2 + $0x13c8] sm:$0xff] }
 0xc6d   :  { %5821 = vmatpush1.bf16.msra.mxu0 %v4936_v40  ;;  %6245 = vmatpush1.bf16.msra.mxu1 %v4938_v43  ;;  %v5003_v40 = vld [vmem:[#allocation2 + $0x13d8] sm:$0xff]  ;;  %v5000_v43 = vld [vmem:[#allocation2 + $0x13c0] sm:$0xff] }
 0xc6e   :  { %5822 = vmatprep.subr.bf16.mxu0 %v4945_v31  ;;  %6246 = vmatprep.subr.bf16.mxu1 %v4947_v44  ;;  %v5002_v31 = vld [vmem:[#allocation2 + $0x13d0] sm:$0xff]  ;;  %v5009_v44 = vld [vmem:[#allocation2 + $0x1408] sm:$0xff] }
 0xc71   :  { %5823 = vmatpush1.bf16.msra.mxu0 %v4944_v30  ;;  %6247 = vmatpush1.bf16.msra.mxu1 %v4946_v46  ;;  %v5011_v30 = vld [vmem:[#allocation2 + $0x1418] sm:$0xff]  ;;  %v13496_v46 = vcombine.low %v13481_v29, %v13484_v32  ;;  %v5016_v29 = vld [vmem:[#allocation2 + $0x1440] sm:$0xff]  ;;  %v5018_v32 = vld [vmem:[#allocation2 + $0x1450] sm:$0xff] }
 0xc72   :  { %5824 = vmatprep.subr.bf16.mxu0 %v4953_v51  ;;  %6248 = vmatprep.subr.bf16.mxu1 %v4955_v7  ;;  %v4354_v51 = vld [vmem:[%s13983_s26 + $0xa0] sm:$0xff] }
 0xc73   :  { %v4362_v7 = vld [vmem:[%s13983_s26 + $0xe0] sm:$0xff] }
 0xc75   :  { %5825 = vmatpush1.bf16.msra.mxu0 %v4952_v13  ;;  %6249 = vmatpush1.bf16.msra.mxu1 %v4954_v2  ;;  %v5008_v13 = vld [vmem:[#allocation2 + $0x1400] sm:$0xff]  ;;  %v5010_v2 = vld [vmem:[#allocation2 + $0x1410] sm:$0xff] }
 0xc76   :  { %5826 = vmatprep.subr.bf16.mxu0 %v4961_v3  ;;  %6250 = vmatprep.subr.bf16.mxu1 %v4963_v6  ;;  %v5017_v3 = vld [vmem:[#allocation2 + $0x1448] sm:$0xff]  ;;  %v5019_v6 = vld [vmem:[#allocation2 + $0x1458] sm:$0xff] }
 0xc79   :  { %5827 = vmatpush1.bf16.msra.mxu0 %v4960_v8  ;;  %6251 = vmatpush1.bf16.msra.mxu1 %v4962_v20  ;;  %v13500_v8 = vcombine.high %v4354_v51, %v4362_v7  ;;  %v5025_v20 = vld [vmem:[#allocation2 + $0x1488] sm:$0xff] }
 0xc7a   :  { %5828 = vmatprep.subr.bf16.mxu0 %v4969_v24  ;;  %6252 = vmatprep.subr.bf16.mxu1 %v4971_v27  ;;  %v5027_v24 = vld [vmem:[#allocation2 + $0x1498] sm:$0xff]  ;;  %v13506_v27 = vcombine.low %v4354_v51, %v4362_v7  ;;  %v5058_v51 = vld [vmem:[#allocation2 + $0x1590] sm:$0xff]  ;;  %v5065_v7 = vld [vmem:[#allocation2 + $0x15c8] sm:$0xff] }
 0xc7d   :  { %5829 = vmatpush1.bf16.msra.mxu0 %v4968_v52  ;;  %6253 = vmatpush1.bf16.msra.mxu1 %v4970_v45  ;;  %v13509_v52 = vld [vmem:[%s13983_s26 + $0x28] sm:$0xff] }
 0xc7e   :  { %5830 = vmatprep.subr.bf16.mxu0 %v4977_v28  ;;  %6254 = vmatprep.subr.bf16.mxu1 %v4979_v19  ;;  %v13512_v45 = vld [vmem:[%s13983_s26 + $0x68] sm:$0xff]  ;;  %v5024_v28 = vld [vmem:[#allocation2 + $0x1480] sm:$0xff]  ;;  %v5026_v19 = vld [vmem:[#allocation2 + $0x1490] sm:$0xff] }
 0xc81   :  { %5831 = vmatpush1.bf16.msra.mxu0 %v4976_v33  ;;  %6255 = vmatpush1.bf16.msra.mxu1 %v4978_v34  ;;  %v5033_v33 = vld [vmem:[#allocation2 + $0x14c8] sm:$0xff]  ;;  %v5035_v34 = vld [vmem:[#allocation2 + $0x14d8] sm:$0xff] }
 0xc82   :  { %5832 = vmatprep.subr.bf16.mxu0 %v4985_v22  ;;  %6256 = vmatprep.subr.bf16.mxu1 %v4987_v47  ;;  %v13516_v22 = vcombine.high %v13509_v52, %v13512_v45  ;;  %v5032_v47 = vld [vmem:[#allocation2 + $0x14c0] sm:$0xff] }
 0xc85   :  { %5833 = vmatpush1.bf16.msra.mxu0 %v4984_v49  ;;  %6257 = vmatpush1.bf16.msra.mxu1 %v4986_v60  ;;  %v5034_v49 = vld [vmem:[#allocation2 + $0x14d0] sm:$0xff]  ;;  %v5041_v60 = vld [vmem:[#allocation2 + $0x1508] sm:$0xff] }
 0xc86   :  { %5834 = vmatprep.subr.bf16.mxu0 %v4993_v35  ;;  %6258 = vmatprep.subr.bf16.mxu1 %v4995_v36  ;;  %v5043_v35 = vld [vmem:[#allocation2 + $0x1518] sm:$0xff]  ;;  %v5040_v36 = vld [vmem:[#allocation2 + $0x1500] sm:$0xff] }
 0xc89   :  { %5835 = vmatpush1.bf16.msra.mxu0 %v4992_v37  ;;  %6259 = vmatpush1.bf16.msra.mxu1 %v4994_v38  ;;  %v5042_v37 = vld [vmem:[#allocation2 + $0x1510] sm:$0xff]  ;;  %v5049_v38 = vld [vmem:[#allocation2 + $0x1548] sm:$0xff] }
 0xc8a   :  { %5836 = vmatprep.subr.bf16.mxu0 %v5001_v39  ;;  %6260 = vmatprep.subr.bf16.mxu1 %v5003_v40  ;;  %v5051_v39 = vld [vmem:[#allocation2 + $0x1558] sm:$0xff]  ;;  %v5048_v40 = vld [vmem:[#allocation2 + $0x1540] sm:$0xff] }
 0xc8d   :  { %5837 = vmatpush1.bf16.msra.mxu0 %v5000_v43  ;;  %6261 = vmatpush1.bf16.msra.mxu1 %v5002_v31  ;;  %v5050_v43 = vld [vmem:[#allocation2 + $0x1550] sm:$0xff]  ;;  %v5057_v31 = vld [vmem:[#allocation2 + $0x1588] sm:$0xff] }
 0xc8e   :  { %5859 = vmatprep.subr.bf16.mxu0 %v5009_v44  ;;  %6283 = vmatprep.subr.bf16.mxu1 %v5011_v30  ;;  %v5059_v44 = vld [vmem:[#allocation2 + $0x1598] sm:$0xff]  ;;  %v5056_v30 = vld [vmem:[#allocation2 + $0x1580] sm:$0xff] }
 0xc90   :  { %5839 = vmatmul.mubr.bf16.vlgmr.msra.gmra.mrb[12].mxu0 %v13496_v46  ;;  %6263 = vmatmul.mubr.bf16.vlgmr.msra.gmra.mrb[24].mxu1 %v13496_v46 }
 0xc91   :  { %5860 = vmatpush1.bf16.msra.mxu0 %v5008_v13  ;;  %6284 = vmatpush1.bf16.msra.mxu1 %v5010_v2  ;;  %v5067_v13 = vld [vmem:[#allocation2 + $0x15d8] sm:$0xff]  ;;  %v5064_v2 = vld [vmem:[#allocation2 + $0x15c0] sm:$0xff] }
 0xc92   :  { %5861 = vmatprep.subr.bf16.mxu0 %v5017_v3  ;;  %6285 = vmatprep.subr.bf16.mxu1 %v5019_v6  ;;  %v5066_v3 = vld [vmem:[#allocation2 + $0x15d0] sm:$0xff]  ;;  %v5073_v6 = vld [vmem:[#allocation2 + $0x1608] sm:$0xff] }
 0xc93   :  { %5848 = vmatprep.mubr.bf16.mxu0 %v13500_v8  ;;  %6272 = vmatprep.mubr.bf16.mxu1 %v13500_v8 }
 0xc95   :  { %5862 = vmatpush1.bf16.msra.mxu0 %v5016_v29  ;;  %6286 = vmatpush1.bf16.msra.mxu1 %v5018_v32  ;;  %v5075_v29 = vld [vmem:[#allocation2 + $0x1618] sm:$0xff]  ;;  %v5072_v32 = vld [vmem:[#allocation2 + $0x1600] sm:$0xff] }
 0xc96   :  { %5863 = vmatprep.subr.bf16.mxu0 %v5025_v20  ;;  %6287 = vmatprep.subr.bf16.mxu1 %v5027_v24  ;;  %v5074_v20 = vld [vmem:[#allocation2 + $0x1610] sm:$0xff]  ;;  %v5081_v24 = vld [vmem:[#allocation2 + $0x1648] sm:$0xff] }
 0xc98   :  { %5849 = vmatmul.mubr.bf16.gmra.mrb[16].mxu0 %v13506_v27  ;;  %6273 = vmatmul.mubr.bf16.gmra.mrb[28].mxu1 %v13506_v27 }
 0xc99   :  { %5864 = vmatpush1.bf16.msra.mxu0 %v5024_v28  ;;  %6288 = vmatpush1.bf16.msra.mxu1 %v5026_v19  ;;  %v5083_v28 = vld [vmem:[#allocation2 + $0x1658] sm:$0xff]  ;;  %v5080_v19 = vld [vmem:[#allocation2 + $0x1640] sm:$0xff] }
 0xc9a   :  { %5865 = vmatprep.subr.bf16.mxu0 %v5033_v33  ;;  %6289 = vmatprep.subr.bf16.mxu1 %v5035_v34  ;;  %v5082_v33 = vld [vmem:[#allocation2 + $0x1650] sm:$0xff]  ;;  %v5089_v34 = vld [vmem:[#allocation2 + $0x1688] sm:$0xff] }
 0xc9b   :  { %5891 = vmatprep.mubr.bf16.mxu0 %v13516_v22  ;;  %6315 = vmatprep.mubr.bf16.mxu1 %v13516_v22 }
 0xc9d   :  { %5866 = vmatpush1.bf16.msra.mxu0 %v5032_v47  ;;  %6290 = vmatpush1.bf16.msra.mxu1 %v5034_v49  ;;  %v5091_v47 = vld [vmem:[#allocation2 + $0x1698] sm:$0xff]  ;;  %v5088_v49 = vld [vmem:[#allocation2 + $0x1680] sm:$0xff] }
 0xc9e   :  { %5867 = vmatprep.subr.bf16.mxu0 %v5041_v60  ;;  %6291 = vmatprep.subr.bf16.mxu1 %v5043_v35  ;;  %v5090_v60 = vld [vmem:[#allocation2 + $0x1690] sm:$0xff]  ;;  %v5097_v35 = vld [vmem:[#allocation2 + $0x16c8] sm:$0xff] }
 0xca1   :  { %5868 = vmatpush1.bf16.msra.mxu0 %v5040_v36  ;;  %6292 = vmatpush1.bf16.msra.mxu1 %v5042_v37  ;;  %v5099_v36 = vld [vmem:[#allocation2 + $0x16d8] sm:$0xff]  ;;  %v5096_v37 = vld [vmem:[#allocation2 + $0x16c0] sm:$0xff] }
 0xca2   :  { %5869 = vmatprep.subr.bf16.mxu0 %v5049_v38  ;;  %6293 = vmatprep.subr.bf16.mxu1 %v5051_v39  ;;  %v5098_v38 = vld [vmem:[#allocation2 + $0x16d0] sm:$0xff]  ;;  %v5105_v39 = vld [vmem:[#allocation2 + $0x1708] sm:$0xff] }
 0xca5   :  { %5870 = vmatpush1.bf16.msra.mxu0 %v5048_v40  ;;  %6294 = vmatpush1.bf16.msra.mxu1 %v5050_v43  ;;  %v5107_v40 = vld [vmem:[#allocation2 + $0x1718] sm:$0xff]  ;;  %v5104_v43 = vld [vmem:[#allocation2 + $0x1700] sm:$0xff] }
 0xca6   :  { %5871 = vmatprep.subr.bf16.mxu0 %v5057_v31  ;;  %6295 = vmatprep.subr.bf16.mxu1 %v5059_v44  ;;  %v5106_v31 = vld [vmem:[#allocation2 + $0x1710] sm:$0xff]  ;;  %v5113_v44 = vld [vmem:[#allocation2 + $0x1748] sm:$0xff] }
 0xca9   :  { %5872 = vmatpush1.bf16.msra.mxu0 %v5056_v30  ;;  %6296 = vmatpush1.bf16.msra.mxu1 %v5058_v51  ;;  %v5115_v30 = vld [vmem:[#allocation2 + $0x1758] sm:$0xff]  ;;  %v5112_v51 = vld [vmem:[#allocation2 + $0x1740] sm:$0xff] }
 0xcaa   :  { %5873 = vmatprep.subr.bf16.mxu0 %v5065_v7  ;;  %6297 = vmatprep.subr.bf16.mxu1 %v5067_v13  ;;  %v5114_v7 = vld [vmem:[#allocation2 + $0x1750] sm:$0xff]  ;;  %v5121_v13 = vld [vmem:[#allocation2 + $0x1788] sm:$0xff] }
 0xcad   :  { %5874 = vmatpush1.bf16.msra.mxu0 %v5064_v2  ;;  %6298 = vmatpush1.bf16.msra.mxu1 %v5066_v3  ;;  %v5123_v2 = vld [vmem:[#allocation2 + $0x1798] sm:$0xff]  ;;  %v5120_v3 = vld [vmem:[#allocation2 + $0x1780] sm:$0xff] }
 0xcae   :  { %5875 = vmatprep.subr.bf16.mxu0 %v5073_v6  ;;  %6299 = vmatprep.subr.bf16.mxu1 %v5075_v29  ;;  %v5122_v6 = vld [vmem:[#allocation2 + $0x1790] sm:$0xff]  ;;  %v5129_v29 = vld [vmem:[#allocation2 + $0x17c8] sm:$0xff] }
 0xcb1   :  { %5876 = vmatpush1.bf16.msra.mxu0 %v5072_v32  ;;  %6300 = vmatpush1.bf16.msra.mxu1 %v5074_v20  ;;  %v5131_v32 = vld [vmem:[#allocation2 + $0x17d8] sm:$0xff]  ;;  %v5128_v20 = vld [vmem:[#allocation2 + $0x17c0] sm:$0xff] }
 0xcb2   :  { %5877 = vmatprep.subr.bf16.mxu0 %v5081_v24  ;;  %6301 = vmatprep.subr.bf16.mxu1 %v5083_v28  ;;  %v5130_v24 = vld [vmem:[#allocation2 + $0x17d0] sm:$0xff]  ;;  %v5137_v28 = vld [vmem:[#allocation2 + $0x1808] sm:$0xff] }
 0xcb5   :  { %5878 = vmatpush1.bf16.msra.mxu0 %v5080_v19  ;;  %6302 = vmatpush1.bf16.msra.mxu1 %v5082_v33  ;;  %v5139_v19 = vld [vmem:[#allocation2 + $0x1818] sm:$0xff]  ;;  %v13524_v33 = vcombine.low %v13509_v52, %v13512_v45  ;;  %v5144_v52 = vld [vmem:[#allocation2 + $0x1840] sm:$0xff]  ;;  %v5146_v45 = vld [vmem:[#allocation2 + $0x1850] sm:$0xff] }
 0xcb6   :  { %5879 = vmatprep.subr.bf16.mxu0 %v5089_v34  ;;  %6303 = vmatprep.subr.bf16.mxu1 %v5091_v47  ;;  %v4355_v34 = vld [vmem:[%s13983_s26 + $0xa8] sm:$0xff] }
 0xcb7   :  { %v4363_v47 = vld [vmem:[%s13983_s26 + $0xe8] sm:$0xff] }
 0xcb9   :  { %5880 = vmatpush1.bf16.msra.mxu0 %v5088_v49  ;;  %6304 = vmatpush1.bf16.msra.mxu1 %v5090_v60  ;;  %v5136_v49 = vld [vmem:[#allocation2 + $0x1800] sm:$0xff]  ;;  %v5138_v60 = vld [vmem:[#allocation2 + $0x1810] sm:$0xff] }
 0xcba   :  { %5881 = vmatprep.subr.bf16.mxu0 %v5097_v35  ;;  %6305 = vmatprep.subr.bf16.mxu1 %v5099_v36  ;;  %v5145_v35 = vld [vmem:[#allocation2 + $0x1848] sm:$0xff]  ;;  %v5147_v36 = vld [vmem:[#allocation2 + $0x1858] sm:$0xff] }
 0xcbd   :  { %5882 = vmatpush1.bf16.msra.mxu0 %v5096_v37  ;;  %6306 = vmatpush1.bf16.msra.mxu1 %v5098_v38  ;;  %v13528_v37 = vcombine.high %v4355_v34, %v4363_v47  ;;  %v5153_v38 = vld [vmem:[#allocation2 + $0x1888] sm:$0xff] }
 0xcbe   :  { %5883 = vmatprep.subr.bf16.mxu0 %v5105_v39  ;;  %6307 = vmatprep.subr.bf16.mxu1 %v5107_v40  ;;  %v5155_v39 = vld [vmem:[#allocation2 + $0x1898] sm:$0xff]  ;;  %v13534_v40 = vcombine.low %v4355_v34, %v4363_v47  ;;  %v5178_v34 = vld [vmem:[#allocation2 + $0x1950] sm:$0xff]  ;;  %v5185_v47 = vld [vmem:[#allocation2 + $0x1988] sm:$0xff] }
 0xcc1   :  { %5884 = vmatpush1.bf16.msra.mxu0 %v5104_v43  ;;  %6308 = vmatpush1.bf16.msra.mxu1 %v5106_v31  ;;  %v13537_v43 = vld [vmem:[%s13983_s26 + $0x30] sm:$0xff] }
 0xcc2   :  { %5885 = vmatprep.subr.bf16.mxu0 %v5113_v44  ;;  %6309 = vmatprep.subr.bf16.mxu1 %v5115_v30  ;;  %v13540_v31 = vld [vmem:[%s13983_s26 + $0x70] sm:$0xff]  ;;  %v5152_v44 = vld [vmem:[#allocation2 + $0x1880] sm:$0xff] }
 0xcc3   :  { %v5154_v30 = vld [vmem:[#allocation2 + $0x1890] sm:$0xff] }
 0xcc5   :  { %5886 = vmatpush1.bf16.msra.mxu0 %v5112_v51  ;;  %6310 = vmatpush1.bf16.msra.mxu1 %v5114_v7  ;;  %v5161_v51 = vld [vmem:[#allocation2 + $0x18c8] sm:$0xff]  ;;  %v5163_v7 = vld [vmem:[#allocation2 + $0x18d8] sm:$0xff] }
 0xcc6   :  { %5887 = vmatprep.subr.bf16.mxu0 %v5121_v13  ;;  %6311 = vmatprep.subr.bf16.mxu1 %v5123_v2  ;;  %v13544_v13 = vcombine.high %v13537_v43, %v13540_v31  ;;  %v5160_v2 = vld [vmem:[#allocation2 + $0x18c0] sm:$0xff] }
 0xcc9   :  { %5888 = vmatpush1.bf16.msra.mxu0 %v5120_v3  ;;  %6312 = vmatpush1.bf16.msra.mxu1 %v5122_v6  ;;  %v5162_v3 = vld [vmem:[#allocation2 + $0x18d0] sm:$0xff]  ;;  %v5169_v6 = vld [vmem:[#allocation2 + $0x1908] sm:$0xff] }
 0xcca   :  { %5889 = vmatprep.subr.bf16.mxu0 %v5129_v29  ;;  %6313 = vmatprep.subr.bf16.mxu1 %v5131_v32  ;;  %v5171_v29 = vld [vmem:[#allocation2 + $0x1918] sm:$0xff]  ;;  %v5168_v32 = vld [vmem:[#allocation2 + $0x1900] sm:$0xff] }
 0xccd   :  { %5890 = vmatpush1.bf16.msra.mxu0 %v5128_v20  ;;  %6314 = vmatpush1.bf16.msra.mxu1 %v5130_v24  ;;  %v5170_v20 = vld [vmem:[#allocation2 + $0x1910] sm:$0xff]  ;;  %v5177_v24 = vld [vmem:[#allocation2 + $0x1948] sm:$0xff] }
 0xcce   :  { %5912 = vmatprep.subr.bf16.mxu0 %v5137_v28  ;;  %6336 = vmatprep.subr.bf16.mxu1 %v5139_v19  ;;  %v5179_v28 = vld [vmem:[#allocation2 + $0x1958] sm:$0xff]  ;;  %v5176_v19 = vld [vmem:[#allocation2 + $0x1940] sm:$0xff] }
 0xcd0   :  { %5892 = vmatmul.mubr.bf16.vlgmr.msra.gmra.mrb[12].mxu0 %v13524_v33  ;;  %6316 = vmatmul.mubr.bf16.vlgmr.msra.gmra.mrb[24].mxu1 %v13524_v33 }
 0xcd1   :  { %5913 = vmatpush1.bf16.msra.mxu0 %v5136_v49  ;;  %6337 = vmatpush1.bf16.msra.mxu1 %v5138_v60  ;;  %v5187_v49 = vld [vmem:[#allocation2 + $0x1998] sm:$0xff]  ;;  %v5184_v60 = vld [vmem:[#allocation2 + $0x1980] sm:$0xff] }
 0xcd2   :  { %5914 = vmatprep.subr.bf16.mxu0 %v5145_v35  ;;  %6338 = vmatprep.subr.bf16.mxu1 %v5147_v36  ;;  %v5186_v35 = vld [vmem:[#allocation2 + $0x1990] sm:$0xff]  ;;  %v5193_v36 = vld [vmem:[#allocation2 + $0x19c8] sm:$0xff] }
 0xcd3   :  { %5901 = vmatprep.mubr.bf16.mxu0 %v13528_v37  ;;  %6325 = vmatprep.mubr.bf16.mxu1 %v13528_v37 }
 0xcd5   :  { %5915 = vmatpush1.bf16.msra.mxu0 %v5144_v52  ;;  %6339 = vmatpush1.bf16.msra.mxu1 %v5146_v45  ;;  %v5195_v52 = vld [vmem:[#allocation2 + $0x19d8] sm:$0xff]  ;;  %v5192_v45 = vld [vmem:[#allocation2 + $0x19c0] sm:$0xff] }
 0xcd6   :  { %5916 = vmatprep.subr.bf16.mxu0 %v5153_v38  ;;  %6340 = vmatprep.subr.bf16.mxu1 %v5155_v39  ;;  %v5194_v38 = vld [vmem:[#allocation2 + $0x19d0] sm:$0xff]  ;;  %v5201_v39 = vld [vmem:[#allocation2 + $0x1a08] sm:$0xff] }
 0xcd8   :  { %5902 = vmatmul.mubr.bf16.gmra.mrb[16].mxu0 %v13534_v40  ;;  %6326 = vmatmul.mubr.bf16.gmra.mrb[28].mxu1 %v13534_v40 }
 0xcd9   :  { %5917 = vmatpush1.bf16.msra.mxu0 %v5152_v44  ;;  %6341 = vmatpush1.bf16.msra.mxu1 %v5154_v30  ;;  %v5203_v44 = vld [vmem:[#allocation2 + $0x1a18] sm:$0xff]  ;;  %v5200_v30 = vld [vmem:[#allocation2 + $0x1a00] sm:$0xff] }
 0xcda   :  { %5918 = vmatprep.subr.bf16.mxu0 %v5161_v51  ;;  %6342 = vmatprep.subr.bf16.mxu1 %v5163_v7  ;;  %v5202_v51 = vld [vmem:[#allocation2 + $0x1a10] sm:$0xff]  ;;  %v5209_v7 = vld [vmem:[#allocation2 + $0x1a48] sm:$0xff] }
 0xcdb   :  { %5944 = vmatprep.mubr.bf16.mxu0 %v13544_v13  ;;  %6368 = vmatprep.mubr.bf16.mxu1 %v13544_v13 }
 0xcdd   :  { %5919 = vmatpush1.bf16.msra.mxu0 %v5160_v2  ;;  %6343 = vmatpush1.bf16.msra.mxu1 %v5162_v3  ;;  %v5211_v2 = vld [vmem:[#allocation2 + $0x1a58] sm:$0xff]  ;;  %v5208_v3 = vld [vmem:[#allocation2 + $0x1a40] sm:$0xff] }
 0xcde   :  { %5920 = vmatprep.subr.bf16.mxu0 %v5169_v6  ;;  %6344 = vmatprep.subr.bf16.mxu1 %v5171_v29  ;;  %v5210_v6 = vld [vmem:[#allocation2 + $0x1a50] sm:$0xff]  ;;  %v5217_v29 = vld [vmem:[#allocation2 + $0x1a88] sm:$0xff] }
 0xce1   :  { %5921 = vmatpush1.bf16.msra.mxu0 %v5168_v32  ;;  %6345 = vmatpush1.bf16.msra.mxu1 %v5170_v20  ;;  %v5219_v32 = vld [vmem:[#allocation2 + $0x1a98] sm:$0xff]  ;;  %v5216_v20 = vld [vmem:[#allocation2 + $0x1a80] sm:$0xff] }
 0xce2   :  { %5922 = vmatprep.subr.bf16.mxu0 %v5177_v24  ;;  %6346 = vmatprep.subr.bf16.mxu1 %v5179_v28  ;;  %v5218_v24 = vld [vmem:[#allocation2 + $0x1a90] sm:$0xff]  ;;  %v5225_v28 = vld [vmem:[#allocation2 + $0x1ac8] sm:$0xff] }
 0xce5   :  { %5923 = vmatpush1.bf16.msra.mxu0 %v5176_v19  ;;  %6347 = vmatpush1.bf16.msra.mxu1 %v5178_v34  ;;  %v5227_v19 = vld [vmem:[#allocation2 + $0x1ad8] sm:$0xff]  ;;  %v5224_v34 = vld [vmem:[#allocation2 + $0x1ac0] sm:$0xff] }
 0xce6   :  { %5924 = vmatprep.subr.bf16.mxu0 %v5185_v47  ;;  %6348 = vmatprep.subr.bf16.mxu1 %v5187_v49  ;;  %v5226_v47 = vld [vmem:[#allocation2 + $0x1ad0] sm:$0xff]  ;;  %v5233_v49 = vld [vmem:[#allocation2 + $0x1b08] sm:$0xff] }
 0xce9   :  { %5925 = vmatpush1.bf16.msra.mxu0 %v5184_v60  ;;  %6349 = vmatpush1.bf16.msra.mxu1 %v5186_v35  ;;  %v5235_v60 = vld [vmem:[#allocation2 + $0x1b18] sm:$0xff]  ;;  %v5232_v35 = vld [vmem:[#allocation2 + $0x1b00] sm:$0xff] }
 0xcea   :  { %5926 = vmatprep.subr.bf16.mxu0 %v5193_v36  ;;  %6350 = vmatprep.subr.bf16.mxu1 %v5195_v52  ;;  %v5234_v36 = vld [vmem:[#allocation2 + $0x1b10] sm:$0xff]  ;;  %v5241_v52 = vld [vmem:[#allocation2 + $0x1b48] sm:$0xff] }
 0xced   :  { %5927 = vmatpush1.bf16.msra.mxu0 %v5192_v45  ;;  %6351 = vmatpush1.bf16.msra.mxu1 %v5194_v38  ;;  %v5243_v45 = vld [vmem:[#allocation2 + $0x1b58] sm:$0xff]  ;;  %v5240_v38 = vld [vmem:[#allocation2 + $0x1b40] sm:$0xff] }
 0xcee   :  { %5928 = vmatprep.subr.bf16.mxu0 %v5201_v39  ;;  %6352 = vmatprep.subr.bf16.mxu1 %v5203_v44  ;;  %v5242_v39 = vld [vmem:[#allocation2 + $0x1b50] sm:$0xff]  ;;  %v5249_v44 = vld [vmem:[#allocation2 + $0x1b88] sm:$0xff] }
 0xcf1   :  { %5929 = vmatpush1.bf16.msra.mxu0 %v5200_v30  ;;  %6353 = vmatpush1.bf16.msra.mxu1 %v5202_v51  ;;  %v5251_v30 = vld [vmem:[#allocation2 + $0x1b98] sm:$0xff]  ;;  %v5248_v51 = vld [vmem:[#allocation2 + $0x1b80] sm:$0xff] }
 0xcf2   :  { %5930 = vmatprep.subr.bf16.mxu0 %v5209_v7  ;;  %6354 = vmatprep.subr.bf16.mxu1 %v5211_v2  ;;  %v5250_v7 = vld [vmem:[#allocation2 + $0x1b90] sm:$0xff]  ;;  %v5257_v2 = vld [vmem:[#allocation2 + $0x1bc8] sm:$0xff] }
 0xcf5   :  { %5931 = vmatpush1.bf16.msra.mxu0 %v5208_v3  ;;  %6355 = vmatpush1.bf16.msra.mxu1 %v5210_v6  ;;  %v5259_v3 = vld [vmem:[#allocation2 + $0x1bd8] sm:$0xff]  ;;  %v5256_v6 = vld [vmem:[#allocation2 + $0x1bc0] sm:$0xff] }
 0xcf6   :  { %5932 = vmatprep.subr.bf16.mxu0 %v5217_v29  ;;  %6356 = vmatprep.subr.bf16.mxu1 %v5219_v32  ;;  %v5258_v29 = vld [vmem:[#allocation2 + $0x1bd0] sm:$0xff]  ;;  %v5265_v32 = vld [vmem:[#allocation2 + $0x1c08] sm:$0xff] }
 0xcf9   :  { %5933 = vmatpush1.bf16.msra.mxu0 %v5216_v20  ;;  %6357 = vmatpush1.bf16.msra.mxu1 %v5218_v24  ;;  %v5267_v20 = vld [vmem:[#allocation2 + $0x1c18] sm:$0xff]  ;;  %v13552_v24 = vcombine.low %v13537_v43, %v13540_v31  ;;  %v5272_v43 = vld [vmem:[#allocation2 + $0x1c40] sm:$0xff]  ;;  %v5274_v31 = vld [vmem:[#allocation2 + $0x1c50] sm:$0xff] }
 0xcfa   :  { %5934 = vmatprep.subr.bf16.mxu0 %v5225_v28  ;;  %6358 = vmatprep.subr.bf16.mxu1 %v5227_v19  ;;  %v4356_v28 = vld [vmem:[%s13983_s26 + $0xb0] sm:$0xff] }
 0xcfb   :  { %v4364_v19 = vld [vmem:[%s13983_s26 + $0xf0] sm:$0xff] }
 0xcfd   :  { %5935 = vmatpush1.bf16.msra.mxu0 %v5224_v34  ;;  %6359 = vmatpush1.bf16.msra.mxu1 %v5226_v47  ;;  %v5264_v34 = vld [vmem:[#allocation2 + $0x1c00] sm:$0xff]  ;;  %v5266_v47 = vld [vmem:[#allocation2 + $0x1c10] sm:$0xff] }
 0xcfe   :  { %5936 = vmatprep.subr.bf16.mxu0 %v5233_v49  ;;  %6360 = vmatprep.subr.bf16.mxu1 %v5235_v60  ;;  %v5273_v49 = vld [vmem:[#allocation2 + $0x1c48] sm:$0xff]  ;;  %v5275_v60 = vld [vmem:[#allocation2 + $0x1c58] sm:$0xff] }
 0xd01   :  { %5937 = vmatpush1.bf16.msra.mxu0 %v5232_v35  ;;  %6361 = vmatpush1.bf16.msra.mxu1 %v5234_v36  ;;  %v13556_v35 = vcombine.high %v4356_v28, %v4364_v19  ;;  %v5281_v36 = vld [vmem:[#allocation2 + $0x1c88] sm:$0xff] }
 0xd02   :  { %5938 = vmatprep.subr.bf16.mxu0 %v5241_v52  ;;  %6362 = vmatprep.subr.bf16.mxu1 %v5243_v45  ;;  %v5283_v52 = vld [vmem:[#allocation2 + $0x1c98] sm:$0xff]  ;;  %v13562_v45 = vcombine.low %v4356_v28, %v4364_v19  ;;  %v5298_v28 = vld [vmem:[#allocation2 + $0x1d10] sm:$0xff]  ;;  %v5305_v19 = vld [vmem:[#allocation2 + $0x1d48] sm:$0xff] }
 0xd05   :  { %5939 = vmatpush1.bf16.msra.mxu0 %v5240_v38  ;;  %6363 = vmatpush1.bf16.msra.mxu1 %v5242_v39  ;;  %v13565_v38 = vld [vmem:[%s13983_s26 + $0x38] sm:$0xff] }
 0xd06   :  { %5940 = vmatprep.subr.bf16.mxu0 %v5249_v44  ;;  %6364 = vmatprep.subr.bf16.mxu1 %v5251_v30  ;;  %v13568_v39 = vld [vmem:[%s13983_s26 + $0x78] sm:$0xff]  ;;  %v5280_v44 = vld [vmem:[#allocation2 + $0x1c80] sm:$0xff]  ;;  %v5282_v30 = vld [vmem:[#allocation2 + $0x1c90] sm:$0xff] }
 0xd09   :  { %5941 = vmatpush1.bf16.msra.mxu0 %v5248_v51  ;;  %6365 = vmatpush1.bf16.msra.mxu1 %v5250_v7  ;;  %v5289_v51 = vld [vmem:[#allocation2 + $0x1cc8] sm:$0xff]  ;;  %v5291_v7 = vld [vmem:[#allocation2 + $0x1cd8] sm:$0xff] }
 0xd0a   :  { %5942 = vmatprep.subr.bf16.mxu0 %v5257_v2  ;;  %6366 = vmatprep.subr.bf16.mxu1 %v5259_v3  ;;  %v13572_v2 = vcombine.high %v13565_v38, %v13568_v39  ;;  %v5288_v3 = vld [vmem:[#allocation2 + $0x1cc0] sm:$0xff] }
 0xd0d   :  { %5943 = vmatpush1.bf16.msra.mxu0 %v5256_v6  ;;  %6367 = vmatpush1.bf16.msra.mxu1 %v5258_v29  ;;  %v5290_v6 = vld [vmem:[#allocation2 + $0x1cd0] sm:$0xff]  ;;  %v5297_v29 = vld [vmem:[#allocation2 + $0x1d08] sm:$0xff] }
 0xd0e   :  { %5965 = vmatprep.subr.bf16.mxu0 %v5265_v32  ;;  %6389 = vmatprep.subr.bf16.mxu1 %v5267_v20  ;;  %v5299_v32 = vld [vmem:[#allocation2 + $0x1d18] sm:$0xff]  ;;  %v5296_v20 = vld [vmem:[#allocation2 + $0x1d00] sm:$0xff] }
 0xd10   :  { %5945 = vmatmul.mubr.bf16.vlgmr.msra.gmra.mrb[12].mxu0 %v13552_v24  ;;  %6369 = vmatmul.mubr.bf16.vlgmr.msra.gmra.mrb[24].mxu1 %v13552_v24 }
 0xd11   :  { %5966 = vmatpush1.bf16.msra.mxu0 %v5264_v34  ;;  %6390 = vmatpush1.bf16.msra.mxu1 %v5266_v47  ;;  %v5307_v34 = vld [vmem:[#allocation2 + $0x1d58] sm:$0xff]  ;;  %v5304_v47 = vld [vmem:[#allocation2 + $0x1d40] sm:$0xff] }
 0xd12   :  { %5967 = vmatprep.subr.bf16.mxu0 %v5273_v49  ;;  %6391 = vmatprep.subr.bf16.mxu1 %v5275_v60  ;;  %v5306_v49 = vld [vmem:[#allocation2 + $0x1d50] sm:$0xff]  ;;  %v5313_v60 = vld [vmem:[#allocation2 + $0x1d88] sm:$0xff] }
 0xd13   :  { %5954 = vmatprep.mubr.bf16.mxu0 %v13556_v35  ;;  %6378 = vmatprep.mubr.bf16.mxu1 %v13556_v35 }
 0xd15   :  { %5968 = vmatpush1.bf16.msra.mxu0 %v5272_v43  ;;  %6392 = vmatpush1.bf16.msra.mxu1 %v5274_v31  ;;  %v5315_v43 = vld [vmem:[#allocation2 + $0x1d98] sm:$0xff]  ;;  %v5312_v31 = vld [vmem:[#allocation2 + $0x1d80] sm:$0xff] }
 0xd16   :  { %5969 = vmatprep.subr.bf16.mxu0 %v5281_v36  ;;  %6393 = vmatprep.subr.bf16.mxu1 %v5283_v52  ;;  %v5314_v36 = vld [vmem:[#allocation2 + $0x1d90] sm:$0xff]  ;;  %v5321_v52 = vld [vmem:[#allocation2 + $0x1dc8] sm:$0xff] }
 0xd18   :  { %5955 = vmatmul.mubr.bf16.gmra.mrb[16].mxu0 %v13562_v45  ;;  %6379 = vmatmul.mubr.bf16.gmra.mrb[28].mxu1 %v13562_v45 }
 0xd19   :  { %5970 = vmatpush1.bf16.msra.mxu0 %v5280_v44  ;;  %6394 = vmatpush1.bf16.msra.mxu1 %v5282_v30  ;;  %v5323_v44 = vld [vmem:[#allocation2 + $0x1dd8] sm:$0xff]  ;;  %v5320_v30 = vld [vmem:[#allocation2 + $0x1dc0] sm:$0xff] }
 0xd1a   :  { %5971 = vmatprep.subr.bf16.mxu0 %v5289_v51  ;;  %6395 = vmatprep.subr.bf16.mxu1 %v5291_v7  ;;  %v5322_v51 = vld [vmem:[#allocation2 + $0x1dd0] sm:$0xff]  ;;  %v5329_v7 = vld [vmem:[#allocation2 + $0x1e08] sm:$0xff] }
 0xd1b   :  { %5997 = vmatprep.mubr.bf16.mxu0 %v13572_v2  ;;  %6421 = vmatprep.mubr.bf16.mxu1 %v13572_v2 }
 0xd1d   :  { %5972 = vmatpush1.bf16.msra.mxu0 %v5288_v3  ;;  %6396 = vmatpush1.bf16.msra.mxu1 %v5290_v6  ;;  %v5331_v3 = vld [vmem:[#allocation2 + $0x1e18] sm:$0xff]  ;;  %v5328_v6 = vld [vmem:[#allocation2 + $0x1e00] sm:$0xff] }
 0xd1e   :  { %5973 = vmatprep.subr.bf16.mxu0 %v5297_v29  ;;  %6397 = vmatprep.subr.bf16.mxu1 %v5299_v32  ;;  %v5330_v29 = vld [vmem:[#allocation2 + $0x1e10] sm:$0xff]  ;;  %v5337_v32 = vld [vmem:[#allocation2 + $0x1e48] sm:$0xff] }
 0xd21   :  { %5974 = vmatpush1.bf16.msra.mxu0 %v5296_v20  ;;  %6398 = vmatpush1.bf16.msra.mxu1 %v5298_v28  ;;  %v5339_v20 = vld [vmem:[#allocation2 + $0x1e58] sm:$0xff]  ;;  %v5336_v28 = vld [vmem:[#allocation2 + $0x1e40] sm:$0xff] }
 0xd22   :  { %5975 = vmatprep.subr.bf16.mxu0 %v5305_v19  ;;  %6399 = vmatprep.subr.bf16.mxu1 %v5307_v34  ;;  %v5338_v19 = vld [vmem:[#allocation2 + $0x1e50] sm:$0xff]  ;;  %v5345_v34 = vld [vmem:[#allocation2 + $0x1e88] sm:$0xff] }
 0xd25   :  { %5976 = vmatpush1.bf16.msra.mxu0 %v5304_v47  ;;  %6400 = vmatpush1.bf16.msra.mxu1 %v5306_v49  ;;  %v5347_v47 = vld [vmem:[#allocation2 + $0x1e98] sm:$0xff]  ;;  %v5344_v49 = vld [vmem:[#allocation2 + $0x1e80] sm:$0xff] }
 0xd26   :  { %5977 = vmatprep.subr.bf16.mxu0 %v5313_v60  ;;  %6401 = vmatprep.subr.bf16.mxu1 %v5315_v43  ;;  %v5346_v60 = vld [vmem:[#allocation2 + $0x1e90] sm:$0xff]  ;;  %v5353_v43 = vld [vmem:[#allocation2 + $0x1ec8] sm:$0xff] }
 0xd29   :  { %5978 = vmatpush1.bf16.msra.mxu0 %v5312_v31  ;;  %6402 = vmatpush1.bf16.msra.mxu1 %v5314_v36  ;;  %v5355_v31 = vld [vmem:[#allocation2 + $0x1ed8] sm:$0xff]  ;;  %v5352_v36 = vld [vmem:[#allocation2 + $0x1ec0] sm:$0xff] }
 0xd2a   :  { %5979 = vmatprep.subr.bf16.mxu0 %v5321_v52  ;;  %6403 = vmatprep.subr.bf16.mxu1 %v5323_v44  ;;  %v5354_v52 = vld [vmem:[#allocation2 + $0x1ed0] sm:$0xff]  ;;  %v5361_v44 = vld [vmem:[#allocation2 + $0x1f08] sm:$0xff] }
 0xd2d   :  { %5980 = vmatpush1.bf16.msra.mxu0 %v5320_v30  ;;  %6404 = vmatpush1.bf16.msra.mxu1 %v5322_v51  ;;  %v5363_v30 = vld [vmem:[#allocation2 + $0x1f18] sm:$0xff]  ;;  %v5360_v51 = vld [vmem:[#allocation2 + $0x1f00] sm:$0xff] }
 0xd2e   :  { %5981 = vmatprep.subr.bf16.mxu0 %v5329_v7  ;;  %6405 = vmatprep.subr.bf16.mxu1 %v5331_v3  ;;  %v5362_v7 = vld [vmem:[#allocation2 + $0x1f10] sm:$0xff]  ;;  %v5369_v3 = vld [vmem:[#allocation2 + $0x1f48] sm:$0xff] }
 0xd31   :  { %5982 = vmatpush1.bf16.msra.mxu0 %v5328_v6  ;;  %6406 = vmatpush1.bf16.msra.mxu1 %v5330_v29  ;;  %v5371_v6 = vld [vmem:[#allocation2 + $0x1f58] sm:$0xff]  ;;  %v5368_v29 = vld [vmem:[#allocation2 + $0x1f40] sm:$0xff] }
 0xd32   :  { %5983 = vmatprep.subr.bf16.mxu0 %v5337_v32  ;;  %6407 = vmatprep.subr.bf16.mxu1 %v5339_v20  ;;  %v5370_v32 = vld [vmem:[#allocation2 + $0x1f50] sm:$0xff]  ;;  %v5377_v20 = vld [vmem:[#allocation2 + $0x1f88] sm:$0xff] }
 0xd35   :  { %5984 = vmatpush1.bf16.msra.mxu0 %v5336_v28  ;;  %6408 = vmatpush1.bf16.msra.mxu1 %v5338_v19  ;;  %v5379_v28 = vld [vmem:[#allocation2 + $0x1f98] sm:$0xff]  ;;  %v5376_v19 = vld [vmem:[#allocation2 + $0x1f80] sm:$0xff] }
 0xd36   :  { %5985 = vmatprep.subr.bf16.mxu0 %v5345_v34  ;;  %6409 = vmatprep.subr.bf16.mxu1 %v5347_v47  ;;  %v5378_v34 = vld [vmem:[#allocation2 + $0x1f90] sm:$0xff]  ;;  %v5385_v47 = vld [vmem:[#allocation2 + $0x1fc8] sm:$0xff] }
 0xd39   :  { %5986 = vmatpush1.bf16.msra.mxu0 %v5344_v49  ;;  %6410 = vmatpush1.bf16.msra.mxu1 %v5346_v60  ;;  %v5387_v49 = vld [vmem:[#allocation2 + $0x1fd8] sm:$0xff]  ;;  %v5384_v60 = vld [vmem:[#allocation2 + $0x1fc0] sm:$0xff] }
 0xd3a   :  { %5987 = vmatprep.subr.bf16.mxu0 %v5353_v43  ;;  %6411 = vmatprep.subr.bf16.mxu1 %v5355_v31  ;;  %v5386_v43 = vld [vmem:[#allocation2 + $0x1fd0] sm:$0xff]  ;;  %v4373_v31 = vld [vmem:[#allocation2 + $0x28] sm:$0xff] }
 0xd3d   :  { %5988 = vmatpush1.bf16.msra.mxu0 %v5352_v36  ;;  %6412 = vmatpush1.bf16.msra.mxu1 %v5354_v52  ;;  %v4375_v36 = vld [vmem:[#allocation2 + $0x38] sm:$0xff]  ;;  %v13580_v52 = vcombine.low %v13565_v38, %v13568_v39  ;;  %v4380_v38 = vld [vmem:[#allocation2 + $0x60] sm:$0xff]  ;;  %v4382_v39 = vld [vmem:[#allocation2 + $0x70] sm:$0xff] }
 0xd3e   :  { %5989 = vmatprep.subr.bf16.mxu0 %v5361_v44  ;;  %6413 = vmatprep.subr.bf16.mxu1 %v5363_v30  ;;  %v4357_v44 = vld [vmem:[%s13983_s26 + $0xb8] sm:$0xff] }
 0xd3f   :  { %v4365_v30 = vld [vmem:[%s13983_s26 + $0xf8] sm:$0xff] }
 0xd41   :  { %5990 = vmatpush1.bf16.msra.mxu0 %v5360_v51  ;;  %6414 = vmatpush1.bf16.msra.mxu1 %v5362_v7  ;;  %v4372_v51 = vld [vmem:[#allocation2 + $0x20] sm:$0xff]  ;;  %v4374_v7 = vld [vmem:[#allocation2 + $0x30] sm:$0xff] }
 0xd42   :  { %5991 = vmatprep.subr.bf16.mxu0 %v5369_v3  ;;  %6415 = vmatprep.subr.bf16.mxu1 %v5371_v6  ;;  %v4381_v3 = vld [vmem:[#allocation2 + $0x68] sm:$0xff]  ;;  %v4383_v6 = vld [vmem:[#allocation2 + $0x78] sm:$0xff] }
 0xd45   :  { %5992 = vmatpush1.bf16.msra.mxu0 %v5368_v29  ;;  %6416 = vmatpush1.bf16.msra.mxu1 %v5370_v32  ;;  %v13584_v29 = vcombine.high %v4357_v44, %v4365_v30  ;;  %v4389_v32 = vld [vmem:[#allocation2 + $0xa8] sm:$0xff] }
 0xd46   :  { %5993 = vmatprep.subr.bf16.mxu0 %v5377_v20  ;;  %6417 = vmatprep.subr.bf16.mxu1 %v5379_v28  ;;  %v4391_v20 = vld [vmem:[#allocation2 + $0xb8] sm:$0xff]  ;;  %v13590_v28 = vcombine.low %v4357_v44, %v4365_v30  ;;  %v4404_v44 = vld [vmem:[#allocation2 + $0x120] sm:$0xff]  ;;  %v4406_v30 = vld [vmem:[#allocation2 + $0x130] sm:$0xff] }
 0xd49   :  { %5994 = vmatpush1.bf16.msra.mxu0 %v5376_v19  ;;  %6418 = vmatpush1.bf16.msra.mxu1 %v5378_v34  ;;  %v4388_v19 = vld [vmem:[#allocation2 + $0xa0] sm:$0xff]  ;;  %v4390_v34 = vld [vmem:[#allocation2 + $0xb0] sm:$0xff] }
 0xd4a   :  { %5995 = vmatprep.subr.bf16.mxu0 %v5385_v47  ;;  %6419 = vmatprep.subr.bf16.mxu1 %v5387_v49  ;;  %v4397_v47 = vld [vmem:[#allocation2 + $0xe8] sm:$0xff]  ;;  %v4399_v49 = vld [vmem:[#allocation2 + $0xf8] sm:$0xff] }
 0xd4d   :  { %5996 = vmatpush1.bf16.msra.mxu0 %v5384_v60  ;;  %6420 = vmatpush1.bf16.msra.mxu1 %v5386_v43  ;;  %v4396_v60 = vld [vmem:[#allocation2 + $0xe0] sm:$0xff]  ;;  %v4398_v43 = vld [vmem:[#allocation2 + $0xf0] sm:$0xff] }
 0xd4e   :  { %6442 = vmatprep.subr.bf16.mxu0 %v4373_v31  ;;  %6866 = vmatprep.subr.bf16.mxu1 %v4375_v36  ;;  %v4405_v31 = vld [vmem:[#allocation2 + $0x128] sm:$0xff]  ;;  %v4407_v36 = vld [vmem:[#allocation2 + $0x138] sm:$0xff] }
 0xd50   :  { %5998 = vmatmul.mubr.bf16.vlgmr.msra.gmra.mrb[12].mxu0 %v13580_v52  ;;  %6422 = vmatmul.mubr.bf16.vlgmr.msra.gmra.mrb[24].mxu1 %v13580_v52 }
 0xd51   :  { %6443 = vmatpush1.bf16.msra.mxu0 %v4372_v51  ;;  %6867 = vmatpush1.bf16.msra.mxu1 %v4374_v7  ;;  %v4413_v51 = vld [vmem:[#allocation2 + $0x168] sm:$0xff]  ;;  %v4415_v7 = vld [vmem:[#allocation2 + $0x178] sm:$0xff] }
 0xd52   :  { %6444 = vmatprep.subr.bf16.mxu0 %v4381_v3  ;;  %6868 = vmatprep.subr.bf16.mxu1 %v4383_v6  ;;  %v4412_v3 = vld [vmem:[#allocation2 + $0x160] sm:$0xff]  ;;  %v4414_v6 = vld [vmem:[#allocation2 + $0x170] sm:$0xff] }
 0xd53   :  { %6007 = vmatprep.mubr.bf16.mxu0 %v13584_v29  ;;  %6431 = vmatprep.mubr.bf16.mxu1 %v13584_v29 }
 0xd55   :  { %6445 = vmatpush1.bf16.msra.mxu0 %v4380_v38  ;;  %6869 = vmatpush1.bf16.msra.mxu1 %v4382_v39  ;;  %v4421_v38 = vld [vmem:[#allocation2 + $0x1a8] sm:$0xff]  ;;  %v4423_v39 = vld [vmem:[#allocation2 + $0x1b8] sm:$0xff] }
 0xd56   :  { %6446 = vmatprep.subr.bf16.mxu0 %v4389_v32  ;;  %6870 = vmatprep.subr.bf16.mxu1 %v4391_v20  ;;  %v4422_v32 = vld [vmem:[#allocation2 + $0x1b0] sm:$0xff]  ;;  %v4429_v20 = vld [vmem:[#allocation2 + $0x1e8] sm:$0xff] }
 0xd58   :  { %6008 = vmatmul.mubr.bf16.gmra.mrb[16].mxu0 %v13590_v28  ;;  %6432 = vmatmul.mubr.bf16.gmra.mrb[28].mxu1 %v13590_v28 }
 0xd59   :  { %6447 = vmatpush1.bf16.msra.mxu0 %v4388_v19  ;;  %6871 = vmatpush1.bf16.msra.mxu1 %v4390_v34  ;;  %v4431_v19 = vld [vmem:[#allocation2 + $0x1f8] sm:$0xff]  ;;  %v4428_v34 = vld [vmem:[#allocation2 + $0x1e0] sm:$0xff] }
 0xd5a   :  { %6448 = vmatprep.subr.bf16.mxu0 %v4397_v47  ;;  %6872 = vmatprep.subr.bf16.mxu1 %v4399_v49  ;;  %v4430_v47 = vld [vmem:[#allocation2 + $0x1f0] sm:$0xff]  ;;  %v4437_v49 = vld [vmem:[#allocation2 + $0x228] sm:$0xff] }
 0xd5b   :  { %6474 = vmatprep.mubr.bf16.mxu0 %v13378_v42  ;;  %6898 = vmatprep.mubr.bf16.mxu1 %v13378_v42  ;;  %v4420_v42 = vld [vmem:[#allocation2 + $0x1a0] sm:$0xff] }
 0xd5d   :  { %6449 = vmatpush1.bf16.msra.mxu0 %v4396_v60  ;;  %6873 = vmatpush1.bf16.msra.mxu1 %v4398_v43  ;;  %v4439_v60 = vld [vmem:[#allocation2 + $0x238] sm:$0xff]  ;;  %v4436_v43 = vld [vmem:[#allocation2 + $0x220] sm:$0xff] }
 0xd5e   :  { %6450 = vmatprep.subr.bf16.mxu0 %v4405_v31  ;;  %6874 = vmatprep.subr.bf16.mxu1 %v4407_v36  ;;  %v4438_v31 = vld [vmem:[#allocation2 + $0x230] sm:$0xff]  ;;  %v4445_v36 = vld [vmem:[#allocation2 + $0x268] sm:$0xff] }
 0xd61   :  { %6451 = vmatpush1.bf16.msra.mxu0 %v4404_v44  ;;  %6875 = vmatpush1.bf16.msra.mxu1 %v4406_v30  ;;  %v4447_v44 = vld [vmem:[#allocation2 + $0x278] sm:$0xff]  ;;  %v4444_v30 = vld [vmem:[#allocation2 + $0x260] sm:$0xff] }
 0xd62   :  { %6452 = vmatprep.subr.bf16.mxu0 %v4413_v51  ;;  %6876 = vmatprep.subr.bf16.mxu1 %v4415_v7  ;;  %v4446_v51 = vld [vmem:[#allocation2 + $0x270] sm:$0xff]  ;;  %v4453_v7 = vld [vmem:[#allocation2 + $0x2a8] sm:$0xff] }
 0xd65   :  { %6453 = vmatpush1.bf16.msra.mxu0 %v4412_v3  ;;  %6877 = vmatpush1.bf16.msra.mxu1 %v4414_v6  ;;  %v4455_v3 = vld [vmem:[#allocation2 + $0x2b8] sm:$0xff]  ;;  %v4452_v6 = vld [vmem:[#allocation2 + $0x2a0] sm:$0xff] }
 0xd66   :  { %6454 = vmatprep.subr.bf16.mxu0 %v4421_v38  ;;  %6878 = vmatprep.subr.bf16.mxu1 %v4423_v39  ;;  %v4454_v38 = vld [vmem:[#allocation2 + $0x2b0] sm:$0xff]  ;;  %v4461_v39 = vld [vmem:[#allocation2 + $0x2e8] sm:$0xff] }
 0xd69   :  { %6455 = vmatpush1.bf16.msra.mxu0 %v4420_v42  ;;  %6879 = vmatpush1.bf16.msra.mxu1 %v4422_v32  ;;  %v4463_v42 = vld [vmem:[#allocation2 + $0x2f8] sm:$0xff]  ;;  %v4460_v32 = vld [vmem:[#allocation2 + $0x2e0] sm:$0xff] }
 0xd6a   :  { %6456 = vmatprep.subr.bf16.mxu0 %v4429_v20  ;;  %6880 = vmatprep.subr.bf16.mxu1 %v4431_v19  ;;  %v4462_v20 = vld [vmem:[#allocation2 + $0x2f0] sm:$0xff]  ;;  %v4469_v19 = vld [vmem:[#allocation2 + $0x328] sm:$0xff] }
 0xd6d   :  { %6457 = vmatpush1.bf16.msra.mxu0 %v4428_v34  ;;  %6881 = vmatpush1.bf16.msra.mxu1 %v4430_v47  ;;  %v4471_v34 = vld [vmem:[#allocation2 + $0x338] sm:$0xff]  ;;  %v4468_v47 = vld [vmem:[#allocation2 + $0x320] sm:$0xff] }
 0xd6e   :  { %6458 = vmatprep.subr.bf16.mxu0 %v4437_v49  ;;  %6882 = vmatprep.subr.bf16.mxu1 %v4439_v60  ;;  %v4470_v49 = vld [vmem:[#allocation2 + $0x330] sm:$0xff]  ;;  %v4477_v60 = vld [vmem:[#allocation2 + $0x368] sm:$0xff] }
 0xd71   :  { %6459 = vmatpush1.bf16.msra.mxu0 %v4436_v43  ;;  %6883 = vmatpush1.bf16.msra.mxu1 %v4438_v31  ;;  %v4479_v43 = vld [vmem:[#allocation2 + $0x378] sm:$0xff]  ;;  %v4476_v31 = vld [vmem:[#allocation2 + $0x360] sm:$0xff] }
 0xd72   :  { %6460 = vmatprep.subr.bf16.mxu0 %v4445_v36  ;;  %6884 = vmatprep.subr.bf16.mxu1 %v4447_v44  ;;  %v4478_v36 = vld [vmem:[#allocation2 + $0x370] sm:$0xff]  ;;  %v4485_v44 = vld [vmem:[#allocation2 + $0x3a8] sm:$0xff] }
 0xd75   :  { %6461 = vmatpush1.bf16.msra.mxu0 %v4444_v30  ;;  %6885 = vmatpush1.bf16.msra.mxu1 %v4446_v51  ;;  %v4487_v30 = vld [vmem:[#allocation2 + $0x3b8] sm:$0xff]  ;;  %v4484_v51 = vld [vmem:[#allocation2 + $0x3a0] sm:$0xff] }
 0xd76   :  { %6462 = vmatprep.subr.bf16.mxu0 %v4453_v7  ;;  %6886 = vmatprep.subr.bf16.mxu1 %v4455_v3  ;;  %v4486_v7 = vld [vmem:[#allocation2 + $0x3b0] sm:$0xff]  ;;  %v4493_v3 = vld [vmem:[#allocation2 + $0x3e8] sm:$0xff] }
 0xd79   :  { %6463 = vmatpush1.bf16.msra.mxu0 %v4452_v6  ;;  %6887 = vmatpush1.bf16.msra.mxu1 %v4454_v38  ;;  %v4495_v6 = vld [vmem:[#allocation2 + $0x3f8] sm:$0xff]  ;;  %v4492_v38 = vld [vmem:[#allocation2 + $0x3e0] sm:$0xff] }
 0xd7a   :  { %6464 = vmatprep.subr.bf16.mxu0 %v4461_v39  ;;  %6888 = vmatprep.subr.bf16.mxu1 %v4463_v42  ;;  %v4494_v39 = vld [vmem:[#allocation2 + $0x3f0] sm:$0xff]  ;;  %v4501_v42 = vld [vmem:[#allocation2 + $0x428] sm:$0xff] }
 0xd7d   :  { %6465 = vmatpush1.bf16.msra.mxu0 %v4460_v32  ;;  %6889 = vmatpush1.bf16.msra.mxu1 %v4462_v20  ;;  %v4503_v32 = vld [vmem:[#allocation2 + $0x438] sm:$0xff]  ;;  %v4500_v20 = vld [vmem:[#allocation2 + $0x420] sm:$0xff] }
 0xd7e   :  { %6466 = vmatprep.subr.bf16.mxu0 %v4469_v19  ;;  %6890 = vmatprep.subr.bf16.mxu1 %v4471_v34  ;;  %v4502_v19 = vld [vmem:[#allocation2 + $0x430] sm:$0xff]  ;;  %v4509_v34 = vld [vmem:[#allocation2 + $0x468] sm:$0xff] }
 0xd81   :  { %6467 = vmatpush1.bf16.msra.mxu0 %v4468_v47  ;;  %6891 = vmatpush1.bf16.msra.mxu1 %v4470_v49  ;;  %v4511_v47 = vld [vmem:[#allocation2 + $0x478] sm:$0xff]  ;;  %v4508_v49 = vld [vmem:[#allocation2 + $0x460] sm:$0xff] }
 0xd82   :  { %6468 = vmatprep.subr.bf16.mxu0 %v4477_v60  ;;  %6892 = vmatprep.subr.bf16.mxu1 %v4479_v43  ;;  %v4510_v60 = vld [vmem:[#allocation2 + $0x470] sm:$0xff]  ;;  %v4517_v43 = vld [vmem:[#allocation2 + $0x4a8] sm:$0xff] }
 0xd85   :  { %6469 = vmatpush1.bf16.msra.mxu0 %v4476_v31  ;;  %6893 = vmatpush1.bf16.msra.mxu1 %v4478_v36  ;;  %v4519_v31 = vld [vmem:[#allocation2 + $0x4b8] sm:$0xff]  ;;  %v4516_v36 = vld [vmem:[#allocation2 + $0x4a0] sm:$0xff] }
 0xd86   :  { %6470 = vmatprep.subr.bf16.mxu0 %v4485_v44  ;;  %6894 = vmatprep.subr.bf16.mxu1 %v4487_v30  ;;  %v4518_v44 = vld [vmem:[#allocation2 + $0x4b0] sm:$0xff]  ;;  %v4525_v30 = vld [vmem:[#allocation2 + $0x4e8] sm:$0xff] }
 0xd89   :  { %6471 = vmatpush1.bf16.msra.mxu0 %v4484_v51  ;;  %6895 = vmatpush1.bf16.msra.mxu1 %v4486_v7  ;;  %v4524_v51 = vld [vmem:[#allocation2 + $0x4e0] sm:$0xff]  ;;  %v4526_v7 = vld [vmem:[#allocation2 + $0x4f0] sm:$0xff] }
 0xd8a   :  { %6472 = vmatprep.subr.bf16.mxu0 %v4493_v3  ;;  %6896 = vmatprep.subr.bf16.mxu1 %v4495_v6  ;;  %v4533_v3 = vld [vmem:[#allocation2 + $0x528] sm:$0xff]  ;;  %v4532_v6 = vld [vmem:[#allocation2 + $0x520] sm:$0xff] }
 0xd8d   :  { %6473 = vmatpush1.bf16.msra.mxu0 %v4492_v38  ;;  %6897 = vmatpush1.bf16.msra.mxu1 %v4494_v39  ;;  %v4534_v38 = vld [vmem:[#allocation2 + $0x530] sm:$0xff]  ;;  %v4541_v39 = vld [vmem:[#allocation2 + $0x568] sm:$0xff] }
 0xd8e   :  { %6495 = vmatprep.subr.bf16.mxu0 %v4501_v42  ;;  %6919 = vmatprep.subr.bf16.mxu1 %v4503_v32  ;;  %v4540_v42 = vld [vmem:[#allocation2 + $0x560] sm:$0xff]  ;;  %v4542_v32 = vld [vmem:[#allocation2 + $0x570] sm:$0xff] }
 0xd90   :  { %6475 = vmatmul.mubr.bf16.vlgmr.msra.gmra.mrb[20].mxu0 %v13384_v56  ;;  %6899 = vmatmul.mubr.bf16.vlgmr.msra.gmra.mrb[32].mxu1 %v13384_v56  ;;  %v4527_v56 = vld [vmem:[#allocation2 + $0x4f8] sm:$0xff] }
 0xd91   :  { %6496 = vmatpush1.bf16.msra.mxu0 %v4500_v20  ;;  %6920 = vmatpush1.bf16.msra.mxu1 %v4502_v19  ;;  %v4549_v20 = vld [vmem:[#allocation2 + $0x5a8] sm:$0xff]  ;;  %v4551_v19 = vld [vmem:[#allocation2 + $0x5b8] sm:$0xff] }
 0xd92   :  { %6497 = vmatprep.subr.bf16.mxu0 %v4509_v34  ;;  %6921 = vmatprep.subr.bf16.mxu1 %v4511_v47  ;;  %v4550_v34 = vld [vmem:[#allocation2 + $0x5b0] sm:$0xff]  ;;  %v4557_v47 = vld [vmem:[#allocation2 + $0x5e8] sm:$0xff] }
 0xd93   :  { %6484 = vmatprep.mubr.bf16.mxu0 %v13388_v23  ;;  %6908 = vmatprep.mubr.bf16.mxu1 %v13388_v23  ;;  %v4535_v23 = vld [vmem:[#allocation2 + $0x538] sm:$0xff] }
 0xd95   :  { %6498 = vmatpush1.bf16.msra.mxu0 %v4508_v49  ;;  %6922 = vmatpush1.bf16.msra.mxu1 %v4510_v60  ;;  %v4559_v49 = vld [vmem:[#allocation2 + $0x5f8] sm:$0xff]  ;;  %v4556_v60 = vld [vmem:[#allocation2 + $0x5e0] sm:$0xff] }
 0xd96   :  { %6499 = vmatprep.subr.bf16.mxu0 %v4517_v43  ;;  %6923 = vmatprep.subr.bf16.mxu1 %v4519_v31  ;;  %v4558_v43 = vld [vmem:[#allocation2 + $0x5f0] sm:$0xff]  ;;  %v4565_v31 = vld [vmem:[#allocation2 + $0x628] sm:$0xff] }
 0xd98   :  { %6485 = vmatmul.mubr.bf16.gmra.mrb[24].mxu0 %v13394_v50  ;;  %6909 = vmatmul.mubr.bf16.gmra.mrb[36].mxu1 %v13394_v50  ;;  %v4543_v50 = vld [vmem:[#allocation2 + $0x578] sm:$0xff] }
 0xd99   :  { %6500 = vmatpush1.bf16.msra.mxu0 %v4516_v36  ;;  %6924 = vmatpush1.bf16.msra.mxu1 %v4518_v44  ;;  %v4567_v36 = vld [vmem:[#allocation2 + $0x638] sm:$0xff]  ;;  %v4564_v44 = vld [vmem:[#allocation2 + $0x620] sm:$0xff] }
 0xd9a   :  { %6501 = vmatprep.subr.bf16.mxu0 %v4525_v30  ;;  %6925 = vmatprep.subr.bf16.mxu1 %v4527_v56  ;;  %v4566_v30 = vld [vmem:[#allocation2 + $0x630] sm:$0xff]  ;;  %v4573_v56 = vld [vmem:[#allocation2 + $0x668] sm:$0xff] }
 0xd9b   :  { %6527 = vmatprep.mubr.bf16.mxu0 %v13404_v48  ;;  %6951 = vmatprep.mubr.bf16.mxu1 %v13404_v48  ;;  %v4548_v48 = vld [vmem:[#allocation2 + $0x5a0] sm:$0xff] }
 0xd9d   :  { %6502 = vmatpush1.bf16.msra.mxu0 %v4524_v51  ;;  %6926 = vmatpush1.bf16.msra.mxu1 %v4526_v7  ;;  %v4575_v51 = vld [vmem:[#allocation2 + $0x678] sm:$0xff]  ;;  %v4572_v7 = vld [vmem:[#allocation2 + $0x660] sm:$0xff] }
 0xd9e   :  { %6503 = vmatprep.subr.bf16.mxu0 %v4533_v3  ;;  %6927 = vmatprep.subr.bf16.mxu1 %v4535_v23  ;;  %v4574_v3 = vld [vmem:[#allocation2 + $0x670] sm:$0xff]  ;;  %v4581_v23 = vld [vmem:[#allocation2 + $0x6a8] sm:$0xff] }
 0xda1   :  { %6504 = vmatpush1.bf16.msra.mxu0 %v4532_v6  ;;  %6928 = vmatpush1.bf16.msra.mxu1 %v4534_v38  ;;  %v4583_v6 = vld [vmem:[#allocation2 + $0x6b8] sm:$0xff]  ;;  %v4580_v38 = vld [vmem:[#allocation2 + $0x6a0] sm:$0xff] }
 0xda2   :  { %6505 = vmatprep.subr.bf16.mxu0 %v4541_v39  ;;  %6929 = vmatprep.subr.bf16.mxu1 %v4543_v50  ;;  %v4582_v39 = vld [vmem:[#allocation2 + $0x6b0] sm:$0xff]  ;;  %v4589_v50 = vld [vmem:[#allocation2 + $0x6e8] sm:$0xff] }
 0xda5   :  { %6506 = vmatpush1.bf16.msra.mxu0 %v4540_v42  ;;  %6930 = vmatpush1.bf16.msra.mxu1 %v4542_v32  ;;  %v4591_v42 = vld [vmem:[#allocation2 + $0x6f8] sm:$0xff]  ;;  %v4588_v32 = vld [vmem:[#allocation2 + $0x6e0] sm:$0xff] }
 0xda6   :  { %6507 = vmatprep.subr.bf16.mxu0 %v4549_v20  ;;  %6931 = vmatprep.subr.bf16.mxu1 %v4551_v19  ;;  %v4590_v20 = vld [vmem:[#allocation2 + $0x6f0] sm:$0xff]  ;;  %v4597_v19 = vld [vmem:[#allocation2 + $0x728] sm:$0xff] }
 0xda9   :  { %6508 = vmatpush1.bf16.msra.mxu0 %v4548_v48  ;;  %6932 = vmatpush1.bf16.msra.mxu1 %v4550_v34  ;;  %v4599_v48 = vld [vmem:[#allocation2 + $0x738] sm:$0xff]  ;;  %v4596_v34 = vld [vmem:[#allocation2 + $0x720] sm:$0xff] }
 0xdaa   :  { %6509 = vmatprep.subr.bf16.mxu0 %v4557_v47  ;;  %6933 = vmatprep.subr.bf16.mxu1 %v4559_v49  ;;  %v4598_v47 = vld [vmem:[#allocation2 + $0x730] sm:$0xff]  ;;  %v4605_v49 = vld [vmem:[#allocation2 + $0x768] sm:$0xff] }
 0xdad   :  { %6510 = vmatpush1.bf16.msra.mxu0 %v4556_v60  ;;  %6934 = vmatpush1.bf16.msra.mxu1 %v4558_v43  ;;  %v4607_v60 = vld [vmem:[#allocation2 + $0x778] sm:$0xff]  ;;  %v4604_v43 = vld [vmem:[#allocation2 + $0x760] sm:$0xff] }
 0xdae   :  { %6511 = vmatprep.subr.bf16.mxu0 %v4565_v31  ;;  %6935 = vmatprep.subr.bf16.mxu1 %v4567_v36  ;;  %v4606_v31 = vld [vmem:[#allocation2 + $0x770] sm:$0xff]  ;;  %v4613_v36 = vld [vmem:[#allocation2 + $0x7a8] sm:$0xff] }
 0xdb1   :  { %6512 = vmatpush1.bf16.msra.mxu0 %v4564_v44  ;;  %6936 = vmatpush1.bf16.msra.mxu1 %v4566_v30  ;;  %v4615_v44 = vld [vmem:[#allocation2 + $0x7b8] sm:$0xff]  ;;  %v4612_v30 = vld [vmem:[#allocation2 + $0x7a0] sm:$0xff] }
 0xdb2   :  { %6513 = vmatprep.subr.bf16.mxu0 %v4573_v56  ;;  %6937 = vmatprep.subr.bf16.mxu1 %v4575_v51  ;;  %v4614_v56 = vld [vmem:[#allocation2 + $0x7b0] sm:$0xff]  ;;  %v4621_v51 = vld [vmem:[#allocation2 + $0x7e8] sm:$0xff] }
 0xdb5   :  { %6514 = vmatpush1.bf16.msra.mxu0 %v4572_v7  ;;  %6938 = vmatpush1.bf16.msra.mxu1 %v4574_v3  ;;  %v4623_v7 = vld [vmem:[#allocation2 + $0x7f8] sm:$0xff]  ;;  %v4620_v3 = vld [vmem:[#allocation2 + $0x7e0] sm:$0xff] }
 0xdb6   :  { %6515 = vmatprep.subr.bf16.mxu0 %v4581_v23  ;;  %6939 = vmatprep.subr.bf16.mxu1 %v4583_v6  ;;  %v4622_v23 = vld [vmem:[#allocation2 + $0x7f0] sm:$0xff]  ;;  %v4629_v6 = vld [vmem:[#allocation2 + $0x828] sm:$0xff] }
 0xdb9   :  { %6516 = vmatpush1.bf16.msra.mxu0 %v4580_v38  ;;  %6940 = vmatpush1.bf16.msra.mxu1 %v4582_v39  ;;  %v4631_v38 = vld [vmem:[#allocation2 + $0x838] sm:$0xff]  ;;  %v4628_v39 = vld [vmem:[#allocation2 + $0x820] sm:$0xff] }
 0xdba   :  { %6517 = vmatprep.subr.bf16.mxu0 %v4589_v50  ;;  %6941 = vmatprep.subr.bf16.mxu1 %v4591_v42  ;;  %v4630_v50 = vld [vmem:[#allocation2 + $0x830] sm:$0xff]  ;;  %v4637_v42 = vld [vmem:[#allocation2 + $0x868] sm:$0xff] }
 0xdbd   :  { %6518 = vmatpush1.bf16.msra.mxu0 %v4588_v32  ;;  %6942 = vmatpush1.bf16.msra.mxu1 %v4590_v20  ;;  %v4639_v32 = vld [vmem:[#allocation2 + $0x878] sm:$0xff]  ;;  %v4636_v20 = vld [vmem:[#allocation2 + $0x860] sm:$0xff] }
 0xdbe   :  { %6519 = vmatprep.subr.bf16.mxu0 %v4597_v19  ;;  %6943 = vmatprep.subr.bf16.mxu1 %v4599_v48  ;;  %v4638_v19 = vld [vmem:[#allocation2 + $0x870] sm:$0xff]  ;;  %v4645_v48 = vld [vmem:[#allocation2 + $0x8a8] sm:$0xff] }
 0xdc1   :  { %6520 = vmatpush1.bf16.msra.mxu0 %v4596_v34  ;;  %6944 = vmatpush1.bf16.msra.mxu1 %v4598_v47  ;;  %v4647_v34 = vld [vmem:[#allocation2 + $0x8b8] sm:$0xff]  ;;  %v4644_v47 = vld [vmem:[#allocation2 + $0x8a0] sm:$0xff] }
 0xdc2   :  { %6521 = vmatprep.subr.bf16.mxu0 %v4605_v49  ;;  %6945 = vmatprep.subr.bf16.mxu1 %v4607_v60  ;;  %v4646_v49 = vld [vmem:[#allocation2 + $0x8b0] sm:$0xff]  ;;  %v4653_v60 = vld [vmem:[#allocation2 + $0x8e8] sm:$0xff] }
 0xdc5   :  { %6522 = vmatpush1.bf16.msra.mxu0 %v4604_v43  ;;  %6946 = vmatpush1.bf16.msra.mxu1 %v4606_v31  ;;  %v4652_v43 = vld [vmem:[#allocation2 + $0x8e0] sm:$0xff]  ;;  %v4654_v31 = vld [vmem:[#allocation2 + $0x8f0] sm:$0xff] }
 0xdc6   :  { %6523 = vmatprep.subr.bf16.mxu0 %v4613_v36  ;;  %6947 = vmatprep.subr.bf16.mxu1 %v4615_v44  ;;  %v4661_v36 = vld [vmem:[#allocation2 + $0x928] sm:$0xff]  ;;  %v4660_v44 = vld [vmem:[#allocation2 + $0x920] sm:$0xff] }
 0xdc9   :  { %6524 = vmatpush1.bf16.msra.mxu0 %v4612_v30  ;;  %6948 = vmatpush1.bf16.msra.mxu1 %v4614_v56  ;;  %v4662_v30 = vld [vmem:[#allocation2 + $0x930] sm:$0xff]  ;;  %v4669_v56 = vld [vmem:[#allocation2 + $0x968] sm:$0xff] }
 0xdca   :  { %6525 = vmatprep.subr.bf16.mxu0 %v4621_v51  ;;  %6949 = vmatprep.subr.bf16.mxu1 %v4623_v7  ;;  %v4668_v51 = vld [vmem:[#allocation2 + $0x960] sm:$0xff]  ;;  %v4670_v7 = vld [vmem:[#allocation2 + $0x970] sm:$0xff] }
 0xdcd   :  { %6526 = vmatpush1.bf16.msra.mxu0 %v4620_v3  ;;  %6950 = vmatpush1.bf16.msra.mxu1 %v4622_v23  ;;  %v4677_v3 = vld [vmem:[#allocation2 + $0x9a8] sm:$0xff]  ;;  %v4679_v23 = vld [vmem:[#allocation2 + $0x9b8] sm:$0xff] }
 0xdce   :  { %6548 = vmatprep.subr.bf16.mxu0 %v4629_v6  ;;  %6972 = vmatprep.subr.bf16.mxu1 %v4631_v38  ;;  %v4678_v6 = vld [vmem:[#allocation2 + $0x9b0] sm:$0xff]  ;;  %v4685_v38 = vld [vmem:[#allocation2 + $0x9e8] sm:$0xff] }
 0xdd0   :  { %6528 = vmatmul.mubr.bf16.vlgmr.msra.gmra.mrb[20].mxu0 %v13413_v16  ;;  %6952 = vmatmul.mubr.bf16.vlgmr.msra.gmra.mrb[32].mxu1 %v13413_v16  ;;  %v4655_v16 = vld [vmem:[#allocation2 + $0x8f8] sm:$0xff] }
 0xdd1   :  { %6549 = vmatpush1.bf16.msra.mxu0 %v4628_v39  ;;  %6973 = vmatpush1.bf16.msra.mxu1 %v4630_v50  ;;  %v4687_v39 = vld [vmem:[#allocation2 + $0x9f8] sm:$0xff]  ;;  %v4684_v50 = vld [vmem:[#allocation2 + $0x9e0] sm:$0xff] }
 0xdd2   :  { %6550 = vmatprep.subr.bf16.mxu0 %v4637_v42  ;;  %6974 = vmatprep.subr.bf16.mxu1 %v4639_v32  ;;  %v4686_v42 = vld [vmem:[#allocation2 + $0x9f0] sm:$0xff]  ;;  %v4693_v32 = vld [vmem:[#allocation2 + $0xa28] sm:$0xff] }
 0xdd3   :  { %6537 = vmatprep.mubr.bf16.mxu0 %v13416_v26  ;;  %6961 = vmatprep.mubr.bf16.mxu1 %v13416_v26  ;;  %v4663_v26 = vld [vmem:[#allocation2 + $0x938] sm:$0xff] }
 0xdd5   :  { %6551 = vmatpush1.bf16.msra.mxu0 %v4636_v20  ;;  %6975 = vmatpush1.bf16.msra.mxu1 %v4638_v19  ;;  %v4695_v20 = vld [vmem:[#allocation2 + $0xa38] sm:$0xff]  ;;  %v4692_v19 = vld [vmem:[#allocation2 + $0xa20] sm:$0xff] }
 0xdd6   :  { %6552 = vmatprep.subr.bf16.mxu0 %v4645_v48  ;;  %6976 = vmatprep.subr.bf16.mxu1 %v4647_v34  ;;  %v4694_v48 = vld [vmem:[#allocation2 + $0xa30] sm:$0xff]  ;;  %v4701_v34 = vld [vmem:[#allocation2 + $0xa68] sm:$0xff] }
 0xdd8   :  { %6538 = vmatmul.mubr.bf16.gmra.mrb[24].mxu0 %v13425_v18  ;;  %6962 = vmatmul.mubr.bf16.gmra.mrb[36].mxu1 %v13425_v18  ;;  %v4671_v18 = vld [vmem:[#allocation2 + $0x978] sm:$0xff] }
 0xdd9   :  { %6553 = vmatpush1.bf16.msra.mxu0 %v4644_v47  ;;  %6977 = vmatpush1.bf16.msra.mxu1 %v4646_v49  ;;  %v4703_v47 = vld [vmem:[#allocation2 + $0xa78] sm:$0xff]  ;;  %v4700_v49 = vld [vmem:[#allocation2 + $0xa60] sm:$0xff] }
 0xdda   :  { %6554 = vmatprep.subr.bf16.mxu0 %v4653_v60  ;;  %6978 = vmatprep.subr.bf16.mxu1 %v4655_v16  ;;  %v4702_v60 = vld [vmem:[#allocation2 + $0xa70] sm:$0xff]  ;;  %v4709_v16 = vld [vmem:[#allocation2 + $0xaa8] sm:$0xff] }
 0xddb   :  { %6580 = vmatprep.mubr.bf16.mxu0 %v13432_v17  ;;  %7004 = vmatprep.mubr.bf16.mxu1 %v13432_v17  ;;  %v4676_v17 = vld [vmem:[#allocation2 + $0x9a0] sm:$0xff] }
 0xddd   :  { %6555 = vmatpush1.bf16.msra.mxu0 %v4652_v43  ;;  %6979 = vmatpush1.bf16.msra.mxu1 %v4654_v31  ;;  %v4711_v43 = vld [vmem:[#allocation2 + $0xab8] sm:$0xff]  ;;  %v4708_v31 = vld [vmem:[#allocation2 + $0xaa0] sm:$0xff] }
 0xdde   :  { %6556 = vmatprep.subr.bf16.mxu0 %v4661_v36  ;;  %6980 = vmatprep.subr.bf16.mxu1 %v4663_v26  ;;  %v4710_v36 = vld [vmem:[#allocation2 + $0xab0] sm:$0xff]  ;;  %v4717_v26 = vld [vmem:[#allocation2 + $0xae8] sm:$0xff] }
 0xde1   :  { %6557 = vmatpush1.bf16.msra.mxu0 %v4660_v44  ;;  %6981 = vmatpush1.bf16.msra.mxu1 %v4662_v30  ;;  %v4719_v44 = vld [vmem:[#allocation2 + $0xaf8] sm:$0xff]  ;;  %v4716_v30 = vld [vmem:[#allocation2 + $0xae0] sm:$0xff] }
 0xde2   :  { %6558 = vmatprep.subr.bf16.mxu0 %v4669_v56  ;;  %6982 = vmatprep.subr.bf16.mxu1 %v4671_v18  ;;  %v4718_v56 = vld [vmem:[#allocation2 + $0xaf0] sm:$0xff]  ;;  %v4725_v18 = vld [vmem:[#allocation2 + $0xb28] sm:$0xff] }
 0xde5   :  { %6559 = vmatpush1.bf16.msra.mxu0 %v4668_v51  ;;  %6983 = vmatpush1.bf16.msra.mxu1 %v4670_v7  ;;  %v4727_v51 = vld [vmem:[#allocation2 + $0xb38] sm:$0xff]  ;;  %v4724_v7 = vld [vmem:[#allocation2 + $0xb20] sm:$0xff] }
 0xde6   :  { %6560 = vmatprep.subr.bf16.mxu0 %v4677_v3  ;;  %6984 = vmatprep.subr.bf16.mxu1 %v4679_v23  ;;  %v4726_v3 = vld [vmem:[#allocation2 + $0xb30] sm:$0xff]  ;;  %v4733_v23 = vld [vmem:[#allocation2 + $0xb68] sm:$0xff] }
 0xde9   :  { %6561 = vmatpush1.bf16.msra.mxu0 %v4676_v17  ;;  %6985 = vmatpush1.bf16.msra.mxu1 %v4678_v6  ;;  %v4735_v17 = vld [vmem:[#allocation2 + $0xb78] sm:$0xff]  ;;  %v4732_v6 = vld [vmem:[#allocation2 + $0xb60] sm:$0xff] }
 0xdea   :  { %6562 = vmatprep.subr.bf16.mxu0 %v4685_v38  ;;  %6986 = vmatprep.subr.bf16.mxu1 %v4687_v39  ;;  %v4734_v38 = vld [vmem:[#allocation2 + $0xb70] sm:$0xff]  ;;  %v4741_v39 = vld [vmem:[#allocation2 + $0xba8] sm:$0xff] }
 0xded   :  { %6563 = vmatpush1.bf16.msra.mxu0 %v4684_v50  ;;  %6987 = vmatpush1.bf16.msra.mxu1 %v4686_v42  ;;  %v4743_v50 = vld [vmem:[#allocation2 + $0xbb8] sm:$0xff]  ;;  %v4740_v42 = vld [vmem:[#allocation2 + $0xba0] sm:$0xff] }
 0xdee   :  { %6564 = vmatprep.subr.bf16.mxu0 %v4693_v32  ;;  %6988 = vmatprep.subr.bf16.mxu1 %v4695_v20  ;;  %v4742_v32 = vld [vmem:[#allocation2 + $0xbb0] sm:$0xff]  ;;  %v4749_v20 = vld [vmem:[#allocation2 + $0xbe8] sm:$0xff] }
 0xdf1   :  { %6565 = vmatpush1.bf16.msra.mxu0 %v4692_v19  ;;  %6989 = vmatpush1.bf16.msra.mxu1 %v4694_v48  ;;  %v4751_v19 = vld [vmem:[#allocation2 + $0xbf8] sm:$0xff]  ;;  %v4748_v48 = vld [vmem:[#allocation2 + $0xbe0] sm:$0xff] }
 0xdf2   :  { %6566 = vmatprep.subr.bf16.mxu0 %v4701_v34  ;;  %6990 = vmatprep.subr.bf16.mxu1 %v4703_v47  ;;  %v4750_v34 = vld [vmem:[#allocation2 + $0xbf0] sm:$0xff]  ;;  %v4757_v47 = vld [vmem:[#allocation2 + $0xc28] sm:$0xff] }
 0xdf5   :  { %6567 = vmatpush1.bf16.msra.mxu0 %v4700_v49  ;;  %6991 = vmatpush1.bf16.msra.mxu1 %v4702_v60  ;;  %v4759_v49 = vld [vmem:[#allocation2 + $0xc38] sm:$0xff]  ;;  %v4756_v60 = vld [vmem:[#allocation2 + $0xc20] sm:$0xff] }
 0xdf6   :  { %6568 = vmatprep.subr.bf16.mxu0 %v4709_v16  ;;  %6992 = vmatprep.subr.bf16.mxu1 %v4711_v43  ;;  %v4758_v16 = vld [vmem:[#allocation2 + $0xc30] sm:$0xff]  ;;  %v4765_v43 = vld [vmem:[#allocation2 + $0xc68] sm:$0xff] }
 0xdf9   :  { %6569 = vmatpush1.bf16.msra.mxu0 %v4708_v31  ;;  %6993 = vmatpush1.bf16.msra.mxu1 %v4710_v36  ;;  %v4767_v31 = vld [vmem:[#allocation2 + $0xc78] sm:$0xff]  ;;  %v4764_v36 = vld [vmem:[#allocation2 + $0xc60] sm:$0xff] }
 0xdfa   :  { %6570 = vmatprep.subr.bf16.mxu0 %v4717_v26  ;;  %6994 = vmatprep.subr.bf16.mxu1 %v4719_v44  ;;  %v4766_v26 = vld [vmem:[#allocation2 + $0xc70] sm:$0xff]  ;;  %v4773_v44 = vld [vmem:[#allocation2 + $0xca8] sm:$0xff] }
 0xdfd   :  { %6571 = vmatpush1.bf16.msra.mxu0 %v4716_v30  ;;  %6995 = vmatpush1.bf16.msra.mxu1 %v4718_v56  ;;  %v4775_v30 = vld [vmem:[#allocation2 + $0xcb8] sm:$0xff]  ;;  %v4772_v56 = vld [vmem:[#allocation2 + $0xca0] sm:$0xff] }
 0xdfe   :  { %6572 = vmatprep.subr.bf16.mxu0 %v4725_v18  ;;  %6996 = vmatprep.subr.bf16.mxu1 %v4727_v51  ;;  %v4774_v18 = vld [vmem:[#allocation2 + $0xcb0] sm:$0xff]  ;;  %v4781_v51 = vld [vmem:[#allocation2 + $0xce8] sm:$0xff] }
 0xe01   :  { %6573 = vmatpush1.bf16.msra.mxu0 %v4724_v7  ;;  %6997 = vmatpush1.bf16.msra.mxu1 %v4726_v3  ;;  %v4780_v7 = vld [vmem:[#allocation2 + $0xce0] sm:$0xff]  ;;  %v4782_v3 = vld [vmem:[#allocation2 + $0xcf0] sm:$0xff] }
 0xe02   :  { %6574 = vmatprep.subr.bf16.mxu0 %v4733_v23  ;;  %6998 = vmatprep.subr.bf16.mxu1 %v4735_v17  ;;  %v4789_v23 = vld [vmem:[#allocation2 + $0xd28] sm:$0xff] }
 0xe03   :  { %v5392_v17 = vld [vmem:[#allocation30] sm:$0xff] }
 0xe05   :  { %6575 = vmatpush1.bf16.msra.mxu0 %v4732_v6  ;;  %6999 = vmatpush1.bf16.msra.mxu1 %v4734_v38  ;;  %v4788_v6 = vld [vmem:[#allocation2 + $0xd20] sm:$0xff]  ;;  %v4790_v38 = vld [vmem:[#allocation2 + $0xd30] sm:$0xff] }
 0xe06   :  { %6576 = vmatprep.subr.bf16.mxu0 %v4741_v39  ;;  %7000 = vmatprep.subr.bf16.mxu1 %v4743_v50  ;;  %v4799_v39 = vld [vmem:[#allocation2 + $0xd78] sm:$0xff]  ;;  %v13621_v50 = vrot.slane %v5392_v17, %v13256_v54 }
 0xe09   :  { %6577 = vmatpush1.bf16.msra.mxu0 %v4740_v42  ;;  %7001 = vmatpush1.bf16.msra.mxu1 %v4742_v32  ;;  %v13625_v42 = vrot.slane %v5392_v17, %v880_v55  ;;  %v13632_v32 = vrot.slane %v5392_v17, %v884_v58 }
 0xe0a   :  { %6578 = vmatprep.subr.bf16.mxu0 %v4749_v20  ;;  %7002 = vmatprep.subr.bf16.mxu1 %v4751_v19  ;;  %v4796_v20 = vld [vmem:[#allocation2 + $0xd60] sm:$0xff]  ;;  %v4798_v19 = vld [vmem:[#allocation2 + $0xd70] sm:$0xff] }
 0xe0d   :  { %6579 = vmatpush1.bf16.msra.mxu0 %v4748_v48  ;;  %7003 = vmatpush1.bf16.msra.mxu1 %v4750_v34 }
 0xe0e   :  { %6601 = vmatprep.subr.bf16.mxu0 %v4757_v47  ;;  %7025 = vmatprep.subr.bf16.mxu1 %v4759_v49  ;;  %v4805_v47 = vld [vmem:[#allocation2 + $0xda8] sm:$0xff]  ;;  %v4807_v49 = vld [vmem:[#allocation2 + $0xdb8] sm:$0xff] }
 0xe10   :  { %6581 = vmatmul.mubr.bf16.vlgmr.msra.gmra.mrb[20].mxu0 %v13441_v59  ;;  %7005 = vmatmul.mubr.bf16.vlgmr.msra.gmra.mrb[32].mxu1 %v13441_v59  ;;  %v4783_v59 = vld [vmem:[#allocation2 + $0xcf8] sm:$0xff] }
 0xe11   :  { %6602 = vmatpush1.bf16.msra.mxu0 %v4756_v60  ;;  %7026 = vmatpush1.bf16.msra.mxu1 %v4758_v16 }
 0xe12   :  { %6603 = vmatprep.subr.bf16.mxu0 %v4765_v43  ;;  %7027 = vmatprep.subr.bf16.mxu1 %v4767_v31 }
 0xe13   :  { %6590 = vmatprep.mubr.bf16.mxu0 %v13444_v4  ;;  %7014 = vmatprep.mubr.bf16.mxu1 %v13444_v4  ;;  %v4791_v4 = vld [vmem:[#allocation2 + $0xd38] sm:$0xff] }
 0xe15   :  { %6604 = vmatpush1.bf16.msra.mxu0 %v4764_v36  ;;  %7028 = vmatpush1.bf16.msra.mxu1 %v4766_v26 }
 0xe16   :  { %6605 = vmatprep.subr.bf16.mxu0 %v4773_v44  ;;  %7029 = vmatprep.subr.bf16.mxu1 %v4775_v30 }
 0xe18   :  { %6591 = vmatmul.mubr.bf16.gmra.mrb[24].mxu0 %v13453_v9  ;;  %7015 = vmatmul.mubr.bf16.gmra.mrb[36].mxu1 %v13453_v9  ;;  %v4797_v9 = vld [vmem:[#allocation2 + $0xd68] sm:$0xff] }
 0xe19   :  { %6606 = vmatpush1.bf16.msra.mxu0 %v4772_v56  ;;  %7030 = vmatpush1.bf16.msra.mxu1 %v4774_v18 }
 0xe1a   :  { %6607 = vmatprep.subr.bf16.mxu0 %v4781_v51  ;;  %7031 = vmatprep.subr.bf16.mxu1 %v4783_v59  ;;  %v4804_v51 = vld [vmem:[#allocation2 + $0xda0] sm:$0xff]  ;;  %v4806_v59 = vld [vmem:[#allocation2 + $0xdb0] sm:$0xff] }
 0xe1b   :  { %6633 = vmatprep.mubr.bf16.mxu0 %v13460_v25  ;;  %7057 = vmatprep.mubr.bf16.mxu1 %v13460_v25  ;;  %v13628_v25 = vrot.slane %v5392_v17, %v13260_v57 }
 0xe1d   :  { %6608 = vmatpush1.bf16.msra.mxu0 %v4780_v7  ;;  %7032 = vmatpush1.bf16.msra.mxu1 %v4782_v3 }
 0xe1e   :  { %6609 = vmatprep.subr.bf16.mxu0 %v4789_v23  ;;  %7033 = vmatprep.subr.bf16.mxu1 %v4791_v4  ;;  %v4813_v23 = vld [vmem:[#allocation2 + $0xde8] sm:$0xff]  ;;  %v4815_v4 = vld [vmem:[#allocation2 + $0xdf8] sm:$0xff] }
 0xe21   :  { %6610 = vmatpush1.bf16.msra.mxu0 %v4788_v6  ;;  %7034 = vmatpush1.bf16.msra.mxu1 %v4790_v38 }
 0xe22   :  { %6611 = vmatprep.subr.bf16.mxu0 %v4797_v9  ;;  %7035 = vmatprep.subr.bf16.mxu1 %v4799_v39 }
 0xe23   :  { %v5999_v48 = vpop.f32.mrb[12].mxu0  ;;  %v6423_v34 = vpop.f32.mrb[24].mxu1 }
 0xe24   :  { %v10817_v55 = vadd.f32 %v5999_v48, %v13621_v50  ;;  %v10825_v60 = vadd.f32 %v6423_v34, %v13625_v42  ;;  %v6001_v16 = vpop.f32.mrb[13].mxu0  ;;  %v6425_v43 = vpop.f32.mrb[25].mxu1 }
 0xe25   :  { %v10818_v31 = vadd.f32 %v6001_v16, %v13628_v25  ;;  %v10826_v36 = vadd.f32 %v6425_v43, %v13632_v32  ;;  %v6003_v58 = vpop.f32.mrb[14].mxu0  ;;  %v6427_v26 = vpop.f32.mrb[26].mxu1  ;;  %6612 = vmatpush1.bf16.msra.mxu0 %v4796_v20  ;;  %7036 = vmatpush1.bf16.msra.mxu1 %v4798_v19  ;;  %v4814_v16 = vld [vmem:[#allocation2 + $0xdf0] sm:$0xff] }
 0xe26   :  { %v10819_v44 = vadd.f32 %v6003_v58, %v13621_v50  ;;  %v10827_v30 = vadd.f32 %v6427_v26, %v13625_v42  ;;  %v6005_v56 = vpop.f32.mrb[15].mxu0  ;;  %v6429_v18 = vpop.f32.mrb[27].mxu1  ;;  %6613 = vmatprep.subr.bf16.mxu0 %v4805_v47  ;;  %7037 = vmatprep.subr.bf16.mxu1 %v4807_v49  ;;  %v7290_v17 = vmax.f32 %v10817_v55, 0.0  ;;  %v7292_v6 = vmax.f32 %v10825_v60, 0.0  ;;  %v4812_v49 = vld [vmem:[#allocation2 + $0xde0] sm:$0xff] }
 0xe27   :  { %v10820_v7 = vadd.f32 %v6005_v56, %v13628_v25  ;;  %v10828_v3 = vadd.f32 %v6429_v18, %v13632_v32  ;;  %v7291_v39 = vmax.f32 %v10818_v31, 0.0  ;;  %v7293_v20 = vmax.f32 %v10826_v36, 0.0  ;;  %v4821_v31 = vld [vmem:[#allocation2 + $0xe28] sm:$0xff]  ;;  %v4823_v36 = vld [vmem:[#allocation2 + $0xe38] sm:$0xff] }
 0xe28   :  { %v7298_v38 = vmax.f32 %v10819_v44, 0.0  ;;  %v7300_v9 = vmax.f32 %v10827_v30, 0.0 }
 0xe29   :  { %v7299_v19 = vmax.f32 %v10820_v7, 0.0  ;;  %v7301_v48 = vmax.f32 %v10828_v3, 0.0  ;;  %6614 = vmatpush1.bf16.msra.mxu0 %v4804_v51  ;;  %7038 = vmatpush1.bf16.msra.mxu1 %v4806_v59 }
 0xe2a   :  { %v13642_v34 = vpack.c.bf16 %v7298_v38, %v7290_v17  ;;  %v13644_v47 = vpack.c.bf16 %v7300_v9, %v7292_v6  ;;  %6615 = vmatprep.subr.bf16.mxu0 %v4813_v23  ;;  %7039 = vmatprep.subr.bf16.mxu1 %v4815_v4  ;;  %v4820_v6 = vld [vmem:[#allocation2 + $0xe20] sm:$0xff]  ;;  %v4822_v38 = vld [vmem:[#allocation2 + $0xe30] sm:$0xff] }
 0xe2b   :  { %v13646_v43 = vpack.c.bf16 %v7299_v19, %v7291_v39  ;;  %v13648_v55 = vpack.c.bf16 %v7301_v48, %v7293_v20  ;;  %v6009_v60 = vpop.f32.mrb[16].mxu0  ;;  %v6433_v58 = vpop.f32.mrb[28].mxu1  ;;  %v4829_v20 = vld [vmem:[#allocation2 + $0xe68] sm:$0xff]  ;;  %v4831_v19 = vld [vmem:[#allocation2 + $0xe78] sm:$0xff] }
 0xe2c   :  { %v10821_v26 = vadd.f32 %v6009_v60, %v13621_v50  ;;  %v10829_v44 = vadd.f32 %v6433_v58, %v13625_v42  ;;  %v6011_v30 = vpop.f32.mrb[17].mxu0  ;;  %v6435_v56 = vpop.f32.mrb[29].mxu1 }
 0xe2d   :  { %v10822_v18 = vadd.f32 %v6011_v30, %v13628_v25  ;;  %v10830_v51 = vadd.f32 %v6435_v56, %v13632_v32  ;;  %v6013_v59 = vpop.f32.mrb[18].mxu0  ;;  %v6437_v7 = vpop.f32.mrb[30].mxu1  ;;  %6616 = vmatpush1.bf16.msra.mxu0 %v4812_v49  ;;  %7040 = vmatpush1.bf16.msra.mxu1 %v4814_v16 }
 0xe2e   :  { %v10823_v3 = vadd.f32 %v6013_v59, %v13621_v50  ;;  %v10831_v23 = vadd.f32 %v6437_v7, %v13625_v42  ;;  %v6015_v4 = vpop.f32.mrb[19].mxu0  ;;  %v6439_v17 = vpop.f32.mrb[31].mxu1  ;;  %6617 = vmatprep.subr.bf16.mxu0 %v4821_v31  ;;  %7041 = vmatprep.subr.bf16.mxu1 %v4823_v36  ;;  %v7306_v48 = vmax.f32 %v10821_v26, 0.0  ;;  %v7308_v60 = vmax.f32 %v10829_v44, 0.0  ;;  %v4837_v44 = vld [vmem:[#allocation2 + $0xea8] sm:$0xff]  ;;  %v4839_v59 = vld [vmem:[#allocation2 + $0xeb8] sm:$0xff] }
 0xe2f   :  { %v10824_v9 = vadd.f32 %v6015_v4, %v13628_v25  ;;  %v10832_v39 = vadd.f32 %v6439_v17, %v13632_v32  ;;  %v7307_v58 = vmax.f32 %v10822_v18, 0.0  ;;  %v7309_v50 = vmax.f32 %v10830_v51, 0.0  ;;  %v4828_v25 = vld [vmem:[#allocation2 + $0xe60] sm:$0xff]  ;;  %v4830_v32 = vld [vmem:[#allocation2 + $0xe70] sm:$0xff]  ;;  %v4845_v7 = vld [vmem:[#allocation2 + $0xee8] sm:$0xff] }
 0xe30   :  { %v7314_v49 = vmax.f32 %v10823_v3, 0.0  ;;  %v7316_v16 = vmax.f32 %v10831_v23, 0.0  ;;  %v4836_v18 = vld [vmem:[#allocation2 + $0xea0] sm:$0xff]  ;;  %v4838_v51 = vld [vmem:[#allocation2 + $0xeb0] sm:$0xff]  ;;  %v4847_v3 = vld [vmem:[#allocation2 + $0xef8] sm:$0xff] }
 0xe31   :  { %v7315_v30 = vmax.f32 %v10824_v9, 0.0  ;;  %v7317_v42 = vmax.f32 %v10832_v39, 0.0  ;;  %6618 = vmatpush1.bf16.msra.mxu0 %v4820_v6  ;;  %7042 = vmatpush1.bf16.msra.mxu1 %v4822_v38  ;;  %v4844_v23 = vld [vmem:[#allocation2 + $0xee0] sm:$0xff]  ;;  %v4846_v4 = vld [vmem:[#allocation2 + $0xef0] sm:$0xff]  ;;  %v4853_v17 = vld [vmem:[#allocation2 + $0xf28] sm:$0xff] }
 0xe32   :  { %v13658_v31 = vpack.c.bf16 %v7314_v49, %v7306_v48  ;;  %v13660_v36 = vpack.c.bf16 %v7316_v16, %v7308_v60  ;;  %6619 = vmatprep.subr.bf16.mxu0 %v4829_v20  ;;  %7043 = vmatprep.subr.bf16.mxu1 %v4831_v19  ;;  %v4855_v6 = vld [vmem:[#allocation2 + $0xf38] sm:$0xff]  ;;  %v4852_v38 = vld [vmem:[#allocation2 + $0xf20] sm:$0xff]  ;;  %v4854_v9 = vld [vmem:[#allocation2 + $0xf30] sm:$0xff] }
 0xe33   :  { %v13662_v56 = vpack.c.bf16 %v7315_v30, %v7307_v58  ;;  %v13664_v26 = vpack.c.bf16 %v7317_v42, %v7309_v50  ;;  %v4861_v39 = vld [vmem:[#allocation2 + $0xf68] sm:$0xff]  ;;  %v4863_v20 = vld [vmem:[#allocation2 + $0xf78] sm:$0xff]  ;;  %v4860_v19 = vld [vmem:[#allocation2 + $0xf60] sm:$0xff] }
 0xe34   :  { %v4862_v48 = vld [vmem:[#allocation2 + $0xf70] sm:$0xff]  ;;  %v4869_v60 = vld [vmem:[#allocation2 + $0xfa8] sm:$0xff]  ;;  %v4871_v49 = vld [vmem:[#allocation2 + $0xfb8] sm:$0xff] }
 0xe35   :  { %6620 = vmatpush1.bf16.msra.mxu0 %v4828_v25  ;;  %7044 = vmatpush1.bf16.msra.mxu1 %v4830_v32  ;;  %v4868_v16 = vld [vmem:[#allocation2 + $0xfa0] sm:$0xff]  ;;  %v4870_v58 = vld [vmem:[#allocation2 + $0xfb0] sm:$0xff]  ;;  %v4877_v50 = vld [vmem:[#allocation2 + $0xfe8] sm:$0xff] }
 0xe36   :  { %6621 = vmatprep.subr.bf16.mxu0 %v4837_v44  ;;  %7045 = vmatprep.subr.bf16.mxu1 %v4839_v59  ;;  %v4879_v30 = vld [vmem:[#allocation2 + $0xff8] sm:$0xff]  ;;  %v4876_v42 = vld [vmem:[#allocation2 + $0xfe0] sm:$0xff]  ;;  %v4878_v25 = vld [vmem:[#allocation2 + $0xff0] sm:$0xff] }
 0xe37   :  { %v4885_v32 = vld [vmem:[#allocation2 + $0x1028] sm:$0xff]  ;;  %v4887_v44 = vld [vmem:[#allocation2 + $0x1038] sm:$0xff]  ;;  %v4884_v59 = vld [vmem:[#allocation2 + $0x1020] sm:$0xff] }
 0xe39   :  { %6622 = vmatpush1.bf16.msra.mxu0 %v4836_v18  ;;  %7046 = vmatpush1.bf16.msra.mxu1 %v4838_v51  ;;  %v4886_v18 = vld [vmem:[#allocation2 + $0x1030] sm:$0xff]  ;;  %v4893_v51 = vld [vmem:[#allocation2 + $0x1068] sm:$0xff] }
 0xe3a   :  { %6623 = vmatprep.subr.bf16.mxu0 %v4845_v7  ;;  %7047 = vmatprep.subr.bf16.mxu1 %v4847_v3  ;;  %v4895_v7 = vld [vmem:[#allocation2 + $0x1078] sm:$0xff]  ;;  %v4892_v3 = vld [vmem:[#allocation2 + $0x1060] sm:$0xff] }
 0xe3d   :  { %6624 = vmatpush1.bf16.msra.mxu0 %v4844_v23  ;;  %7048 = vmatpush1.bf16.msra.mxu1 %v4846_v4  ;;  %v4894_v23 = vld [vmem:[#allocation2 + $0x1070] sm:$0xff]  ;;  %v4901_v4 = vld [vmem:[#allocation2 + $0x10a8] sm:$0xff] }
 0xe3e   :  { %6625 = vmatprep.subr.bf16.mxu0 %v4853_v17  ;;  %7049 = vmatprep.subr.bf16.mxu1 %v4855_v6  ;;  %v4903_v17 = vld [vmem:[#allocation2 + $0x10b8] sm:$0xff]  ;;  %v4900_v6 = vld [vmem:[#allocation2 + $0x10a0] sm:$0xff] }
 0xe41   :  { %6626 = vmatpush1.bf16.msra.mxu0 %v4852_v38  ;;  %7050 = vmatpush1.bf16.msra.mxu1 %v4854_v9  ;;  %v4902_v38 = vld [vmem:[#allocation2 + $0x10b0] sm:$0xff]  ;;  %v4909_v9 = vld [vmem:[#allocation2 + $0x10e8] sm:$0xff] }
 0xe42   :  { %6627 = vmatprep.subr.bf16.mxu0 %v4861_v39  ;;  %7051 = vmatprep.subr.bf16.mxu1 %v4863_v20  ;;  %v4908_v39 = vld [vmem:[#allocation2 + $0x10e0] sm:$0xff]  ;;  %v4910_v20 = vld [vmem:[#allocation2 + $0x10f0] sm:$0xff] }
 0xe45   :  { %6628 = vmatpush1.bf16.msra.mxu0 %v4860_v19  ;;  %7052 = vmatpush1.bf16.msra.mxu1 %v4862_v48  ;;  %v4917_v19 = vld [vmem:[#allocation2 + $0x1128] sm:$0xff]  ;;  %v4916_v48 = vld [vmem:[#allocation2 + $0x1120] sm:$0xff] }
 0xe46   :  { %6629 = vmatprep.subr.bf16.mxu0 %v4869_v60  ;;  %7053 = vmatprep.subr.bf16.mxu1 %v4871_v49  ;;  %v4918_v60 = vld [vmem:[#allocation2 + $0x1130] sm:$0xff]  ;;  %v4925_v49 = vld [vmem:[#allocation2 + $0x1168] sm:$0xff] }
 0xe49   :  { %6630 = vmatpush1.bf16.msra.mxu0 %v4868_v16  ;;  %7054 = vmatpush1.bf16.msra.mxu1 %v4870_v58  ;;  %v4924_v16 = vld [vmem:[#allocation2 + $0x1160] sm:$0xff]  ;;  %v4926_v58 = vld [vmem:[#allocation2 + $0x1170] sm:$0xff] }
 0xe4a   :  { %6631 = vmatprep.subr.bf16.mxu0 %v4877_v50  ;;  %7055 = vmatprep.subr.bf16.mxu1 %v4879_v30  ;;  %v4933_v50 = vld [vmem:[#allocation2 + $0x11a8] sm:$0xff]  ;;  %v4935_v30 = vld [vmem:[#allocation2 + $0x11b8] sm:$0xff] }
 0xe4d   :  { %6632 = vmatpush1.bf16.msra.mxu0 %v4876_v42  ;;  %7056 = vmatpush1.bf16.msra.mxu1 %v4878_v25  ;;  %v4934_v42 = vld [vmem:[#allocation2 + $0x11b0] sm:$0xff]  ;;  %v4941_v25 = vld [vmem:[#allocation2 + $0x11e8] sm:$0xff] }
 0xe4e   :  { %6654 = vmatprep.subr.bf16.mxu0 %v4885_v32  ;;  %7078 = vmatprep.subr.bf16.mxu1 %v4887_v44  ;;  %v4943_v32 = vld [vmem:[#allocation2 + $0x11f8] sm:$0xff]  ;;  %v4940_v44 = vld [vmem:[#allocation2 + $0x11e0] sm:$0xff] }
 0xe50   :  { %6634 = vmatmul.mubr.bf16.vlgmr.msra.gmra.mrb[20].mxu0 %v13468_v41  ;;  %7058 = vmatmul.mubr.bf16.vlgmr.msra.gmra.mrb[32].mxu1 %v13468_v41  ;;  %v4911_v41 = vld [vmem:[#allocation2 + $0x10f8] sm:$0xff] }
 0xe51   :  { %6655 = vmatpush1.bf16.msra.mxu0 %v4884_v59  ;;  %7079 = vmatpush1.bf16.msra.mxu1 %v4886_v18  ;;  %v4942_v59 = vld [vmem:[#allocation2 + $0x11f0] sm:$0xff]  ;;  %v4949_v18 = vld [vmem:[#allocation2 + $0x1228] sm:$0xff] }
 0xe52   :  { %6656 = vmatprep.subr.bf16.mxu0 %v4893_v51  ;;  %7080 = vmatprep.subr.bf16.mxu1 %v4895_v7  ;;  %v4951_v51 = vld [vmem:[#allocation2 + $0x1238] sm:$0xff]  ;;  %v4948_v7 = vld [vmem:[#allocation2 + $0x1220] sm:$0xff] }
 0xe53   :  { %6643 = vmatprep.mubr.bf16.mxu0 %v13472_v61  ;;  %7067 = vmatprep.mubr.bf16.mxu1 %v13472_v61  ;;  %v4919_v61 = vld [vmem:[#allocation2 + $0x1138] sm:$0xff] }
 0xe55   :  { %6657 = vmatpush1.bf16.msra.mxu0 %v4892_v3  ;;  %7081 = vmatpush1.bf16.msra.mxu1 %v4894_v23  ;;  %v4950_v3 = vld [vmem:[#allocation2 + $0x1230] sm:$0xff]  ;;  %v4957_v23 = vld [vmem:[#allocation2 + $0x1268] sm:$0xff] }
 0xe56   :  { %6658 = vmatprep.subr.bf16.mxu0 %v4901_v4  ;;  %7082 = vmatprep.subr.bf16.mxu1 %v4903_v17  ;;  %v4959_v4 = vld [vmem:[#allocation2 + $0x1278] sm:$0xff]  ;;  %v4956_v17 = vld [vmem:[#allocation2 + $0x1260] sm:$0xff] }
 0xe58   :  { %6644 = vmatmul.mubr.bf16.gmra.mrb[24].mxu0 %v13478_v5  ;;  %7068 = vmatmul.mubr.bf16.gmra.mrb[36].mxu1 %v13478_v5  ;;  %v4927_v5 = vld [vmem:[#allocation2 + $0x1178] sm:$0xff] }
 0xe59   :  { %6659 = vmatpush1.bf16.msra.mxu0 %v4900_v6  ;;  %7083 = vmatpush1.bf16.msra.mxu1 %v4902_v38  ;;  %v4958_v6 = vld [vmem:[#allocation2 + $0x1270] sm:$0xff]  ;;  %v4965_v38 = vld [vmem:[#allocation2 + $0x12a8] sm:$0xff] }
 0xe5a   :  { %6660 = vmatprep.subr.bf16.mxu0 %v4909_v9  ;;  %7084 = vmatprep.subr.bf16.mxu1 %v4911_v41  ;;  %v4967_v9 = vld [vmem:[#allocation2 + $0x12b8] sm:$0xff]  ;;  %v4964_v41 = vld [vmem:[#allocation2 + $0x12a0] sm:$0xff] }
 0xe5b   :  { %6686 = vmatprep.mubr.bf16.mxu0 %v13488_v21  ;;  %7110 = vmatprep.mubr.bf16.mxu1 %v13488_v21  ;;  %v4932_v21 = vld [vmem:[#allocation2 + $0x11a0] sm:$0xff] }
 0xe5d   :  { %6661 = vmatpush1.bf16.msra.mxu0 %v4908_v39  ;;  %7085 = vmatpush1.bf16.msra.mxu1 %v4910_v20  ;;  %v4966_v39 = vld [vmem:[#allocation2 + $0x12b0] sm:$0xff]  ;;  %v4973_v20 = vld [vmem:[#allocation2 + $0x12e8] sm:$0xff] }
 0xe5e   :  { %6662 = vmatprep.subr.bf16.mxu0 %v4917_v19  ;;  %7086 = vmatprep.subr.bf16.mxu1 %v4919_v61  ;;  %v4975_v19 = vld [vmem:[#allocation2 + $0x12f8] sm:$0xff]  ;;  %v4972_v61 = vld [vmem:[#allocation2 + $0x12e0] sm:$0xff] }
 0xe61   :  { %6663 = vmatpush1.bf16.msra.mxu0 %v4916_v48  ;;  %7087 = vmatpush1.bf16.msra.mxu1 %v4918_v60  ;;  %v4974_v48 = vld [vmem:[#allocation2 + $0x12f0] sm:$0xff]  ;;  %v4981_v60 = vld [vmem:[#allocation2 + $0x1328] sm:$0xff] }
 0xe62   :  { %6664 = vmatprep.subr.bf16.mxu0 %v4925_v49  ;;  %7088 = vmatprep.subr.bf16.mxu1 %v4927_v5  ;;  %v4983_v49 = vld [vmem:[#allocation2 + $0x1338] sm:$0xff]  ;;  %v4980_v5 = vld [vmem:[#allocation2 + $0x1320] sm:$0xff] }
 0xe65   :  { %6665 = vmatpush1.bf16.msra.mxu0 %v4924_v16  ;;  %7089 = vmatpush1.bf16.msra.mxu1 %v4926_v58  ;;  %v4982_v16 = vld [vmem:[#allocation2 + $0x1330] sm:$0xff]  ;;  %v4989_v58 = vld [vmem:[#allocation2 + $0x1368] sm:$0xff] }
 0xe66   :  { %6666 = vmatprep.subr.bf16.mxu0 %v4933_v50  ;;  %7090 = vmatprep.subr.bf16.mxu1 %v4935_v30  ;;  %v4991_v50 = vld [vmem:[#allocation2 + $0x1378] sm:$0xff]  ;;  %v4988_v30 = vld [vmem:[#allocation2 + $0x1360] sm:$0xff] }
 0xe69   :  { %6667 = vmatpush1.bf16.msra.mxu0 %v4932_v21  ;;  %7091 = vmatpush1.bf16.msra.mxu1 %v4934_v42  ;;  %v4990_v21 = vld [vmem:[#allocation2 + $0x1370] sm:$0xff]  ;;  %v4997_v42 = vld [vmem:[#allocation2 + $0x13a8] sm:$0xff] }
 0xe6a   :  { %6668 = vmatprep.subr.bf16.mxu0 %v4941_v25  ;;  %7092 = vmatprep.subr.bf16.mxu1 %v4943_v32  ;;  %v4999_v25 = vld [vmem:[#allocation2 + $0x13b8] sm:$0xff]  ;;  %v4996_v32 = vld [vmem:[#allocation2 + $0x13a0] sm:$0xff] }
 0xe6d   :  { %6669 = vmatpush1.bf16.msra.mxu0 %v4940_v44  ;;  %7093 = vmatpush1.bf16.msra.mxu1 %v4942_v59  ;;  %v4998_v44 = vld [vmem:[#allocation2 + $0x13b0] sm:$0xff]  ;;  %v5005_v59 = vld [vmem:[#allocation2 + $0x13e8] sm:$0xff] }
 0xe6e   :  { %6670 = vmatprep.subr.bf16.mxu0 %v4949_v18  ;;  %7094 = vmatprep.subr.bf16.mxu1 %v4951_v51  ;;  %v5007_v18 = vld [vmem:[#allocation2 + $0x13f8] sm:$0xff]  ;;  %v5004_v51 = vld [vmem:[#allocation2 + $0x13e0] sm:$0xff] }
 0xe71   :  { %6671 = vmatpush1.bf16.msra.mxu0 %v4948_v7  ;;  %7095 = vmatpush1.bf16.msra.mxu1 %v4950_v3  ;;  %v5006_v7 = vld [vmem:[#allocation2 + $0x13f0] sm:$0xff]  ;;  %v5013_v3 = vld [vmem:[#allocation2 + $0x1428] sm:$0xff] }
 0xe72   :  { %6672 = vmatprep.subr.bf16.mxu0 %v4957_v23  ;;  %7096 = vmatprep.subr.bf16.mxu1 %v4959_v4  ;;  %v5015_v23 = vld [vmem:[#allocation2 + $0x1438] sm:$0xff]  ;;  %v5012_v4 = vld [vmem:[#allocation2 + $0x1420] sm:$0xff] }
 0xe75   :  { %6673 = vmatpush1.bf16.msra.mxu0 %v4956_v17  ;;  %7097 = vmatpush1.bf16.msra.mxu1 %v4958_v6  ;;  %v5014_v17 = vld [vmem:[#allocation2 + $0x1430] sm:$0xff]  ;;  %v5021_v6 = vld [vmem:[#allocation2 + $0x1468] sm:$0xff] }
 0xe76   :  { %6674 = vmatprep.subr.bf16.mxu0 %v4965_v38  ;;  %7098 = vmatprep.subr.bf16.mxu1 %v4967_v9  ;;  %v5023_v38 = vld [vmem:[#allocation2 + $0x1478] sm:$0xff]  ;;  %v5020_v9 = vld [vmem:[#allocation2 + $0x1460] sm:$0xff] }
 0xe79   :  { %6675 = vmatpush1.bf16.msra.mxu0 %v4964_v41  ;;  %7099 = vmatpush1.bf16.msra.mxu1 %v4966_v39  ;;  %v5022_v41 = vld [vmem:[#allocation2 + $0x1470] sm:$0xff]  ;;  %v5029_v39 = vld [vmem:[#allocation2 + $0x14a8] sm:$0xff] }
 0xe7a   :  { %6676 = vmatprep.subr.bf16.mxu0 %v4973_v20  ;;  %7100 = vmatprep.subr.bf16.mxu1 %v4975_v19  ;;  %v5031_v20 = vld [vmem:[#allocation2 + $0x14b8] sm:$0xff]  ;;  %v5028_v19 = vld [vmem:[#allocation2 + $0x14a0] sm:$0xff] }
 0xe7d   :  { %6677 = vmatpush1.bf16.msra.mxu0 %v4972_v61  ;;  %7101 = vmatpush1.bf16.msra.mxu1 %v4974_v48  ;;  %v5030_v61 = vld [vmem:[#allocation2 + $0x14b0] sm:$0xff]  ;;  %v5037_v48 = vld [vmem:[#allocation2 + $0x14e8] sm:$0xff] }
 0xe7e   :  { %6678 = vmatprep.subr.bf16.mxu0 %v4981_v60  ;;  %7102 = vmatprep.subr.bf16.mxu1 %v4983_v49  ;;  %v5036_v60 = vld [vmem:[#allocation2 + $0x14e0] sm:$0xff]  ;;  %v5038_v49 = vld [vmem:[#allocation2 + $0x14f0] sm:$0xff] }
 0xe81   :  { %6679 = vmatpush1.bf16.msra.mxu0 %v4980_v5  ;;  %7103 = vmatpush1.bf16.msra.mxu1 %v4982_v16  ;;  %v5045_v5 = vld [vmem:[#allocation2 + $0x1528] sm:$0xff]  ;;  %v5044_v16 = vld [vmem:[#allocation2 + $0x1520] sm:$0xff] }
 0xe82   :  { %6680 = vmatprep.subr.bf16.mxu0 %v4989_v58  ;;  %7104 = vmatprep.subr.bf16.mxu1 %v4991_v50  ;;  %v5046_v58 = vld [vmem:[#allocation2 + $0x1530] sm:$0xff]  ;;  %v5053_v50 = vld [vmem:[#allocation2 + $0x1568] sm:$0xff] }
 0xe85   :  { %6681 = vmatpush1.bf16.msra.mxu0 %v4988_v30  ;;  %7105 = vmatpush1.bf16.msra.mxu1 %v4990_v21  ;;  %v5052_v30 = vld [vmem:[#allocation2 + $0x1560] sm:$0xff]  ;;  %v5054_v21 = vld [vmem:[#allocation2 + $0x1570] sm:$0xff] }
 0xe86   :  { %6682 = vmatprep.subr.bf16.mxu0 %v4997_v42  ;;  %7106 = vmatprep.subr.bf16.mxu1 %v4999_v25  ;;  %v5061_v42 = vld [vmem:[#allocation2 + $0x15a8] sm:$0xff]  ;;  %v5063_v25 = vld [vmem:[#allocation2 + $0x15b8] sm:$0xff] }
 0xe89   :  { %6683 = vmatpush1.bf16.msra.mxu0 %v4996_v32  ;;  %7107 = vmatpush1.bf16.msra.mxu1 %v4998_v44  ;;  %v5062_v32 = vld [vmem:[#allocation2 + $0x15b0] sm:$0xff]  ;;  %v5069_v44 = vld [vmem:[#allocation2 + $0x15e8] sm:$0xff] }
 0xe8a   :  { %6684 = vmatprep.subr.bf16.mxu0 %v5005_v59  ;;  %7108 = vmatprep.subr.bf16.mxu1 %v5007_v18  ;;  %v5071_v59 = vld [vmem:[#allocation2 + $0x15f8] sm:$0xff]  ;;  %v5068_v18 = vld [vmem:[#allocation2 + $0x15e0] sm:$0xff] }
 0xe8d   :  { %6685 = vmatpush1.bf16.msra.mxu0 %v5004_v51  ;;  %7109 = vmatpush1.bf16.msra.mxu1 %v5006_v7  ;;  %v5070_v51 = vld [vmem:[#allocation2 + $0x15f0] sm:$0xff]  ;;  %v5077_v7 = vld [vmem:[#allocation2 + $0x1628] sm:$0xff] }
 0xe8e   :  { %6707 = vmatprep.subr.bf16.mxu0 %v5013_v3  ;;  %7131 = vmatprep.subr.bf16.mxu1 %v5015_v23  ;;  %v5079_v3 = vld [vmem:[#allocation2 + $0x1638] sm:$0xff]  ;;  %v5076_v23 = vld [vmem:[#allocation2 + $0x1620] sm:$0xff] }
 0xe90   :  { %6687 = vmatmul.mubr.bf16.vlgmr.msra.gmra.mrb[20].mxu0 %v13496_v46  ;;  %7111 = vmatmul.mubr.bf16.vlgmr.msra.gmra.mrb[32].mxu1 %v13496_v46  ;;  %v5039_v46 = vld [vmem:[#allocation2 + $0x14f8] sm:$0xff] }
 0xe91   :  { %6708 = vmatpush1.bf16.msra.mxu0 %v5012_v4  ;;  %7132 = vmatpush1.bf16.msra.mxu1 %v5014_v17  ;;  %v5078_v4 = vld [vmem:[#allocation2 + $0x1630] sm:$0xff]  ;;  %v5085_v17 = vld [vmem:[#allocation2 + $0x1668] sm:$0xff] }
 0xe92   :  { %6709 = vmatprep.subr.bf16.mxu0 %v5021_v6  ;;  %7133 = vmatprep.subr.bf16.mxu1 %v5023_v38  ;;  %v5087_v6 = vld [vmem:[#allocation2 + $0x1678] sm:$0xff]  ;;  %v5084_v38 = vld [vmem:[#allocation2 + $0x1660] sm:$0xff] }
 0xe93   :  { %6696 = vmatprep.mubr.bf16.mxu0 %v13500_v8  ;;  %7120 = vmatprep.mubr.bf16.mxu1 %v13500_v8  ;;  %v5047_v8 = vld [vmem:[#allocation2 + $0x1538] sm:$0xff] }
 0xe95   :  { %6710 = vmatpush1.bf16.msra.mxu0 %v5020_v9  ;;  %7134 = vmatpush1.bf16.msra.mxu1 %v5022_v41  ;;  %v5086_v9 = vld [vmem:[#allocation2 + $0x1670] sm:$0xff]  ;;  %v5093_v41 = vld [vmem:[#allocation2 + $0x16a8] sm:$0xff] }
 0xe96   :  { %6711 = vmatprep.subr.bf16.mxu0 %v5029_v39  ;;  %7135 = vmatprep.subr.bf16.mxu1 %v5031_v20  ;;  %v5095_v39 = vld [vmem:[#allocation2 + $0x16b8] sm:$0xff]  ;;  %v5092_v20 = vld [vmem:[#allocation2 + $0x16a0] sm:$0xff] }
 0xe98   :  { %6697 = vmatmul.mubr.bf16.gmra.mrb[24].mxu0 %v13506_v27  ;;  %7121 = vmatmul.mubr.bf16.gmra.mrb[36].mxu1 %v13506_v27  ;;  %v5055_v27 = vld [vmem:[#allocation2 + $0x1578] sm:$0xff] }
 0xe99   :  { %6712 = vmatpush1.bf16.msra.mxu0 %v5028_v19  ;;  %7136 = vmatpush1.bf16.msra.mxu1 %v5030_v61  ;;  %v5094_v19 = vld [vmem:[#allocation2 + $0x16b0] sm:$0xff]  ;;  %v5101_v61 = vld [vmem:[#allocation2 + $0x16e8] sm:$0xff] }
 0xe9a   :  { %6713 = vmatprep.subr.bf16.mxu0 %v5037_v48  ;;  %7137 = vmatprep.subr.bf16.mxu1 %v5039_v46  ;;  %v5103_v48 = vld [vmem:[#allocation2 + $0x16f8] sm:$0xff]  ;;  %v5100_v46 = vld [vmem:[#allocation2 + $0x16e0] sm:$0xff] }
 0xe9b   :  { %6739 = vmatprep.mubr.bf16.mxu0 %v13516_v22  ;;  %7163 = vmatprep.mubr.bf16.mxu1 %v13516_v22  ;;  %v5060_v22 = vld [vmem:[#allocation2 + $0x15a0] sm:$0xff] }
 0xe9d   :  { %6714 = vmatpush1.bf16.msra.mxu0 %v5036_v60  ;;  %7138 = vmatpush1.bf16.msra.mxu1 %v5038_v49  ;;  %v5102_v60 = vld [vmem:[#allocation2 + $0x16f0] sm:$0xff]  ;;  %v5109_v49 = vld [vmem:[#allocation2 + $0x1728] sm:$0xff] }
 0xe9e   :  { %6715 = vmatprep.subr.bf16.mxu0 %v5045_v5  ;;  %7139 = vmatprep.subr.bf16.mxu1 %v5047_v8  ;;  %v5111_v5 = vld [vmem:[#allocation2 + $0x1738] sm:$0xff]  ;;  %v5108_v8 = vld [vmem:[#allocation2 + $0x1720] sm:$0xff] }
 0xea1   :  { %6716 = vmatpush1.bf16.msra.mxu0 %v5044_v16  ;;  %7140 = vmatpush1.bf16.msra.mxu1 %v5046_v58  ;;  %v5110_v16 = vld [vmem:[#allocation2 + $0x1730] sm:$0xff]  ;;  %v5117_v58 = vld [vmem:[#allocation2 + $0x1768] sm:$0xff] }
 0xea2   :  { %6717 = vmatprep.subr.bf16.mxu0 %v5053_v50  ;;  %7141 = vmatprep.subr.bf16.mxu1 %v5055_v27  ;;  %v5119_v50 = vld [vmem:[#allocation2 + $0x1778] sm:$0xff]  ;;  %v5116_v27 = vld [vmem:[#allocation2 + $0x1760] sm:$0xff] }
 0xea5   :  { %6718 = vmatpush1.bf16.msra.mxu0 %v5052_v30  ;;  %7142 = vmatpush1.bf16.msra.mxu1 %v5054_v21  ;;  %v5118_v30 = vld [vmem:[#allocation2 + $0x1770] sm:$0xff]  ;;  %v5125_v21 = vld [vmem:[#allocation2 + $0x17a8] sm:$0xff] }
 0xea6   :  { %6719 = vmatprep.subr.bf16.mxu0 %v5061_v42  ;;  %7143 = vmatprep.subr.bf16.mxu1 %v5063_v25  ;;  %v5127_v42 = vld [vmem:[#allocation2 + $0x17b8] sm:$0xff]  ;;  %v5124_v25 = vld [vmem:[#allocation2 + $0x17a0] sm:$0xff] }
 0xea9   :  { %6720 = vmatpush1.bf16.msra.mxu0 %v5060_v22  ;;  %7144 = vmatpush1.bf16.msra.mxu1 %v5062_v32  ;;  %v5126_v22 = vld [vmem:[#allocation2 + $0x17b0] sm:$0xff]  ;;  %v5133_v32 = vld [vmem:[#allocation2 + $0x17e8] sm:$0xff] }
 0xeaa   :  { %6721 = vmatprep.subr.bf16.mxu0 %v5069_v44  ;;  %7145 = vmatprep.subr.bf16.mxu1 %v5071_v59  ;;  %v5135_v44 = vld [vmem:[#allocation2 + $0x17f8] sm:$0xff]  ;;  %v5132_v59 = vld [vmem:[#allocation2 + $0x17e0] sm:$0xff] }
 0xead   :  { %6722 = vmatpush1.bf16.msra.mxu0 %v5068_v18  ;;  %7146 = vmatpush1.bf16.msra.mxu1 %v5070_v51  ;;  %v5134_v18 = vld [vmem:[#allocation2 + $0x17f0] sm:$0xff]  ;;  %v5141_v51 = vld [vmem:[#allocation2 + $0x1828] sm:$0xff] }
 0xeae   :  { %6723 = vmatprep.subr.bf16.mxu0 %v5077_v7  ;;  %7147 = vmatprep.subr.bf16.mxu1 %v5079_v3  ;;  %v5143_v7 = vld [vmem:[#allocation2 + $0x1838] sm:$0xff]  ;;  %v5140_v3 = vld [vmem:[#allocation2 + $0x1820] sm:$0xff] }
 0xeb1   :  { %6724 = vmatpush1.bf16.msra.mxu0 %v5076_v23  ;;  %7148 = vmatpush1.bf16.msra.mxu1 %v5078_v4  ;;  %v5142_v23 = vld [vmem:[#allocation2 + $0x1830] sm:$0xff]  ;;  %v5149_v4 = vld [vmem:[#allocation2 + $0x1868] sm:$0xff] }
 0xeb2   :  { %6725 = vmatprep.subr.bf16.mxu0 %v5085_v17  ;;  %7149 = vmatprep.subr.bf16.mxu1 %v5087_v6  ;;  %v5151_v17 = vld [vmem:[#allocation2 + $0x1878] sm:$0xff]  ;;  %v5148_v6 = vld [vmem:[#allocation2 + $0x1860] sm:$0xff] }
 0xeb5   :  { %6726 = vmatpush1.bf16.msra.mxu0 %v5084_v38  ;;  %7150 = vmatpush1.bf16.msra.mxu1 %v5086_v9  ;;  %v5150_v38 = vld [vmem:[#allocation2 + $0x1870] sm:$0xff]  ;;  %v5157_v9 = vld [vmem:[#allocation2 + $0x18a8] sm:$0xff] }
 0xeb6   :  { %6727 = vmatprep.subr.bf16.mxu0 %v5093_v41  ;;  %7151 = vmatprep.subr.bf16.mxu1 %v5095_v39  ;;  %v5159_v41 = vld [vmem:[#allocation2 + $0x18b8] sm:$0xff]  ;;  %v5156_v39 = vld [vmem:[#allocation2 + $0x18a0] sm:$0xff] }
 0xeb9   :  { %6728 = vmatpush1.bf16.msra.mxu0 %v5092_v20  ;;  %7152 = vmatpush1.bf16.msra.mxu1 %v5094_v19  ;;  %v5158_v20 = vld [vmem:[#allocation2 + $0x18b0] sm:$0xff]  ;;  %v5165_v19 = vld [vmem:[#allocation2 + $0x18e8] sm:$0xff] }
 0xeba   :  { %6729 = vmatprep.subr.bf16.mxu0 %v5101_v61  ;;  %7153 = vmatprep.subr.bf16.mxu1 %v5103_v48  ;;  %v5164_v61 = vld [vmem:[#allocation2 + $0x18e0] sm:$0xff]  ;;  %v5166_v48 = vld [vmem:[#allocation2 + $0x18f0] sm:$0xff] }
 0xebd   :  { %6730 = vmatpush1.bf16.msra.mxu0 %v5100_v46  ;;  %7154 = vmatpush1.bf16.msra.mxu1 %v5102_v60  ;;  %v5173_v46 = vld [vmem:[#allocation2 + $0x1928] sm:$0xff]  ;;  %v5172_v60 = vld [vmem:[#allocation2 + $0x1920] sm:$0xff] }
 0xebe   :  { %6731 = vmatprep.subr.bf16.mxu0 %v5109_v49  ;;  %7155 = vmatprep.subr.bf16.mxu1 %v5111_v5  ;;  %v5174_v49 = vld [vmem:[#allocation2 + $0x1930] sm:$0xff]  ;;  %v5181_v5 = vld [vmem:[#allocation2 + $0x1968] sm:$0xff] }
 0xec1   :  { %6732 = vmatpush1.bf16.msra.mxu0 %v5108_v8  ;;  %7156 = vmatpush1.bf16.msra.mxu1 %v5110_v16  ;;  %v5180_v8 = vld [vmem:[#allocation2 + $0x1960] sm:$0xff]  ;;  %v5182_v16 = vld [vmem:[#allocation2 + $0x1970] sm:$0xff] }
 0xec2   :  { %6733 = vmatprep.subr.bf16.mxu0 %v5117_v58  ;;  %7157 = vmatprep.subr.bf16.mxu1 %v5119_v50  ;;  %v5189_v58 = vld [vmem:[#allocation2 + $0x19a8] sm:$0xff]  ;;  %v5191_v50 = vld [vmem:[#allocation2 + $0x19b8] sm:$0xff] }
 0xec5   :  { %6734 = vmatpush1.bf16.msra.mxu0 %v5116_v27  ;;  %7158 = vmatpush1.bf16.msra.mxu1 %v5118_v30  ;;  %v5190_v27 = vld [vmem:[#allocation2 + $0x19b0] sm:$0xff]  ;;  %v5197_v30 = vld [vmem:[#allocation2 + $0x19e8] sm:$0xff] }
 0xec6   :  { %6735 = vmatprep.subr.bf16.mxu0 %v5125_v21  ;;  %7159 = vmatprep.subr.bf16.mxu1 %v5127_v42  ;;  %v5199_v21 = vld [vmem:[#allocation2 + $0x19f8] sm:$0xff]  ;;  %v5196_v42 = vld [vmem:[#allocation2 + $0x19e0] sm:$0xff] }
 0xec9   :  { %6736 = vmatpush1.bf16.msra.mxu0 %v5124_v25  ;;  %7160 = vmatpush1.bf16.msra.mxu1 %v5126_v22  ;;  %v5198_v25 = vld [vmem:[#allocation2 + $0x19f0] sm:$0xff]  ;;  %v5205_v22 = vld [vmem:[#allocation2 + $0x1a28] sm:$0xff] }
 0xeca   :  { %6737 = vmatprep.subr.bf16.mxu0 %v5133_v32  ;;  %7161 = vmatprep.subr.bf16.mxu1 %v5135_v44  ;;  %v5207_v32 = vld [vmem:[#allocation2 + $0x1a38] sm:$0xff]  ;;  %v5204_v44 = vld [vmem:[#allocation2 + $0x1a20] sm:$0xff] }
 0xecd   :  { %6738 = vmatpush1.bf16.msra.mxu0 %v5132_v59  ;;  %7162 = vmatpush1.bf16.msra.mxu1 %v5134_v18  ;;  %v5206_v59 = vld [vmem:[#allocation2 + $0x1a30] sm:$0xff]  ;;  %v5213_v18 = vld [vmem:[#allocation2 + $0x1a68] sm:$0xff] }
 0xece   :  { %6760 = vmatprep.subr.bf16.mxu0 %v5141_v51  ;;  %7184 = vmatprep.subr.bf16.mxu1 %v5143_v7  ;;  %v5215_v51 = vld [vmem:[#allocation2 + $0x1a78] sm:$0xff]  ;;  %v5212_v7 = vld [vmem:[#allocation2 + $0x1a60] sm:$0xff] }
 0xed0   :  { %6740 = vmatmul.mubr.bf16.vlgmr.msra.gmra.mrb[20].mxu0 %v13524_v33  ;;  %7164 = vmatmul.mubr.bf16.vlgmr.msra.gmra.mrb[32].mxu1 %v13524_v33  ;;  %v5167_v33 = vld [vmem:[#allocation2 + $0x18f8] sm:$0xff] }
 0xed1   :  { %6761 = vmatpush1.bf16.msra.mxu0 %v5140_v3  ;;  %7185 = vmatpush1.bf16.msra.mxu1 %v5142_v23  ;;  %v5214_v3 = vld [vmem:[#allocation2 + $0x1a70] sm:$0xff]  ;;  %v5221_v23 = vld [vmem:[#allocation2 + $0x1aa8] sm:$0xff] }
 0xed2   :  { %6762 = vmatprep.subr.bf16.mxu0 %v5149_v4  ;;  %7186 = vmatprep.subr.bf16.mxu1 %v5151_v17  ;;  %v5223_v4 = vld [vmem:[#allocation2 + $0x1ab8] sm:$0xff]  ;;  %v5220_v17 = vld [vmem:[#allocation2 + $0x1aa0] sm:$0xff] }
 0xed3   :  { %6749 = vmatprep.mubr.bf16.mxu0 %v13528_v37  ;;  %7173 = vmatprep.mubr.bf16.mxu1 %v13528_v37  ;;  %v5175_v37 = vld [vmem:[#allocation2 + $0x1938] sm:$0xff] }
 0xed5   :  { %6763 = vmatpush1.bf16.msra.mxu0 %v5148_v6  ;;  %7187 = vmatpush1.bf16.msra.mxu1 %v5150_v38  ;;  %v5222_v6 = vld [vmem:[#allocation2 + $0x1ab0] sm:$0xff]  ;;  %v5229_v38 = vld [vmem:[#allocation2 + $0x1ae8] sm:$0xff] }
 0xed6   :  { %6764 = vmatprep.subr.bf16.mxu0 %v5157_v9  ;;  %7188 = vmatprep.subr.bf16.mxu1 %v5159_v41  ;;  %v5231_v9 = vld [vmem:[#allocation2 + $0x1af8] sm:$0xff]  ;;  %v5228_v41 = vld [vmem:[#allocation2 + $0x1ae0] sm:$0xff] }
 0xed8   :  { %6750 = vmatmul.mubr.bf16.gmra.mrb[24].mxu0 %v13534_v40  ;;  %7174 = vmatmul.mubr.bf16.gmra.mrb[36].mxu1 %v13534_v40  ;;  %v5183_v40 = vld [vmem:[#allocation2 + $0x1978] sm:$0xff] }
 0xed9   :  { %6765 = vmatpush1.bf16.msra.mxu0 %v5156_v39  ;;  %7189 = vmatpush1.bf16.msra.mxu1 %v5158_v20  ;;  %v5230_v39 = vld [vmem:[#allocation2 + $0x1af0] sm:$0xff]  ;;  %v5237_v20 = vld [vmem:[#allocation2 + $0x1b28] sm:$0xff] }
 0xeda   :  { %6766 = vmatprep.subr.bf16.mxu0 %v5165_v19  ;;  %7190 = vmatprep.subr.bf16.mxu1 %v5167_v33  ;;  %v5239_v19 = vld [vmem:[#allocation2 + $0x1b38] sm:$0xff]  ;;  %v5236_v33 = vld [vmem:[#allocation2 + $0x1b20] sm:$0xff] }
 0xedb   :  { %6792 = vmatprep.mubr.bf16.mxu0 %v13544_v13  ;;  %7216 = vmatprep.mubr.bf16.mxu1 %v13544_v13  ;;  %v5188_v13 = vld [vmem:[#allocation2 + $0x19a0] sm:$0xff] }
 0xedd   :  { %6767 = vmatpush1.bf16.msra.mxu0 %v5164_v61  ;;  %7191 = vmatpush1.bf16.msra.mxu1 %v5166_v48  ;;  %v5238_v61 = vld [vmem:[#allocation2 + $0x1b30] sm:$0xff]  ;;  %v5245_v48 = vld [vmem:[#allocation2 + $0x1b68] sm:$0xff] }
 0xede   :  { %6768 = vmatprep.subr.bf16.mxu0 %v5173_v46  ;;  %7192 = vmatprep.subr.bf16.mxu1 %v5175_v37  ;;  %v5247_v46 = vld [vmem:[#allocation2 + $0x1b78] sm:$0xff]  ;;  %v5244_v37 = vld [vmem:[#allocation2 + $0x1b60] sm:$0xff] }
 0xee1   :  { %6769 = vmatpush1.bf16.msra.mxu0 %v5172_v60  ;;  %7193 = vmatpush1.bf16.msra.mxu1 %v5174_v49  ;;  %v5246_v60 = vld [vmem:[#allocation2 + $0x1b70] sm:$0xff]  ;;  %v5253_v49 = vld [vmem:[#allocation2 + $0x1ba8] sm:$0xff] }
 0xee2   :  { %6770 = vmatprep.subr.bf16.mxu0 %v5181_v5  ;;  %7194 = vmatprep.subr.bf16.mxu1 %v5183_v40  ;;  %v5255_v5 = vld [vmem:[#allocation2 + $0x1bb8] sm:$0xff]  ;;  %v5252_v40 = vld [vmem:[#allocation2 + $0x1ba0] sm:$0xff] }
 0xee5   :  { %6771 = vmatpush1.bf16.msra.mxu0 %v5180_v8  ;;  %7195 = vmatpush1.bf16.msra.mxu1 %v5182_v16  ;;  %v5254_v8 = vld [vmem:[#allocation2 + $0x1bb0] sm:$0xff]  ;;  %v5261_v16 = vld [vmem:[#allocation2 + $0x1be8] sm:$0xff] }
 0xee6   :  { %6772 = vmatprep.subr.bf16.mxu0 %v5189_v58  ;;  %7196 = vmatprep.subr.bf16.mxu1 %v5191_v50  ;;  %v5263_v58 = vld [vmem:[#allocation2 + $0x1bf8] sm:$0xff]  ;;  %v5260_v50 = vld [vmem:[#allocation2 + $0x1be0] sm:$0xff] }
 0xee9   :  { %6773 = vmatpush1.bf16.msra.mxu0 %v5188_v13  ;;  %7197 = vmatpush1.bf16.msra.mxu1 %v5190_v27  ;;  %v5262_v13 = vld [vmem:[#allocation2 + $0x1bf0] sm:$0xff]  ;;  %v5269_v27 = vld [vmem:[#allocation2 + $0x1c28] sm:$0xff] }
 0xeea   :  { %6774 = vmatprep.subr.bf16.mxu0 %v5197_v30  ;;  %7198 = vmatprep.subr.bf16.mxu1 %v5199_v21  ;;  %v5271_v30 = vld [vmem:[#allocation2 + $0x1c38] sm:$0xff]  ;;  %v5268_v21 = vld [vmem:[#allocation2 + $0x1c20] sm:$0xff] }
 0xeed   :  { %6775 = vmatpush1.bf16.msra.mxu0 %v5196_v42  ;;  %7199 = vmatpush1.bf16.msra.mxu1 %v5198_v25  ;;  %v5270_v42 = vld [vmem:[#allocation2 + $0x1c30] sm:$0xff]  ;;  %v5277_v25 = vld [vmem:[#allocation2 + $0x1c68] sm:$0xff] }
 0xeee   :  { %6776 = vmatprep.subr.bf16.mxu0 %v5205_v22  ;;  %7200 = vmatprep.subr.bf16.mxu1 %v5207_v32  ;;  %v5279_v22 = vld [vmem:[#allocation2 + $0x1c78] sm:$0xff]  ;;  %v5276_v32 = vld [vmem:[#allocation2 + $0x1c60] sm:$0xff] }
 0xef1   :  { %6777 = vmatpush1.bf16.msra.mxu0 %v5204_v44  ;;  %7201 = vmatpush1.bf16.msra.mxu1 %v5206_v59  ;;  %v5278_v44 = vld [vmem:[#allocation2 + $0x1c70] sm:$0xff]  ;;  %v5285_v59 = vld [vmem:[#allocation2 + $0x1ca8] sm:$0xff] }
 0xef2   :  { %6778 = vmatprep.subr.bf16.mxu0 %v5213_v18  ;;  %7202 = vmatprep.subr.bf16.mxu1 %v5215_v51  ;;  %v5287_v18 = vld [vmem:[#allocation2 + $0x1cb8] sm:$0xff]  ;;  %v5284_v51 = vld [vmem:[#allocation2 + $0x1ca0] sm:$0xff] }
 0xef5   :  { %6779 = vmatpush1.bf16.msra.mxu0 %v5212_v7  ;;  %7203 = vmatpush1.bf16.msra.mxu1 %v5214_v3  ;;  %v5286_v7 = vld [vmem:[#allocation2 + $0x1cb0] sm:$0xff]  ;;  %v5293_v3 = vld [vmem:[#allocation2 + $0x1ce8] sm:$0xff] }
 0xef6   :  { %6780 = vmatprep.subr.bf16.mxu0 %v5221_v23  ;;  %7204 = vmatprep.subr.bf16.mxu1 %v5223_v4  ;;  %v5292_v23 = vld [vmem:[#allocation2 + $0x1ce0] sm:$0xff]  ;;  %v5294_v4 = vld [vmem:[#allocation2 + $0x1cf0] sm:$0xff] }
 0xef9   :  { %6781 = vmatpush1.bf16.msra.mxu0 %v5220_v17  ;;  %7205 = vmatpush1.bf16.msra.mxu1 %v5222_v6  ;;  %v5301_v17 = vld [vmem:[#allocation2 + $0x1d28] sm:$0xff]  ;;  %v5300_v6 = vld [vmem:[#allocation2 + $0x1d20] sm:$0xff] }
 0xefa   :  { %6782 = vmatprep.subr.bf16.mxu0 %v5229_v38  ;;  %7206 = vmatprep.subr.bf16.mxu1 %v5231_v9  ;;  %v5302_v38 = vld [vmem:[#allocation2 + $0x1d30] sm:$0xff]  ;;  %v5309_v9 = vld [vmem:[#allocation2 + $0x1d68] sm:$0xff] }
 0xefd   :  { %6783 = vmatpush1.bf16.msra.mxu0 %v5228_v41  ;;  %7207 = vmatpush1.bf16.msra.mxu1 %v5230_v39  ;;  %v5308_v41 = vld [vmem:[#allocation2 + $0x1d60] sm:$0xff]  ;;  %v5310_v39 = vld [vmem:[#allocation2 + $0x1d70] sm:$0xff] }
 0xefe   :  { %6784 = vmatprep.subr.bf16.mxu0 %v5237_v20  ;;  %7208 = vmatprep.subr.bf16.mxu1 %v5239_v19  ;;  %v5317_v20 = vld [vmem:[#allocation2 + $0x1da8] sm:$0xff]  ;;  %v5319_v19 = vld [vmem:[#allocation2 + $0x1db8] sm:$0xff] }
 0xf01   :  { %6785 = vmatpush1.bf16.msra.mxu0 %v5236_v33  ;;  %7209 = vmatpush1.bf16.msra.mxu1 %v5238_v61  ;;  %v5318_v33 = vld [vmem:[#allocation2 + $0x1db0] sm:$0xff]  ;;  %v5325_v61 = vld [vmem:[#allocation2 + $0x1de8] sm:$0xff] }
 0xf02   :  { %6786 = vmatprep.subr.bf16.mxu0 %v5245_v48  ;;  %7210 = vmatprep.subr.bf16.mxu1 %v5247_v46  ;;  %v5327_v48 = vld [vmem:[#allocation2 + $0x1df8] sm:$0xff]  ;;  %v5324_v46 = vld [vmem:[#allocation2 + $0x1de0] sm:$0xff] }
 0xf05   :  { %6787 = vmatpush1.bf16.msra.mxu0 %v5244_v37  ;;  %7211 = vmatpush1.bf16.msra.mxu1 %v5246_v60  ;;  %v5326_v37 = vld [vmem:[#allocation2 + $0x1df0] sm:$0xff]  ;;  %v5333_v60 = vld [vmem:[#allocation2 + $0x1e28] sm:$0xff] }
 0xf06   :  { %6788 = vmatprep.subr.bf16.mxu0 %v5253_v49  ;;  %7212 = vmatprep.subr.bf16.mxu1 %v5255_v5  ;;  %v5335_v49 = vld [vmem:[#allocation2 + $0x1e38] sm:$0xff]  ;;  %v5332_v5 = vld [vmem:[#allocation2 + $0x1e20] sm:$0xff] }
 0xf09   :  { %6789 = vmatpush1.bf16.msra.mxu0 %v5252_v40  ;;  %7213 = vmatpush1.bf16.msra.mxu1 %v5254_v8  ;;  %v5334_v40 = vld [vmem:[#allocation2 + $0x1e30] sm:$0xff]  ;;  %v5341_v8 = vld [vmem:[#allocation2 + $0x1e68] sm:$0xff] }
 0xf0a   :  { %6790 = vmatprep.subr.bf16.mxu0 %v5261_v16  ;;  %7214 = vmatprep.subr.bf16.mxu1 %v5263_v58  ;;  %v5343_v16 = vld [vmem:[#allocation2 + $0x1e78] sm:$0xff]  ;;  %v5340_v58 = vld [vmem:[#allocation2 + $0x1e60] sm:$0xff] }
 0xf0d   :  { %6791 = vmatpush1.bf16.msra.mxu0 %v5260_v50  ;;  %7215 = vmatpush1.bf16.msra.mxu1 %v5262_v13  ;;  %v5342_v50 = vld [vmem:[#allocation2 + $0x1e70] sm:$0xff]  ;;  %v5349_v13 = vld [vmem:[#allocation2 + $0x1ea8] sm:$0xff] }
 0xf0e   :  { %6813 = vmatprep.subr.bf16.mxu0 %v5269_v27  ;;  %7237 = vmatprep.subr.bf16.mxu1 %v5271_v30  ;;  %v5351_v27 = vld [vmem:[#allocation2 + $0x1eb8] sm:$0xff]  ;;  %v5348_v30 = vld [vmem:[#allocation2 + $0x1ea0] sm:$0xff] }
 0xf10   :  { %6793 = vmatmul.mubr.bf16.vlgmr.msra.gmra.mrb[20].mxu0 %v13552_v24  ;;  %7217 = vmatmul.mubr.bf16.vlgmr.msra.gmra.mrb[32].mxu1 %v13552_v24  ;;  %v5295_v24 = vld [vmem:[#allocation2 + $0x1cf8] sm:$0xff] }
 0xf11   :  { %6814 = vmatpush1.bf16.msra.mxu0 %v5268_v21  ;;  %7238 = vmatpush1.bf16.msra.mxu1 %v5270_v42  ;;  %v5350_v21 = vld [vmem:[#allocation2 + $0x1eb0] sm:$0xff]  ;;  %v5357_v42 = vld [vmem:[#allocation2 + $0x1ee8] sm:$0xff] }
 0xf12   :  { %6815 = vmatprep.subr.bf16.mxu0 %v5277_v25  ;;  %7239 = vmatprep.subr.bf16.mxu1 %v5279_v22  ;;  %v5359_v25 = vld [vmem:[#allocation2 + $0x1ef8] sm:$0xff]  ;;  %v5356_v22 = vld [vmem:[#allocation2 + $0x1ee0] sm:$0xff] }
 0xf13   :  { %6802 = vmatprep.mubr.bf16.mxu0 %v13556_v35  ;;  %7226 = vmatprep.mubr.bf16.mxu1 %v13556_v35  ;;  %v5303_v35 = vld [vmem:[#allocation2 + $0x1d38] sm:$0xff] }
 0xf15   :  { %6816 = vmatpush1.bf16.msra.mxu0 %v5276_v32  ;;  %7240 = vmatpush1.bf16.msra.mxu1 %v5278_v44  ;;  %v5358_v32 = vld [vmem:[#allocation2 + $0x1ef0] sm:$0xff]  ;;  %v5365_v44 = vld [vmem:[#allocation2 + $0x1f28] sm:$0xff] }
 0xf16   :  { %6817 = vmatprep.subr.bf16.mxu0 %v5285_v59  ;;  %7241 = vmatprep.subr.bf16.mxu1 %v5287_v18  ;;  %v5367_v59 = vld [vmem:[#allocation2 + $0x1f38] sm:$0xff]  ;;  %v5364_v18 = vld [vmem:[#allocation2 + $0x1f20] sm:$0xff] }
 0xf18   :  { %6803 = vmatmul.mubr.bf16.gmra.mrb[24].mxu0 %v13562_v45  ;;  %7227 = vmatmul.mubr.bf16.gmra.mrb[36].mxu1 %v13562_v45  ;;  %v5311_v45 = vld [vmem:[#allocation2 + $0x1d78] sm:$0xff] }
 0xf19   :  { %6818 = vmatpush1.bf16.msra.mxu0 %v5284_v51  ;;  %7242 = vmatpush1.bf16.msra.mxu1 %v5286_v7  ;;  %v5366_v51 = vld [vmem:[#allocation2 + $0x1f30] sm:$0xff]  ;;  %v5373_v7 = vld [vmem:[#allocation2 + $0x1f68] sm:$0xff] }
 0xf1a   :  { %6819 = vmatprep.subr.bf16.mxu0 %v5293_v3  ;;  %7243 = vmatprep.subr.bf16.mxu1 %v5295_v24  ;;  %v5375_v3 = vld [vmem:[#allocation2 + $0x1f78] sm:$0xff]  ;;  %v5372_v24 = vld [vmem:[#allocation2 + $0x1f60] sm:$0xff] }
 0xf1b   :  { %6845 = vmatprep.mubr.bf16.mxu0 %v13572_v2  ;;  %7269 = vmatprep.mubr.bf16.mxu1 %v13572_v2  ;;  %v5316_v2 = vld [vmem:[#allocation2 + $0x1da0] sm:$0xff] }
 0xf1d   :  { %6820 = vmatpush1.bf16.msra.mxu0 %v5292_v23  ;;  %7244 = vmatpush1.bf16.msra.mxu1 %v5294_v4  ;;  %v5374_v23 = vld [vmem:[#allocation2 + $0x1f70] sm:$0xff]  ;;  %v5381_v4 = vld [vmem:[#allocation2 + $0x1fa8] sm:$0xff] }
 0xf1e   :  { %6821 = vmatprep.subr.bf16.mxu0 %v5301_v17  ;;  %7245 = vmatprep.subr.bf16.mxu1 %v5303_v35  ;;  %v5383_v17 = vld [vmem:[#allocation2 + $0x1fb8] sm:$0xff]  ;;  %v5380_v35 = vld [vmem:[#allocation2 + $0x1fa0] sm:$0xff] }
 0xf21   :  { %6822 = vmatpush1.bf16.msra.mxu0 %v5300_v6  ;;  %7246 = vmatpush1.bf16.msra.mxu1 %v5302_v38  ;;  %v5382_v6 = vld [vmem:[#allocation2 + $0x1fb0] sm:$0xff]  ;;  %v5389_v38 = vld [vmem:[#allocation2 + $0x1fe8] sm:$0xff] }
 0xf22   :  { %6823 = vmatprep.subr.bf16.mxu0 %v5309_v9  ;;  %7247 = vmatprep.subr.bf16.mxu1 %v5311_v45  ;;  %v5391_v9 = vld [vmem:[#allocation2 + $0x1ff8] sm:$0xff]  ;;  %v5388_v45 = vld [vmem:[#allocation2 + $0x1fe0] sm:$0xff] }
 0xf25   :  { %6824 = vmatpush1.bf16.msra.mxu0 %v5308_v41  ;;  %7248 = vmatpush1.bf16.msra.mxu1 %v5310_v39  ;;  %v5390_v41 = vld [vmem:[#allocation2 + $0x1ff0] sm:$0xff]  ;;  %v7339_v39 = vld [vmem:[#allocation3 + $0x8] sm:$0xff] }
 0xf26   :  { %6825 = vmatprep.subr.bf16.mxu0 %v5317_v20  ;;  %7249 = vmatprep.subr.bf16.mxu1 %v5319_v19  ;;  %v7338_v20 = vld [vmem:[#allocation3] sm:$0xff]  ;;  %v7341_v19 = vld [vmem:[#allocation3 + $0x18] sm:$0xff] }
 0xf29   :  { %6826 = vmatpush1.bf16.msra.mxu0 %v5316_v2  ;;  %7250 = vmatpush1.bf16.msra.mxu1 %v5318_v33  ;;  %v7340_v2 = vld [vmem:[#allocation3 + $0x10] sm:$0xff]  ;;  %v7343_v33 = vld [vmem:[#allocation3 + $0x28] sm:$0xff] }
 0xf2a   :  { %6827 = vmatprep.subr.bf16.mxu0 %v5325_v61  ;;  %7251 = vmatprep.subr.bf16.mxu1 %v5327_v48  ;;  %v7342_v61 = vld [vmem:[#allocation3 + $0x20] sm:$0xff]  ;;  %v7345_v48 = vld [vmem:[#allocation3 + $0x38] sm:$0xff] }
 0xf2d   :  { %6828 = vmatpush1.bf16.msra.mxu0 %v5324_v46  ;;  %7252 = vmatpush1.bf16.msra.mxu1 %v5326_v37  ;;  %v7347_v46 = vld [vmem:[#allocation3 + $0x48] sm:$0xff]  ;;  %v7349_v37 = vld [vmem:[#allocation3 + $0x58] sm:$0xff] }
 0xf2e   :  { %6829 = vmatprep.subr.bf16.mxu0 %v5333_v60  ;;  %7253 = vmatprep.subr.bf16.mxu1 %v5335_v49  ;;  %v7348_v60 = vld [vmem:[#allocation3 + $0x50] sm:$0xff]  ;;  %v7351_v49 = vld [vmem:[#allocation3 + $0x68] sm:$0xff] }
 0xf31   :  { %6830 = vmatpush1.bf16.msra.mxu0 %v5332_v5  ;;  %7254 = vmatpush1.bf16.msra.mxu1 %v5334_v40  ;;  %v7350_v5 = vld [vmem:[#allocation3 + $0x60] sm:$0xff]  ;;  %v7355_v40 = vld [vmem:[#allocation3 + $0x88] sm:$0xff] }
 0xf32   :  { %6831 = vmatprep.subr.bf16.mxu0 %v5341_v8  ;;  %7255 = vmatprep.subr.bf16.mxu1 %v5343_v16  ;;  %v7354_v8 = vld [vmem:[#allocation3 + $0x80] sm:$0xff]  ;;  %v7357_v16 = vld [vmem:[#allocation3 + $0x98] sm:$0xff] }
 0xf35   :  { %6832 = vmatpush1.bf16.msra.mxu0 %v5340_v58  ;;  %7256 = vmatpush1.bf16.msra.mxu1 %v5342_v50  ;;  %v7356_v58 = vld [vmem:[#allocation3 + $0x90] sm:$0xff]  ;;  %v7359_v50 = vld [vmem:[#allocation3 + $0xa8] sm:$0xff] }
 0xf36   :  { %6833 = vmatprep.subr.bf16.mxu0 %v5349_v13  ;;  %7257 = vmatprep.subr.bf16.mxu1 %v5351_v27  ;;  %v7358_v13 = vld [vmem:[#allocation3 + $0xa0] sm:$0xff]  ;;  %v7361_v27 = vld [vmem:[#allocation3 + $0xb8] sm:$0xff] }
 0xf39   :  { %6834 = vmatpush1.bf16.msra.mxu0 %v5348_v30  ;;  %7258 = vmatpush1.bf16.msra.mxu1 %v5350_v21  ;;  %v7360_v30 = vld [vmem:[#allocation3 + $0xb0] sm:$0xff]  ;;  %v7363_v21 = vld [vmem:[#allocation3 + $0xc8] sm:$0xff] }
 0xf3a   :  { %6835 = vmatprep.subr.bf16.mxu0 %v5357_v42  ;;  %7259 = vmatprep.subr.bf16.mxu1 %v5359_v25  ;;  %v7362_v42 = vld [vmem:[#allocation3 + $0xc0] sm:$0xff]  ;;  %v7365_v25 = vld [vmem:[#allocation3 + $0xd8] sm:$0xff] }
 0xf3d   :  { %6836 = vmatpush1.bf16.msra.mxu0 %v5356_v22  ;;  %7260 = vmatpush1.bf16.msra.mxu1 %v5358_v32  ;;  %v7364_v22 = vld [vmem:[#allocation3 + $0xd0] sm:$0xff]  ;;  %v7367_v32 = vld [vmem:[#allocation3 + $0xe8] sm:$0xff] }
 0xf3e   :  { %6837 = vmatprep.subr.bf16.mxu0 %v5365_v44  ;;  %7261 = vmatprep.subr.bf16.mxu1 %v5367_v59  ;;  %v7366_v44 = vld [vmem:[#allocation3 + $0xe0] sm:$0xff]  ;;  %v7369_v59 = vld [vmem:[#allocation3 + $0xf8] sm:$0xff] }
 0xf41   :  { %6838 = vmatpush1.bf16.msra.mxu0 %v5364_v18  ;;  %7262 = vmatpush1.bf16.msra.mxu1 %v5366_v51  ;;  %v7368_v18 = vld [vmem:[#allocation3 + $0xf0] sm:$0xff]  ;;  %v7371_v51 = vld [vmem:[#allocation3 + $0x108] sm:$0xff] }
 0xf42   :  { %6839 = vmatprep.subr.bf16.mxu0 %v5373_v7  ;;  %7263 = vmatprep.subr.bf16.mxu1 %v5375_v3  ;;  %v7370_v7 = vld [vmem:[#allocation3 + $0x100] sm:$0xff]  ;;  %v7373_v3 = vld [vmem:[#allocation3 + $0x118] sm:$0xff] }
 0xf45   :  { %6840 = vmatpush1.bf16.msra.mxu0 %v5372_v24  ;;  %7264 = vmatpush1.bf16.msra.mxu1 %v5374_v23  ;;  %v7372_v24 = vld [vmem:[#allocation3 + $0x110] sm:$0xff]  ;;  %v7375_v23 = vld [vmem:[#allocation3 + $0x128] sm:$0xff] }
 0xf46   :  { %6841 = vmatprep.subr.bf16.mxu0 %v5381_v4  ;;  %7265 = vmatprep.subr.bf16.mxu1 %v5383_v17  ;;  %v7374_v4 = vld [vmem:[#allocation3 + $0x120] sm:$0xff]  ;;  %v7377_v17 = vld [vmem:[#allocation3 + $0x138] sm:$0xff] }
 0xf49   :  { %6842 = vmatpush1.bf16.msra.mxu0 %v5380_v35  ;;  %7266 = vmatpush1.bf16.msra.mxu1 %v5382_v6  ;;  %v7376_v35 = vld [vmem:[#allocation3 + $0x130] sm:$0xff]  ;;  %v7379_v6 = vld [vmem:[#allocation3 + $0x148] sm:$0xff] }
 0xf4a   :  { %6843 = vmatprep.subr.bf16.mxu0 %v5389_v38  ;;  %7267 = vmatprep.subr.bf16.mxu1 %v5391_v9  ;;  %v7380_v38 = vld [vmem:[#allocation3 + $0x150] sm:$0xff]  ;;  %v7383_v9 = vld [vmem:[#allocation3 + $0x168] sm:$0xff] }
 0xf4d   :  { %6844 = vmatpush1.bf16.msra.mxu0 %v5388_v45  ;;  %7268 = vmatpush1.bf16.msra.mxu1 %v5390_v41  ;;  %v7382_v45 = vld [vmem:[#allocation3 + $0x160] sm:$0xff]  ;;  %v7385_v41 = vld [vmem:[#allocation3 + $0x178] sm:$0xff] }
 0xf4e   :  { %7478 = vmatprep.subr.bf16.mxu0 %v7339_v39  ;;  %v7387_v39 = vld [vmem:[#allocation3 + $0x188] sm:$0xff] }
 0xf50   :  { %6846 = vmatmul.mubr.bf16.vlgmr.msra.gmra.mrb[20].mxu0 %v13580_v52  ;;  %7270 = vmatmul.mubr.bf16.vlgmr.msra.gmra.mrb[32].mxu1 %v13580_v52  ;;  %v7344_v52 = vld [vmem:[#allocation3 + $0x30] sm:$0xff] }
 0xf51   :  { %7479 = vmatpush1.bf16.msra.mxu0 %v7338_v20  ;;  %6855 = vmatprep.mubr.bf16.mxu0 %v13584_v29  ;;  %v7389_v20 = vld [vmem:[#allocation3 + $0x198] sm:$0xff] }
 0xf52   :  { %7480 = vmatprep.subr.bf16.mxu0 %v7341_v19  ;;  %7279 = vmatprep.mubr.bf16.mxu1 %v13584_v29  ;;  %v7346_v29 = vld [vmem:[#allocation3 + $0x40] sm:$0xff]  ;;  %v7388_v19 = vld [vmem:[#allocation3 + $0x190] sm:$0xff] }
 0xf55   :  { %7481 = vmatpush1.bf16.msra.mxu0 %v7340_v2  ;;  %v7391_v2 = vld [vmem:[#allocation3 + $0x1a8] sm:$0xff] }
 0xf56   :  { %7482 = vmatprep.subr.bf16.mxu0 %v7343_v33  ;;  %v7390_v33 = vld [vmem:[#allocation3 + $0x1a0] sm:$0xff] }
 0xf58   :  { %6856 = vmatmul.mubr.bf16.gmra.mrb[24].mxu0 %v13590_v28  ;;  %7280 = vmatmul.mubr.bf16.gmra.mrb[36].mxu1 %v13590_v28  ;;  %v7353_v28 = vld [vmem:[#allocation3 + $0x78] sm:$0xff] }
 0xf59   :  { %7483 = vmatpush1.bf16.msra.mxu0 %v7342_v61  ;;  %7510 = vmatprep.mubr.bf16.mxu0 %v13646_v43  ;;  %v7352_v43 = vld [vmem:[#allocation3 + $0x70] sm:$0xff]  ;;  %v7393_v61 = vld [vmem:[#allocation3 + $0x1b8] sm:$0xff] }
 0xf5a   :  { %7484 = vmatprep.subr.bf16.mxu0 %v7345_v48  ;;  %7769 = vmatprep.mubr.f32.mxu1 %v12824_v15  ;;  %v7392_v48 = vld [vmem:[#allocation3 + $0x1b0] sm:$0xff] }
 0xf5d   :  { %7485 = vmatpush1.bf16.msra.mxu0 %v7344_v52  ;;  %v7395_v52 = vld [vmem:[#allocation3 + $0x1c8] sm:$0xff] }
 0xf5e   :  { %7486 = vmatprep.subr.bf16.mxu0 %v7347_v46  ;;  %v7394_v46 = vld [vmem:[#allocation3 + $0x1c0] sm:$0xff] }
 0xf61   :  { %7487 = vmatpush1.bf16.msra.mxu0 %v7346_v29  ;;  %v7397_v29 = vld [vmem:[#allocation3 + $0x1d8] sm:$0xff] }
 0xf62   :  { %7488 = vmatprep.subr.bf16.mxu0 %v7349_v37  ;;  %v7396_v37 = vld [vmem:[#allocation3 + $0x1d0] sm:$0xff] }
 0xf65   :  { %7489 = vmatpush1.bf16.msra.mxu0 %v7348_v60  ;;  %v7399_v60 = vld [vmem:[#allocation3 + $0x1e8] sm:$0xff] }
 0xf66   :  { %7490 = vmatprep.subr.bf16.mxu0 %v7351_v49  ;;  %v7398_v49 = vld [vmem:[#allocation3 + $0x1e0] sm:$0xff] }
 0xf69   :  { %7491 = vmatpush1.bf16.msra.mxu0 %v7350_v5  ;;  %v7401_v5 = vld [vmem:[#allocation3 + $0x1f8] sm:$0xff] }
 0xf6a   :  { %7492 = vmatprep.subr.bf16.mxu0 %v7353_v28  ;;  %v7400_v28 = vld [vmem:[#allocation3 + $0x1f0] sm:$0xff] }
 0xf6d   :  { %7493 = vmatpush1.bf16.msra.mxu0 %v7352_v43  ;;  %v7403_v43 = vld [vmem:[#allocation3 + $0x208] sm:$0xff] }
 0xf6e   :  { %7494 = vmatprep.subr.bf16.mxu0 %v7355_v40  ;;  %v7402_v40 = vld [vmem:[#allocation3 + $0x200] sm:$0xff] }
 0xf71   :  { %7495 = vmatpush1.bf16.msra.mxu0 %v7354_v8  ;;  %v7405_v8 = vld [vmem:[#allocation3 + $0x218] sm:$0xff] }
 0xf72   :  { %7496 = vmatprep.subr.bf16.mxu0 %v7357_v16  ;;  %v7404_v16 = vld [vmem:[#allocation3 + $0x210] sm:$0xff] }
 0xf75   :  { %7497 = vmatpush1.bf16.msra.mxu0 %v7356_v58  ;;  %v7407_v58 = vld [vmem:[#allocation3 + $0x228] sm:$0xff] }
 0xf76   :  { %7498 = vmatprep.subr.bf16.mxu0 %v7359_v50  ;;  %v7406_v50 = vld [vmem:[#allocation3 + $0x220] sm:$0xff] }
 0xf79   :  { %7499 = vmatpush1.bf16.msra.mxu0 %v7358_v13  ;;  %v7409_v13 = vld [vmem:[#allocation3 + $0x238] sm:$0xff] }
 0xf7a   :  { %7500 = vmatprep.subr.bf16.mxu0 %v7361_v27  ;;  %v7408_v27 = vld [vmem:[#allocation3 + $0x230] sm:$0xff] }
 0xf7d   :  { %7501 = vmatpush1.bf16.msra.mxu0 %v7360_v30  ;;  %v7411_v30 = vld [vmem:[#allocation3 + $0x248] sm:$0xff] }
 0xf7e   :  { %7502 = vmatprep.subr.bf16.mxu0 %v7363_v21  ;;  %v7410_v21 = vld [vmem:[#allocation3 + $0x240] sm:$0xff] }
 0xf81   :  { %7503 = vmatpush1.bf16.msra.mxu0 %v7362_v42  ;;  %v7415_v42 = vld [vmem:[#allocation3 + $0x268] sm:$0xff] }
 0xf82   :  { %7504 = vmatprep.subr.bf16.mxu0 %v7365_v25  ;;  %v7414_v25 = vld [vmem:[#allocation3 + $0x260] sm:$0xff] }
 0xf85   :  { %7505 = vmatpush1.bf16.msra.mxu0 %v7364_v22  ;;  %v7417_v22 = vld [vmem:[#allocation3 + $0x278] sm:$0xff] }
 0xf86   :  { %7506 = vmatprep.subr.bf16.mxu0 %v7367_v32  ;;  %v7416_v32 = vld [vmem:[#allocation3 + $0x270] sm:$0xff] }
 0xf89   :  { %7507 = vmatpush1.bf16.msra.mxu0 %v7366_v44  ;;  %v7418_v44 = vld [vmem:[#allocation3 + $0x280] sm:$0xff] }
 0xf8a   :  { %7508 = vmatprep.subr.bf16.mxu0 %v7369_v59  ;;  %v7421_v59 = vld [vmem:[#allocation3 + $0x298] sm:$0xff] }
 0xf8d   :  { %7509 = vmatpush1.bf16.msra.mxu0 %v7368_v18  ;;  %v7420_v18 = vld [vmem:[#allocation3 + $0x290] sm:$0xff] }
 0xf8e   :  { %7531 = vmatprep.subr.bf16.mxu0 %v7371_v51  ;;  %v7423_v51 = vld [vmem:[#allocation3 + $0x2a8] sm:$0xff] }
 0xf90   :  { %7511 = vmatmul.mubr.bf16.vlgmr.msra.gmra.mrb[28].mxu0 %v13642_v34  ;;  %v7378_v34 = vld [vmem:[#allocation3 + $0x140] sm:$0xff] }
 0xf91   :  { %7520 = vmatprep.mubr.bf16.mxu0 %v13662_v56  ;;  %7532 = vmatpush1.bf16.msra.mxu0 %v7370_v7  ;;  %v7381_v56 = vld [vmem:[#allocation3 + $0x158] sm:$0xff]  ;;  %v7422_v7 = vld [vmem:[#allocation3 + $0x2a0] sm:$0xff] }
 0xf92   :  { %7533 = vmatprep.subr.bf16.mxu0 %v7373_v3  ;;  %v7425_v3 = vld [vmem:[#allocation3 + $0x2b8] sm:$0xff] }
 0xf95   :  { %7534 = vmatpush1.bf16.msra.mxu0 %v7372_v24  ;;  %v7424_v24 = vld [vmem:[#allocation3 + $0x2b0] sm:$0xff] }
 0xf96   :  { %7535 = vmatprep.subr.bf16.mxu0 %v7375_v23  ;;  %v7427_v23 = vld [vmem:[#allocation3 + $0x2c8] sm:$0xff] }
 0xf98   :  { %7521 = vmatmul.mubr.bf16.gmra.mrb[32].mxu0 %v13658_v31  ;;  %v7384_v31 = vld [vmem:[#allocation3 + $0x170] sm:$0xff] }
 0xf99   :  { %7536 = vmatpush1.bf16.msra.mxu0 %v7374_v4  ;;  %7563 = vmatprep.mubr.bf16.mxu0 %v13648_v55  ;;  %v7386_v55 = vld [vmem:[#allocation3 + $0x180] sm:$0xff] }
 0xf9a   :  { %7537 = vmatprep.subr.bf16.mxu0 %v7377_v17  ;;  %v7426_v4 = vld [vmem:[#allocation3 + $0x2c0] sm:$0xff]  ;;  %v7429_v17 = vld [vmem:[#allocation3 + $0x2d8] sm:$0xff] }
 0xf9d   :  { %7538 = vmatpush1.bf16.msra.mxu0 %v7376_v35  ;;  %v7428_v35 = vld [vmem:[#allocation3 + $0x2d0] sm:$0xff] }
 0xf9e   :  { %7539 = vmatprep.subr.bf16.mxu0 %v7379_v6  ;;  %v7431_v6 = vld [vmem:[#allocation3 + $0x2e8] sm:$0xff] }
 0xfa1   :  { %7540 = vmatpush1.bf16.msra.mxu0 %v7378_v34  ;;  %v7430_v34 = vld [vmem:[#allocation3 + $0x2e0] sm:$0xff] }
 0xfa2   :  { %7541 = vmatprep.subr.bf16.mxu0 %v7381_v56  ;;  %v7433_v56 = vld [vmem:[#allocation3 + $0x2f8] sm:$0xff] }
 0xfa5   :  { %7542 = vmatpush1.bf16.msra.mxu0 %v7380_v38  ;;  %v7432_v38 = vld [vmem:[#allocation3 + $0x2f0] sm:$0xff] }
 0xfa6   :  { %7543 = vmatprep.subr.bf16.mxu0 %v7383_v9  ;;  %v7435_v9 = vld [vmem:[#allocation3 + $0x308] sm:$0xff] }
 0xfa9   :  { %7544 = vmatpush1.bf16.msra.mxu0 %v7382_v45  ;;  %v5412_v45 = vsub.s32 4, %v13253_v53 }
 0xfaa   :  { %7545 = vmatprep.subr.bf16.mxu0 %v7385_v41  ;;  %v5420_v41 = vsub.s32 6, %v13253_v53 }
 0xfad   :  { %7546 = vmatpush1.bf16.msra.mxu0 %v7384_v31  ;;  %v5416_v31 = vsub.s32 5, %v13253_v53 }
 0xfae   :  { %7547 = vmatprep.subr.bf16.mxu0 %v7387_v39  ;;  %v5424_v39 = vsub.s32 7, %v13253_v53 }
 0xfb1   :  { %7548 = vmatpush1.bf16.msra.mxu0 %v7386_v55  ;;  %v12045_v55 = vld [vmem:[#allocation30] sm:$0xff] }
 0xfb2   :  { %7549 = vmatprep.subr.bf16.mxu0 %v7389_v20  ;;  %v5413_v20 = vrot.slane %v12045_v55, %v5412_v45 }
 0xfb5   :  { %7550 = vmatpush1.bf16.msra.mxu0 %v7388_v19  ;;  %v5421_v19 = vrot.slane %v12045_v55, %v5420_v41 }
 0xfb6   :  { %7551 = vmatprep.subr.bf16.mxu0 %v7391_v2  ;;  %v5417_v2 = vrot.slane %v12045_v55, %v5416_v31 }
 0xfb9   :  { %7552 = vmatpush1.bf16.msra.mxu0 %v7390_v33  ;;  %v5425_v33 = vrot.slane %v12045_v55, %v5424_v39 }
 0xfba   :  { %7553 = vmatprep.subr.bf16.mxu0 %v7393_v61 }
 0xfbd   :  { %7554 = vmatpush1.bf16.msra.mxu0 %v7392_v48 }
 0xfbe   :  { %7555 = vmatprep.subr.bf16.mxu0 %v7395_v52 }
 0xfc1   :  { %7556 = vmatpush1.bf16.msra.mxu0 %v7394_v46 }
 0xfc2   :  { %7557 = vmatprep.subr.bf16.mxu0 %v7397_v29 }
 0xfc5   :  { %7558 = vmatpush1.bf16.msra.mxu0 %v7396_v37 }
 0xfc6   :  { %7559 = vmatprep.subr.bf16.mxu0 %v7399_v60 }
 0xfc9   :  { %7560 = vmatpush1.bf16.msra.mxu0 %v7398_v49 }
 0xfca   :  { %7561 = vmatprep.subr.bf16.mxu0 %v7401_v5 }
 0xfcd   :  { %7562 = vmatpush1.bf16.msra.mxu0 %v7400_v28 }
 0xfce   :  { %7584 = vmatprep.subr.bf16.mxu0 %v7403_v43 }
 0xfd0   :  { %7564 = vmatmul.mubr.bf16.vlgmr.msra.gmra.mrb[28].mxu0 %v13644_v47  ;;  %v7413_v47 = vld [vmem:[#allocation3 + $0x258] sm:$0xff] }
 0xfd1   :  { %7573 = vmatprep.mubr.bf16.mxu0 %v13664_v26  ;;  %7585 = vmatpush1.bf16.msra.mxu0 %v7402_v40  ;;  %v7412_v26 = vld [vmem:[#allocation3 + $0x250] sm:$0xff] }
 0xfd2   :  { %7586 = vmatprep.subr.bf16.mxu0 %v7405_v8 }
 0xfd5   :  { %7587 = vmatpush1.bf16.msra.mxu0 %v7404_v16 }
 0xfd6   :  { %7588 = vmatprep.subr.bf16.mxu0 %v7407_v58 }
 0xfd8   :  { %7574 = vmatmul.mubr.bf16.gmra.mrb[32].mxu0 %v13660_v36  ;;  %v7419_v36 = vld [vmem:[#allocation3 + $0x288] sm:$0xff] }
 0xfd9   :  { %7589 = vmatpush1.bf16.msra.mxu0 %v7406_v50 }
 0xfda   :  { %7590 = vmatprep.subr.bf16.mxu0 %v7409_v13 }
 0xfdd   :  { %7591 = vmatpush1.bf16.msra.mxu0 %v7408_v27 }
 0xfde   :  { %7592 = vmatprep.subr.bf16.mxu0 %v7411_v30 }
 0xfe1   :  { %7593 = vmatpush1.bf16.msra.mxu0 %v7410_v21 }
 0xfe2   :  { %7594 = vmatprep.subr.bf16.mxu0 %v7413_v47 }
 0xfe5   :  { %7595 = vmatpush1.bf16.msra.mxu0 %v7412_v26 }
 0xfe6   :  { %7596 = vmatprep.subr.bf16.mxu0 %v7415_v42 }
 0xfe9   :  { %7597 = vmatpush1.bf16.msra.mxu0 %v7414_v25 }
 0xfea   :  { %7598 = vmatprep.subr.bf16.mxu0 %v7417_v22 }
 0xfed   :  { %7599 = vmatpush1.bf16.msra.mxu0 %v7416_v32 }
 0xfee   :  { %7600 = vmatprep.subr.bf16.mxu0 %v7419_v36 }
 0xff1   :  { %7601 = vmatpush1.bf16.msra.mxu0 %v7418_v44 }
 0xff2   :  { %7602 = vmatprep.subr.bf16.mxu0 %v7421_v59 }
 0xff5   :  { %7603 = vmatpush1.bf16.msra.mxu0 %v7420_v18 }
 0xff6   :  { %7604 = vmatprep.subr.bf16.mxu0 %v7423_v51 }
 0xff9   :  { %7605 = vmatpush1.bf16.msra.mxu0 %v7422_v7 }
 0xffa   :  { %7606 = vmatprep.subr.bf16.mxu0 %v7425_v3 }
 0xffd   :  { %7607 = vmatpush1.bf16.msra.mxu0 %v7424_v24  ;;  %v7434_v24 = vld [vmem:[#allocation3 + $0x300] sm:$0xff] }
 0xffe   :  { %7608 = vmatprep.subr.bf16.mxu0 %v7427_v23 }
0x1001   :  { %7609 = vmatpush1.bf16.msra.mxu0 %v7426_v4 }
0x1002   :  { %7610 = vmatprep.subr.bf16.mxu0 %v7429_v17 }
0x1005   :  { %7611 = vmatpush1.bf16.msra.mxu0 %v7428_v35 }
0x1006   :  { %7612 = vmatprep.subr.bf16.mxu0 %v7431_v6  ;;  %v7437_v6 = vld [vmem:[#allocation3 + $0x318] sm:$0xff] }
0x1009   :  { %7613 = vmatpush1.bf16.msra.mxu0 %v7430_v34 }
0x100a   :  { %7614 = vmatprep.subr.bf16.mxu0 %v7433_v56 }
0x100d   :  { %7615 = vmatpush1.bf16.msra.mxu0 %v7432_v38 }
0x100e   :  { %7637 = vmatprep.subr.bf16.mxu0 %v7435_v9 }
0x1023   :  { %v6847_v61 = vpop.f32.mrb[20].mxu0  ;;  %v7271_v48 = vpop.f32.mrb[32].mxu1 }
0x1024   :  { %v10833_v52 = vadd.f32 %v6847_v61, %v5413_v20  ;;  %v10841_v46 = vadd.f32 %v7271_v48, %v5421_v19  ;;  %v6849_v29 = vpop.f32.mrb[21].mxu0  ;;  %v7273_v37 = vpop.f32.mrb[33].mxu1  ;;  %v7436_v48 = vld [vmem:[#allocation3 + $0x310] sm:$0xff] }
0x1025   :  { %v10834_v60 = vadd.f32 %v6849_v29, %v5417_v2  ;;  %v10842_v49 = vadd.f32 %v7273_v37, %v5425_v33  ;;  %v6851_v5 = vpop.f32.mrb[22].mxu0  ;;  %v7275_v28 = vpop.f32.mrb[34].mxu1 }
0x1026   :  { %v10835_v43 = vadd.f32 %v6851_v5, %v5413_v20  ;;  %v10843_v40 = vadd.f32 %v7275_v28, %v5421_v19  ;;  %v6853_v8 = vpop.f32.mrb[23].mxu0  ;;  %v7277_v16 = vpop.f32.mrb[35].mxu1  ;;  %v7294_v50 = vmax.f32 %v10833_v52, 0.0  ;;  %v7296_v13 = vmax.f32 %v10841_v46, 0.0  ;;  %v7440_v28 = vld [vmem:[#allocation3 + $0x330] sm:$0xff] }
0x1027   :  { %v10836_v53 = vadd.f32 %v6853_v8, %v5417_v2  ;;  %v10844_v58 = vadd.f32 %v7277_v16, %v5425_v33  ;;  %v7295_v21 = vmax.f32 %v10834_v60, 0.0  ;;  %v7297_v47 = vmax.f32 %v10842_v49, 0.0  ;;  %v7439_v60 = vld [vmem:[#allocation3 + $0x328] sm:$0xff]  ;;  %v7445_v8 = vld [vmem:[#allocation3 + $0x358] sm:$0xff]  ;;  %v7444_v16 = vld [vmem:[#allocation3 + $0x350] sm:$0xff] }
0x1028   :  { %v7302_v27 = vmax.f32 %v10835_v43, 0.0  ;;  %v7304_v30 = vmax.f32 %v10843_v40, 0.0  ;;  %v7443_v43 = vld [vmem:[#allocation3 + $0x348] sm:$0xff]  ;;  %v7442_v40 = vld [vmem:[#allocation3 + $0x340] sm:$0xff] }
0x1029   :  { %v7303_v26 = vmax.f32 %v10836_v53, 0.0  ;;  %v7305_v42 = vmax.f32 %v10844_v58, 0.0  ;;  %v7447_v53 = vld [vmem:[#allocation3 + $0x368] sm:$0xff]  ;;  %v7446_v58 = vld [vmem:[#allocation3 + $0x360] sm:$0xff] }
0x102a   :  { %v7326_v25 = vpack.c.bf16 %v7302_v27, %v7294_v50  ;;  %v13717_v22 = vpack.c.bf16 %v7304_v30, %v7296_v13  ;;  %v7449_v50 = vld [vmem:[#allocation3 + $0x378] sm:$0xff]  ;;  %v7448_v13 = vld [vmem:[#allocation3 + $0x370] sm:$0xff]  ;;  %v7451_v27 = vld [vmem:[#allocation3 + $0x388] sm:$0xff] }
0x102b   :  { %v7327_v32 = vpack.c.bf16 %v7303_v26, %v7295_v21  ;;  %v7329_v36 = vpack.c.bf16 %v7305_v42, %v7297_v47  ;;  %v6857_v44 = vpop.f32.mrb[24].mxu0  ;;  %v7281_v59 = vpop.f32.mrb[36].mxu1  ;;  %v7450_v30 = vld [vmem:[#allocation3 + $0x380] sm:$0xff]  ;;  %v7453_v21 = vld [vmem:[#allocation3 + $0x398] sm:$0xff]  ;;  %v7452_v47 = vld [vmem:[#allocation3 + $0x390] sm:$0xff] }
0x102c   :  { %v10837_v18 = vadd.f32 %v6857_v44, %v5413_v20  ;;  %v10845_v51 = vadd.f32 %v7281_v59, %v5421_v19  ;;  %v6859_v7 = vpop.f32.mrb[25].mxu0  ;;  %v7283_v3 = vpop.f32.mrb[37].mxu1  ;;  %v7455_v26 = vld [vmem:[#allocation3 + $0x3a8] sm:$0xff]  ;;  %v7454_v42 = vld [vmem:[#allocation3 + $0x3a0] sm:$0xff]  ;;  %v7461_v59 = vld [vmem:[#allocation3 + $0x3d8] sm:$0xff] }
0x102d   :  { %v10838_v23 = vadd.f32 %v6859_v7, %v5417_v2  ;;  %v10846_v4 = vadd.f32 %v7283_v3, %v5425_v33  ;;  %v6861_v17 = vpop.f32.mrb[26].mxu0  ;;  %v7285_v35 = vpop.f32.mrb[38].mxu1  ;;  %7616 = vmatprep.mubr.bf16.mxu0 %v7327_v32  ;;  %v7456_v32 = vld [vmem:[#allocation3 + $0x3b0] sm:$0xff]  ;;  %v7458_v44 = vld [vmem:[#allocation3 + $0x3c0] sm:$0xff]  ;;  %v7465_v3 = vld [vmem:[#allocation3 + $0x3f8] sm:$0xff] }
0x102e   :  { %v10839_v34 = vadd.f32 %v6861_v17, %v5413_v20  ;;  %v10847_v56 = vadd.f32 %v7285_v35, %v5421_v19  ;;  %v6863_v38 = vpop.f32.mrb[27].mxu0  ;;  %v7287_v9 = vpop.f32.mrb[39].mxu1  ;;  %7617 = vmatmul.mubr.bf16.vlgmr.msra.gmra.mrb[28].mxu0 %v7326_v25  ;;  %v7310_v31 = vmax.f32 %v10837_v18, 0.0  ;;  %v7312_v39 = vmax.f32 %v10845_v51, 0.0  ;;  %v7457_v25 = vld [vmem:[#allocation3 + $0x3b8] sm:$0xff]  ;;  %v7460_v18 = vld [vmem:[#allocation3 + $0x3d0] sm:$0xff] }
0x102f   :  { %v10840_v45 = vadd.f32 %v6863_v38, %v5417_v2  ;;  %v10848_v41 = vadd.f32 %v7287_v9, %v5425_v33  ;;  %7638 = vmatpush1.bf16.msra.mxu0 %v7434_v24  ;;  %v7311_v52 = vmax.f32 %v10838_v23, 0.0  ;;  %v7313_v46 = vmax.f32 %v10846_v4, 0.0  ;;  %v7438_v2 = vld [vmem:[#allocation3 + $0x320] sm:$0xff]  ;;  %v7441_v33 = vld [vmem:[#allocation3 + $0x338] sm:$0xff]  ;;  %v7463_v51 = vld [vmem:[#allocation3 + $0x3e8] sm:$0xff] }
0x1030   :  { %v7318_v55 = vmax.f32 %v10839_v34, 0.0  ;;  %v7320_v61 = vmax.f32 %v10847_v56, 0.0  ;;  %7639 = vmatprep.subr.bf16.mxu0 %v7437_v6  ;;  %v7462_v7 = vld [vmem:[#allocation3 + $0x3e0] sm:$0xff]  ;;  %v7464_v24 = vld [vmem:[#allocation3 + $0x3f0] sm:$0xff] }
0x1031   :  { %v7319_v29 = vmax.f32 %v10840_v45, 0.0  ;;  %v7321_v37 = vmax.f32 %v10848_v41, 0.0  ;;  %v7466_v23 = vld [vmem:[#allocation31] sm:$0x3] }
0x1032   :  { %v7334_v49 = vpack.c.bf16 %v7318_v55, %v7310_v31  ;;  %v13719_v20 = vpack.c.bf16 %v7320_v61, %v7312_v39  ;;  %v7475_v4 = vrot.slane %v7466_v23, %v13260_v57  ;;  %v7471_v17 = vrot.slane %v7466_v23, %v13256_v54  ;;  %v11869_v23 = vld [vmem:[#allocation33 + $0xa4] ss:$8 sps:$4 sm:$0xff]  }
0x1033   :  { %v7335_v19 = vpack.c.bf16 %v7319_v29, %v7311_v52  ;;  %v7337_v5 = vpack.c.bf16 %v7321_v37, %v7313_v46  ;;  %7640 = vmatpush1.bf16.msra.mxu0 %v7436_v48 }
0x1034   :  { %7641 = vmatprep.subr.bf16.mxu0 %v7439_v60 }
0x1035   :  { %7626 = vmatprep.mubr.bf16.mxu0 %v7335_v19  ;;  %v13757_v19 = vld [vmem:[#allocation10] sm:$0xff] }
0x1036   :  { %7627 = vmatmul.mubr.bf16.gmra.mrb[32].mxu0 %v7334_v49 }
0x1037   :  { %7642 = vmatpush1.bf16.msra.mxu0 %v7438_v2  ;;  %7669 = vmatprep.mubr.bf16.mxu0 %v7329_v36  ;;  %v7459_v36 = vld [vmem:[#allocation3 + $0x3c8] sm:$0xff] }
0x1038   :  { %7643 = vmatprep.subr.bf16.mxu0 %v7441_v33 }
0x103b   :  { %7644 = vmatpush1.bf16.msra.mxu0 %v7440_v28 }
0x103c   :  { %7645 = vmatprep.subr.bf16.mxu0 %v7443_v43 }
0x103f   :  { %7646 = vmatpush1.bf16.msra.mxu0 %v7442_v40  ;;  %v13768_v40 = vld [vmem:[#allocation10 + $0x8] sm:$0xff] }
0x1040   :  { %7647 = vmatprep.subr.bf16.mxu0 %v7445_v8 }
0x1043   :  { %7648 = vmatpush1.bf16.msra.mxu0 %v7444_v16  ;;  %v11839_v16 = vld [vmem:[#allocation33 + $0x4] ss:$8 sps:$4 sm:$0xff]  }
0x1044   :  { %7649 = vmatprep.subr.bf16.mxu0 %v7447_v53 }
0x1047   :  { %7650 = vmatpush1.bf16.msra.mxu0 %v7446_v58  ;;  %v11837_v58 = vld [vmem:[#allocation33] ss:$8 sps:$4 sm:$0xff]  }
0x1048   :  { %7651 = vmatprep.subr.bf16.mxu0 %v7449_v50  ;;  %v11842_v50 = vld [vmem:[#allocation33 + $0x14] ss:$8 sps:$4 sm:$0xff]  }
0x104b   :  { %7652 = vmatpush1.bf16.msra.mxu0 %v7448_v13  ;;  %v11840_v13 = vld [vmem:[#allocation33 + $0x10] ss:$8 sps:$4 sm:$0xff]  }
0x104c   :  { %7653 = vmatprep.subr.bf16.mxu0 %v7451_v27  ;;  %v11845_v27 = vld [vmem:[#allocation33 + $0x24] ss:$8 sps:$4 sm:$0xff]  }
0x104f   :  { %7654 = vmatpush1.bf16.msra.mxu0 %v7450_v30  ;;  %v11843_v30 = vld [vmem:[#allocation33 + $0x20] ss:$8 sps:$4 sm:$0xff]  }
0x1050   :  { %7655 = vmatprep.subr.bf16.mxu0 %v7453_v21  ;;  %v11848_v21 = vld [vmem:[#allocation33 + $0x34] ss:$8 sps:$4 sm:$0xff]  }
0x1053   :  { %7656 = vmatpush1.bf16.msra.mxu0 %v7452_v47  ;;  %v11846_v47 = vld [vmem:[#allocation33 + $0x30] ss:$8 sps:$4 sm:$0xff]  }
0x1054   :  { %7657 = vmatprep.subr.bf16.mxu0 %v7455_v26  ;;  %v11851_v26 = vld [vmem:[#allocation33 + $0x44] ss:$8 sps:$4 sm:$0xff]  }
0x1057   :  { %7658 = vmatpush1.bf16.msra.mxu0 %v7454_v42  ;;  %v11849_v42 = vld [vmem:[#allocation33 + $0x40] ss:$8 sps:$4 sm:$0xff]  }
0x1058   :  { %7659 = vmatprep.subr.bf16.mxu0 %v7457_v25  ;;  %v11854_v25 = vld [vmem:[#allocation33 + $0x54] ss:$8 sps:$4 sm:$0xff]  }
0x105b   :  { %7660 = vmatpush1.bf16.msra.mxu0 %v7456_v32  ;;  %v11852_v32 = vld [vmem:[#allocation33 + $0x50] ss:$8 sps:$4 sm:$0xff]  }
0x105c   :  { %7661 = vmatprep.subr.bf16.mxu0 %v7459_v36  ;;  %v11857_v36 = vld [vmem:[#allocation33 + $0x64] ss:$8 sps:$4 sm:$0xff]  }
0x105f   :  { %7662 = vmatpush1.bf16.msra.mxu0 %v7458_v44  ;;  %v11855_v44 = vld [vmem:[#allocation33 + $0x60] ss:$8 sps:$4 sm:$0xff]  }
0x1060   :  { %7663 = vmatprep.subr.bf16.mxu0 %v7461_v59  ;;  %v11860_v59 = vld [vmem:[#allocation33 + $0x74] ss:$8 sps:$4 sm:$0xff]  }
0x1063   :  { %7664 = vmatpush1.bf16.msra.mxu0 %v7460_v18  ;;  %v11858_v18 = vld [vmem:[#allocation33 + $0x70] ss:$8 sps:$4 sm:$0xff]  }
0x1064   :  { %7665 = vmatprep.subr.bf16.mxu0 %v7463_v51  ;;  %v11863_v51 = vld [vmem:[#allocation33 + $0x84] ss:$8 sps:$4 sm:$0xff]  }
0x1067   :  { %7666 = vmatpush1.bf16.msra.mxu0 %v7462_v7  ;;  %v11861_v7 = vld [vmem:[#allocation33 + $0x80] ss:$8 sps:$4 sm:$0xff]  }
0x1068   :  { %7667 = vmatprep.subr.bf16.mxu0 %v7465_v3  ;;  %v11866_v3 = vld [vmem:[#allocation33 + $0x94] ss:$8 sps:$4 sm:$0xff]  }
0x106b   :  { %7668 = vmatpush1.bf16.msra.mxu0 %v7464_v24  ;;  %v11864_v24 = vld [vmem:[#allocation33 + $0x90] ss:$8 sps:$4 sm:$0xff]  }
0x106e   :  { %7670 = vmatmul.mubr.bf16.vlgmr.msra.gmra.mrb[28].mxu0 %v13717_v22 }
0x106f   :  { %7679 = vmatprep.mubr.bf16.mxu0 %v7337_v5 }
0x1076   :  { %7680 = vmatmul.mubr.bf16.gmra.mrb[32].mxu0 %v13719_v20 }
0x1141   :  { %v7671_v35 = vpop.f32.mrb[28].mxu0 }
0x1142   :  { %v7673_v6 = vpop.f32.mrb[29].mxu0  ;;  %v13727_v38 = vadd.f32 %v7671_v35, %v7471_v17  ;;  %v11870_v35 = vld [vmem:[#allocation33 + $0xb0] ss:$8 sps:$4 sm:$0xff]  }
0x1143   :  { %v13725_v34 = vadd.f32 %v7673_v6, %v7475_v4  ;;  %v7675_v56 = vpop.f32.mrb[30].mxu0  ;;  %v11875_v6 = vld [vmem:[#allocation33 + $0xc4] ss:$8 sps:$4 sm:$0xff]  }
0x1144   :  { %v13729_v9 = vadd.f32 %v7675_v56, %v7471_v17  ;;  %v7677_v45 = vpop.f32.mrb[31].mxu0  ;;  %v7690_v55 = vmax.f32 %v13727_v38, 0.0  ;;  %v11873_v56 = vld [vmem:[#allocation33 + $0xc0] ss:$8 sps:$4 sm:$0xff]  }
0x1145   :  { %v13731_v41 = vadd.f32 %v7677_v45, %v7475_v4  ;;  %v7691_v31 = vmax.f32 %v13725_v34, 0.0  ;;  %v11878_v45 = vld [vmem:[#allocation33 + $0xd4] ss:$8 sps:$4 sm:$0xff]  }
0x1146   :  { %v7692_v22 = vmax.f32 %v13729_v9, 0.0 }
0x1147   :  { %v7693_v39 = vmax.f32 %v13731_v41, 0.0 }
0x1148   :  { %v13747_v52 = vpack.c.bf16 %v7692_v22, %v7690_v55 }
0x1149   :  { %v13741_v61 = vpack.c.bf16 %v7693_v39, %v7691_v31  ;;  %v7681_v48 = vpop.f32.mrb[32].mxu0 }
0x114a   :  { %v7683_v46 = vpop.f32.mrb[33].mxu0  ;;  %v13752_v60 = vadd.f32 %v7681_v48, %v7471_v17  ;;  %v11876_v48 = vld [vmem:[#allocation33 + $0xd0] ss:$8 sps:$4 sm:$0xff]  }
0x114b   :  { %v13749_v29 = vadd.f32 %v7683_v46, %v7475_v4  ;;  %v7685_v37 = vpop.f32.mrb[34].mxu0  ;;  %10790 = vmatprep.subr.bf16.mxu1 %v13741_v61  ;;  %v11881_v46 = vld [vmem:[#allocation33 + $0xe4] ss:$8 sps:$4 sm:$0xff]  }
0x114c   :  { %v13754_v49 = vadd.f32 %v7685_v37, %v7471_v17  ;;  %v7687_v20 = vpop.f32.mrb[35].mxu0  ;;  %10792 = vmatpush1.bf16.msra.mxu1 %v13747_v52  ;;  %v7694_v43 = vmax.f32 %v13752_v60, 0.0  ;;  %v11872_v17 = vld [vmem:[#allocation33 + $0xb4] ss:$8 sps:$4 sm:$0xff]   ;;  %v11879_v37 = vld [vmem:[#allocation33 + $0xe0] ss:$8 sps:$4 sm:$0xff]  }
0x114d   :  { %v13759_v5 = vadd.f32 %v7687_v20, %v7475_v4  ;;  %v7695_v33 = vmax.f32 %v13749_v29, 0.0  ;;  %v11867_v4 = vld [vmem:[#allocation33 + $0xa0] ss:$8 sps:$4 sm:$0xff]   ;;  %v11884_v20 = vld [vmem:[#allocation33 + $0xf4] ss:$8 sps:$4 sm:$0xff]  }
0x114e   :  { %v7696_v2 = vmax.f32 %v13754_v49, 0.0 }
0x114f   :  { %v13945_v28 = vmax.f32 %v13759_v5, 0.0  ;;  %10425 = vmatmul.mubr.msk.f32.vlgmr.msra.gmra.mrb[40].mxu1 %vm7698_vm2, %v13757_v19 }
0x1150   :  { %7775 = vmatprep.mubr.f32.mxu1 %v12824_v15  ;;  %v13780_v53 = vpack.c.bf16 %v7696_v2, %v7694_v43 }
0x1151   :  { %v13774_v8 = vpack.c.bf16 %v13945_v28, %v7695_v33 }
0x1153   :  { %10426 = vmatmul.mubr.msk.f32.gmra.mrb[42].mxu1 %vm7698_vm2, %v13768_v40  ;;  %10794 = vmatprep.subr.bf16.mxu1 %v13774_v8 }
0x1154   :  { %10796 = vmatpush1.bf16.msra.mxu1 %v13780_v53  ;;  %7846 = vmatprep.mubr.f32.mxu1 %v12824_v15 }
0x1155   :  { %8067 = vmatprep.subr.bf16.mxu1 %v11839_v16  ;;  %v11882_v16 = vld [vmem:[#allocation33 + $0xf0] ss:$8 sps:$4 sm:$0xff]  }
0x1157   :  { %10427 = vmatmul.mubr.msk.f32.vlgmr.msra.gmra.mrb[44].mxu1 %vm7698_vm2, %v13757_v19 }
0x1158   :  { %7852 = vmatprep.mubr.f32.mxu1 %v12824_v15  ;;  %8068 = vmatpush1.bf16.msra.mxu1 %v11837_v58 }
0x1159   :  { %8069 = vmatprep.subr.bf16.mxu1 %v11842_v50 }
0x115b   :  { %10428 = vmatmul.mubr.msk.f32.gmra.mrb[46].mxu1 %vm7698_vm2, %v13768_v40 }
0x115c   :  { %8070 = vmatpush1.bf16.msra.mxu1 %v11840_v13 }
0x115d   :  { %8071 = vmatprep.subr.bf16.mxu1 %v11845_v27 }
0x1160   :  { %8072 = vmatpush1.bf16.msra.mxu1 %v11843_v30 }
0x1161   :  { %8073 = vmatprep.subr.bf16.mxu1 %v11848_v21 }
0x1164   :  { %8074 = vmatpush1.bf16.msra.mxu1 %v11846_v47 }
0x1165   :  { %8075 = vmatprep.subr.bf16.mxu1 %v11851_v26 }
0x1168   :  { %8076 = vmatpush1.bf16.msra.mxu1 %v11849_v42 }
0x1169   :  { %8077 = vmatprep.subr.bf16.mxu1 %v11854_v25 }
0x116c   :  { %8078 = vmatpush1.bf16.msra.mxu1 %v11852_v32 }
0x116d   :  { %8079 = vmatprep.subr.bf16.mxu1 %v11857_v36 }
0x1170   :  { %8080 = vmatpush1.bf16.msra.mxu1 %v11855_v44  ;;  %v7895_v44 = vld [vmem:[#allocation34] sm:$0x3] }
0x1171   :  { %8081 = vmatprep.subr.bf16.mxu1 %v11860_v59  ;;  %v7900_v59 = vrot.slane %v7895_v44, %v13256_v54 }
0x1174   :  { %8082 = vmatpush1.bf16.msra.mxu1 %v11858_v18  ;;  %v7904_v18 = vrot.slane %v7895_v44, %v13260_v57  ;;  %v11887_v44 = vld [vmem:[#allocation36 + $0x4] ss:$8 sps:$4 sm:$0xff]  }
0x1175   :  { %8083 = vmatprep.subr.bf16.mxu1 %v11863_v51 }
0x1178   :  { %8084 = vmatpush1.bf16.msra.mxu1 %v11861_v7 }
0x1179   :  { %8085 = vmatprep.subr.bf16.mxu1 %v11866_v3 }
0x117c   :  { %8086 = vmatpush1.bf16.msra.mxu1 %v11864_v24 }
0x117d   :  { %8087 = vmatprep.subr.bf16.mxu1 %v11869_v23 }
0x1180   :  { %8088 = vmatpush1.bf16.msra.mxu1 %v11867_v4 }
0x1181   :  { %8089 = vmatprep.subr.bf16.mxu1 %v11872_v17 }
0x1184   :  { %8090 = vmatpush1.bf16.msra.mxu1 %v11870_v35 }
0x1185   :  { %8091 = vmatprep.subr.bf16.mxu1 %v11875_v6 }
0x1188   :  { %8092 = vmatpush1.bf16.msra.mxu1 %v11873_v56 }
0x1189   :  { %8093 = vmatprep.subr.bf16.mxu1 %v11878_v45 }
0x118c   :  { %8094 = vmatpush1.bf16.msra.mxu1 %v11876_v48 }
0x118d   :  { %8095 = vmatprep.subr.bf16.mxu1 %v11881_v46 }
0x1190   :  { %8096 = vmatpush1.bf16.msra.mxu1 %v11879_v37 }
0x1191   :  { %8097 = vmatprep.subr.bf16.mxu1 %v11884_v20 }
0x1194   :  { %8098 = vmatpush1.bf16.msra.mxu1 %v11882_v16 }
0x1222   :  { %v7771_v58 = vpop.f32.mrb[40].mxu1 }
0x1223   :  { %v7773_v50 = vpop.f32.mrb[41].mxu1 }
0x1226   :  { %v7777_v13 = vpop.f32.mrb[42].mxu1 }
0x1227   :  { %v7859_v27 = vpack.c.bf16 %v7777_v13, %v7771_v58  ;;  %v7779_v30 = vpop.f32.mrb[43].mxu1 }
0x1228   :  { %v7860_v21 = vpack.c.bf16 %v7779_v30, %v7773_v50 }
0x122a   :  { %8099 = vmatprep.mubr.bf16.mxu1 %v7860_v21  ;;  %v7848_v47 = vpop.f32.mrb[44].mxu1 }
0x122b   :  { %8100 = vmatmul.mubr.bf16.vlgmr.msra.gmra.mrb[48].mxu1 %v7859_v27  ;;  %v7850_v26 = vpop.f32.mrb[45].mxu1 }
0x122e   :  { %v7854_v42 = vpop.f32.mrb[46].mxu1 }
0x122f   :  { %v7861_v25 = vpack.c.bf16 %v7854_v42, %v7848_v47  ;;  %v7856_v32 = vpop.f32.mrb[47].mxu1 }
0x1230   :  { %v7862_v36 = vpack.c.bf16 %v7856_v32, %v7850_v26 }
0x1232   :  { %8109 = vmatprep.mubr.bf16.mxu1 %v7862_v36 }
0x1233   :  { %8110 = vmatmul.mubr.bf16.gmra.mrb[52].mxu1 %v7861_v25 }
0x1234   :  { %8192 = vmatprep.mubr.f32.mxu1 %v12824_v15 }
0x12fe   :  { %v8101_v51 = vpop.f32.mrb[48].mxu1 }
0x12ff   :  { %v8102_v7 = vadd.f32 %v8101_v51, %v7900_v59  ;;  %v8103_v3 = vpop.f32.mrb[49].mxu1  ;;  %v11888_v51 = vld [vmem:[#allocation36 + $0x10] ss:$8 sps:$4 sm:$0xff]  }
0x1300   :  { %v8104_v24 = vadd.f32 %v8103_v3, %v7904_v18  ;;  %v8105_v23 = vpop.f32.mrb[50].mxu1  ;;  %v11891_v3 = vld [vmem:[#allocation36 + $0x20] ss:$8 sps:$4 sm:$0xff]  }
0x1301   :  { %v8106_v4 = vadd.f32 %v8105_v23, %v7900_v59  ;;  %v8107_v17 = vpop.f32.mrb[51].mxu1  ;;  %v8120_v6 = vmax.f32 %v8102_v7, 0.0  ;;  %v11893_v7 = vld [vmem:[#allocation36 + $0x24] ss:$8 sps:$4 sm:$0xff]   ;;  %v11894_v23 = vld [vmem:[#allocation36 + $0x30] ss:$8 sps:$4 sm:$0xff]  }
0x1302   :  { %v8108_v35 = vadd.f32 %v8107_v17, %v7904_v18  ;;  %v8121_v45 = vmax.f32 %v8104_v24, 0.0  ;;  %v11896_v24 = vld [vmem:[#allocation36 + $0x34] ss:$8 sps:$4 sm:$0xff]   ;;  %v11897_v17 = vld [vmem:[#allocation36 + $0x40] ss:$8 sps:$4 sm:$0xff]  }
0x1303   :  { %v8122_v56 = vmax.f32 %v8106_v4, 0.0  ;;  %v11899_v4 = vld [vmem:[#allocation36 + $0x44] ss:$8 sps:$4 sm:$0xff]  }
0x1304   :  { %v8123_v48 = vmax.f32 %v8108_v35, 0.0  ;;  %v11905_v35 = vld [vmem:[#allocation36 + $0x64] ss:$8 sps:$4 sm:$0xff]  }
0x1305   :  { %v10799_v46 = vpack.c.bf16 %v8122_v56, %v8120_v6  ;;  %v11903_v6 = vld [vmem:[#allocation36 + $0x60] ss:$8 sps:$4 sm:$0xff]   ;;  %v11906_v56 = vld [vmem:[#allocation36 + $0x70] ss:$8 sps:$4 sm:$0xff]  }
0x1306   :  { %v10797_v37 = vpack.c.bf16 %v8123_v48, %v8121_v45  ;;  %v8111_v20 = vpop.f32.mrb[52].mxu1  ;;  %v11911_v45 = vld [vmem:[#allocation36 + $0x84] ss:$8 sps:$4 sm:$0xff]   ;;  %v11909_v48 = vld [vmem:[#allocation36 + $0x80] ss:$8 sps:$4 sm:$0xff]  }
0x1307   :  { %v8112_v16 = vadd.f32 %v8111_v20, %v7900_v59  ;;  %v8113_v58 = vpop.f32.mrb[53].mxu1  ;;  %v11917_v20 = vld [vmem:[#allocation36 + $0xa4] ss:$8 sps:$4 sm:$0xff]  }
0x1308   :  { %v8114_v50 = vadd.f32 %v8113_v58, %v7904_v18  ;;  %v8115_v13 = vpop.f32.mrb[54].mxu1  ;;  %10798 = vmatprep.subr.bf16.mxu1 %v10797_v37  ;;  %v11912_v37 = vld [vmem:[#allocation36 + $0x90] ss:$8 sps:$4 sm:$0xff]   ;;  %v11920_v58 = vld [vmem:[#allocation36 + $0xb4] ss:$8 sps:$4 sm:$0xff]  }
0x1309   :  { %v8116_v27 = vadd.f32 %v8115_v13, %v7900_v59  ;;  %v8117_v30 = vpop.f32.mrb[55].mxu1  ;;  %10800 = vmatpush1.bf16.msra.mxu1 %v10799_v46  ;;  %v8124_v47 = vmax.f32 %v8112_v16, 0.0  ;;  %v11885_v59 = vld [vmem:[#allocation36] ss:$8 sps:$4 sm:$0xff]   ;;  %v11914_v46 = vld [vmem:[#allocation36 + $0x94] ss:$8 sps:$4 sm:$0xff]  }
0x130a   :  { %v8118_v21 = vadd.f32 %v8117_v30, %v7904_v18  ;;  %v8125_v42 = vmax.f32 %v8114_v50, 0.0  ;;  %v11890_v18 = vld [vmem:[#allocation36 + $0x14] ss:$8 sps:$4 sm:$0xff]   ;;  %v11915_v16 = vld [vmem:[#allocation36 + $0xa0] ss:$8 sps:$4 sm:$0xff]  }
0x130b   :  { %v8126_v26 = vmax.f32 %v8116_v27, 0.0  ;;  %v11918_v50 = vld [vmem:[#allocation36 + $0xb0] ss:$8 sps:$4 sm:$0xff]   ;;  %v11923_v13 = vld [vmem:[#allocation36 + $0xc4] ss:$8 sps:$4 sm:$0xff]  }
0x130c   :  { %v8127_v25 = vmax.f32 %v8118_v21, 0.0  ;;  %10461 = vmatmul.mubr.msk.f32.vlgmr.msra.gmra.mrb[56].mxu1 %vm7698_vm2, %v13757_v19  ;;  %v11921_v27 = vld [vmem:[#allocation36 + $0xc0] ss:$8 sps:$4 sm:$0xff]   ;;  %v11926_v30 = vld [vmem:[#allocation36 + $0xd4] ss:$8 sps:$4 sm:$0xff]  }
0x130d   :  { %v10803_v32 = vpack.c.bf16 %v8126_v26, %v8124_v47  ;;  %8198 = vmatprep.mubr.f32.mxu1 %v12824_v15  ;;  %v11924_v21 = vld [vmem:[#allocation36 + $0xd0] ss:$8 sps:$4 sm:$0xff]   ;;  %v11929_v47 = vld [vmem:[#allocation36 + $0xe4] ss:$8 sps:$4 sm:$0xff]   ;;  %v11927_v26 = vld [vmem:[#allocation36 + $0xe0] ss:$8 sps:$4 sm:$0xff]  }
0x130e   :  { %v10801_v36 = vpack.c.bf16 %v8127_v25, %v8125_v42  ;;  %v11932_v42 = vld [vmem:[#allocation36 + $0xf4] ss:$8 sps:$4 sm:$0xff]   ;;  %v11930_v25 = vld [vmem:[#allocation36 + $0xf0] ss:$8 sps:$4 sm:$0xff]  }
0x1310   :  { %10462 = vmatmul.mubr.msk.f32.gmra.mrb[58].mxu1 %vm7698_vm2, %v13768_v40  ;;  %10802 = vmatprep.subr.bf16.mxu1 %v10801_v36 }
0x1311   :  { %10804 = vmatpush1.bf16.msra.mxu1 %v10803_v32  ;;  %8269 = vmatprep.mubr.f32.mxu1 %v12824_v15  ;;  %v11933_v32 = vld [vmem:[#allocation39 + $0x40] sm:$0xff]  }
0x1312   :  { %8490 = vmatprep.subr.bf16.mxu1 %v11887_v44 }
0x1314   :  { %10463 = vmatmul.mubr.msk.f32.vlgmr.msra.gmra.mrb[60].mxu1 %vm7698_vm2, %v13757_v19  ;;  %v11902_v19 = vld [vmem:[#allocation36 + $0x54] ss:$8 sps:$4 sm:$0xff]  }
0x1315   :  { %8275 = vmatprep.mubr.f32.mxu1 %v12824_v15  ;;  %8491 = vmatpush1.bf16.msra.mxu1 %v11885_v59  ;;  %v11900_v15 = vld [vmem:[#allocation36 + $0x50] ss:$8 sps:$4 sm:$0xff]  }
0x1316   :  { %8492 = vmatprep.subr.bf16.mxu1 %v11890_v18 }
0x1318   :  { %10464 = vmatmul.mubr.msk.f32.gmra.mrb[62].mxu1 %vm7698_vm2, %v13768_v40  ;;  %v11908_v40 = vld [vmem:[#allocation36 + $0x74] ss:$8 sps:$4 sm:$0xff]  }
0x1319   :  { %8493 = vmatpush1.bf16.msra.mxu1 %v11888_v51 }
0x131a   :  { %8494 = vmatprep.subr.bf16.mxu1 %v11893_v7 }
0x131d   :  { %8495 = vmatpush1.bf16.msra.mxu1 %v11891_v3  ;;  %v11934_v3 = vld [vmem:[#allocation39] sm:$0xff]  }
0x131e   :  { %8496 = vmatprep.subr.bf16.mxu1 %v11896_v24  ;;  %v11935_v24 = vld [vmem:[#allocation39 + $0x48] sm:$0xff]  }
0x1321   :  { %8497 = vmatpush1.bf16.msra.mxu1 %v11894_v23 }
0x1322   :  { %8498 = vmatprep.subr.bf16.mxu1 %v11899_v4 }
0x1325   :  { %8499 = vmatpush1.bf16.msra.mxu1 %v11897_v17  ;;  %v11936_v17 = vld [vmem:[#allocation39 + $0x8] sm:$0xff]  }
0x1326   :  { %8500 = vmatprep.subr.bf16.mxu1 %v11902_v19  ;;  %v11937_v19 = vld [vmem:[#allocation39 + $0x50] sm:$0xff]  }
0x1329   :  { %8501 = vmatpush1.bf16.msra.mxu1 %v11900_v15 }
0x132a   :  { %8502 = vmatprep.subr.bf16.mxu1 %v11905_v35 }
0x132d   :  { %8503 = vmatpush1.bf16.msra.mxu1 %v11903_v6 }
0x132e   :  { %8504 = vmatprep.subr.bf16.mxu1 %v11908_v40 }
0x1331   :  { %8505 = vmatpush1.bf16.msra.mxu1 %v11906_v56  ;;  %v11938_v56 = vld [vmem:[#allocation39 + $0x10] sm:$0xff]  }
0x1332   :  { %8506 = vmatprep.subr.bf16.mxu1 %v11911_v45  ;;  %v11939_v45 = vld [vmem:[#allocation39 + $0x58] sm:$0xff]  }
0x1335   :  { %8507 = vmatpush1.bf16.msra.mxu1 %v11909_v48  ;;  %v11940_v48 = vld [vmem:[#allocation39 + $0x18] sm:$0xff]  }
0x1336   :  { %8508 = vmatprep.subr.bf16.mxu1 %v11914_v46  ;;  %v11941_v46 = vld [vmem:[#allocation39 + $0x60] sm:$0xff]  }
0x1339   :  { %8509 = vmatpush1.bf16.msra.mxu1 %v11912_v37  ;;  %v11942_v37 = vld [vmem:[#allocation39 + $0x20] sm:$0xff]  }
0x133a   :  { %8510 = vmatprep.subr.bf16.mxu1 %v11917_v20  ;;  %v11943_v20 = vld [vmem:[#allocation39 + $0x68] sm:$0xff]  }
0x133d   :  { %8511 = vmatpush1.bf16.msra.mxu1 %v11915_v16  ;;  %v11944_v16 = vld [vmem:[#allocation39 + $0x28] sm:$0xff]  }
0x133e   :  { %8512 = vmatprep.subr.bf16.mxu1 %v11920_v58  ;;  %v11945_v58 = vld [vmem:[#allocation39 + $0x70] sm:$0xff]  }
0x1341   :  { %8513 = vmatpush1.bf16.msra.mxu1 %v11918_v50  ;;  %v11946_v50 = vld [vmem:[#allocation39 + $0x30] sm:$0xff]  }
0x1342   :  { %8514 = vmatprep.subr.bf16.mxu1 %v11923_v13  ;;  %v11947_v13 = vld [vmem:[#allocation39 + $0x78] sm:$0xff]  }
0x1345   :  { %8515 = vmatpush1.bf16.msra.mxu1 %v11921_v27  ;;  %v11948_v27 = vld [vmem:[#allocation39 + $0x38] sm:$0xff]  }
0x1346   :  { %8516 = vmatprep.subr.bf16.mxu1 %v11926_v30  ;;  %v11949_v30 = vld [vmem:[#allocation40 + $0x40] sm:$0xff]  }
0x1349   :  { %8517 = vmatpush1.bf16.msra.mxu1 %v11924_v21  ;;  %v11951_v21 = vld [vmem:[#allocation40 + $0x48] sm:$0xff]  }
0x134a   :  { %8518 = vmatprep.subr.bf16.mxu1 %v11929_v47  ;;  %v11952_v47 = vld [vmem:[#allocation40 + $0x8] sm:$0xff]  }
0x134d   :  { %8519 = vmatpush1.bf16.msra.mxu1 %v11927_v26  ;;  %v11953_v26 = vld [vmem:[#allocation40 + $0x50] sm:$0xff]  }
0x134e   :  { %8520 = vmatprep.subr.bf16.mxu1 %v11932_v42  ;;  %v11954_v42 = vld [vmem:[#allocation40 + $0x10] sm:$0xff]  }
0x1351   :  { %8521 = vmatpush1.bf16.msra.mxu1 %v11930_v25  ;;  %v11955_v25 = vld [vmem:[#allocation40 + $0x58] sm:$0xff]  }
0x1352   :  { %10645 = vmatprep.subr.bf16.mxu1 %v11933_v32  ;;  %v11956_v32 = vld [vmem:[#allocation40 + $0x18] sm:$0xff]  }
0x13df   :  { %v8194_v36 = vpop.f32.mrb[56].mxu1 }
0x13e0   :  { %v8196_v44 = vpop.f32.mrb[57].mxu1 }
0x13e3   :  { %v8200_v59 = vpop.f32.mrb[58].mxu1 }
0x13e4   :  { %v8282_v18 = vpack.c.bf16 %v8200_v59, %v8194_v36  ;;  %v8202_v51 = vpop.f32.mrb[59].mxu1  ;;  %v11957_v36 = vld [vmem:[#allocation40 + $0x60] sm:$0xff]   ;;  %v11961_v59 = vld [vmem:[#allocation40 + $0x70] sm:$0xff]  }
0x13e5   :  { %v8283_v7 = vpack.c.bf16 %v8202_v51, %v8196_v44  ;;  %v11958_v44 = vld [vmem:[#allocation40 + $0x20] sm:$0xff]   ;;  %v11963_v51 = vld [vmem:[#allocation40 + $0x78] sm:$0xff]  }
0x13e7   :  { %8522 = vmatprep.mubr.bf16.mxu1 %v8283_v7  ;;  %v8271_v23 = vpop.f32.mrb[60].mxu1  ;;  %v11964_v7 = vld [vmem:[#allocation40 + $0x38] sm:$0xff]  }
0x13e8   :  { %8523 = vmatmul.mubr.bf16.vlgmr.msra.gmra.mrb[64].mxu1 %v8282_v18  ;;  %v8273_v4 = vpop.f32.mrb[61].mxu1  ;;  %v11962_v18 = vld [vmem:[#allocation40 + $0x30] sm:$0xff]  }
0x13e9   :  { %10646 = vmatpush3.bf16.msra.mxu1 %v11934_v3 }
0x13ea   :  { %10647 = vmatprep.subr.bf16.mxu1 %v11935_v24 }
0x13eb   :  { %v8277_v15 = vpop.f32.mrb[62].mxu1 }
0x13ec   :  { %v8284_v35 = vpack.c.bf16 %v8277_v15, %v8271_v23  ;;  %v8279_v6 = vpop.f32.mrb[63].mxu1 }
0x13ed   :  { %v8285_v40 = vpack.c.bf16 %v8279_v6, %v8273_v4  ;;  %10648 = vmatpush3.bf16.msra.mxu1 %v11936_v17 }
0x13ee   :  { %10649 = vmatprep.subr.bf16.mxu1 %v11937_v19 }
0x13ef   :  { %8532 = vmatprep.mubr.bf16.mxu1 %v8285_v40 }
0x13f0   :  { %8533 = vmatmul.mubr.bf16.gmra.mrb[68].mxu1 %v8284_v35 }
0x13f1   :  { %10650 = vmatpush3.bf16.msra.mxu1 %v11938_v56  ;;  %8722 = vmatprep.mubr.bf16.mxu1 %v13741_v61  ;;  %v11950_v61 = vld [vmem:[#allocation40] sm:$0xff]  }
0x13f2   :  { %10651 = vmatprep.subr.bf16.mxu1 %v11939_v45 }
0x13f5   :  { %10652 = vmatpush3.bf16.msra.mxu1 %v11940_v48 }
0x13f6   :  { %10653 = vmatprep.subr.bf16.mxu1 %v11941_v46 }
0x13f9   :  { %10654 = vmatpush3.bf16.msra.mxu1 %v11942_v37 }
0x13fa   :  { %10655 = vmatprep.subr.bf16.mxu1 %v11943_v20 }
0x13fd   :  { %10656 = vmatpush3.bf16.msra.mxu1 %v11944_v16 }
0x13fe   :  { %10657 = vmatprep.subr.bf16.mxu1 %v11945_v58 }
0x1401   :  { %10658 = vmatpush3.bf16.msra.mxu1 %v11946_v50 }
0x1402   :  { %10659 = vmatprep.subr.bf16.mxu1 %v11947_v13 }
0x1405   :  { %10660 = vmatpush3.bf16.msra.mxu1 %v11948_v27 }
0x1406   :  { %10673 = vmatprep.subr.bf16.mxu1 %v11949_v30 }
0x1408   :  { %8723 = vmatmul.mubr.bf16.vlgmr.msra.gmra.mrb[72].mxu1 %v13747_v52  ;;  %v11959_v52 = vld [vmem:[#allocation40 + $0x68] sm:$0xff]  }
0x1409   :  { %8730 = vmatprep.mubr.bf16.mxu1 %v13774_v8  ;;  %10674 = vmatpush3.bf16.msra.mxu1 %v11950_v61  ;;  %v11960_v8 = vld [vmem:[#allocation40 + $0x28] sm:$0xff]  }
0x140a   :  { %10675 = vmatprep.subr.bf16.mxu1 %v11951_v21 }
0x140d   :  { %10676 = vmatpush3.bf16.msra.mxu1 %v11952_v47 }
0x140e   :  { %10677 = vmatprep.subr.bf16.mxu1 %v11953_v26 }
0x1410   :  { %8731 = vmatmul.mubr.bf16.gmra.mrb[76].mxu1 %v13780_v53  ;;  %v8318_v53 = vld [vmem:[#allocation37] sm:$0x3] }
0x1411   :  { %10678 = vmatpush3.bf16.msra.mxu1 %v11954_v42  ;;  %v8327_v3 = vrot.slane %v8318_v53, %v13260_v57  ;;  %v8323_v24 = vrot.slane %v8318_v53, %v13256_v54 }
0x1412   :  { %10679 = vmatprep.subr.bf16.mxu1 %v11955_v25 }
0x1415   :  { %10680 = vmatpush3.bf16.msra.mxu1 %v11956_v32 }
0x1416   :  { %10681 = vmatprep.subr.bf16.mxu1 %v11957_v36 }
0x1419   :  { %10682 = vmatpush3.bf16.msra.mxu1 %v11958_v44 }
0x141a   :  { %10683 = vmatprep.subr.bf16.mxu1 %v11959_v52 }
0x141d   :  { %10684 = vmatpush3.bf16.msra.mxu1 %v11960_v8 }
0x141e   :  { %10685 = vmatprep.subr.bf16.mxu1 %v11961_v59 }
0x1421   :  { %10686 = vmatpush3.bf16.msra.mxu1 %v11962_v18 }
0x1422   :  { %10687 = vmatprep.subr.bf16.mxu1 %v11963_v51 }
0x1425   :  { %10688 = vmatpush3.bf16.msra.mxu1 %v11964_v7 }
0x14bb   :  { %v8524_v23 = vpop.f32.mrb[64].mxu1 }
0x14bc   :  { %v8526_v4 = vpop.f32.mrb[65].mxu1  ;;  %v13814_v15 = vadd.f32 %v8524_v23, %v8323_v24  ;;  %v10497_v23 = vld [vmem:[#allocation42] ss:$0 sm:$0xff] }
0x14bd   :  { %v13812_v17 = vadd.f32 %v8526_v4, %v8327_v3  ;;  %v8528_v19 = vpop.f32.mrb[66].mxu1 }
0x14be   :  { %v13816_v35 = vadd.f32 %v8528_v19, %v8323_v24  ;;  %v8530_v6 = vpop.f32.mrb[67].mxu1  ;;  %v8543_v54 = vmax.f32 %v13814_v15, 0.0 }
0x14bf   :  { %v13818_v40 = vadd.f32 %v8530_v6, %v8327_v3  ;;  %v8544_v45 = vmax.f32 %v13812_v17, 0.0 }
0x14c0   :  { %v8545_v56 = vmax.f32 %v13816_v35, 0.0 }
0x14c1   :  { %v8546_v57 = vmax.f32 %v13818_v40, 0.0 }
0x14c2   :  { %v8739_v37 = vpack.c.bf16 %v8545_v56, %v8543_v54 }
0x14c3   :  { %v8740_v48 = vpack.c.bf16 %v8546_v57, %v8544_v45  ;;  %v8534_v46 = vpop.f32.mrb[68].mxu1 }
0x14c4   :  { %v8536_v20 = vpop.f32.mrb[69].mxu1  ;;  %v13834_v50 = vadd.f32 %v8534_v46, %v8323_v24 }
0x14c5   :  { %v13832_v16 = vadd.f32 %v8536_v20, %v8327_v3  ;;  %v8538_v58 = vpop.f32.mrb[70].mxu1  ;;  %8903 = vmatprep.mubr.bf16.mxu1 %v8740_v48 }
0x14c6   :  { %v13836_v13 = vadd.f32 %v8538_v58, %v8323_v24  ;;  %v8540_v27 = vpop.f32.mrb[71].mxu1  ;;  %8904 = vmatmul.mubr.bf16.vlgmr.msra.gmra.mrb[80].mxu1 %v8739_v37  ;;  %v8547_v26 = vmax.f32 %v13834_v50, 0.0 }
0x14c7   :  { %v13838_v30 = vadd.f32 %v8540_v27, %v8327_v3  ;;  %v8548_v21 = vmax.f32 %v13832_v16, 0.0 }
0x14c8   :  { %v13944_v61 = vmax.f32 %v13836_v13, 0.0 }
0x14c9   :  { %v13943_v47 = vmax.f32 %v13838_v30, 0.0 }
0x14ca   :  { %v8741_v25 = vpack.c.bf16 %v13944_v61, %v8547_v26 }
0x14cb   :  { %v8742_v42 = vpack.c.bf16 %v13943_v47, %v8548_v21 }
0x14cd   :  { %8911 = vmatprep.mubr.bf16.mxu1 %v8742_v42  ;;  %v10530_v42 = vld [vmem:[#allocation43] ss:$0 sm:$0xff] }
0x14ce   :  { %8912 = vmatmul.mubr.bf16.gmra.mrb[84].mxu1 %v8741_v25 }
0x14db   :  { %v10661_v32 = vpop.f32.mrb[72].mxu1 }
0x14dc   :  { %v10662_v36 = vpop.f32.mrb[73].mxu1 }
0x14dd   :  { %v10663_v44 = vadd.f32 %v10662_v36, %v10661_v32  ;;  %v10664_v52 = vpop.f32.mrb[74].mxu1 }
0x14de   :  { %v10665_v8 = vpop.f32.mrb[75].mxu1 }
0x14df   :  { %v10666_v59 = vadd.f32 %v10665_v8, %v10664_v52  ;;  %v8725_v6 = vadd.f32 %v10663_v44, %v10497_v23 }
0x14e1   :  { %v8728_v20 = vadd.f32 %v10666_v59, %v10497_v23 }
0x14e3   :  { %v10667_v18 = vpop.f32.mrb[76].mxu1 }
0x14e4   :  { %v10668_v51 = vpop.f32.mrb[77].mxu1 }
0x14e5   :  { %v10669_v7 = vadd.f32 %v10668_v51, %v10667_v18  ;;  %v10670_v53 = vpop.f32.mrb[78].mxu1 }
0x14e6   :  { %v10671_v3 = vpop.f32.mrb[79].mxu1 }
0x14e7   :  { %v10672_v24 = vadd.f32 %v10671_v3, %v10670_v53  ;;  %v8733_v51 = vadd.f32 %v10669_v7, %v10497_v23  ;;  %v11968_v7 = vld [vmem:[#allocation45] sm:$0xff]  }
0x14e9   :  { %v8736_v61 = vadd.f32 %v10672_v24, %v10497_v23  ;;  %v11971_v24 = vld [vmem:[#allocation46 + $0x8] sm:$0xff]   ;;  %v11975_v23 = vld [vmem:[#allocation46 + $0x10] sm:$0xff]  }
0x1599   :  { %v10689_v4 = vpop.f32.mrb[80].mxu1 }
0x159a   :  { %v10690_v19 = vpop.f32.mrb[81].mxu1 }
0x159b   :  { %v10691_v48 = vadd.f32 %v10690_v19, %v10689_v4  ;;  %v10692_v46 = vpop.f32.mrb[82].mxu1 }
0x159c   :  { %v10693_v37 = vpop.f32.mrb[83].mxu1 }
0x159d   :  { %v10694_v58 = vadd.f32 %v10693_v37, %v10692_v46  ;;  %v8920_v27 = vadd.f32 %v10691_v48, %v8725_v6  ;;  %v11965_v37 = vld [vmem:[#allocation46 + $0x40] sm:$0xff]  }
0x159e   :  { %10701 = vmatprep.subr.bf16.mxu0 %v11965_v37  ;;  %v11992_v37 = vld [vmem:[#allocation45 + $0x30] sm:$0xff]  }
0x159f   :  { %v8921_v25 = vadd.f32 %v10694_v58, %v8728_v20  ;;  %v8924_v32 = vmax.f32 %v8920_v27, 0.0  ;;  %v11966_v20 = vld [vmem:[#allocation45 + $0x40] sm:$0xff]   ;;  %v11969_v27 = vld [vmem:[#allocation46 + $0x48] sm:$0xff]  }
0x15a0   :  { %v11967_v58 = vld [vmem:[#allocation46] sm:$0xff]   ;;  %10723 = vmatprep.subr.bf16.mxu1 %v11966_v20 }
0x15a1   :  { %v8925_v36 = vmax.f32 %v8921_v25, 0.0  ;;  %v10695_v52 = vpop.f32.mrb[84].mxu1  ;;  %v8935_v8 = vmul.f32 %v10530_v42, %v8924_v32  ;;  %v11970_v25 = vld [vmem:[#allocation45 + $0x48] sm:$0xff]   ;;  %10702 = vmatpush3.bf16.msra.mxu0 %v11967_v58  ;;  %10724 = vmatpush3.bf16.msra.mxu1 %v11968_v7  ;;  %v11977_v32 = vld [vmem:[#allocation46 + $0x58] sm:$0xff]   ;;  %v10531_v20 = vld [vmem:[#allocation6] ss:$0 sm:$0xff] }
0x15a2   :  { %v10696_v18 = vpop.f32.mrb[85].mxu1  ;;  %10703 = vmatprep.subr.bf16.mxu0 %v11969_v27  ;;  %10725 = vmatprep.subr.bf16.mxu1 %v11970_v25 }
0x15a3   :  { %v10697_v47 = vadd.f32 %v10696_v18, %v10695_v52  ;;  %8939 = vadd.xlane.f32.xlu0 %v8935_v8  ;;  %v10698_v53 = vpop.f32.mrb[86].mxu1  ;;  %v8936_v4 = vmul.f32 %v10530_v42, %v8925_v36  ;;  %v11978_v36 = vld [vmem:[#allocation45 + $0x58] sm:$0xff]   ;;  %v11981_v18 = vld [vmem:[#allocation46 + $0x60] sm:$0xff]  }
0x15a4   :  { %v10699_v3 = vpop.f32.mrb[87].mxu1  ;;  %v11979_v52 = vld [vmem:[#allocation46 + $0x18] sm:$0xff]  }
0x15a5   :  { %v10700_v44 = vadd.f32 %v10699_v3, %v10698_v53  ;;  %v8922_v19 = vadd.f32 %v10697_v47, %v8733_v51  ;;  %v11972_v47 = vld [vmem:[#allocation45 + $0x8] sm:$0xff]   ;;  %10704 = vmatpush3.bf16.msra.mxu0 %v11971_v24  ;;  %v11980_v8 = vld [vmem:[#allocation45 + $0x18] sm:$0xff]   ;;  %v11982_v51 = vld [vmem:[#allocation45 + $0x60] sm:$0xff]  }
0x15a6   :  { %10726 = vmatpush3.bf16.msra.mxu1 %v11972_v47  ;;  %v11983_v53 = vld [vmem:[#allocation46 + $0x20] sm:$0xff]  }
0x15a7   :  { %v8923_v28 = vadd.f32 %v10700_v44, %v8736_v61  ;;  %8941 = vadd.xlane.f32.xlu0 %v8936_v4  ;;  %v8926_v59 = vmax.f32 %v8922_v19, 0.0  ;;  %v11973_v61 = vld [vmem:[#allocation46 + $0x50] sm:$0xff]   ;;  %v11984_v3 = vld [vmem:[#allocation45 + $0x20] sm:$0xff]   ;;  %v11985_v44 = vld [vmem:[#allocation46 + $0x68] sm:$0xff]  }
0x15a8   :  { %10705 = vmatprep.subr.bf16.mxu0 %v11973_v61  ;;  %v11986_v4 = vld [vmem:[#allocation45 + $0x68] sm:$0xff]  }
0x15a9   :  { %v8927_v6 = vmax.f32 %v8923_v28, 0.0  ;;  %v8937_v48 = vmul.f32 %v10530_v42, %v8926_v59  ;;  %v11974_v28 = vld [vmem:[#allocation45 + $0x50] sm:$0xff]   ;;  %10706 = vmatpush3.bf16.msra.mxu0 %v11975_v23  ;;  %v11987_v19 = vld [vmem:[#allocation46 + $0x28] sm:$0xff]  }
0x15aa   :  { %10727 = vmatprep.subr.bf16.mxu1 %v11974_v28  ;;  %10707 = vmatprep.subr.bf16.mxu0 %v11977_v32  ;;  %v11988_v59 = vld [vmem:[#allocation45 + $0x28] sm:$0xff]  }
0x15ab   :  { %8943 = vadd.xlane.f32.xlu1 %v8937_v48  ;;  %v8938_v46 = vmul.f32 %v10530_v42, %v8927_v6  ;;  %v11976_v42 = vld [vmem:[#allocation45 + $0x10] sm:$0xff]  }
0x15ac   :  { %10728 = vmatpush3.bf16.msra.mxu1 %v11976_v42  ;;  %v11989_v6 = vld [vmem:[#allocation46 + $0x70] sm:$0xff]  }
0x15ad   :  { %10729 = vmatprep.subr.bf16.mxu1 %v11978_v36  ;;  %10708 = vmatpush3.bf16.msra.mxu0 %v11979_v52  ;;  %v11990_v48 = vld [vmem:[#allocation45 + $0x70] sm:$0xff]  }
0x15ae   :  { %10709 = vmatprep.subr.bf16.mxu0 %v11981_v18 }
0x15af   :  { %8945 = vadd.xlane.f32.xlu1 %v8938_v46  ;;  %v11991_v46 = vld [vmem:[#allocation46 + $0x30] sm:$0xff]  }
0x15b0   :  { %10730 = vmatpush3.bf16.msra.mxu1 %v11980_v8 }
0x15b1   :  { %10731 = vmatprep.subr.bf16.mxu1 %v11982_v51  ;;  %10710 = vmatpush3.bf16.msra.mxu0 %v11983_v53 }
0x15b2   :  { %10711 = vmatprep.subr.bf16.mxu0 %v11985_v44 }
0x15b4   :  { %10732 = vmatpush3.bf16.msra.mxu1 %v11984_v3 }
0x15b5   :  { %10733 = vmatprep.subr.bf16.mxu1 %v11986_v4  ;;  %10712 = vmatpush3.bf16.msra.mxu0 %v11987_v19 }
0x15b6   :  { %10713 = vmatprep.subr.bf16.mxu0 %v11989_v6 }
0x15b8   :  { %10734 = vmatpush3.bf16.msra.mxu1 %v11988_v59 }
0x15b9   :  { %10735 = vmatprep.subr.bf16.mxu1 %v11990_v48  ;;  %10714 = vmatpush3.bf16.msra.mxu0 %v11991_v46 }
0x15bc   :  { %10736 = vmatpush3.bf16.msra.mxu1 %v11992_v37 }
0x1630   :  { %v8940_v58 = vpop.xlane.xlu0 %8939 }
0x1631   :  { %v8954_v7 = vadd.f32 %v10531_v20, %v8940_v58 }
0x1633   :  { %v8958_v24 = vsel %vm4221_vm1, %v8954_v7, -inf }
0x1634   :  { %v8942_v27 = vpop.xlane.xlu0 %8941 }
0x1635   :  { %v8955_v25 = vadd.f32 %v10531_v20, %v8942_v27 }
0x1637   :  { %v8959_v47 = vsel %vm4221_vm1, %v8955_v25, -inf }
0x1638   :  { %v8960_v61 = vmax.f32 %v8958_v24, %v8959_v47  ;;  %v8944_v28 = vpop.xlane.xlu1 %8943 }
0x1639   :  { %v8956_v42 = vadd.f32 %v10531_v20, %v8944_v28 }
0x163a   :  { %v8961_v23 = vrot.slane %v8960_v61, 4 }
0x163b   :  { %v8967_v18 = vsel %vm4221_vm1, %v8956_v42, -inf }
0x163c   :  { %v8962_v32 = vmax.f32 %v8960_v61, %v8961_v23  ;;  %v8946_v36 = vpop.xlane.xlu1 %8945 }
0x163d   :  { %v8957_v52 = vadd.f32 %v10531_v20, %v8946_v36 }
0x163e   :  { %v8963_v8 = vrot.slane %v8962_v32, 2 }
0x163f   :  { %v8968_v51 = vsel %vm4221_vm1, %v8957_v52, -inf }
0x1640   :  { %v8964_v53 = vmax.f32 %v8962_v32, %v8963_v8  ;;  %v8969_v3 = vmax.f32 %v8967_v18, %v8968_v51 }
0x1642   :  { %v8965_v44 = vrot.slane %v8964_v53, 1  ;;  %v8970_v4 = vrot.slane %v8969_v3, 4 }
0x1644   :  { %v8966_v19 = vmax.f32 %v8964_v53, %v8965_v44  ;;  %v8971_v59 = vmax.f32 %v8969_v3, %v8970_v4 }
0x1646   :  { %v8976_v6 = vsub.f32 %v8954_v7, %v8966_v19  ;;  %v8977_v48 = vsub.f32 %v8955_v25, %v8966_v19  ;;  %v8972_v46 = vrot.slane %v8971_v59, 2 }
0x1648   :  { %v8980_v37 = vmul.f32 1.442695, %v8976_v6  ;;  %v8982_v58 = vmul.f32 1.442695, %v8977_v48  ;;  %v8973_v27 = vmax.f32 %v8971_v59, %v8972_v46 }
0x164a   :  { %12029 = vpow2.f32 %v8980_v37  ;;  %v8974_v24 = vrot.slane %v8973_v27, 1 }
0x164b   :  { %12031 = vpow2.f32 %v8982_v58 }
0x164c   :  { %v8975_v20 = vmax.f32 %v8973_v27, %v8974_v24 }
0x164e   :  { %v8978_v47 = vsub.f32 %v8956_v42, %v8975_v20  ;;  %v8979_v61 = vsub.f32 %v8957_v52, %v8975_v20  ;;  %v9141_v20 = vpack.c.bf16 %v13358_v1, %v13358_v1 }
0x1650   :  { %v8984_v28 = vmul.f32 1.442695, %v8978_v47  ;;  %v8986_v23 = vmul.f32 1.442695, %v8979_v61  ;;  %v9143_v47 = vpack.c.bf16 %v13366_v14, %v13366_v14  ;;  %v9140_v61 = vpack.c.bf16 %v13356_v0, %v13356_v0  ;;  %v11994_v0 = vld [vmem:[#allocation45 + $0x78] sm:$0xff]  }
0x1651   :  { %10737 = vmatprep.subr.bf16.mxu1 %v11994_v0  ;;  %v12011_v0 = vld [vmem:[#allocation48 + $0x18] sm:$0xff]  }
0x1652   :  { %12033 = vpow2.f32 %v8984_v28  ;;  %v9142_v28 = vpack.c.bf16 %v13364_v12, %v13364_v12  ;;  %v9180_v14 = vunpack.c.l.b16 %v9140_v61 }
0x1653   :  { %12035 = vpow2.f32 %v8986_v23 }
0x1654   :  { %v12030_v32 = vpop.eup %12029 }
0x1655   :  { %v12032_v36 = vpop.eup %12031  ;;  %v8988_v8 = vsel %vm4221_vm1, %v12030_v32, 0.0 }
0x1656   :  { %v8989_v7 = vsel %vm4221_vm1, %v12032_v36, 0.0 }
0x1657   :  { %v8990_v25 = vadd.f32 %v8989_v7, %v8988_v8  ;;  %v11993_v8 = vld [vmem:[#allocation46 + $0x78] sm:$0xff]   ;;  %v9181_v7 = vunpack.c.l.b16 %v9141_v20  ;;  %v11999_v20 = vld [vmem:[#allocation48] sm:$0xff]  }
0x1658   :  { %10715 = vmatprep.subr.bf16.mxu0 %v11993_v8  ;;  %v12002_v8 = vld [vmem:[#allocation49 + $0x48] sm:$0xff]  }
0x1659   :  { %v8991_v18 = vrot.slane %v8990_v25, 4 }
0x165b   :  { %v8992_v51 = vadd.f32 %v8991_v18, %v8990_v25  ;;  %v9183_v25 = vunpack.c.l.b16 %v9143_v47  ;;  %v9105_v18 = vpack.c.bf16 %v13354_v63, %v13354_v63  ;;  %v9104_v63 = vpack.c.bf16 %v13352_v62, %v13352_v62 }
0x165c   :  { %v13858_v53 = vpop.eup %12033 }
0x165d   :  { %v13860_v3 = vpop.eup %12035  ;;  %v8997_v42 = vsel %vm4221_vm1, %v13858_v53, 0.0  ;;  %v8993_v52 = vrot.slane %v8992_v51, 2  ;;  %v9332_v12 = vunpack.c.l.b16 %v9105_v18 }
0x165e   :  { %v8998_v44 = vsel %vm4221_vm1, %v13860_v3, 0.0 }
0x165f   :  { %v8999_v4 = vadd.f32 %v8998_v44, %v8997_v42  ;;  %v8994_v19 = vadd.f32 %v8993_v52, %v8992_v51  ;;  %v9107_v51 = vpack.c.bf16 %v13362_v11, %v13362_v11  ;;  %v11995_v52 = vld [vmem:[#allocation46 + $0x38] sm:$0xff]   ;;  %v9186_v44 = vsel %vm9184_vm3, %v9183_v25, %v9181_v7  ;;  %v12003_v7 = vld [vmem:[#allocation48 + $0x8] sm:$0xff]  }
0x1660   :  { %v9106_v11 = vpack.c.bf16 %v13360_v10, %v13360_v10  ;;  %10716 = vmatpush3.bf16.msra.mxu0 %v11995_v52  ;;  %v12000_v10 = vld [vmem:[#allocation49] sm:$0xff]   ;;  %v12004_v25 = vld [vmem:[#allocation49 + $0x8] sm:$0xff]   ;;  %v12008_v52 = vld [vmem:[#allocation49 + $0x10] sm:$0xff]  }
0x1661   :  { %v9000_v59 = vrot.slane %v8999_v4, 4  ;;  %v8995_v6 = vrot.slane %v8994_v19, 1 }
0x1663   :  { %v9001_v48 = vadd.f32 %v9000_v59, %v8999_v4  ;;  %v8996_v46 = vadd.f32 %v8995_v6, %v8994_v19  ;;  %v9334_v4 = vunpack.c.l.b16 %v9107_v51  ;;  %v9182_v19 = vunpack.c.l.b16 %v9142_v28  ;;  %v11996_v59 = vld [vmem:[#allocation45 + $0x38] sm:$0xff]   ;;  %v12005_v51 = vld [vmem:[#allocation48 + $0x50] sm:$0xff]  }
0x1664   :  { %v9188_v6 = vpack.c.b16 %v9186_v44, %v9186_v44  ;;  %10738 = vmatpush3.bf16.msra.mxu1 %v11996_v59  ;;  %v12012_v44 = vld [vmem:[#allocation49 + $0x18] sm:$0xff]   ;;  %v12017_v59 = vld [vmem:[#allocation48 + $0x68] sm:$0xff]  }
0x1665   :  { %12037 = vrcp.f32 %v8996_v46  ;;  %v9002_v37 = vrot.slane %v9001_v48, 2 }
0x1666   :  { %9319 = vmatprep.mubr.bf16.mxu0 %v9188_v6  ;;  %v12018_v6 = vld [vmem:[#allocation49 + $0x68] sm:$0xff]  }
0x1667   :  { %v9003_v58 = vadd.f32 %v9002_v37, %v9001_v48  ;;  %v9331_v37 = vunpack.c.l.b16 %v9104_v63  ;;  %v12019_v63 = vld [vmem:[#allocation48 + $0x28] sm:$0xff]  }
0x1669   :  { %v9004_v27 = vrot.slane %v9003_v58, 1 }
0x166b   :  { %v9005_v24 = vadd.f32 %v9004_v27, %v9003_v58  ;;  %v9333_v58 = vunpack.c.l.b16 %v9106_v11  ;;  %v11997_v27 = vld [vmem:[#allocation48 + $0x40] sm:$0xff]   ;;  %v12020_v11 = vld [vmem:[#allocation49 + $0x28] sm:$0xff]  }
0x166c   :  { %10745 = vmatprep.subr.bf16.mxu0 %v11997_v27  ;;  %v12027_v27 = vld [vmem:[#allocation48 + $0x38] sm:$0xff]  }
0x166d   :  { %12039 = vrcp.f32 %v9005_v24  ;;  %v11998_v24 = vld [vmem:[#allocation49 + $0x40] sm:$0xff]   ;;  %v9335_v62 = vsel %vm9184_vm3, %v9333_v58, %v9331_v37  ;;  %v12024_v37 = vld [vmem:[#allocation49 + $0x30] sm:$0xff]   ;;  %v12026_v58 = vld [vmem:[#allocation49 + $0x78] sm:$0xff]  }
0x166e   :  { %10767 = vmatprep.subr.bf16.mxu1 %v11998_v24  ;;  %v9337_v61 = vpack.c.b16 %v9335_v62, %v9335_v62  ;;  %v12028_v24 = vld [vmem:[#allocation49 + $0x38] sm:$0xff]  }
0x166f   :  { %v12038_v23 = vpop.eup %12037 }
0x1670   :  { %v9007_v1 = vmul.f32 %v12038_v23, %v12030_v32  ;;  %v9008_v42 = vmul.f32 %v12038_v23, %v12032_v36  ;;  %v9336_v32 = vsel %vm9184_vm3, %v9334_v4, %v9332_v12  ;;  %v9185_v36 = vsel %vm9184_vm3, %v9182_v19, %v9180_v14  ;;  %v12001_v23 = vld [vmem:[#allocation48 + $0x48] sm:$0xff]   ;;  %v12010_v14 = vld [vmem:[#allocation49 + $0x58] sm:$0xff]   ;;  %v12013_v12 = vld [vmem:[#allocation48 + $0x60] sm:$0xff]  }
0x1671   :  { %v9338_v48 = vpack.c.b16 %v9336_v32, %v9336_v32  ;;  %v9187_v46 = vpack.c.b16 %v9185_v36, %v9185_v36  ;;  %v12015_v4 = vld [vmem:[#allocation48 + $0x20] sm:$0xff]   ;;  %v12021_v32 = vld [vmem:[#allocation48 + $0x70] sm:$0xff]  }
0x1672   :  { %9014 = vperm.xlu0 %11835, %v9007_v1   ;;  %9019 = vperm.xlu1 %11836, %v9008_v42   ;;  %v12006_v1 = vld [vmem:[#allocation49 + $0x50] sm:$0xff]   ;;  %v12016_v19 = vld [vmem:[#allocation49 + $0x20] sm:$0xff]  }
0x1673   :  { %9469 = vmatprep.mubr.bf16.mxu1 %v9338_v48  ;;  %9320 = vmatmul.mubr.bf16.vlgmr.msra.gmra.mrb[36].mxu0 %v9187_v46  ;;  %v12007_v42 = vld [vmem:[#allocation48 + $0x10] sm:$0xff]   ;;  %v12025_v46 = vld [vmem:[#allocation48 + $0x78] sm:$0xff]  }
0x1674   :  { %10746 = vmatpush3.bf16.msra.mxu0 %v11999_v20  ;;  %9470 = vmatmul.mubr.bf16.vlgmr.msra.gmra.mrb[88].mxu1 %v9337_v61  ;;  %v12022_v36 = vld [vmem:[#allocation49 + $0x70] sm:$0xff]  }
0x1675   :  { %10768 = vmatpush3.bf16.msra.mxu1 %v12000_v10  ;;  %10747 = vmatprep.subr.bf16.mxu0 %v12001_v23  ;;  %v12023_v48 = vld [vmem:[#allocation48 + $0x30] sm:$0xff]  }
0x1676   :  { %10769 = vmatprep.subr.bf16.mxu1 %v12002_v8 }
0x1677   :  { %v12040_v47 = vpop.eup %12039 }
0x1678   :  { %v9010_v28 = vmul.f32 %v12040_v47, %v13858_v53  ;;  %v9011_v18 = vmul.f32 %v12040_v47, %v13860_v3  ;;  %10748 = vmatpush3.bf16.msra.mxu0 %v12003_v7  ;;  %v12009_v53 = vld [vmem:[#allocation48 + $0x58] sm:$0xff]   ;;  %v12014_v3 = vld [vmem:[#allocation49 + $0x60] sm:$0xff]  }
0x1679   :  { %10770 = vmatpush3.bf16.msra.mxu1 %v12004_v25  ;;  %10749 = vmatprep.subr.bf16.mxu0 %v12005_v51 }
0x167a   :  { %9024 = vperm.xlu1 %11836, %v9010_v28   ;;  %10771 = vmatprep.subr.bf16.mxu1 %v12006_v1 }
0x167c   :  { %10750 = vmatpush3.bf16.msra.mxu0 %v12007_v42 }
0x167d   :  { %10772 = vmatpush3.bf16.msra.mxu1 %v12008_v52  ;;  %10751 = vmatprep.subr.bf16.mxu0 %v12009_v53 }
0x167e   :  { %9029 = vperm.xlu1 %11836, %v9011_v18   ;;  %10773 = vmatprep.subr.bf16.mxu1 %v12010_v14 }
0x1680   :  { %10752 = vmatpush3.bf16.msra.mxu0 %v12011_v0  ;;  %v13984_v0 = vmax.f32 %v13759_v5, 0.0 }
0x1681   :  { %10774 = vmatpush3.bf16.msra.mxu1 %v12012_v44  ;;  %10753 = vmatprep.subr.bf16.mxu0 %v12013_v12  ;;  %v13985_v12 = vmax.f32 %v13836_v13, 0.0 }
0x1682   :  { %10775 = vmatprep.subr.bf16.mxu1 %v12014_v3 }
0x1684   :  { %10754 = vmatpush3.bf16.msra.mxu0 %v12015_v4 }
0x1685   :  { %10776 = vmatpush3.bf16.msra.mxu1 %v12016_v19  ;;  %10755 = vmatprep.subr.bf16.mxu0 %v12017_v59 }
0x1686   :  { %10777 = vmatprep.subr.bf16.mxu1 %v12018_v6 }
0x1688   :  { %10756 = vmatpush3.bf16.msra.mxu0 %v12019_v63 }
0x1689   :  { %10757 = vmatprep.subr.bf16.mxu0 %v12021_v32  ;;  %10778 = vmatpush3.bf16.msra.mxu1 %v12020_v11 }
0x168a   :  { %10779 = vmatprep.subr.bf16.mxu1 %v12022_v36 }
0x168c   :  { %10758 = vmatpush3.bf16.msra.mxu0 %v12023_v48 }
0x168d   :  { %10759 = vmatprep.subr.bf16.mxu0 %v12025_v46  ;;  %10780 = vmatpush3.bf16.msra.mxu1 %v12024_v37 }
0x168e   :  { %10781 = vmatprep.subr.bf16.mxu1 %v12026_v58 }
0x1690   :  { %10760 = vmatpush3.bf16.msra.mxu0 %v12027_v27 }
0x1691   :  { %10782 = vmatpush3.bf16.msra.mxu1 %v12028_v24 }
0x16f1   :  { %v9015_v62 = vpop.permute.xlu0 %9014  ;;  %v9020_v20 = vpop.permute.xlu1 %9019 }
0x16f2   :  { %v9032_v10 = vmul.f32 %v9015_v62, %v7690_v55  ;;  %v9033_v47 = vmul.f32 %v9015_v62, %v7691_v31  ;;  %v9068_v61 = vmul.f32 %v9015_v62, %v8543_v54  ;;  %v9069_v28 = vmul.f32 %v9015_v62, %v8544_v45 }
0x16f3   :  { %v9034_v23 = vmul.f32 %v9020_v20, %v7692_v22  ;;  %v9035_v8 = vmul.f32 %v9020_v20, %v7693_v39  ;;  %v9070_v7 = vmul.f32 %v9020_v20, %v8545_v56  ;;  %v9071_v38 = vmul.f32 %v9020_v20, %v8546_v57 }
0x16f5   :  { %v9040_v34 = vadd.f32 %v9034_v23, %v9032_v10  ;;  %v9047_v31 = vadd.f32 %v9035_v8, %v9033_v47  ;;  %v9076_v55 = vadd.f32 %v9070_v7, %v9068_v61  ;;  %v9083_v15 = vadd.f32 %v9071_v38, %v9069_v28 }
0x16f7   :  { %v9041_v54 = vrot.slane %v9040_v34, 4  ;;  %v9048_v25 = vrot.slane %v9047_v31, 4  ;;  %v9077_v17 = vrot.slane %v9076_v55, 4  ;;  %v9084_v45 = vrot.slane %v9083_v15, 4 }
0x16f9   :  { %v9042_v18 = vadd.f32 %v9041_v54, %v9040_v34  ;;  %v9049_v9 = vadd.f32 %v9048_v25, %v9047_v31  ;;  %v9078_v22 = vadd.f32 %v9077_v17, %v9076_v55  ;;  %v9085_v51 = vadd.f32 %v9084_v45, %v9083_v15  ;;  %v9025_v41 = vpop.permute.xlu1 %9024 }
0x16fa   :  { %v9036_v40 = vmul.f32 %v9025_v41, %v7694_v43  ;;  %v9037_v57 = vmul.f32 %v9025_v41, %v7695_v33  ;;  %v9072_v42 = vmul.f32 %v9025_v41, %v8547_v26  ;;  %v9073_v52 = vmul.f32 %v9025_v41, %v8548_v21 }
0x16fb   :  { %v9043_v39 = vrot.slane %v9042_v18, 2  ;;  %v9050_v1 = vrot.slane %v9049_v9, 2  ;;  %v9079_v35 = vrot.slane %v9078_v22, 2  ;;  %v9086_v56 = vrot.slane %v9085_v51, 2 }
0x16fc   :  { %v13986_v43 = vmax.f32 %v13838_v30, 0.0 }
0x16fd   :  { %v9030_v53 = vpop.permute.xlu1 %9029  ;;  %v9044_v33 = vadd.f32 %v9043_v39, %v9042_v18  ;;  %v9080_v3 = vadd.f32 %v9079_v35, %v9078_v22  ;;  %v9051_v50 = vadd.f32 %v9050_v1, %v9049_v9  ;;  %v9087_v26 = vadd.f32 %v9086_v56, %v9085_v51 }
0x16fe   :  { %v9038_v14 = vmul.f32 %v9030_v53, %v7696_v2  ;;  %v9039_v44 = vmul.f32 %v9030_v53, %v13984_v0  ;;  %v9074_v60 = vmul.f32 %v9030_v53, %v13985_v12  ;;  %v9075_v29 = vmul.f32 %v9030_v53, %v13986_v43 }
0x16ff   :  { %v9045_v5 = vrot.slane %v9044_v33, 1  ;;  %v9081_v63 = vrot.slane %v9080_v3, 1  ;;  %v9052_v11 = vrot.slane %v9051_v50, 1  ;;  %v9088_v13 = vrot.slane %v9087_v26, 1 }
0x1700   :  { %v9054_v4 = vadd.f32 %v9038_v14, %v9036_v40  ;;  %v9061_v16 = vadd.f32 %v9039_v44, %v9037_v57  ;;  %v9090_v21 = vadd.f32 %v9074_v60, %v9072_v42  ;;  %v9097_v19 = vadd.f32 %v9075_v29, %v9073_v52 }
0x1701   :  { %v9053_v24 = vadd.f32 %v9052_v11, %v9051_v50  ;;  %v9089_v62 = vadd.f32 %v9088_v13, %v9087_v26  ;;  %v9046_v20 = vadd.f32 %v9045_v5, %v9044_v33  ;;  %v9082_v10 = vadd.f32 %v9081_v63, %v9080_v3 }
0x1702   :  { %v9055_v59 = vrot.slane %v9054_v4, 4  ;;  %v9062_v49 = vrot.slane %v9061_v16, 4  ;;  %v9091_v2 = vrot.slane %v9090_v21, 4  ;;  %v9098_v6 = vrot.slane %v9097_v19, 4 }
0x1703   :  { %v9478_v31 = vpack.c.bf16 %v9053_v24, %v9053_v24  ;;  %v9665_v55 = vpack.c.bf16 %v9089_v62, %v9089_v62  ;;  %v9477_v15 = vpack.c.bf16 %v9046_v20, %v9046_v20  ;;  %v9664_v54 = vpack.c.bf16 %v9082_v10, %v9082_v10  ;;  %v10597_v62 = vld [vmem:[#allocation52] ss:$0 sm:$0xff] }
0x1704   :  { %v9056_v32 = vadd.f32 %v9055_v59, %v9054_v4  ;;  %v9063_v36 = vadd.f32 %v9062_v49, %v9061_v16  ;;  %v9092_v30 = vadd.f32 %v9091_v2, %v9090_v21  ;;  %v9099_v48 = vadd.f32 %v9098_v6, %v9097_v19 }
0x1705   :  { %v9518_v39 = vunpack.c.l.b16 %v9478_v31  ;;  %v9705_v1 = vunpack.c.l.b16 %v9665_v55  ;;  %v9517_v35 = vunpack.c.l.b16 %v9477_v15  ;;  %v9704_v56 = vunpack.c.l.b16 %v9664_v54 }
0x1706   :  { %v9057_v46 = vrot.slane %v9056_v32, 2  ;;  %v9064_v37 = vrot.slane %v9063_v36, 2  ;;  %v9093_v58 = vrot.slane %v9092_v30, 2  ;;  %v9100_v27 = vrot.slane %v9099_v48, 2 }
0x1708   :  { %v9058_v47 = vadd.f32 %v9057_v46, %v9056_v32  ;;  %v9094_v61 = vadd.f32 %v9093_v58, %v9092_v30  ;;  %v9065_v28 = vadd.f32 %v9064_v37, %v9063_v36  ;;  %v9101_v23 = vadd.f32 %v9100_v27, %v9099_v48  ;;  %v10596_v58 = vld [vmem:[#allocation51] ss:$0 sm:$0xff] }
0x170a   :  { %v9059_v8 = vrot.slane %v9058_v47, 1  ;;  %v9095_v7 = vrot.slane %v9094_v61, 1  ;;  %v9066_v38 = vrot.slane %v9065_v28, 1  ;;  %v9102_v34 = vrot.slane %v9101_v23, 1 }
0x170c   :  { %v9067_v25 = vadd.f32 %v9066_v38, %v9065_v28  ;;  %v9103_v17 = vadd.f32 %v9102_v34, %v9101_v23  ;;  %v9060_v45 = vadd.f32 %v9059_v8, %v9058_v47  ;;  %v9096_v18 = vadd.f32 %v9095_v7, %v9094_v61  ;;  %v10598_v61 = vld [vmem:[#allocation7] ss:$0 sm:$0xff] }
0x170e   :  { %v9480_v9 = vpack.c.bf16 %v9067_v25, %v9067_v25  ;;  %v9667_v22 = vpack.c.bf16 %v9103_v17, %v9103_v17  ;;  %v9479_v51 = vpack.c.bf16 %v9060_v45, %v9060_v45  ;;  %v9666_v41 = vpack.c.bf16 %v9096_v18, %v9096_v18 }
0x1710   :  { %v9520_v40 = vunpack.c.l.b16 %v9480_v9  ;;  %v9707_v57 = vunpack.c.l.b16 %v9667_v22  ;;  %v9519_v42 = vunpack.c.l.b16 %v9479_v51  ;;  %v9706_v52 = vunpack.c.l.b16 %v9666_v41 }
0x1712   :  { %v9522_v53 = vsel %vm9184_vm3, %v9520_v40, %v9518_v39  ;;  %v9709_v14 = vsel %vm9184_vm3, %v9707_v57, %v9705_v1  ;;  %v9521_v0 = vsel %vm9184_vm3, %v9519_v42, %v9517_v35  ;;  %v9708_v44 = vsel %vm9184_vm3, %v9706_v52, %v9704_v56 }
0x1713   :  { %v9524_v12 = vpack.c.b16 %v9522_v53, %v9522_v53  ;;  %v9711_v60 = vpack.c.b16 %v9709_v14, %v9709_v14  ;;  %v9523_v43 = vpack.c.b16 %v9521_v0, %v9521_v0  ;;  %v9710_v29 = vpack.c.b16 %v9708_v44, %v9708_v44 }
0x1715   :  { %9655 = vmatprep.mubr.bf16.mxu0 %v9524_v12  ;;  %9842 = vmatprep.mubr.bf16.mxu1 %v9711_v60 }
0x1716   :  { %9656 = vmatmul.mubr.bf16.vlgmr.msra.gmra.mrb[40].mxu0 %v9523_v43  ;;  %9843 = vmatmul.mubr.bf16.vlgmr.msra.gmra.mrb[92].mxu1 %v9710_v29 }
0x1746   :  { %v10717_v33 = vpop.f32.mrb[36].mxu0 }
0x1747   :  { %v10718_v3 = vpop.f32.mrb[37].mxu0  ;;  %v10739_v4 = vpop.f32.mrb[88].mxu1 }
0x1748   :  { %v10719_v50 = vadd.f32 %v10718_v3, %v10717_v33  ;;  %v10720_v26 = vpop.f32.mrb[38].mxu0  ;;  %v10740_v21 = vpop.f32.mrb[89].mxu1 }
0x1749   :  { %v10721_v16 = vpop.f32.mrb[39].mxu0  ;;  %v10741_v19 = vadd.f32 %v10740_v21, %v10739_v4  ;;  %v10742_v59 = vpop.f32.mrb[90].mxu1 }
0x174a   :  { %v10743_v49 = vpop.f32.mrb[91].mxu1 }
0x174b   :  { %v9472_v2 = vadd.f32 %v10741_v19, %v10719_v50 }
0x17e9   :  { %v10761_v6 = vpop.f32.mrb[40].mxu0  ;;  %v10783_v5 = vpop.f32.mrb[92].mxu1 }
0x17ea   :  { %v10762_v63 = vpop.f32.mrb[41].mxu0  ;;  %v10784_v11 = vpop.f32.mrb[93].mxu1 }
0x17eb   :  { %v10763_v13 = vadd.f32 %v10762_v63, %v10761_v6  ;;  %v10785_v32 = vadd.f32 %v10784_v11, %v10783_v5  ;;  %v10764_v36 = vpop.f32.mrb[42].mxu0  ;;  %v10786_v30 = vpop.f32.mrb[94].mxu1 }
0x17ec   :  { %v10765_v48 = vpop.f32.mrb[43].mxu0  ;;  %v10787_v46 = vpop.f32.mrb[95].mxu1 }
0x17ed   :  { %v9663_v37 = vadd.f32 %v10763_v13, %v9472_v2 }
0x17ef   :  { %v9850_v27 = vadd.f32 %v10785_v32, %v9663_v37 }
0x17f1   :  { %v9858_v24 = vadd.f32 %v10596_v58, %v9850_v27 }
0x17f3   :  { %v9859_v20 = vmax.f32 %v9858_v24, 0.0 }
0x17f5   :  { %v9867_v10 = vmul.f32 %v10597_v62, %v9859_v20 }
0x17f7   :  { %v9869_v47 = vsel %vm9868_vm4, %v9867_v10, 0.0 }
0x17f8   :  { %9870 = vadd.xlane.f32.xlu1 %v9869_v47 }
0x1885   :  { %v9871_v28 = vpop.xlane.xlu1 %9870 }
0x1886   :  { %v9879_v23 = vadd.f32 %v10598_v61, %v9871_v28 }
0x1888   :  { %v9880_v8 = vsub.f32 0.0, %v9879_v23 }
0x188a   :  { %v9881_v7 = vmul.f32 1.442695, %v9880_v8 }
0x188c   :  { %12041 = vpow2.f32 %v9881_v7 }
0x1896   :  { %v12042_v38 = vpop.eup %12041 }
0x1897   :  { %v9883_v34 = vadd.f32 1.0, %v12042_v38 }
0x1899   :  { %12043 = vrcp.f32 %v9883_v34 }
0x18a3   :  { %v12044_v31 = vpop.eup %12043 }
0x18a4   :  { %9887 = vst.msk [vmem:[%s13007_s30] sm:$0x3] %vm9886_vm5, %v12044_v31 }
0x18a5   :  { %9892 = vsyncpa [#allocation9], 1 }
0x18a6   :  { %9893 = vsyncpa [#allocation11], 1 }
0x18a7   :  { %9894 = vsyncpa [#allocation14], 1 }
0x18a8   :  { %9895 = vsyncpa [#allocation17], 1 }
0x18a9   :  { %9896 = vsyncpa [#allocation20], 1 }
0x18aa   :  { %9897 = vsyncpa [#allocation23], 1 }
0x18ab   :  { %9898 = vsyncpa [#allocation26], 1 }
0x18ac   :  { %9899 = vsyncpa [#allocation29], 1 }
0x18ad   :  { %9900 = vsyncpa [#allocation32], 1 }
0x18ae   :  { %9901 = vsyncpa [#allocation35], 1 }
0x18af   :  { %9902 = vsyncpa [#allocation38], 1 }
0x18b0   :  { %9903 = vsyncpa [#allocation41], 1 }
0x18b1   :  { %9904 = vsyncpa [#allocation44], 1 }
0x18b2   :  { %9905 = vsyncpa [#allocation47], 1 }
0x18b3   :  { %9906 = vsyncpa [#allocation50], 1 }
0x18b4   :  { %9907 = vsyncpa [#allocation53], 1 }
0x18b5   :  { %9908 = vsyncmov [#allocation4] }
0x18b8   :  { %s9909_s24 = vpop.sfrf %9908 }
0x18b9   :  { %p10599_p2 = scmp.ne.s32.totalorder %s9909_s24, 0 }
0x18bb   :  { %9913 = shalt.err (%p10599_p2)  }
0x18bc   :  { %9915 = vsyncmov [#allocation4 + $0x1] }
0x18bf   :  { %s9916_s30 = vpop.sfrf %9915 }
0x18c0   :  { %p10600_p3 = scmp.ne.s32.totalorder %s9916_s30, 0 }
0x18c2   :  { %9920 = shalt.err (%p10600_p3)  }

</bundles_post_ra>
